<compile_context>
chip_gen: v7x
topology: tpu7x:2x2x1
jax: 0.10.0
libtpu: 0.0.40
codegen_flags: <defaults>
</compile_context>

<pallas_src>
import functools

import jax
import jax.numpy as jnp
from jax.experimental import pallas as pl
from jax.experimental.pallas import tpu as pltpu


IN_CHANNELS = 100
NUM_CLASSES = 19
C1, C2 = 32, 64          # reduced encoder widths (stand-in for efficientnet-b5)
CPAD = 128               # lane-dense channel padding


# ----------------------------------------------------------------------------
# Pallas kernels
# ----------------------------------------------------------------------------
def _conv3x3_kernel(x_ref, w_ref, b_ref, o_ref, acc_ref, *, wp, L, relu):
    """Fused 3x3 'same' conv + bias (+ReLU).

    x_ref : (1, P, C)  bf16  spatially padded, row-flattened image (P=(H+3)*wp)
    w_ref : (9, C, F)  bf16  per-tap weights
    b_ref : (1, F)     f32
    o_ref : (1, L, F)        L = H*wp dense output (garbage cols sliced outside)
    acc_ref: (L, F)    f32   VMEM scratch accumulator
    """
    acc_ref[...] = jnp.zeros_like(acc_ref)
    for dy in range(3):
        for dx in range(3):
            a = x_ref[0, pl.ds(dy * wp + dx, L), :]          # (L, C) bf16
            acc_ref[...] += jnp.dot(a, w_ref[dy * 3 + dx],
                                    preferred_element_type=jnp.float32)
    y = acc_ref[...] + b_ref[...]
    if relu:
        y = jnp.maximum(y, 0.0)
    o_ref[0] = y.astype(o_ref.dtype)


def _dec_head_kernel(u_ref, e_ref, wa_ref, wb_ref, b_ref, wh_ref, bh_ref,
                     o_ref, acc_ref, *, wp, L):
    """Fused decoder block: conv3x3(concat(up(e2), e1)) + bias + ReLU, then the
    1x1 classification head — concat is realized as split-K accumulation."""
    acc_ref[...] = jnp.zeros_like(acc_ref)
    for dy in range(3):
        for dx in range(3):
            off = dy * wp + dx
            t = dy * 3 + dx
            acc_ref[...] += jnp.dot(u_ref[0, pl.ds(off, L), :], wa_ref[t],
                                    preferred_element_type=jnp.float32)
            acc_ref[...] += jnp.dot(e_ref[0, pl.ds(off, L), :], wb_ref[t],
                                    preferred_element_type=jnp.float32)
    d = jnp.maximum(acc_ref[...] + b_ref[...], 0.0)          # (L, F) f32
    logits = jnp.dot(d.astype(jnp.bfloat16), wh_ref[...],
                     preferred_element_type=jnp.float32) + bh_ref[...]
    o_ref[0] = logits.astype(o_ref.dtype)


# ----------------------------------------------------------------------------
# Wrappers
# ----------------------------------------------------------------------------
def _flatten_padded(x):
    """(N, H, W, C) -> (N, (H+3)*(W+2), C): zero pad H by (1,2), W by (1,1),
    then flatten rows.  The extra bottom row keeps all 9 tap slices in-bounds
    for the dense (garbage-column-included) output of length H*(W+2)."""
    n, h, w, c = x.shape
    xp = jnp.pad(x, ((0, 0), (1, 2), (1, 1), (0, 0)))
    return xp.reshape(n, (h + 3) * (w + 2), c)


def conv3x3_fused(x, w9, bias, *, relu, out_dtype):
    """x: (N, H, W, CPAD) bf16; w9: (9, CPAD, CPAD) bf16; bias: (1, CPAD) f32."""
    n, h, w, c = x.shape
    wp = w + 2
    L = h * wp
    x_flat = _flatten_padded(x)                              # (N, P, C)
    P = x_flat.shape[1]
    f = w9.shape[-1]

    out = pl.pallas_call(
        functools.partial(_conv3x3_kernel, wp=wp, L=L, relu=relu),
        out_shape=jax.ShapeDtypeStruct((n, L, f), out_dtype),
        grid=(n,),
        in_specs=[
            pl.BlockSpec((1, P, c), lambda b: (b, 0, 0)),
            pl.BlockSpec((9, c, f), lambda b: (0, 0, 0)),
            pl.BlockSpec((1, f), lambda b: (0, 0)),
        ],
        out_specs=pl.BlockSpec((1, L, f), lambda b: (b, 0, 0)),
        scratch_shapes=[pltpu.VMEM((L, f), jnp.float32)],
        compiler_params=pltpu.CompilerParams(
            dimension_semantics=("parallel",)),
        cost_estimate=pl.CostEstimate(
            flops=2 * n * L * 9 * c * f,
            transcendentals=0,
            bytes_accessed=(x_flat.size * x_flat.dtype.itemsize
                            + w9.size * w9.dtype.itemsize
                            + n * L * f * jnp.dtype(out_dtype).itemsize)),
    )(x_flat, w9, bias)

    # (N, L, F) -> (N, H, W, F): drop the two garbage columns per row.
    return out.reshape(n, h, wp, f)[:, :, :w, :]


def decoder_head_fused(u1, e1, params):
    """u1, e1: (N, H, W, CPAD) bf16 -> logits (N, H, W, CPAD) f32."""
    n, h, w, c = u1.shape
    wp = w + 2
    L = h * wp
    u_flat = _flatten_padded(u1)
    e_flat = _flatten_padded(e1)
    P = u_flat.shape[1]
    f = CPAD

    out = pl.pallas_call(
        functools.partial(_dec_head_kernel, wp=wp, L=L),
        out_shape=jax.ShapeDtypeStruct((n, L, f), jnp.float32),
        grid=(n,),
        in_specs=[
            pl.BlockSpec((1, P, c), lambda b: (b, 0, 0)),
            pl.BlockSpec((1, P, c), lambda b: (b, 0, 0)),
            pl.BlockSpec((9, c, f), lambda b: (0, 0, 0)),
            pl.BlockSpec((9, c, f), lambda b: (0, 0, 0)),
            pl.BlockSpec((1, f), lambda b: (0, 0)),
            pl.BlockSpec((f, f), lambda b: (0, 0)),
            pl.BlockSpec((1, f), lambda b: (0, 0)),
        ],
        out_specs=pl.BlockSpec((1, L, f), lambda b: (b, 0, 0)),
        scratch_shapes=[pltpu.VMEM((L, f), jnp.float32)],
        compiler_params=pltpu.CompilerParams(
            dimension_semantics=("parallel",)),
        cost_estimate=pl.CostEstimate(
            flops=2 * n * L * (18 * c * f + f * f),
            transcendentals=0,
            bytes_accessed=(2 * u_flat.size * u_flat.dtype.itemsize
                            + 2 * 9 * c * f * 2 + n * L * f * 4)),
    )(u_flat, e_flat, params["dec_wa"], params["dec_wb"], params["dec_b"],
      params["head_w"], params["head_b"])

    return out.reshape(n, h, wp, f)[:, :, :w, :]


def maxpool2(x):
    n, h, w, c = x.shape
    return x.reshape(n, h // 2, 2, w // 2, 2, c).max(axis=(2, 4))


def upsample2_nearest(x):
    x = jnp.repeat(x, 2, axis=1)
    return jnp.repeat(x, 2, axis=2)


# ----------------------------------------------------------------------------
# Parameters (deterministic, in-script; no checkpoint loading).
# ----------------------------------------------------------------------------
def init_params(key):
    ks = jax.random.split(key, 5)

    def he(k, shape, fan_in):
        return jax.random.normal(k, shape, jnp.float32) * jnp.sqrt(2.0 / fan_in)

    def pack3x3(w):
        kh, kw, cin, cout = w.shape
        w9 = w.reshape(kh * kw, cin, cout)
        w9 = jnp.pad(w9, ((0, 0), (0, CPAD - cin), (0, CPAD - cout)))
        return w9.astype(jnp.bfloat16)

    def zero_bias():
        return jnp.zeros((1, CPAD), jnp.float32)

    enc1 = he(ks[0], (3, 3, IN_CHANNELS, C1), 9 * IN_CHANNELS)
    enc2 = he(ks[1], (3, 3, C1, C2), 9 * C1)
    dec_a = he(ks[2], (3, 3, C2, C1), 9 * (C2 + C1))   # applied to up(e2)
    dec_b = he(ks[3], (3, 3, C1, C1), 9 * (C2 + C1))   # applied to e1 skip
    head = he(ks[4], (C1, NUM_CLASSES), C1)
    head_w = jnp.pad(head, ((0, CPAD - C1),
                            (0, CPAD - NUM_CLASSES))).astype(jnp.bfloat16)

    return {
        "enc1_w": pack3x3(enc1), "enc1_b": zero_bias(),
        "enc2_w": pack3x3(enc2), "enc2_b": zero_bias(),
        "dec_wa": pack3x3(dec_a), "dec_wb": pack3x3(dec_b), "dec_b": zero_bias(),
        "head_w": head_w, "head_b": jnp.zeros((1, CPAD), jnp.float32),
    }


# ----------------------------------------------------------------------------
# Forward pass: Model(x) with x NCHW -> logits NCHW (N, 19, H, W).
# ----------------------------------------------------------------------------
@jax.jit
def model_forward(x_nchw, params):
    n, c, h, w = x_nchw.shape
    assert h % 2 == 0 and w % 2 == 0, "single pool level needs even H, W"

    x = jnp.transpose(x_nchw, (0, 2, 3, 1))                       # NCHW -> NHWC
    x = jnp.pad(x, ((0, 0), (0, 0), (0, 0), (0, CPAD - c)))
    x = x.astype(jnp.bfloat16)                                    # (N,H,W,128)

    e1 = conv3x3_fused(x, params["enc1_w"], params["enc1_b"],
                       relu=True, out_dtype=jnp.bfloat16)         # (N,H,W,128)
    p1 = maxpool2(e1)                                             # (N,H/2,W/2,128)
    e2 = conv3x3_fused(p1, params["enc2_w"], params["enc2_b"],
                       relu=True, out_dtype=jnp.bfloat16)         # (N,H/2,W/2,128)

    u1 = upsample2_nearest(e2)                                    # (N,H,W,128)
    logits = decoder_head_fused(u1, e1, params)                   # (N,H,W,128) f32
    logits = logits[..., :NUM_CLASSES]                            # (N,H,W,19)
    return jnp.transpose(logits, (0, 3, 1, 2))                    # NHWC -> NCHW


if __name__ == "__main__":
    key = jax.random.PRNGKey(0)
    k_param, k_x = jax.random.split(key)

    params = init_params(k_param)
    x = jax.random.normal(k_x, (2, IN_CHANNELS, 16, 16), jnp.float32)

    y = model_forward(x, params)
    y = jax.block_until_ready(y)

    assert y.shape == (2, NUM_CLASSES, 16, 16), y.shape
    assert y.dtype == jnp.float32, y.dtype
    assert bool(jnp.all(jnp.isfinite(y)))
    print("KERNEL_OK")
</pallas_src>

<mosaic_0001>
module attributes {stable_mosaic.version = 11 : i64} {
  func.func @_conv3x3_kernel(%arg0: i32, %arg1: memref<1x342x128xbf16, #tpu.memory_space<vmem>>, %arg2: memref<9x128x128xbf16, #tpu.memory_space<vmem>>, %arg3: memref<1x128xf32, #tpu.memory_space<vmem>>, %arg4: memref<1x288x128xbf16, #tpu.memory_space<vmem>>, %arg5: memref<288x128xf32, #tpu.memory_space<vmem>>) attributes {dimension_semantics = [#tpu.dimension_semantics<parallel>], iteration_bounds = array<i64: 2>, scalar_prefetch = 0 : i64, scratch_operands = 1 : i64, tpu.core_type = #tpu.core_type<tc>, window_params = [{transform_indices = @transform_0, window_bounds = array<i64: 1, 342, 128>}, {pipeline_mode = #tpu.pipeline_mode<synchronous>, transform_indices = @transform_1, window_bounds = array<i64: 9, 128, 128>}, {pipeline_mode = #tpu.pipeline_mode<synchronous>, transform_indices = @transform_2, window_bounds = array<i64: 1, 128>}, {transform_indices = @transform_3, window_bounds = array<i64: 1, 288, 128>}]} {
    %cst = arith.constant 0.000000e+00 : f32
    %0 = vector.broadcast %cst : f32 to vector<288x128xf32>
    %c0 = arith.constant 0 : index
    %c0_0 = arith.constant 0 : index
    %1 = vector.load %arg5[%c0, %c0_0] : memref<288x128xf32, #tpu.memory_space<vmem>>, vector<288x128xf32>
    tpu.vector_store %arg5[%c0, %c0_0], %0 {strides = array<i32>} : memref<288x128xf32, #tpu.memory_space<vmem>>, vector<288x128xf32>,
    %c0_1 = arith.constant 0 : index
    %c0_2 = arith.constant 0 : index
    %c0_3 = arith.constant 0 : index
    %2 = vector.load %arg1[%c0_1, %c0_2, %c0_3] : memref<1x342x128xbf16, #tpu.memory_space<vmem>>, vector<1x288x128xbf16>
    %3 = vector.shape_cast %2 : vector<1x288x128xbf16> to vector<288x128xbf16>
    %c0_4 = arith.constant 0 : index
    %c0_5 = arith.constant 0 : index
    %4 = vector.load %arg5[%c0_4, %c0_5] : memref<288x128xf32, #tpu.memory_space<vmem>>, vector<288x128xf32>
    %c0_6 = arith.constant 0 : index
    %c0_7 = arith.constant 0 : index
    %c0_8 = arith.constant 0 : index
    %5 = vector.load %arg2[%c0_6, %c0_7, %c0_8] : memref<9x128x128xbf16, #tpu.memory_space<vmem>>, vector<1x128x128xbf16>
    %6 = vector.shape_cast %5 : vector<1x128x128xbf16> to vector<128x128xbf16>
    %cst_9 = arith.constant dense<0.000000e+00> : vector<288x128xf32>
    %7 = tpu.matmul %3, %6, %cst_9 {dimension_numbers = #tpu.dot_dimension_numbers<[1], [0], [0], [1], [0, 0, 1, 1], [], []>} : vector<288x128xbf16>, vector<128x128xbf16>, vector<288x128xf32> -> vector<288x128xf32>
    %8 = arith.addf %4, %7 : vector<288x128xf32>
    %c0_10 = arith.constant 0 : index
    %c0_11 = arith.constant 0 : index
    %9 = vector.load %arg5[%c0_10, %c0_11] : memref<288x128xf32, #tpu.memory_space<vmem>>, vector<288x128xf32>
    tpu.vector_store %arg5[%c0_10, %c0_11], %8 {strides = array<i32>} : memref<288x128xf32, #tpu.memory_space<vmem>>, vector<288x128xf32>,
    %c0_12 = arith.constant 0 : index
    %c1 = arith.constant 1 : index
    %c0_13 = arith.constant 0 : index
    %10 = vector.load %arg1[%c0_12, %c1, %c0_13] : memref<1x342x128xbf16, #tpu.memory_space<vmem>>, vector<1x288x128xbf16>
    %11 = vector.shape_cast %10 : vector<1x288x128xbf16> to vector<288x128xbf16>
    %c0_14 = arith.constant 0 : index
    %c0_15 = arith.constant 0 : index
    %12 = vector.load %arg5[%c0_14, %c0_15] : memref<288x128xf32, #tpu.memory_space<vmem>>, vector<288x128xf32>
    %c1_16 = arith.constant 1 : index
    %c0_17 = arith.constant 0 : index
    %c0_18 = arith.constant 0 : index
    %13 = vector.load %arg2[%c1_16, %c0_17, %c0_18] : memref<9x128x128xbf16, #tpu.memory_space<vmem>>, vector<1x128x128xbf16>
    %14 = vector.shape_cast %13 : vector<1x128x128xbf16> to vector<128x128xbf16>
    %cst_19 = arith.constant dense<0.000000e+00> : vector<288x128xf32>
    %15 = tpu.matmul %11, %14, %cst_19 {dimension_numbers = #tpu.dot_dimension_numbers<[1], [0], [0], [1], [0, 0, 1, 1], [], []>} : vector<288x128xbf16>, vector<128x128xbf16>, vector<288x128xf32> -> vector<288x128xf32>
    %16 = arith.addf %12, %15 : vector<288x128xf32>
    %c0_20 = arith.constant 0 : index
    %c0_21 = arith.constant 0 : index
    %17 = vector.load %arg5[%c0_20, %c0_21] : memref<288x128xf32, #tpu.memory_space<vmem>>, vector<288x128xf32>
    tpu.vector_store %arg5[%c0_20, %c0_21], %16 {strides = array<i32>} : memref<288x128xf32, #tpu.memory_space<vmem>>, vector<288x128xf32>,
    %c0_22 = arith.constant 0 : index
    %c2 = arith.constant 2 : index
    %c0_23 = arith.constant 0 : index
    %18 = vector.load %arg1[%c0_22, %c2, %c0_23] : memref<1x342x128xbf16, #tpu.memory_space<vmem>>, vector<1x288x128xbf16>
    %19 = vector.shape_cast %18 : vector<1x288x128xbf16> to vector<288x128xbf16>
    %c0_24 = arith.constant 0 : index
    %c0_25 = arith.constant 0 : index
    %20 = vector.load %arg5[%c0_24, %c0_25] : memref<288x128xf32, #tpu.memory_space<vmem>>, vector<288x128xf32>
    %c2_26 = arith.constant 2 : index
    %c0_27 = arith.constant 0 : index
    %c0_28 = arith.constant 0 : index
    %21 = vector.load %arg2[%c2_26, %c0_27, %c0_28] : memref<9x128x128xbf16, #tpu.memory_space<vmem>>, vector<1x128x128xbf16>
    %22 = vector.shape_cast %21 : vector<1x128x128xbf16> to vector<128x128xbf16>
    %cst_29 = arith.constant dense<0.000000e+00> : vector<288x128xf32>
    %23 = tpu.matmul %19, %22, %cst_29 {dimension_numbers = #tpu.dot_dimension_numbers<[1], [0], [0], [1], [0, 0, 1, 1], [], []>} : vector<288x128xbf16>, vector<128x128xbf16>, vector<288x128xf32> -> vector<288x128xf32>
    %24 = arith.addf %20, %23 : vector<288x128xf32>
    %c0_30 = arith.constant 0 : index
    %c0_31 = arith.constant 0 : index
    %25 = vector.load %arg5[%c0_30, %c0_31] : memref<288x128xf32, #tpu.memory_space<vmem>>, vector<288x128xf32>
    tpu.vector_store %arg5[%c0_30, %c0_31], %24 {strides = array<i32>} : memref<288x128xf32, #tpu.memory_space<vmem>>, vector<288x128xf32>,
    %c0_32 = arith.constant 0 : index
    %c18 = arith.constant 18 : index
    %c0_33 = arith.constant 0 : index
    %26 = vector.load %arg1[%c0_32, %c18, %c0_33] : memref<1x342x128xbf16, #tpu.memory_space<vmem>>, vector<1x288x128xbf16>
    %27 = vector.shape_cast %26 : vector<1x288x128xbf16> to vector<288x128xbf16>
    %c0_34 = arith.constant 0 : index
    %c0_35 = arith.constant 0 : index
    %28 = vector.load %arg5[%c0_34, %c0_35] : memref<288x128xf32, #tpu.memory_space<vmem>>, vector<288x128xf32>
    %c3 = arith.constant 3 : index
    %c0_36 = arith.constant 0 : index
    %c0_37 = arith.constant 0 : index
    %29 = vector.load %arg2[%c3, %c0_36, %c0_37] : memref<9x128x128xbf16, #tpu.memory_space<vmem>>, vector<1x128x128xbf16>
    %30 = vector.shape_cast %29 : vector<1x128x128xbf16> to vector<128x128xbf16>
    %cst_38 = arith.constant dense<0.000000e+00> : vector<288x128xf32>
    %31 = tpu.matmul %27, %30, %cst_38 {dimension_numbers = #tpu.dot_dimension_numbers<[1], [0], [0], [1], [0, 0, 1, 1], [], []>} : vector<288x128xbf16>, vector<128x128xbf16>, vector<288x128xf32> -> vector<288x128xf32>
    %32 = arith.addf %28, %31 : vector<288x128xf32>
    %c0_39 = arith.constant 0 : index
    %c0_40 = arith.constant 0 : index
    %33 = vector.load %arg5[%c0_39, %c0_40] : memref<288x128xf32, #tpu.memory_space<vmem>>, vector<288x128xf32>
    tpu.vector_store %arg5[%c0_39, %c0_40], %32 {strides = array<i32>} : memref<288x128xf32, #tpu.memory_space<vmem>>, vector<288x128xf32>,
    %c0_41 = arith.constant 0 : index
    %c19 = arith.constant 19 : index
    %c0_42 = arith.constant 0 : index
    %34 = vector.load %arg1[%c0_41, %c19, %c0_42] : memref<1x342x128xbf16, #tpu.memory_space<vmem>>, vector<1x288x128xbf16>
    %35 = vector.shape_cast %34 : vector<1x288x128xbf16> to vector<288x128xbf16>
    %c0_43 = arith.constant 0 : index
    %c0_44 = arith.constant 0 : index
    %36 = vector.load %arg5[%c0_43, %c0_44] : memref<288x128xf32, #tpu.memory_space<vmem>>, vector<288x128xf32>
    %c4 = arith.constant 4 : index
    %c0_45 = arith.constant 0 : index
    %c0_46 = arith.constant 0 : index
    %37 = vector.load %arg2[%c4, %c0_45, %c0_46] : memref<9x128x128xbf16, #tpu.memory_space<vmem>>, vector<1x128x128xbf16>
    %38 = vector.shape_cast %37 : vector<1x128x128xbf16> to vector<128x128xbf16>
    %cst_47 = arith.constant dense<0.000000e+00> : vector<288x128xf32>
    %39 = tpu.matmul %35, %38, %cst_47 {dimension_numbers = #tpu.dot_dimension_numbers<[1], [0], [0], [1], [0, 0, 1, 1], [], []>} : vector<288x128xbf16>, vector<128x128xbf16>, vector<288x128xf32> -> vector<288x128xf32>
    %40 = arith.addf %36, %39 : vector<288x128xf32>
    %c0_48 = arith.constant 0 : index
    %c0_49 = arith.constant 0 : index
    %41 = vector.load %arg5[%c0_48, %c0_49] : memref<288x128xf32, #tpu.memory_space<vmem>>, vector<288x128xf32>
    tpu.vector_store %arg5[%c0_48, %c0_49], %40 {strides = array<i32>} : memref<288x128xf32, #tpu.memory_space<vmem>>, vector<288x128xf32>,
    %c0_50 = arith.constant 0 : index
    %c20 = arith.constant 20 : index
    %c0_51 = arith.constant 0 : index
    %42 = vector.load %arg1[%c0_50, %c20, %c0_51] : memref<1x342x128xbf16, #tpu.memory_space<vmem>>, vector<1x288x128xbf16>
    %43 = vector.shape_cast %42 : vector<1x288x128xbf16> to vector<288x128xbf16>
    %c0_52 = arith.constant 0 : index
    %c0_53 = arith.constant 0 : index
    %44 = vector.load %arg5[%c0_52, %c0_53] : memref<288x128xf32, #tpu.memory_space<vmem>>, vector<288x128xf32>
    %c5 = arith.constant 5 : index
    %c0_54 = arith.constant 0 : index
    %c0_55 = arith.constant 0 : index
    %45 = vector.load %arg2[%c5, %c0_54, %c0_55] : memref<9x128x128xbf16, #tpu.memory_space<vmem>>, vector<1x128x128xbf16>
    %46 = vector.shape_cast %45 : vector<1x128x128xbf16> to vector<128x128xbf16>
    %cst_56 = arith.constant dense<0.000000e+00> : vector<288x128xf32>
    %47 = tpu.matmul %43, %46, %cst_56 {dimension_numbers = #tpu.dot_dimension_numbers<[1], [0], [0], [1], [0, 0, 1, 1], [], []>} : vector<288x128xbf16>, vector<128x128xbf16>, vector<288x128xf32> -> vector<288x128xf32>
    %48 = arith.addf %44, %47 : vector<288x128xf32>
    %c0_57 = arith.constant 0 : index
    %c0_58 = arith.constant 0 : index
    %49 = vector.load %arg5[%c0_57, %c0_58] : memref<288x128xf32, #tpu.memory_space<vmem>>, vector<288x128xf32>
    tpu.vector_store %arg5[%c0_57, %c0_58], %48 {strides = array<i32>} : memref<288x128xf32, #tpu.memory_space<vmem>>, vector<288x128xf32>,
    %c0_59 = arith.constant 0 : index
    %c36 = arith.constant 36 : index
    %c0_60 = arith.constant 0 : index
    %50 = vector.load %arg1[%c0_59, %c36, %c0_60] : memref<1x342x128xbf16, #tpu.memory_space<vmem>>, vector<1x288x128xbf16>
    %51 = vector.shape_cast %50 : vector<1x288x128xbf16> to vector<288x128xbf16>
    %c0_61 = arith.constant 0 : index
    %c0_62 = arith.constant 0 : index
    %52 = vector.load %arg5[%c0_61, %c0_62] : memref<288x128xf32, #tpu.memory_space<vmem>>, vector<288x128xf32>
    %c6 = arith.constant 6 : index
    %c0_63 = arith.constant 0 : index
    %c0_64 = arith.constant 0 : index
    %53 = vector.load %arg2[%c6, %c0_63, %c0_64] : memref<9x128x128xbf16, #tpu.memory_space<vmem>>, vector<1x128x128xbf16>
    %54 = vector.shape_cast %53 : vector<1x128x128xbf16> to vector<128x128xbf16>
    %cst_65 = arith.constant dense<0.000000e+00> : vector<288x128xf32>
    %55 = tpu.matmul %51, %54, %cst_65 {dimension_numbers = #tpu.dot_dimension_numbers<[1], [0], [0], [1], [0, 0, 1, 1], [], []>} : vector<288x128xbf16>, vector<128x128xbf16>, vector<288x128xf32> -> vector<288x128xf32>
    %56 = arith.addf %52, %55 : vector<288x128xf32>
    %c0_66 = arith.constant 0 : index
    %c0_67 = arith.constant 0 : index
    %57 = vector.load %arg5[%c0_66, %c0_67] : memref<288x128xf32, #tpu.memory_space<vmem>>, vector<288x128xf32>
    tpu.vector_store %arg5[%c0_66, %c0_67], %56 {strides = array<i32>} : memref<288x128xf32, #tpu.memory_space<vmem>>, vector<288x128xf32>,
    %c0_68 = arith.constant 0 : index
    %c37 = arith.constant 37 : index
    %c0_69 = arith.constant 0 : index
    %58 = vector.load %arg1[%c0_68, %c37, %c0_69] : memref<1x342x128xbf16, #tpu.memory_space<vmem>>, vector<1x288x128xbf16>
    %59 = vector.shape_cast %58 : vector<1x288x128xbf16> to vector<288x128xbf16>
    %c0_70 = arith.constant 0 : index
    %c0_71 = arith.constant 0 : index
    %60 = vector.load %arg5[%c0_70, %c0_71] : memref<288x128xf32, #tpu.memory_space<vmem>>, vector<288x128xf32>
    %c7 = arith.constant 7 : index
    %c0_72 = arith.constant 0 : index
    %c0_73 = arith.constant 0 : index
    %61 = vector.load %arg2[%c7, %c0_72, %c0_73] : memref<9x128x128xbf16, #tpu.memory_space<vmem>>, vector<1x128x128xbf16>
    %62 = vector.shape_cast %61 : vector<1x128x128xbf16> to vector<128x128xbf16>
    %cst_74 = arith.constant dense<0.000000e+00> : vector<288x128xf32>
    %63 = tpu.matmul %59, %62, %cst_74 {dimension_numbers = #tpu.dot_dimension_numbers<[1], [0], [0], [1], [0, 0, 1, 1], [], []>} : vector<288x128xbf16>, vector<128x128xbf16>, vector<288x128xf32> -> vector<288x128xf32>
    %64 = arith.addf %60, %63 : vector<288x128xf32>
    %c0_75 = arith.constant 0 : index
    %c0_76 = arith.constant 0 : index
    %65 = vector.load %arg5[%c0_75, %c0_76] : memref<288x128xf32, #tpu.memory_space<vmem>>, vector<288x128xf32>
    tpu.vector_store %arg5[%c0_75, %c0_76], %64 {strides = array<i32>} : memref<288x128xf32, #tpu.memory_space<vmem>>, vector<288x128xf32>,
    %c0_77 = arith.constant 0 : index
    %c38 = arith.constant 38 : index
    %c0_78 = arith.constant 0 : index
    %66 = vector.load %arg1[%c0_77, %c38, %c0_78] : memref<1x342x128xbf16, #tpu.memory_space<vmem>>, vector<1x288x128xbf16>
    %67 = vector.shape_cast %66 : vector<1x288x128xbf16> to vector<288x128xbf16>
    %c0_79 = arith.constant 0 : index
    %c0_80 = arith.constant 0 : index
    %68 = vector.load %arg5[%c0_79, %c0_80] : memref<288x128xf32, #tpu.memory_space<vmem>>, vector<288x128xf32>
    %c8 = arith.constant 8 : index
    %c0_81 = arith.constant 0 : index
    %c0_82 = arith.constant 0 : index
    %69 = vector.load %arg2[%c8, %c0_81, %c0_82] : memref<9x128x128xbf16, #tpu.memory_space<vmem>>, vector<1x128x128xbf16>
    %70 = vector.shape_cast %69 : vector<1x128x128xbf16> to vector<128x128xbf16>
    %cst_83 = arith.constant dense<0.000000e+00> : vector<288x128xf32>
    %71 = tpu.matmul %67, %70, %cst_83 {dimension_numbers = #tpu.dot_dimension_numbers<[1], [0], [0], [1], [0, 0, 1, 1], [], []>} : vector<288x128xbf16>, vector<128x128xbf16>, vector<288x128xf32> -> vector<288x128xf32>
    %72 = arith.addf %68, %71 : vector<288x128xf32>
    %c0_84 = arith.constant 0 : index
    %c0_85 = arith.constant 0 : index
    %73 = vector.load %arg5[%c0_84, %c0_85] : memref<288x128xf32, #tpu.memory_space<vmem>>, vector<288x128xf32>
    tpu.vector_store %arg5[%c0_84, %c0_85], %72 {strides = array<i32>} : memref<288x128xf32, #tpu.memory_space<vmem>>, vector<288x128xf32>,
    %c0_86 = arith.constant 0 : index
    %c0_87 = arith.constant 0 : index
    %74 = vector.load %arg5[%c0_86, %c0_87] : memref<288x128xf32, #tpu.memory_space<vmem>>, vector<288x128xf32>
    %c0_88 = arith.constant 0 : index
    %c0_89 = arith.constant 0 : index
    %75 = vector.load %arg3[%c0_88, %c0_89] : memref<1x128xf32, #tpu.memory_space<vmem>>, vector<1x128xf32>
    %76 = vector.broadcast %75 : vector<1x128xf32> to vector<288x128xf32>
    %77 = arith.addf %74, %76 : vector<288x128xf32>
    %cst_90 = arith.constant 0.000000e+00 : f32
    %78 = vector.broadcast %cst_90 : f32 to vector<288x128xf32>
    %79 = arith.maximumf %77, %78 : vector<288x128xf32>
    %80 = arith.truncf %79 : vector<288x128xf32> to vector<288x128xbf16>
    %c0_91 = arith.constant 0 : index
    %c0_92 = arith.constant 0 : index
    %c0_93 = arith.constant 0 : index
    %81 = vector.load %arg4[%c0_91, %c0_92, %c0_93] : memref<1x288x128xbf16, #tpu.memory_space<vmem>>, vector<1x288x128xbf16>
    %82 = vector.shape_cast %81 : vector<1x288x128xbf16> to vector<288x128xbf16>
    %83 = vector.shape_cast %80 : vector<288x128xbf16> to vector<1x288x128xbf16>
    tpu.vector_store %arg4[%c0_91, %c0_92, %c0_93], %83 {strides = array<i32>} : memref<1x288x128xbf16, #tpu.memory_space<vmem>>, vector<1x288x128xbf16>,
    return
  }
  func.func @transform_0(%arg0: i32) -> (i32, i32, i32) {
    %c0_i32 = arith.constant 0 : i32
    %c0_i32_0 = arith.constant 0 : i32
    %c0_i32_1 = arith.constant 0 : i32
    return %arg0, %c0_i32, %c0_i32_0 : i32, i32, i32
  }
  func.func @transform_1(%arg0: i32) -> (i32, i32, i32) {
    %c0_i32 = arith.constant 0 : i32
    %c0_i32_0 = arith.constant 0 : i32
    %c0_i32_1 = arith.constant 0 : i32
    %c0_i32_2 = arith.constant 0 : i32
    return %c0_i32, %c0_i32_0, %c0_i32_1 : i32, i32, i32
  }
  func.func @transform_2(%arg0: i32) -> (i32, i32) {
    %c0_i32 = arith.constant 0 : i32
    %c0_i32_0 = arith.constant 0 : i32
    %c0_i32_1 = arith.constant 0 : i32
    return %c0_i32, %c0_i32_0 : i32, i32
  }
  func.func @transform_3(%arg0: i32) -> (i32, i32, i32) {
    %c0_i32 = arith.constant 0 : i32
    %c0_i32_0 = arith.constant 0 : i32
    %c0_i32_1 = arith.constant 0 : i32
    return %arg0, %c0_i32, %c0_i32_0 : i32, i32, i32
  }
}

module attributes {stable_mosaic.version = 11 : i64} {
  func.func @_conv3x3_kernel(%arg0: i32, %arg1: memref<1x110x128xbf16, #tpu.memory_space<vmem>>, %arg2: memref<9x128x128xbf16, #tpu.memory_space<vmem>>, %arg3: memref<1x128xf32, #tpu.memory_space<vmem>>, %arg4: memref<1x80x128xbf16, #tpu.memory_space<vmem>>, %arg5: memref<80x128xf32, #tpu.memory_space<vmem>>) attributes {dimension_semantics = [#tpu.dimension_semantics<parallel>], iteration_bounds = array<i64: 2>, scalar_prefetch = 0 : i64, scratch_operands = 1 : i64, tpu.core_type = #tpu.core_type<tc>, window_params = [{transform_indices = @transform_0, window_bounds = array<i64: 1, 110, 128>}, {pipeline_mode = #tpu.pipeline_mode<synchronous>, transform_indices = @transform_1, window_bounds = array<i64: 9, 128, 128>}, {pipeline_mode = #tpu.pipeline_mode<synchronous>, transform_indices = @transform_2, window_bounds = array<i64: 1, 128>}, {transform_indices = @transform_3, window_bounds = array<i64: 1, 80, 128>}]} {
    %cst = arith.constant 0.000000e+00 : f32
    %0 = vector.broadcast %cst : f32 to vector<80x128xf32>
    %c0 = arith.constant 0 : index
    %c0_0 = arith.constant 0 : index
    %1 = vector.load %arg5[%c0, %c0_0] : memref<80x128xf32, #tpu.memory_space<vmem>>, vector<80x128xf32>
    tpu.vector_store %arg5[%c0, %c0_0], %0 {strides = array<i32>} : memref<80x128xf32, #tpu.memory_space<vmem>>, vector<80x128xf32>,
    %c0_1 = arith.constant 0 : index
    %c0_2 = arith.constant 0 : index
    %c0_3 = arith.constant 0 : index
    %2 = vector.load %arg1[%c0_1, %c0_2, %c0_3] : memref<1x110x128xbf16, #tpu.memory_space<vmem>>, vector<1x80x128xbf16>
    %3 = vector.shape_cast %2 : vector<1x80x128xbf16> to vector<80x128xbf16>
    %c0_4 = arith.constant 0 : index
    %c0_5 = arith.constant 0 : index
    %4 = vector.load %arg5[%c0_4, %c0_5] : memref<80x128xf32, #tpu.memory_space<vmem>>, vector<80x128xf32>
    %c0_6 = arith.constant 0 : index
    %c0_7 = arith.constant 0 : index
    %c0_8 = arith.constant 0 : index
    %5 = vector.load %arg2[%c0_6, %c0_7, %c0_8] : memref<9x128x128xbf16, #tpu.memory_space<vmem>>, vector<1x128x128xbf16>
    %6 = vector.shape_cast %5 : vector<1x128x128xbf16> to vector<128x128xbf16>
    %cst_9 = arith.constant dense<0.000000e+00> : vector<80x128xf32>
    %7 = tpu.matmul %3, %6, %cst_9 {dimension_numbers = #tpu.dot_dimension_numbers<[1], [0], [0], [1], [0, 0, 1, 1], [], []>} : vector<80x128xbf16>, vector<128x128xbf16>, vector<80x128xf32> -> vector<80x128xf32>
    %8 = arith.addf %4, %7 : vector<80x128xf32>
    %c0_10 = arith.constant 0 : index
    %c0_11 = arith.constant 0 : index
    %9 = vector.load %arg5[%c0_10, %c0_11] : memref<80x128xf32, #tpu.memory_space<vmem>>, vector<80x128xf32>
    tpu.vector_store %arg5[%c0_10, %c0_11], %8 {strides = array<i32>} : memref<80x128xf32, #tpu.memory_space<vmem>>, vector<80x128xf32>,
    %c0_12 = arith.constant 0 : index
    %c1 = arith.constant 1 : index
    %c0_13 = arith.constant 0 : index
    %10 = vector.load %arg1[%c0_12, %c1, %c0_13] : memref<1x110x128xbf16, #tpu.memory_space<vmem>>, vector<1x80x128xbf16>
    %11 = vector.shape_cast %10 : vector<1x80x128xbf16> to vector<80x128xbf16>
    %c0_14 = arith.constant 0 : index
    %c0_15 = arith.constant 0 : index
    %12 = vector.load %arg5[%c0_14, %c0_15] : memref<80x128xf32, #tpu.memory_space<vmem>>, vector<80x128xf32>
    %c1_16 = arith.constant 1 : index
    %c0_17 = arith.constant 0 : index
    %c0_18 = arith.constant 0 : index
    %13 = vector.load %arg2[%c1_16, %c0_17, %c0_18] : memref<9x128x128xbf16, #tpu.memory_space<vmem>>, vector<1x128x128xbf16>
    %14 = vector.shape_cast %13 : vector<1x128x128xbf16> to vector<128x128xbf16>
    %cst_19 = arith.constant dense<0.000000e+00> : vector<80x128xf32>
    %15 = tpu.matmul %11, %14, %cst_19 {dimension_numbers = #tpu.dot_dimension_numbers<[1], [0], [0], [1], [0, 0, 1, 1], [], []>} : vector<80x128xbf16>, vector<128x128xbf16>, vector<80x128xf32> -> vector<80x128xf32>
    %16 = arith.addf %12, %15 : vector<80x128xf32>
    %c0_20 = arith.constant 0 : index
    %c0_21 = arith.constant 0 : index
    %17 = vector.load %arg5[%c0_20, %c0_21] : memref<80x128xf32, #tpu.memory_space<vmem>>, vector<80x128xf32>
    tpu.vector_store %arg5[%c0_20, %c0_21], %16 {strides = array<i32>} : memref<80x128xf32, #tpu.memory_space<vmem>>, vector<80x128xf32>,
    %c0_22 = arith.constant 0 : index
    %c2 = arith.constant 2 : index
    %c0_23 = arith.constant 0 : index
    %18 = vector.load %arg1[%c0_22, %c2, %c0_23] : memref<1x110x128xbf16, #tpu.memory_space<vmem>>, vector<1x80x128xbf16>
    %19 = vector.shape_cast %18 : vector<1x80x128xbf16> to vector<80x128xbf16>
    %c0_24 = arith.constant 0 : index
    %c0_25 = arith.constant 0 : index
    %20 = vector.load %arg5[%c0_24, %c0_25] : memref<80x128xf32, #tpu.memory_space<vmem>>, vector<80x128xf32>
    %c2_26 = arith.constant 2 : index
    %c0_27 = arith.constant 0 : index
    %c0_28 = arith.constant 0 : index
    %21 = vector.load %arg2[%c2_26, %c0_27, %c0_28] : memref<9x128x128xbf16, #tpu.memory_space<vmem>>, vector<1x128x128xbf16>
    %22 = vector.shape_cast %21 : vector<1x128x128xbf16> to vector<128x128xbf16>
    %cst_29 = arith.constant dense<0.000000e+00> : vector<80x128xf32>
    %23 = tpu.matmul %19, %22, %cst_29 {dimension_numbers = #tpu.dot_dimension_numbers<[1], [0], [0], [1], [0, 0, 1, 1], [], []>} : vector<80x128xbf16>, vector<128x128xbf16>, vector<80x128xf32> -> vector<80x128xf32>
    %24 = arith.addf %20, %23 : vector<80x128xf32>
    %c0_30 = arith.constant 0 : index
    %c0_31 = arith.constant 0 : index
    %25 = vector.load %arg5[%c0_30, %c0_31] : memref<80x128xf32, #tpu.memory_space<vmem>>, vector<80x128xf32>
    tpu.vector_store %arg5[%c0_30, %c0_31], %24 {strides = array<i32>} : memref<80x128xf32, #tpu.memory_space<vmem>>, vector<80x128xf32>,
    %c0_32 = arith.constant 0 : index
    %c10 = arith.constant 10 : index
    %c0_33 = arith.constant 0 : index
    %26 = vector.load %arg1[%c0_32, %c10, %c0_33] : memref<1x110x128xbf16, #tpu.memory_space<vmem>>, vector<1x80x128xbf16>
    %27 = vector.shape_cast %26 : vector<1x80x128xbf16> to vector<80x128xbf16>
    %c0_34 = arith.constant 0 : index
    %c0_35 = arith.constant 0 : index
    %28 = vector.load %arg5[%c0_34, %c0_35] : memref<80x128xf32, #tpu.memory_space<vmem>>, vector<80x128xf32>
    %c3 = arith.constant 3 : index
    %c0_36 = arith.constant 0 : index
    %c0_37 = arith.constant 0 : index
    %29 = vector.load %arg2[%c3, %c0_36, %c0_37] : memref<9x128x128xbf16, #tpu.memory_space<vmem>>, vector<1x128x128xbf16>
    %30 = vector.shape_cast %29 : vector<1x128x128xbf16> to vector<128x128xbf16>
    %cst_38 = arith.constant dense<0.000000e+00> : vector<80x128xf32>
    %31 = tpu.matmul %27, %30, %cst_38 {dimension_numbers = #tpu.dot_dimension_numbers<[1], [0], [0], [1], [0, 0, 1, 1], [], []>} : vector<80x128xbf16>, vector<128x128xbf16>, vector<80x128xf32> -> vector<80x128xf32>
    %32 = arith.addf %28, %31 : vector<80x128xf32>
    %c0_39 = arith.constant 0 : index
    %c0_40 = arith.constant 0 : index
    %33 = vector.load %arg5[%c0_39, %c0_40] : memref<80x128xf32, #tpu.memory_space<vmem>>, vector<80x128xf32>
    tpu.vector_store %arg5[%c0_39, %c0_40], %32 {strides = array<i32>} : memref<80x128xf32, #tpu.memory_space<vmem>>, vector<80x128xf32>,
    %c0_41 = arith.constant 0 : index
    %c11 = arith.constant 11 : index
    %c0_42 = arith.constant 0 : index
    %34 = vector.load %arg1[%c0_41, %c11, %c0_42] : memref<1x110x128xbf16, #tpu.memory_space<vmem>>, vector<1x80x128xbf16>
    %35 = vector.shape_cast %34 : vector<1x80x128xbf16> to vector<80x128xbf16>
    %c0_43 = arith.constant 0 : index
    %c0_44 = arith.constant 0 : index
    %36 = vector.load %arg5[%c0_43, %c0_44] : memref<80x128xf32, #tpu.memory_space<vmem>>, vector<80x128xf32>
    %c4 = arith.constant 4 : index
    %c0_45 = arith.constant 0 : index
    %c0_46 = arith.constant 0 : index
    %37 = vector.load %arg2[%c4, %c0_45, %c0_46] : memref<9x128x128xbf16, #tpu.memory_space<vmem>>, vector<1x128x128xbf16>
    %38 = vector.shape_cast %37 : vector<1x128x128xbf16> to vector<128x128xbf16>
    %cst_47 = arith.constant dense<0.000000e+00> : vector<80x128xf32>
    %39 = tpu.matmul %35, %38, %cst_47 {dimension_numbers = #tpu.dot_dimension_numbers<[1], [0], [0], [1], [0, 0, 1, 1], [], []>} : vector<80x128xbf16>, vector<128x128xbf16>, vector<80x128xf32> -> vector<80x128xf32>
    %40 = arith.addf %36, %39 : vector<80x128xf32>
    %c0_48 = arith.constant 0 : index
    %c0_49 = arith.constant 0 : index
    %41 = vector.load %arg5[%c0_48, %c0_49] : memref<80x128xf32, #tpu.memory_space<vmem>>, vector<80x128xf32>
    tpu.vector_store %arg5[%c0_48, %c0_49], %40 {strides = array<i32>} : memref<80x128xf32, #tpu.memory_space<vmem>>, vector<80x128xf32>,
    %c0_50 = arith.constant 0 : index
    %c12 = arith.constant 12 : index
    %c0_51 = arith.constant 0 : index
    %42 = vector.load %arg1[%c0_50, %c12, %c0_51] : memref<1x110x128xbf16, #tpu.memory_space<vmem>>, vector<1x80x128xbf16>
    %43 = vector.shape_cast %42 : vector<1x80x128xbf16> to vector<80x128xbf16>
    %c0_52 = arith.constant 0 : index
    %c0_53 = arith.constant 0 : index
    %44 = vector.load %arg5[%c0_52, %c0_53] : memref<80x128xf32, #tpu.memory_space<vmem>>, vector<80x128xf32>
    %c5 = arith.constant 5 : index
    %c0_54 = arith.constant 0 : index
    %c0_55 = arith.constant 0 : index
    %45 = vector.load %arg2[%c5, %c0_54, %c0_55] : memref<9x128x128xbf16, #tpu.memory_space<vmem>>, vector<1x128x128xbf16>
    %46 = vector.shape_cast %45 : vector<1x128x128xbf16> to vector<128x128xbf16>
    %cst_56 = arith.constant dense<0.000000e+00> : vector<80x128xf32>
    %47 = tpu.matmul %43, %46, %cst_56 {dimension_numbers = #tpu.dot_dimension_numbers<[1], [0], [0], [1], [0, 0, 1, 1], [], []>} : vector<80x128xbf16>, vector<128x128xbf16>, vector<80x128xf32> -> vector<80x128xf32>
    %48 = arith.addf %44, %47 : vector<80x128xf32>
    %c0_57 = arith.constant 0 : index
    %c0_58 = arith.constant 0 : index
    %49 = vector.load %arg5[%c0_57, %c0_58] : memref<80x128xf32, #tpu.memory_space<vmem>>, vector<80x128xf32>
    tpu.vector_store %arg5[%c0_57, %c0_58], %48 {strides = array<i32>} : memref<80x128xf32, #tpu.memory_space<vmem>>, vector<80x128xf32>,
    %c0_59 = arith.constant 0 : index
    %c20 = arith.constant 20 : index
    %c0_60 = arith.constant 0 : index
    %50 = vector.load %arg1[%c0_59, %c20, %c0_60] : memref<1x110x128xbf16, #tpu.memory_space<vmem>>, vector<1x80x128xbf16>
    %51 = vector.shape_cast %50 : vector<1x80x128xbf16> to vector<80x128xbf16>
    %c0_61 = arith.constant 0 : index
    %c0_62 = arith.constant 0 : index
    %52 = vector.load %arg5[%c0_61, %c0_62] : memref<80x128xf32, #tpu.memory_space<vmem>>, vector<80x128xf32>
    %c6 = arith.constant 6 : index
    %c0_63 = arith.constant 0 : index
    %c0_64 = arith.constant 0 : index
    %53 = vector.load %arg2[%c6, %c0_63, %c0_64] : memref<9x128x128xbf16, #tpu.memory_space<vmem>>, vector<1x128x128xbf16>
    %54 = vector.shape_cast %53 : vector<1x128x128xbf16> to vector<128x128xbf16>
    %cst_65 = arith.constant dense<0.000000e+00> : vector<80x128xf32>
    %55 = tpu.matmul %51, %54, %cst_65 {dimension_numbers = #tpu.dot_dimension_numbers<[1], [0], [0], [1], [0, 0, 1, 1], [], []>} : vector<80x128xbf16>, vector<128x128xbf16>, vector<80x128xf32> -> vector<80x128xf32>
    %56 = arith.addf %52, %55 : vector<80x128xf32>
    %c0_66 = arith.constant 0 : index
    %c0_67 = arith.constant 0 : index
    %57 = vector.load %arg5[%c0_66, %c0_67] : memref<80x128xf32, #tpu.memory_space<vmem>>, vector<80x128xf32>
    tpu.vector_store %arg5[%c0_66, %c0_67], %56 {strides = array<i32>} : memref<80x128xf32, #tpu.memory_space<vmem>>, vector<80x128xf32>,
    %c0_68 = arith.constant 0 : index
    %c21 = arith.constant 21 : index
    %c0_69 = arith.constant 0 : index
    %58 = vector.load %arg1[%c0_68, %c21, %c0_69] : memref<1x110x128xbf16, #tpu.memory_space<vmem>>, vector<1x80x128xbf16>
    %59 = vector.shape_cast %58 : vector<1x80x128xbf16> to vector<80x128xbf16>
    %c0_70 = arith.constant 0 : index
    %c0_71 = arith.constant 0 : index
    %60 = vector.load %arg5[%c0_70, %c0_71] : memref<80x128xf32, #tpu.memory_space<vmem>>, vector<80x128xf32>
    %c7 = arith.constant 7 : index
    %c0_72 = arith.constant 0 : index
    %c0_73 = arith.constant 0 : index
    %61 = vector.load %arg2[%c7, %c0_72, %c0_73] : memref<9x128x128xbf16, #tpu.memory_space<vmem>>, vector<1x128x128xbf16>
    %62 = vector.shape_cast %61 : vector<1x128x128xbf16> to vector<128x128xbf16>
    %cst_74 = arith.constant dense<0.000000e+00> : vector<80x128xf32>
    %63 = tpu.matmul %59, %62, %cst_74 {dimension_numbers = #tpu.dot_dimension_numbers<[1], [0], [0], [1], [0, 0, 1, 1], [], []>} : vector<80x128xbf16>, vector<128x128xbf16>, vector<80x128xf32> -> vector<80x128xf32>
    %64 = arith.addf %60, %63 : vector<80x128xf32>
    %c0_75 = arith.constant 0 : index
    %c0_76 = arith.constant 0 : index
    %65 = vector.load %arg5[%c0_75, %c0_76] : memref<80x128xf32, #tpu.memory_space<vmem>>, vector<80x128xf32>
    tpu.vector_store %arg5[%c0_75, %c0_76], %64 {strides = array<i32>} : memref<80x128xf32, #tpu.memory_space<vmem>>, vector<80x128xf32>,
    %c0_77 = arith.constant 0 : index
    %c22 = arith.constant 22 : index
    %c0_78 = arith.constant 0 : index
    %66 = vector.load %arg1[%c0_77, %c22, %c0_78] : memref<1x110x128xbf16, #tpu.memory_space<vmem>>, vector<1x80x128xbf16>
    %67 = vector.shape_cast %66 : vector<1x80x128xbf16> to vector<80x128xbf16>
    %c0_79 = arith.constant 0 : index
    %c0_80 = arith.constant 0 : index
    %68 = vector.load %arg5[%c0_79, %c0_80] : memref<80x128xf32, #tpu.memory_space<vmem>>, vector<80x128xf32>
    %c8 = arith.constant 8 : index
    %c0_81 = arith.constant 0 : index
    %c0_82 = arith.constant 0 : index
    %69 = vector.load %arg2[%c8, %c0_81, %c0_82] : memref<9x128x128xbf16, #tpu.memory_space<vmem>>, vector<1x128x128xbf16>
    %70 = vector.shape_cast %69 : vector<1x128x128xbf16> to vector<128x128xbf16>
    %cst_83 = arith.constant dense<0.000000e+00> : vector<80x128xf32>
    %71 = tpu.matmul %67, %70, %cst_83 {dimension_numbers = #tpu.dot_dimension_numbers<[1], [0], [0], [1], [0, 0, 1, 1], [], []>} : vector<80x128xbf16>, vector<128x128xbf16>, vector<80x128xf32> -> vector<80x128xf32>
    %72 = arith.addf %68, %71 : vector<80x128xf32>
    %c0_84 = arith.constant 0 : index
    %c0_85 = arith.constant 0 : index
    %73 = vector.load %arg5[%c0_84, %c0_85] : memref<80x128xf32, #tpu.memory_space<vmem>>, vector<80x128xf32>
    tpu.vector_store %arg5[%c0_84, %c0_85], %72 {strides = array<i32>} : memref<80x128xf32, #tpu.memory_space<vmem>>, vector<80x128xf32>,
    %c0_86 = arith.constant 0 : index
    %c0_87 = arith.constant 0 : index
    %74 = vector.load %arg5[%c0_86, %c0_87] : memref<80x128xf32, #tpu.memory_space<vmem>>, vector<80x128xf32>
    %c0_88 = arith.constant 0 : index
    %c0_89 = arith.constant 0 : index
    %75 = vector.load %arg3[%c0_88, %c0_89] : memref<1x128xf32, #tpu.memory_space<vmem>>, vector<1x128xf32>
    %76 = vector.broadcast %75 : vector<1x128xf32> to vector<80x128xf32>
    %77 = arith.addf %74, %76 : vector<80x128xf32>
    %cst_90 = arith.constant 0.000000e+00 : f32
    %78 = vector.broadcast %cst_90 : f32 to vector<80x128xf32>
    %79 = arith.maximumf %77, %78 : vector<80x128xf32>
    %80 = arith.truncf %79 : vector<80x128xf32> to vector<80x128xbf16>
    %c0_91 = arith.constant 0 : index
    %c0_92 = arith.constant 0 : index
    %c0_93 = arith.constant 0 : index
    %81 = vector.load %arg4[%c0_91, %c0_92, %c0_93] : memref<1x80x128xbf16, #tpu.memory_space<vmem>>, vector<1x80x128xbf16>
    %82 = vector.shape_cast %81 : vector<1x80x128xbf16> to vector<80x128xbf16>
    %83 = vector.shape_cast %80 : vector<80x128xbf16> to vector<1x80x128xbf16>
    tpu.vector_store %arg4[%c0_91, %c0_92, %c0_93], %83 {strides = array<i32>} : memref<1x80x128xbf16, #tpu.memory_space<vmem>>, vector<1x80x128xbf16>,
    return
  }
  func.func @transform_0(%arg0: i32) -> (i32, i32, i32) {
    %c0_i32 = arith.constant 0 : i32
    %c0_i32_0 = arith.constant 0 : i32
    %c0_i32_1 = arith.constant 0 : i32
    return %arg0, %c0_i32, %c0_i32_0 : i32, i32, i32
  }
  func.func @transform_1(%arg0: i32) -> (i32, i32, i32) {
    %c0_i32 = arith.constant 0 : i32
    %c0_i32_0 = arith.constant 0 : i32
    %c0_i32_1 = arith.constant 0 : i32
    %c0_i32_2 = arith.constant 0 : i32
    return %c0_i32, %c0_i32_0, %c0_i32_1 : i32, i32, i32
  }
  func.func @transform_2(%arg0: i32) -> (i32, i32) {
    %c0_i32 = arith.constant 0 : i32
    %c0_i32_0 = arith.constant 0 : i32
    %c0_i32_1 = arith.constant 0 : i32
    return %c0_i32, %c0_i32_0 : i32, i32
  }
  func.func @transform_3(%arg0: i32) -> (i32, i32, i32) {
    %c0_i32 = arith.constant 0 : i32
    %c0_i32_0 = arith.constant 0 : i32
    %c0_i32_1 = arith.constant 0 : i32
    return %arg0, %c0_i32, %c0_i32_0 : i32, i32, i32
  }
}

module attributes {stable_mosaic.version = 11 : i64} {
  func.func @_dec_head_kernel(%arg0: i32, %arg1: memref<1x342x128xbf16, #tpu.memory_space<vmem>>, %arg2: memref<1x342x128xbf16, #tpu.memory_space<vmem>>, %arg3: memref<9x128x128xbf16, #tpu.memory_space<vmem>>, %arg4: memref<9x128x128xbf16, #tpu.memory_space<vmem>>, %arg5: memref<1x128xf32, #tpu.memory_space<vmem>>, %arg6: memref<128x128xbf16, #tpu.memory_space<vmem>>, %arg7: memref<1x128xf32, #tpu.memory_space<vmem>>, %arg8: memref<1x288x128xf32, #tpu.memory_space<vmem>>, %arg9: memref<288x128xf32, #tpu.memory_space<vmem>>) attributes {dimension_semantics = [#tpu.dimension_semantics<parallel>], iteration_bounds = array<i64: 2>, scalar_prefetch = 0 : i64, scratch_operands = 1 : i64, tpu.core_type = #tpu.core_type<tc>, window_params = [{transform_indices = @transform_0, window_bounds = array<i64: 1, 342, 128>}, {transform_indices = @transform_1, window_bounds = array<i64: 1, 342, 128>}, {pipeline_mode = #tpu.pipeline_mode<synchronous>, transform_indices = @transform_2, window_bounds = array<i64: 9, 128, 128>}, {pipeline_mode = #tpu.pipeline_mode<synchronous>, transform_indices = @transform_3, window_bounds = array<i64: 9, 128, 128>}, {pipeline_mode = #tpu.pipeline_mode<synchronous>, transform_indices = @transform_4, window_bounds = array<i64: 1, 128>}, {pipeline_mode = #tpu.pipeline_mode<synchronous>, transform_indices = @transform_5, window_bounds = array<i64: 128, 128>}, {pipeline_mode = #tpu.pipeline_mode<synchronous>, transform_indices = @transform_6, window_bounds = array<i64: 1, 128>}, {transform_indices = @transform_7, window_bounds = array<i64: 1, 288, 128>}]} {
    %cst = arith.constant 0.000000e+00 : f32
    %0 = vector.broadcast %cst : f32 to vector<288x128xf32>
    %c0 = arith.constant 0 : index
    %c0_0 = arith.constant 0 : index
    %1 = vector.load %arg9[%c0, %c0_0] : memref<288x128xf32, #tpu.memory_space<vmem>>, vector<288x128xf32>
    tpu.vector_store %arg9[%c0, %c0_0], %0 {strides = array<i32>} : memref<288x128xf32, #tpu.memory_space<vmem>>, vector<288x128xf32>,
    %c0_1 = arith.constant 0 : index
    %c0_2 = arith.constant 0 : index
    %2 = vector.load %arg9[%c0_1, %c0_2] : memref<288x128xf32, #tpu.memory_space<vmem>>, vector<288x128xf32>
    %c0_3 = arith.constant 0 : index
    %c0_4 = arith.constant 0 : index
    %c0_5 = arith.constant 0 : index
    %3 = vector.load %arg1[%c0_3, %c0_4, %c0_5] : memref<1x342x128xbf16, #tpu.memory_space<vmem>>, vector<1x288x128xbf16>
    %4 = vector.shape_cast %3 : vector<1x288x128xbf16> to vector<288x128xbf16>
    %c0_6 = arith.constant 0 : index
    %c0_7 = arith.constant 0 : index
    %c0_8 = arith.constant 0 : index
    %5 = vector.load %arg3[%c0_6, %c0_7, %c0_8] : memref<9x128x128xbf16, #tpu.memory_space<vmem>>, vector<1x128x128xbf16>
    %6 = vector.shape_cast %5 : vector<1x128x128xbf16> to vector<128x128xbf16>
    %cst_9 = arith.constant dense<0.000000e+00> : vector<288x128xf32>
    %7 = tpu.matmul %4, %6, %cst_9 {dimension_numbers = #tpu.dot_dimension_numbers<[1], [0], [0], [1], [0, 0, 1, 1], [], []>} : vector<288x128xbf16>, vector<128x128xbf16>, vector<288x128xf32> -> vector<288x128xf32>
    %8 = arith.addf %2, %7 : vector<288x128xf32>
    %c0_10 = arith.constant 0 : index
    %c0_11 = arith.constant 0 : index
    %9 = vector.load %arg9[%c0_10, %c0_11] : memref<288x128xf32, #tpu.memory_space<vmem>>, vector<288x128xf32>
    tpu.vector_store %arg9[%c0_10, %c0_11], %8 {strides = array<i32>} : memref<288x128xf32, #tpu.memory_space<vmem>>, vector<288x128xf32>,
    %c0_12 = arith.constant 0 : index
    %c0_13 = arith.constant 0 : index
    %10 = vector.load %arg9[%c0_12, %c0_13] : memref<288x128xf32, #tpu.memory_space<vmem>>, vector<288x128xf32>
    %c0_14 = arith.constant 0 : index
    %c0_15 = arith.constant 0 : index
    %c0_16 = arith.constant 0 : index
    %11 = vector.load %arg2[%c0_14, %c0_15, %c0_16] : memref<1x342x128xbf16, #tpu.memory_space<vmem>>, vector<1x288x128xbf16>
    %12 = vector.shape_cast %11 : vector<1x288x128xbf16> to vector<288x128xbf16>
    %c0_17 = arith.constant 0 : index
    %c0_18 = arith.constant 0 : index
    %c0_19 = arith.constant 0 : index
    %13 = vector.load %arg4[%c0_17, %c0_18, %c0_19] : memref<9x128x128xbf16, #tpu.memory_space<vmem>>, vector<1x128x128xbf16>
    %14 = vector.shape_cast %13 : vector<1x128x128xbf16> to vector<128x128xbf16>
    %cst_20 = arith.constant dense<0.000000e+00> : vector<288x128xf32>
    %15 = tpu.matmul %12, %14, %cst_20 {dimension_numbers = #tpu.dot_dimension_numbers<[1], [0], [0], [1], [0, 0, 1, 1], [], []>} : vector<288x128xbf16>, vector<128x128xbf16>, vector<288x128xf32> -> vector<288x128xf32>
    %16 = arith.addf %10, %15 : vector<288x128xf32>
    %c0_21 = arith.constant 0 : index
    %c0_22 = arith.constant 0 : index
    %17 = vector.load %arg9[%c0_21, %c0_22] : memref<288x128xf32, #tpu.memory_space<vmem>>, vector<288x128xf32>
    tpu.vector_store %arg9[%c0_21, %c0_22], %16 {strides = array<i32>} : memref<288x128xf32, #tpu.memory_space<vmem>>, vector<288x128xf32>,
    %c0_23 = arith.constant 0 : index
    %c0_24 = arith.constant 0 : index
    %18 = vector.load %arg9[%c0_23, %c0_24] : memref<288x128xf32, #tpu.memory_space<vmem>>, vector<288x128xf32>
    %c0_25 = arith.constant 0 : index
    %c1 = arith.constant 1 : index
    %c0_26 = arith.constant 0 : index
    %19 = vector.load %arg1[%c0_25, %c1, %c0_26] : memref<1x342x128xbf16, #tpu.memory_space<vmem>>, vector<1x288x128xbf16>
    %20 = vector.shape_cast %19 : vector<1x288x128xbf16> to vector<288x128xbf16>
    %c1_27 = arith.constant 1 : index
    %c0_28 = arith.constant 0 : index
    %c0_29 = arith.constant 0 : index
    %21 = vector.load %arg3[%c1_27, %c0_28, %c0_29] : memref<9x128x128xbf16, #tpu.memory_space<vmem>>, vector<1x128x128xbf16>
    %22 = vector.shape_cast %21 : vector<1x128x128xbf16> to vector<128x128xbf16>
    %cst_30 = arith.constant dense<0.000000e+00> : vector<288x128xf32>
    %23 = tpu.matmul %20, %22, %cst_30 {dimension_numbers = #tpu.dot_dimension_numbers<[1], [0], [0], [1], [0, 0, 1, 1], [], []>} : vector<288x128xbf16>, vector<128x128xbf16>, vector<288x128xf32> -> vector<288x128xf32>
    %24 = arith.addf %18, %23 : vector<288x128xf32>
    %c0_31 = arith.constant 0 : index
    %c0_32 = arith.constant 0 : index
    %25 = vector.load %arg9[%c0_31, %c0_32] : memref<288x128xf32, #tpu.memory_space<vmem>>, vector<288x128xf32>
    tpu.vector_store %arg9[%c0_31, %c0_32], %24 {strides = array<i32>} : memref<288x128xf32, #tpu.memory_space<vmem>>, vector<288x128xf32>,
    %c0_33 = arith.constant 0 : index
    %c0_34 = arith.constant 0 : index
    %26 = vector.load %arg9[%c0_33, %c0_34] : memref<288x128xf32, #tpu.memory_space<vmem>>, vector<288x128xf32>
    %c0_35 = arith.constant 0 : index
    %c1_36 = arith.constant 1 : index
    %c0_37 = arith.constant 0 : index
    %27 = vector.load %arg2[%c0_35, %c1_36, %c0_37] : memref<1x342x128xbf16, #tpu.memory_space<vmem>>, vector<1x288x128xbf16>
    %28 = vector.shape_cast %27 : vector<1x288x128xbf16> to vector<288x128xbf16>
    %c1_38 = arith.constant 1 : index
    %c0_39 = arith.constant 0 : index
    %c0_40 = arith.constant 0 : index
    %29 = vector.load %arg4[%c1_38, %c0_39, %c0_40] : memref<9x128x128xbf16, #tpu.memory_space<vmem>>, vector<1x128x128xbf16>
    %30 = vector.shape_cast %29 : vector<1x128x128xbf16> to vector<128x128xbf16>
    %cst_41 = arith.constant dense<0.000000e+00> : vector<288x128xf32>
    %31 = tpu.matmul %28, %30, %cst_41 {dimension_numbers = #tpu.dot_dimension_numbers<[1], [0], [0], [1], [0, 0, 1, 1], [], []>} : vector<288x128xbf16>, vector<128x128xbf16>, vector<288x128xf32> -> vector<288x128xf32>
    %32 = arith.addf %26, %31 : vector<288x128xf32>
    %c0_42 = arith.constant 0 : index
    %c0_43 = arith.constant 0 : index
    %33 = vector.load %arg9[%c0_42, %c0_43] : memref<288x128xf32, #tpu.memory_space<vmem>>, vector<288x128xf32>
    tpu.vector_store %arg9[%c0_42, %c0_43], %32 {strides = array<i32>} : memref<288x128xf32, #tpu.memory_space<vmem>>, vector<288x128xf32>,
    %c0_44 = arith.constant 0 : index
    %c0_45 = arith.constant 0 : index
    %34 = vector.load %arg9[%c0_44, %c0_45] : memref<288x128xf32, #tpu.memory_space<vmem>>, vector<288x128xf32>
    %c0_46 = arith.constant 0 : index
    %c2 = arith.constant 2 : index
    %c0_47 = arith.constant 0 : index
    %35 = vector.load %arg1[%c0_46, %c2, %c0_47] : memref<1x342x128xbf16, #tpu.memory_space<vmem>>, vector<1x288x128xbf16>
    %36 = vector.shape_cast %35 : vector<1x288x128xbf16> to vector<288x128xbf16>
    %c2_48 = arith.constant 2 : index
    %c0_49 = arith.constant 0 : index
    %c0_50 = arith.constant 0 : index
    %37 = vector.load %arg3[%c2_48, %c0_49, %c0_50] : memref<9x128x128xbf16, #tpu.memory_space<vmem>>, vector<1x128x128xbf16>
    %38 = vector.shape_cast %37 : vector<1x128x128xbf16> to vector<128x128xbf16>
    %cst_51 = arith.constant dense<0.000000e+00> : vector<288x128xf32>
    %39 = tpu.matmul %36, %38, %cst_51 {dimension_numbers = #tpu.dot_dimension_numbers<[1], [0], [0], [1], [0, 0, 1, 1], [], []>} : vector<288x128xbf16>, vector<128x128xbf16>, vector<288x128xf32> -> vector<288x128xf32>
    %40 = arith.addf %34, %39 : vector<288x128xf32>
    %c0_52 = arith.constant 0 : index
    %c0_53 = arith.constant 0 : index
    %41 = vector.load %arg9[%c0_52, %c0_53] : memref<288x128xf32, #tpu.memory_space<vmem>>, vector<288x128xf32>
    tpu.vector_store %arg9[%c0_52, %c0_53], %40 {strides = array<i32>} : memref<288x128xf32, #tpu.memory_space<vmem>>, vector<288x128xf32>,
    %c0_54 = arith.constant 0 : index
    %c0_55 = arith.constant 0 : index
    %42 = vector.load %arg9[%c0_54, %c0_55] : memref<288x128xf32, #tpu.memory_space<vmem>>, vector<288x128xf32>
    %c0_56 = arith.constant 0 : index
    %c2_57 = arith.constant 2 : index
    %c0_58 = arith.constant 0 : index
    %43 = vector.load %arg2[%c0_56, %c2_57, %c0_58] : memref<1x342x128xbf16, #tpu.memory_space<vmem>>, vector<1x288x128xbf16>
    %44 = vector.shape_cast %43 : vector<1x288x128xbf16> to vector<288x128xbf16>
    %c2_59 = arith.constant 2 : index
    %c0_60 = arith.constant 0 : index
    %c0_61 = arith.constant 0 : index
    %45 = vector.load %arg4[%c2_59, %c0_60, %c0_61] : memref<9x128x128xbf16, #tpu.memory_space<vmem>>, vector<1x128x128xbf16>
    %46 = vector.shape_cast %45 : vector<1x128x128xbf16> to vector<128x128xbf16>
    %cst_62 = arith.constant dense<0.000000e+00> : vector<288x128xf32>
    %47 = tpu.matmul %44, %46, %cst_62 {dimension_numbers = #tpu.dot_dimension_numbers<[1], [0], [0], [1], [0, 0, 1, 1], [], []>} : vector<288x128xbf16>, vector<128x128xbf16>, vector<288x128xf32> -> vector<288x128xf32>
    %48 = arith.addf %42, %47 : vector<288x128xf32>
    %c0_63 = arith.constant 0 : index
    %c0_64 = arith.constant 0 : index
    %49 = vector.load %arg9[%c0_63, %c0_64] : memref<288x128xf32, #tpu.memory_space<vmem>>, vector<288x128xf32>
    tpu.vector_store %arg9[%c0_63, %c0_64], %48 {strides = array<i32>} : memref<288x128xf32, #tpu.memory_space<vmem>>, vector<288x128xf32>,
    %c0_65 = arith.constant 0 : index
    %c0_66 = arith.constant 0 : index
    %50 = vector.load %arg9[%c0_65, %c0_66] : memref<288x128xf32, #tpu.memory_space<vmem>>, vector<288x128xf32>
    %c0_67 = arith.constant 0 : index
    %c18 = arith.constant 18 : index
    %c0_68 = arith.constant 0 : index
    %51 = vector.load %arg1[%c0_67, %c18, %c0_68] : memref<1x342x128xbf16, #tpu.memory_space<vmem>>, vector<1x288x128xbf16>
    %52 = vector.shape_cast %51 : vector<1x288x128xbf16> to vector<288x128xbf16>
    %c3 = arith.constant 3 : index
    %c0_69 = arith.constant 0 : index
    %c0_70 = arith.constant 0 : index
    %53 = vector.load %arg3[%c3, %c0_69, %c0_70] : memref<9x128x128xbf16, #tpu.memory_space<vmem>>, vector<1x128x128xbf16>
    %54 = vector.shape_cast %53 : vector<1x128x128xbf16> to vector<128x128xbf16>
    %cst_71 = arith.constant dense<0.000000e+00> : vector<288x128xf32>
    %55 = tpu.matmul %52, %54, %cst_71 {dimension_numbers = #tpu.dot_dimension_numbers<[1], [0], [0], [1], [0, 0, 1, 1], [], []>} : vector<288x128xbf16>, vector<128x128xbf16>, vector<288x128xf32> -> vector<288x128xf32>
    %56 = arith.addf %50, %55 : vector<288x128xf32>
    %c0_72 = arith.constant 0 : index
    %c0_73 = arith.constant 0 : index
    %57 = vector.load %arg9[%c0_72, %c0_73] : memref<288x128xf32, #tpu.memory_space<vmem>>, vector<288x128xf32>
    tpu.vector_store %arg9[%c0_72, %c0_73], %56 {strides = array<i32>} : memref<288x128xf32, #tpu.memory_space<vmem>>, vector<288x128xf32>,
    %c0_74 = arith.constant 0 : index
    %c0_75 = arith.constant 0 : index
    %58 = vector.load %arg9[%c0_74, %c0_75] : memref<288x128xf32, #tpu.memory_space<vmem>>, vector<288x128xf32>
    %c0_76 = arith.constant 0 : index
    %c18_77 = arith.constant 18 : index
    %c0_78 = arith.constant 0 : index
    %59 = vector.load %arg2[%c0_76, %c18_77, %c0_78] : memref<1x342x128xbf16, #tpu.memory_space<vmem>>, vector<1x288x128xbf16>
    %60 = vector.shape_cast %59 : vector<1x288x128xbf16> to vector<288x128xbf16>
    %c3_79 = arith.constant 3 : index
    %c0_80 = arith.constant 0 : index
    %c0_81 = arith.constant 0 : index
    %61 = vector.load %arg4[%c3_79, %c0_80, %c0_81] : memref<9x128x128xbf16, #tpu.memory_space<vmem>>, vector<1x128x128xbf16>
    %62 = vector.shape_cast %61 : vector<1x128x128xbf16> to vector<128x128xbf16>
    %cst_82 = arith.constant dense<0.000000e+00> : vector<288x128xf32>
    %63 = tpu.matmul %60, %62, %cst_82 {dimension_numbers = #tpu.dot_dimension_numbers<[1], [0], [0], [1], [0, 0, 1, 1], [], []>} : vector<288x128xbf16>, vector<128x128xbf16>, vector<288x128xf32> -> vector<288x128xf32>
    %64 = arith.addf %58, %63 : vector<288x128xf32>
    %c0_83 = arith.constant 0 : index
    %c0_84 = arith.constant 0 : index
    %65 = vector.load %arg9[%c0_83, %c0_84] : memref<288x128xf32, #tpu.memory_space<vmem>>, vector<288x128xf32>
    tpu.vector_store %arg9[%c0_83, %c0_84], %64 {strides = array<i32>} : memref<288x128xf32, #tpu.memory_space<vmem>>, vector<288x128xf32>,
    %c0_85 = arith.constant 0 : index
    %c0_86 = arith.constant 0 : index
    %66 = vector.load %arg9[%c0_85, %c0_86] : memref<288x128xf32, #tpu.memory_space<vmem>>, vector<288x128xf32>
    %c0_87 = arith.constant 0 : index
    %c19 = arith.constant 19 : index
    %c0_88 = arith.constant 0 : index
    %67 = vector.load %arg1[%c0_87, %c19, %c0_88] : memref<1x342x128xbf16, #tpu.memory_space<vmem>>, vector<1x288x128xbf16>
    %68 = vector.shape_cast %67 : vector<1x288x128xbf16> to vector<288x128xbf16>
    %c4 = arith.constant 4 : index
    %c0_89 = arith.constant 0 : index
    %c0_90 = arith.constant 0 : index
    %69 = vector.load %arg3[%c4, %c0_89, %c0_90] : memref<9x128x128xbf16, #tpu.memory_space<vmem>>, vector<1x128x128xbf16>
    %70 = vector.shape_cast %69 : vector<1x128x128xbf16> to vector<128x128xbf16>
    %cst_91 = arith.constant dense<0.000000e+00> : vector<288x128xf32>
    %71 = tpu.matmul %68, %70, %cst_91 {dimension_numbers = #tpu.dot_dimension_numbers<[1], [0], [0], [1], [0, 0, 1, 1], [], []>} : vector<288x128xbf16>, vector<128x128xbf16>, vector<288x128xf32> -> vector<288x128xf32>
    %72 = arith.addf %66, %71 : vector<288x128xf32>
    %c0_92 = arith.constant 0 : index
    %c0_93 = arith.constant 0 : index
    %73 = vector.load %arg9[%c0_92, %c0_93] : memref<288x128xf32, #tpu.memory_space<vmem>>, vector<288x128xf32>
    tpu.vector_store %arg9[%c0_92, %c0_93], %72 {strides = array<i32>} : memref<288x128xf32, #tpu.memory_space<vmem>>, vector<288x128xf32>,
    %c0_94 = arith.constant 0 : index
    %c0_95 = arith.constant 0 : index
    %74 = vector.load %arg9[%c0_94, %c0_95] : memref<288x128xf32, #tpu.memory_space<vmem>>, vector<288x128xf32>
    %c0_96 = arith.constant 0 : index
    %c19_97 = arith.constant 19 : index
    %c0_98 = arith.constant 0 : index
    %75 = vector.load %arg2[%c0_96, %c19_97, %c0_98] : memref<1x342x128xbf16, #tpu.memory_space<vmem>>, vector<1x288x128xbf16>
    %76 = vector.shape_cast %75 : vector<1x288x128xbf16> to vector<288x128xbf16>
    %c4_99 = arith.constant 4 : index
    %c0_100 = arith.constant 0 : index
    %c0_101 = arith.constant 0 : index
    %77 = vector.load %arg4[%c4_99, %c0_100, %c0_101] : memref<9x128x128xbf16, #tpu.memory_space<vmem>>, vector<1x128x128xbf16>
    %78 = vector.shape_cast %77 : vector<1x128x128xbf16> to vector<128x128xbf16>
    %cst_102 = arith.constant dense<0.000000e+00> : vector<288x128xf32>
    %79 = tpu.matmul %76, %78, %cst_102 {dimension_numbers = #tpu.dot_dimension_numbers<[1], [0], [0], [1], [0, 0, 1, 1], [], []>} : vector<288x128xbf16>, vector<128x128xbf16>, vector<288x128xf32> -> vector<288x128xf32>
    %80 = arith.addf %74, %79 : vector<288x128xf32>
    %c0_103 = arith.constant 0 : index
    %c0_104 = arith.constant 0 : index
    %81 = vector.load %arg9[%c0_103, %c0_104] : memref<288x128xf32, #tpu.memory_space<vmem>>, vector<288x128xf32>
    tpu.vector_store %arg9[%c0_103, %c0_104], %80 {strides = array<i32>} : memref<288x128xf32, #tpu.memory_space<vmem>>, vector<288x128xf32>,
    %c0_105 = arith.constant 0 : index
    %c0_106 = arith.constant 0 : index
    %82 = vector.load %arg9[%c0_105, %c0_106] : memref<288x128xf32, #tpu.memory_space<vmem>>, vector<288x128xf32>
    %c0_107 = arith.constant 0 : index
    %c20 = arith.constant 20 : index
    %c0_108 = arith.constant 0 : index
    %83 = vector.load %arg1[%c0_107, %c20, %c0_108] : memref<1x342x128xbf16, #tpu.memory_space<vmem>>, vector<1x288x128xbf16>
    %84 = vector.shape_cast %83 : vector<1x288x128xbf16> to vector<288x128xbf16>
    %c5 = arith.constant 5 : index
    %c0_109 = arith.constant 0 : index
    %c0_110 = arith.constant 0 : index
    %85 = vector.load %arg3[%c5, %c0_109, %c0_110] : memref<9x128x128xbf16, #tpu.memory_space<vmem>>, vector<1x128x128xbf16>
    %86 = vector.shape_cast %85 : vector<1x128x128xbf16> to vector<128x128xbf16>
    %cst_111 = arith.constant dense<0.000000e+00> : vector<288x128xf32>
    %87 = tpu.matmul %84, %86, %cst_111 {dimension_numbers = #tpu.dot_dimension_numbers<[1], [0], [0], [1], [0, 0, 1, 1], [], []>} : vector<288x128xbf16>, vector<128x128xbf16>, vector<288x128xf32> -> vector<288x128xf32>
    %88 = arith.addf %82, %87 : vector<288x128xf32>
    %c0_112 = arith.constant 0 : index
    %c0_113 = arith.constant 0 : index
    %89 = vector.load %arg9[%c0_112, %c0_113] : memref<288x128xf32, #tpu.memory_space<vmem>>, vector<288x128xf32>
    tpu.vector_store %arg9[%c0_112, %c0_113], %88 {strides = array<i32>} : memref<288x128xf32, #tpu.memory_space<vmem>>, vector<288x128xf32>,
    %c0_114 = arith.constant 0 : index
    %c0_115 = arith.constant 0 : index
    %90 = vector.load %arg9[%c0_114, %c0_115] : memref<288x128xf32, #tpu.memory_space<vmem>>, vector<288x128xf32>
    %c0_116 = arith.constant 0 : index
    %c20_117 = arith.constant 20 : index
    %c0_118 = arith.constant 0 : index
    %91 = vector.load %arg2[%c0_116, %c20_117, %c0_118] : memref<1x342x128xbf16, #tpu.memory_space<vmem>>, vector<1x288x128xbf16>
    %92 = vector.shape_cast %91 : vector<1x288x128xbf16> to vector<288x128xbf16>
    %c5_119 = arith.constant 5 : index
    %c0_120 = arith.constant 0 : index
    %c0_121 = arith.constant 0 : index
    %93 = vector.load %arg4[%c5_119, %c0_120, %c0_121] : memref<9x128x128xbf16, #tpu.memory_space<vmem>>, vector<1x128x128xbf16>
    %94 = vector.shape_cast %93 : vector<1x128x128xbf16> to vector<128x128xbf16>
    %cst_122 = arith.constant dense<0.000000e+00> : vector<288x128xf32>
    %95 = tpu.matmul %92, %94, %cst_122 {dimension_numbers = #tpu.dot_dimension_numbers<[1], [0], [0], [1], [0, 0, 1, 1], [], []>} : vector<288x128xbf16>, vector<128x128xbf16>, vector<288x128xf32> -> vector<288x128xf32>
    %96 = arith.addf %90, %95 : vector<288x128xf32>
    %c0_123 = arith.constant 0 : index
    %c0_124 = arith.constant 0 : index
    %97 = vector.load %arg9[%c0_123, %c0_124] : memref<288x128xf32, #tpu.memory_space<vmem>>, vector<288x128xf32>
    tpu.vector_store %arg9[%c0_123, %c0_124], %96 {strides = array<i32>} : memref<288x128xf32, #tpu.memory_space<vmem>>, vector<288x128xf32>,
    %c0_125 = arith.constant 0 : index
    %c0_126 = arith.constant 0 : index
    %98 = vector.load %arg9[%c0_125, %c0_126] : memref<288x128xf32, #tpu.memory_space<vmem>>, vector<288x128xf32>
    %c0_127 = arith.constant 0 : index
    %c36 = arith.constant 36 : index
    %c0_128 = arith.constant 0 : index
    %99 = vector.load %arg1[%c0_127, %c36, %c0_128] : memref<1x342x128xbf16, #tpu.memory_space<vmem>>, vector<1x288x128xbf16>
    %100 = vector.shape_cast %99 : vector<1x288x128xbf16> to vector<288x128xbf16>
    %c6 = arith.constant 6 : index
    %c0_129 = arith.constant 0 : index
    %c0_130 = arith.constant 0 : index
    %101 = vector.load %arg3[%c6, %c0_129, %c0_130] : memref<9x128x128xbf16, #tpu.memory_space<vmem>>, vector<1x128x128xbf16>
    %102 = vector.shape_cast %101 : vector<1x128x128xbf16> to vector<128x128xbf16>
    %cst_131 = arith.constant dense<0.000000e+00> : vector<288x128xf32>
    %103 = tpu.matmul %100, %102, %cst_131 {dimension_numbers = #tpu.dot_dimension_numbers<[1], [0], [0], [1], [0, 0, 1, 1], [], []>} : vector<288x128xbf16>, vector<128x128xbf16>, vector<288x128xf32> -> vector<288x128xf32>
    %104 = arith.addf %98, %103 : vector<288x128xf32>
    %c0_132 = arith.constant 0 : index
    %c0_133 = arith.constant 0 : index
    %105 = vector.load %arg9[%c0_132, %c0_133] : memref<288x128xf32, #tpu.memory_space<vmem>>, vector<288x128xf32>
    tpu.vector_store %arg9[%c0_132, %c0_133], %104 {strides = array<i32>} : memref<288x128xf32, #tpu.memory_space<vmem>>, vector<288x128xf32>,
    %c0_134 = arith.constant 0 : index
    %c0_135 = arith.constant 0 : index
    %106 = vector.load %arg9[%c0_134, %c0_135] : memref<288x128xf32, #tpu.memory_space<vmem>>, vector<288x128xf32>
    %c0_136 = arith.constant 0 : index
    %c36_137 = arith.constant 36 : index
    %c0_138 = arith.constant 0 : index
    %107 = vector.load %arg2[%c0_136, %c36_137, %c0_138] : memref<1x342x128xbf16, #tpu.memory_space<vmem>>, vector<1x288x128xbf16>
    %108 = vector.shape_cast %107 : vector<1x288x128xbf16> to vector<288x128xbf16>
    %c6_139 = arith.constant 6 : index
    %c0_140 = arith.constant 0 : index
    %c0_141 = arith.constant 0 : index
    %109 = vector.load %arg4[%c6_139, %c0_140, %c0_141] : memref<9x128x128xbf16, #tpu.memory_space<vmem>>, vector<1x128x128xbf16>
    %110 = vector.shape_cast %109 : vector<1x128x128xbf16> to vector<128x128xbf16>
    %cst_142 = arith.constant dense<0.000000e+00> : vector<288x128xf32>
    %111 = tpu.matmul %108, %110, %cst_142 {dimension_numbers = #tpu.dot_dimension_numbers<[1], [0], [0], [1], [0, 0, 1, 1], [], []>} : vector<288x128xbf16>, vector<128x128xbf16>, vector<288x128xf32> -> vector<288x128xf32>
    %112 = arith.addf %106, %111 : vector<288x128xf32>
    %c0_143 = arith.constant 0 : index
    %c0_144 = arith.constant 0 : index
    %113 = vector.load %arg9[%c0_143, %c0_144] : memref<288x128xf32, #tpu.memory_space<vmem>>, vector<288x128xf32>
    tpu.vector_store %arg9[%c0_143, %c0_144], %112 {strides = array<i32>} : memref<288x128xf32, #tpu.memory_space<vmem>>, vector<288x128xf32>,
    %c0_145 = arith.constant 0 : index
    %c0_146 = arith.constant 0 : index
    %114 = vector.load %arg9[%c0_145, %c0_146] : memref<288x128xf32, #tpu.memory_space<vmem>>, vector<288x128xf32>
    %c0_147 = arith.constant 0 : index
    %c37 = arith.constant 37 : index
    %c0_148 = arith.constant 0 : index
    %115 = vector.load %arg1[%c0_147, %c37, %c0_148] : memref<1x342x128xbf16, #tpu.memory_space<vmem>>, vector<1x288x128xbf16>
    %116 = vector.shape_cast %115 : vector<1x288x128xbf16> to vector<288x128xbf16>
    %c7 = arith.constant 7 : index
    %c0_149 = arith.constant 0 : index
    %c0_150 = arith.constant 0 : index
    %117 = vector.load %arg3[%c7, %c0_149, %c0_150] : memref<9x128x128xbf16, #tpu.memory_space<vmem>>, vector<1x128x128xbf16>
    %118 = vector.shape_cast %117 : vector<1x128x128xbf16> to vector<128x128xbf16>
    %cst_151 = arith.constant dense<0.000000e+00> : vector<288x128xf32>
    %119 = tpu.matmul %116, %118, %cst_151 {dimension_numbers = #tpu.dot_dimension_numbers<[1], [0], [0], [1], [0, 0, 1, 1], [], []>} : vector<288x128xbf16>, vector<128x128xbf16>, vector<288x128xf32> -> vector<288x128xf32>
    %120 = arith.addf %114, %119 : vector<288x128xf32>
    %c0_152 = arith.constant 0 : index
    %c0_153 = arith.constant 0 : index
    %121 = vector.load %arg9[%c0_152, %c0_153] : memref<288x128xf32, #tpu.memory_space<vmem>>, vector<288x128xf32>
    tpu.vector_store %arg9[%c0_152, %c0_153], %120 {strides = array<i32>} : memref<288x128xf32, #tpu.memory_space<vmem>>, vector<288x128xf32>,
    %c0_154 = arith.constant 0 : index
    %c0_155 = arith.constant 0 : index
    %122 = vector.load %arg9[%c0_154, %c0_155] : memref<288x128xf32, #tpu.memory_space<vmem>>, vector<288x128xf32>
    %c0_156 = arith.constant 0 : index
    %c37_157 = arith.constant 37 : index
    %c0_158 = arith.constant 0 : index
    %123 = vector.load %arg2[%c0_156, %c37_157, %c0_158] : memref<1x342x128xbf16, #tpu.memory_space<vmem>>, vector<1x288x128xbf16>
    %124 = vector.shape_cast %123 : vector<1x288x128xbf16> to vector<288x128xbf16>
    %c7_159 = arith.constant 7 : index
    %c0_160 = arith.constant 0 : index
    %c0_161 = arith.constant 0 : index
    %125 = vector.load %arg4[%c7_159, %c0_160, %c0_161] : memref<9x128x128xbf16, #tpu.memory_space<vmem>>, vector<1x128x128xbf16>
    %126 = vector.shape_cast %125 : vector<1x128x128xbf16> to vector<128x128xbf16>
    %cst_162 = arith.constant dense<0.000000e+00> : vector<288x128xf32>
    %127 = tpu.matmul %124, %126, %cst_162 {dimension_numbers = #tpu.dot_dimension_numbers<[1], [0], [0], [1], [0, 0, 1, 1], [], []>} : vector<288x128xbf16>, vector<128x128xbf16>, vector<288x128xf32> -> vector<288x128xf32>
    %128 = arith.addf %122, %127 : vector<288x128xf32>
    %c0_163 = arith.constant 0 : index
    %c0_164 = arith.constant 0 : index
    %129 = vector.load %arg9[%c0_163, %c0_164] : memref<288x128xf32, #tpu.memory_space<vmem>>, vector<288x128xf32>
    tpu.vector_store %arg9[%c0_163, %c0_164], %128 {strides = array<i32>} : memref<288x128xf32, #tpu.memory_space<vmem>>, vector<288x128xf32>,
    %c0_165 = arith.constant 0 : index
    %c0_166 = arith.constant 0 : index
    %130 = vector.load %arg9[%c0_165, %c0_166] : memref<288x128xf32, #tpu.memory_space<vmem>>, vector<288x128xf32>
    %c0_167 = arith.constant 0 : index
    %c38 = arith.constant 38 : index
    %c0_168 = arith.constant 0 : index
    %131 = vector.load %arg1[%c0_167, %c38, %c0_168] : memref<1x342x128xbf16, #tpu.memory_space<vmem>>, vector<1x288x128xbf16>
    %132 = vector.shape_cast %131 : vector<1x288x128xbf16> to vector<288x128xbf16>
    %c8 = arith.constant 8 : index
    %c0_169 = arith.constant 0 : index
    %c0_170 = arith.constant 0 : index
    %133 = vector.load %arg3[%c8, %c0_169, %c0_170] : memref<9x128x128xbf16, #tpu.memory_space<vmem>>, vector<1x128x128xbf16>
    %134 = vector.shape_cast %133 : vector<1x128x128xbf16> to vector<128x128xbf16>
    %cst_171 = arith.constant dense<0.000000e+00> : vector<288x128xf32>
    %135 = tpu.matmul %132, %134, %cst_171 {dimension_numbers = #tpu.dot_dimension_numbers<[1], [0], [0], [1], [0, 0, 1, 1], [], []>} : vector<288x128xbf16>, vector<128x128xbf16>, vector<288x128xf32> -> vector<288x128xf32>
    %136 = arith.addf %130, %135 : vector<288x128xf32>
    %c0_172 = arith.constant 0 : index
    %c0_173 = arith.constant 0 : index
    %137 = vector.load %arg9[%c0_172, %c0_173] : memref<288x128xf32, #tpu.memory_space<vmem>>, vector<288x128xf32>
    tpu.vector_store %arg9[%c0_172, %c0_173], %136 {strides = array<i32>} : memref<288x128xf32, #tpu.memory_space<vmem>>, vector<288x128xf32>,
    %c0_174 = arith.constant 0 : index
    %c0_175 = arith.constant 0 : index
    %138 = vector.load %arg9[%c0_174, %c0_175] : memref<288x128xf32, #tpu.memory_space<vmem>>, vector<288x128xf32>
    %c0_176 = arith.constant 0 : index
    %c38_177 = arith.constant 38 : index
    %c0_178 = arith.constant 0 : index
    %139 = vector.load %arg2[%c0_176, %c38_177, %c0_178] : memref<1x342x128xbf16, #tpu.memory_space<vmem>>, vector<1x288x128xbf16>
    %140 = vector.shape_cast %139 : vector<1x288x128xbf16> to vector<288x128xbf16>
    %c8_179 = arith.constant 8 : index
    %c0_180 = arith.constant 0 : index
    %c0_181 = arith.constant 0 : index
    %141 = vector.load %arg4[%c8_179, %c0_180, %c0_181] : memref<9x128x128xbf16, #tpu.memory_space<vmem>>, vector<1x128x128xbf16>
    %142 = vector.shape_cast %141 : vector<1x128x128xbf16> to vector<128x128xbf16>
    %cst_182 = arith.constant dense<0.000000e+00> : vector<288x128xf32>
    %143 = tpu.matmul %140, %142, %cst_182 {dimension_numbers = #tpu.dot_dimension_numbers<[1], [0], [0], [1], [0, 0, 1, 1], [], []>} : vector<288x128xbf16>, vector<128x128xbf16>, vector<288x128xf32> -> vector<288x128xf32>
    %144 = arith.addf %138, %143 : vector<288x128xf32>
    %c0_183 = arith.constant 0 : index
    %c0_184 = arith.constant 0 : index
    %145 = vector.load %arg9[%c0_183, %c0_184] : memref<288x128xf32, #tpu.memory_space<vmem>>, vector<288x128xf32>
    tpu.vector_store %arg9[%c0_183, %c0_184], %144 {strides = array<i32>} : memref<288x128xf32, #tpu.memory_space<vmem>>, vector<288x128xf32>,
    %c0_185 = arith.constant 0 : index
    %c0_186 = arith.constant 0 : index
    %146 = vector.load %arg9[%c0_185, %c0_186] : memref<288x128xf32, #tpu.memory_space<vmem>>, vector<288x128xf32>
    %c0_187 = arith.constant 0 : index
    %c0_188 = arith.constant 0 : index
    %147 = vector.load %arg5[%c0_187, %c0_188] : memref<1x128xf32, #tpu.memory_space<vmem>>, vector<1x128xf32>
    %148 = vector.broadcast %147 : vector<1x128xf32> to vector<288x128xf32>
    %149 = arith.addf %146, %148 : vector<288x128xf32>
    %cst_189 = arith.constant 0.000000e+00 : f32
    %150 = vector.broadcast %cst_189 : f32 to vector<288x128xf32>
    %151 = arith.maximumf %149, %150 : vector<288x128xf32>
    %152 = arith.truncf %151 : vector<288x128xf32> to vector<288x128xbf16>
    %c0_190 = arith.constant 0 : index
    %c0_191 = arith.constant 0 : index
    %153 = vector.load %arg6[%c0_190, %c0_191] : memref<128x128xbf16, #tpu.memory_space<vmem>>, vector<128x128xbf16>
    %cst_192 = arith.constant dense<0.000000e+00> : vector<288x128xf32>
    %154 = tpu.matmul %152, %153, %cst_192 {dimension_numbers = #tpu.dot_dimension_numbers<[1], [0], [0], [1], [0, 0, 1, 1], [], []>} : vector<288x128xbf16>, vector<128x128xbf16>, vector<288x128xf32> -> vector<288x128xf32>
    %c0_193 = arith.constant 0 : index
    %c0_194 = arith.constant 0 : index
    %155 = vector.load %arg7[%c0_193, %c0_194] : memref<1x128xf32, #tpu.memory_space<vmem>>, vector<1x128xf32>
    %156 = vector.broadcast %155 : vector<1x128xf32> to vector<288x128xf32>
    %157 = arith.addf %154, %156 : vector<288x128xf32>
    %c0_195 = arith.constant 0 : index
    %c0_196 = arith.constant 0 : index
    %c0_197 = arith.constant 0 : index
    %158 = vector.load %arg8[%c0_195, %c0_196, %c0_197] : memref<1x288x128xf32, #tpu.memory_space<vmem>>, vector<1x288x128xf32>
    %159 = vector.shape_cast %158 : vector<1x288x128xf32> to vector<288x128xf32>
    %160 = vector.shape_cast %157 : vector<288x128xf32> to vector<1x288x128xf32>
    tpu.vector_store %arg8[%c0_195, %c0_196, %c0_197], %160 {strides = array<i32>} : memref<1x288x128xf32, #tpu.memory_space<vmem>>, vector<1x288x128xf32>,
    return
  }
  func.func @transform_0(%arg0: i32) -> (i32, i32, i32) {
    %c0_i32 = arith.constant 0 : i32
    %c0_i32_0 = arith.constant 0 : i32
    %c0_i32_1 = arith.constant 0 : i32
    return %arg0, %c0_i32, %c0_i32_0 : i32, i32, i32
  }
  func.func @transform_1(%arg0: i32) -> (i32, i32, i32) {
    %c0_i32 = arith.constant 0 : i32
    %c0_i32_0 = arith.constant 0 : i32
    %c0_i32_1 = arith.constant 0 : i32
    return %arg0, %c0_i32, %c0_i32_0 : i32, i32, i32
  }
  func.func @transform_2(%arg0: i32) -> (i32, i32, i32) {
    %c0_i32 = arith.constant 0 : i32
    %c0_i32_0 = arith.constant 0 : i32
    %c0_i32_1 = arith.constant 0 : i32
    %c0_i32_2 = arith.constant 0 : i32
    return %c0_i32, %c0_i32_0, %c0_i32_1 : i32, i32, i32
  }
  func.func @transform_3(%arg0: i32) -> (i32, i32, i32) {
    %c0_i32 = arith.constant 0 : i32
    %c0_i32_0 = arith.constant 0 : i32
    %c0_i32_1 = arith.constant 0 : i32
    %c0_i32_2 = arith.constant 0 : i32
    return %c0_i32, %c0_i32_0, %c0_i32_1 : i32, i32, i32
  }
  func.func @transform_4(%arg0: i32) -> (i32, i32) {
    %c0_i32 = arith.constant 0 : i32
    %c0_i32_0 = arith.constant 0 : i32
    %c0_i32_1 = arith.constant 0 : i32
    return %c0_i32, %c0_i32_0 : i32, i32
  }
  func.func @transform_5(%arg0: i32) -> (i32, i32) {
    %c0_i32 = arith.constant 0 : i32
    %c0_i32_0 = arith.constant 0 : i32
    %c0_i32_1 = arith.constant 0 : i32
    return %c0_i32, %c0_i32_0 : i32, i32
  }
  func.func @transform_6(%arg0: i32) -> (i32, i32) {
    %c0_i32 = arith.constant 0 : i32
    %c0_i32_0 = arith.constant 0 : i32
    %c0_i32_1 = arith.constant 0 : i32
    return %c0_i32, %c0_i32_0 : i32, i32
  }
  func.func @transform_7(%arg0: i32) -> (i32, i32, i32) {
    %c0_i32 = arith.constant 0 : i32
    %c0_i32_0 = arith.constant 0 : i32
    %c0_i32_1 = arith.constant 0 : i32
    return %arg0, %c0_i32, %c0_i32_0 : i32, i32, i32
  }
}

</mosaic_0001>

<bundles_post_ra>
// kernel: model_forward.4
= control target key start
LH: loop header
LB: loop body
LE: loop exit
PB: predicated region body
PF: predicated region fallthrough
CT: control target
= control target key end

     0   :  { %s3374_s12 = smov 0   ;;  %s3898_s0 = inlined_call_operand.vmem [shape: bf16[2,110,128], index: 0, kind: input, shape index: {}]   ;;  %s3899_s1 = inlined_call_operand.vmem [shape: bf16[9,128,128], index: 1, kind: input, shape index: {}]   ;;  %s3900_s2 = inlined_call_operand.vmem [shape: f32[1,128], index: 2, kind: input, shape index: {}]   ;;  %s3901_s3 = inlined_call_operand.vmem [shape: bf16[2,80,128], index: 3, kind: output, shape index: {}]  }
   0x1 LB: > { %s2438_s13 = sadd.s32 4294967295, %s3350_s12   ;;  %p2442_p0 = scmp.ge.s32.totalorder %s3350_s12, 1  ;;  %s3350_s12 = sphi %s3374_s12, %s13_s12  }
   0x2   : > { %p137_p1 = scmp.lt.s32.totalorder %s3350_s12, 3 }
   0x4   : > { %p138_p2 = pnand %p2442_p0, %p137_p1 }
   0x5   : > { %v3219_v0 = vld [vmem:[%s3899_s1] sm:$0xff] (!%p138_p2)   ;;  %v3352_v1 = vmov (!%p138_p2), 0.0   ;;  %v3221_v3 = vld [vmem:[%s3899_s1 + $0x8] sm:$0xff] (!%p138_p2)   ;;  %vm3353_vm0 = vmmov (!%p138_p2), 0   ;;  %p161_p3 = scmp.lt.s32.totalorder (!%p138_p2), %s2438_s13, 1  ;;  %v3223_v5 = vld [vmem:[%s3899_s1 + $0x10] sm:$0xff] (!%p138_p2)  }
   0x6   : > { %141 = sbr.rel (%p138_p2) target bundleno = 437 (0x1b5), region = 32  ;;  %2867 = vmatprep.subr.bf16.mxu0 (!%p138_p2), %v3352_v1  ;;  %2903 = vmatprep.subr.bf16.mxu1 (!%p138_p2), %v3352_v1  ;;  %v3220_v2 = vld [vmem:[%s3899_s1 + $0x40] sm:$0xff] (!%p138_p2)   ;;  %v3222_v4 = vld [vmem:[%s3899_s1 + $0x48] sm:$0xff] (!%p138_p2)   ;;  %v3224_v6 = vld [vmem:[%s3899_s1 + $0x50] sm:$0xff] (!%p138_p2)   ;;  %vm455_vm1 = vsmask.f32 (!%p138_p2), 7424 }
   0x7   : > { %2868 = vmatpush3.bf16.msra.mxu0 (!%p138_p2), %v3219_v0  ;;  %2883 = vmatprep.mubr.msk.bf16.mxu0 (!%p138_p2), %vm3353_vm0, %v3352_v1  ;;  %v3225_v7 = vld [vmem:[%s3899_s1 + $0x18] sm:$0xff] (!%p138_p2)   ;;  %v3227_v9 = vld [vmem:[%s3899_s1 + $0x20] sm:$0xff] (!%p138_p2)   ;;  %v3229_v11 = vld [vmem:[%s3899_s1 + $0x28] sm:$0xff] (!%p138_p2)   ;;  %vm712_vm2 = vcmask (!%p138_p2), 1046528   ;;  %vm1159_vm3 = vsmask.f32 (!%p138_p2), 6400 }
   0x8   : > { %2904 = vmatpush3.bf16.msra.mxu1 (!%p138_p2), %v3220_v2  ;;  %2869 = vmatprep.subr.bf16.mxu0 (!%p138_p2), %v3352_v1  ;;  %v3226_v8 = vld [vmem:[%s3899_s1 + $0x58] sm:$0xff] (!%p138_p2)   ;;  %v3228_v10 = vld [vmem:[%s3899_s1 + $0x60] sm:$0xff] (!%p138_p2)   ;;  %v3230_v12 = vld [vmem:[%s3899_s1 + $0x68] sm:$0xff] (!%p138_p2)   ;;  %vm1425_vm4 = vcmask (!%p138_p2), 1045504   ;;  %vm1872_vm5 = vsmask.f32 (!%p138_p2), 5376 }
   0x9   : > { %2905 = vmatprep.subr.bf16.mxu1 (!%p138_p2), %v3352_v1  ;;  %2919 = vmatprep.mubr.msk.bf16.mxu1 (!%p138_p2), %vm3353_vm0, %v3352_v1  ;;  %v3231_v16 = vld [vmem:[%s3899_s1 + $0x30] sm:$0xff] (!%p138_p2)   ;;  %v3233_v21 = vld [vmem:[%s3899_s1 + $0x38] sm:$0xff] (!%p138_p2)   ;;  %v3238_v27 = vld [vmem:[%s3899_s1 + $0x80] sm:$0xff] (!%p138_p2)   ;;  %vm2138_vm6 = vcmask (!%p138_p2), 1044480  }
   0xa   : > { %v3232_v17 = vld [vmem:[%s3899_s1 + $0x70] sm:$0xff] (!%p138_p2)   ;;  %v3234_v22 = vld [vmem:[%s3899_s1 + $0x78] sm:$0xff] (!%p138_p2)   ;;  %v3242_v31 = vld [vmem:[%s3899_s1 + $0xc0] sm:$0xff] (!%p138_p2)  }
   0xb   : > { %2870 = vmatpush3.bf16.msra.mxu0 (!%p138_p2), %v3221_v3  ;;  %v3239_v32 = vld [vmem:[%s3899_s1 + $0x88] sm:$0xff] (!%p138_p2)   ;;  %v3243_v38 = vld [vmem:[%s3899_s1 + $0x90] sm:$0xff] (!%p138_p2)   ;;  %v3247_v43 = vld [vmem:[%s3899_s1 + $0x98] sm:$0xff] (!%p138_p2)  }
   0xc   : > { %2906 = vmatpush3.bf16.msra.mxu1 (!%p138_p2), %v3222_v4  ;;  %2871 = vmatprep.subr.bf16.mxu0 (!%p138_p2), %v3352_v1  ;;  %v3244_v36 = vld [vmem:[%s3899_s1 + $0xc8] sm:$0xff] (!%p138_p2)   ;;  %v3248_v42 = vld [vmem:[%s3899_s1 + $0xd0] sm:$0xff] (!%p138_p2)   ;;  %v3250_v47 = vld [vmem:[%s3899_s1 + $0xd8] sm:$0xff] (!%p138_p2)  }
   0xd   : > { %s3903_s13 = smov (!%p161_p3, %s2438_s13), 1  ;;  %2907 = vmatprep.subr.bf16.mxu1 %v3352_v1  ;;  %v3249_v49 = vld [vmem:[%s3899_s1 + $0xa0] sm:$0xff]   ;;  %v3254_v55 = vld [vmem:[%s3899_s1 + $0xa8] sm:$0xff]   ;;  %v3256_v62 = vld [vmem:[%s3899_s1 + $0xb0] sm:$0xff]  }
   0xe   : > { %s3207_s30 = smul.u32 56, %s3903_s13  ;;  %v3253_v53 = vld [vmem:[%s3899_s1 + $0xe0] sm:$0xff]   ;;  %v3255_v58 = vld [vmem:[%s3899_s1 + $0xe8] sm:$0xff]   ;;  %v3259_v0 = vld [vmem:[%s3899_s1 + $0xf0] sm:$0xff]  }
   0xf   : > { %2872 = vmatpush3.bf16.msra.mxu0 %v3223_v5  ;;  %v3260_v2 = vld [vmem:[%s3899_s1 + $0xb8] sm:$0xff]   ;;  %s3208_s18 = smul.u32 40, %s3903_s13 }
  0x10   : > { %2908 = vmatpush3.bf16.msra.mxu1 %v3224_v6  ;;  %2873 = vmatprep.subr.bf16.mxu0 %v3352_v1  ;;  %s3431_s10 = scalar_lea.vmem %s3898_s0, %s3207_s30  ;;  %v3261_v6 = vld [vmem:[%s3899_s1 + $0xf8] sm:$0xff]  }
  0x11   : > { %2909 = vmatprep.subr.bf16.mxu1 %v3352_v1  ;;  %v3236_v13 = vld [vmem:[%s3431_s10] sm:$0xff]   ;;  %v3237_v14 = vld [vmem:[%s3431_s10 + $0x8] sm:$0xff]   ;;  %v3241_v25 = vld [vmem:[%s3431_s10 + $0x10] sm:$0xff]   ;;  %s3884_s21 = scalar_lea.vmem %s3901_s3, %s3208_s18 }
  0x12   : > { %v459_v15 = vshll.u32 %v3236_v13, 16  ;;  %v457_v18 = vshrl.u32 %v3236_v13, 16  ;;  %v464_v20 = vshll.u32 %v3237_v14, 16  ;;  %v3235_v26 = vld [vmem:[%s3431_s10] sm:$0xff]   ;;  %v468_v29 = vshrl.u32 %v3237_v14, 16  ;;  %v3246_v35 = vld [vmem:[%s3431_s10 + $0x18] sm:$0xff]  }
  0x13   : > { %2874 = vmatpush3.bf16.msra.mxu0 %v3225_v7  ;;  %v472_v30 = vshll.u32 %v3241_v25, 16  ;;  %v3240_v37 = vld [vmem:[%s3431_s10 + $0x8] sm:$0xff]   ;;  %v476_v40 = vshrl.u32 %v3241_v25, 16  ;;  %v480_v41 = vshll.u32 %v3246_v35, 16  ;;  %v3252_v46 = vld [vmem:[%s3431_s10 + $0x20] sm:$0xff]   ;;  %v3245_v48 = vld [vmem:[%s3431_s10 + $0x10] sm:$0xff]  }
  0x14   : > { %2910 = vmatpush3.bf16.msra.mxu1 %v3226_v8  ;;  %2875 = vmatprep.subr.bf16.mxu0 %v3352_v1  ;;  %v461_v19 = vrot.slane %v459_v15, 1  ;;  %v466_v24 = vrot.slane %v464_v20, 1  ;;  %v484_v51 = vshrl.u32 %v3246_v35, 16  ;;  %v488_v52 = vshll.u32 %v3252_v46, 16  ;;  %v3251_v59 = vld [vmem:[%s3431_s10 + $0x18] sm:$0xff]   ;;  %v3257_v3 = vld [vmem:[%s3431_s10 + $0x20] sm:$0xff]  }
  0x15   : > { %2911 = vmatprep.subr.bf16.mxu1 %v3352_v1  ;;  %v474_v34 = vrot.slane %v472_v30, 1  ;;  %v482_v45 = vrot.slane %v480_v41, 1  ;;  %v3258_v54 = vld [vmem:[%s3431_s10 + $0x28] ss:$0 sps:$4 sm:$0x11]   ;;  %v492_v60 = vshrl.u32 %v3252_v46, 16 }
  0x16   : > { %v462_v23 = vor.u32 %v461_v19, %v457_v18  ;;  %v470_v33 = vor.u32 %v468_v29, %v466_v24  ;;  %v490_v57 = vrot.slane %v488_v52, 1  ;;  %v496_v63 = vshll.u32 %v3258_v54, 16  ;;  %v3263_v7 = vld [vmem:[%s3431_s10 + $0x8] sm:$0xff]   ;;  %v3262_v8 = vld [vmem:[%s3431_s10] sm:$0xfe]   ;;  %v3269_v18 = vld [vmem:[%s3431_s10 + $0x14] sm:$0xff]  }
  0x17   : > { %2876 = vmatpush3.bf16.msra.mxu0 %v3227_v9  ;;  %v478_v44 = vor.u32 %v476_v40, %v474_v34  ;;  %v486_v56 = vor.u32 %v484_v51, %v482_v45  ;;  %v3265_v9 = vld [vmem:[%s3431_s10 + $0xc] sm:$0xff]   ;;  %v714_v13 = vrot.slane %v3263_v7, 1  ;;  %v3274_v29 = vld [vmem:[%s3431_s10 + $0x1c] sm:$0xff]   ;;  %v3280_v40 = vld [vmem:[%s3431_s10 + $0x24] sm:$0xff]  }
  0x18   : > { %2912 = vmatpush3.bf16.msra.mxu1 %v3228_v10  ;;  %2877 = vmatprep.subr.bf16.mxu0 %v3352_v1  ;;  %v467_v28 = vsel %vm455_vm1, %v462_v23, %v466_v24  ;;  %v475_v39 = vsel %vm455_vm1, %v470_v33, %v474_v34  ;;  %v494_v4 = vor.u32 %v492_v60, %v490_v57  ;;  %v498_v5 = vrot.slane %v496_v63, 1  ;;  %v3271_v25 = vld [vmem:[%s3899_s1 + $0x110] sm:$0xff]   ;;  %v3275_v34 = vld [vmem:[%s3899_s1 + $0x118] sm:$0xff]   ;;  %v3281_v41 = vld [vmem:[%s3899_s1 + $0x160] sm:$0xff]  }
  0x19   : > { %2913 = vmatprep.subr.bf16.mxu1 %v3352_v1  ;;  %v483_v50 = vsel %vm455_vm1, %v478_v44, %v482_v45  ;;  %v491_v61 = vsel %vm455_vm1, %v486_v56, %v490_v57  ;;  %v937_v15 = vrot.slane %v3265_v9, 1  ;;  %v939_v24 = vrot.slane %v3269_v18, 1  ;;  %v3278_v35 = vld [vmem:[%s3899_s1 + $0x158] sm:$0xff]   ;;  %v3283_v45 = vld [vmem:[%s3899_s1 + $0x168] sm:$0xff]   ;;  %v3284_v52 = vld [vmem:[%s3899_s1 + $0x130] sm:$0xff]  }
  0x1a   : > { %v499_v10 = vsel %vm455_vm1, %v494_v4, %v498_v5  ;;  %v941_v33 = vrot.slane %v3274_v29, 1  ;;  %v943_v44 = vrot.slane %v3280_v40, 1  ;;  %v3285_v46 = vld [vmem:[%s3431_s10 + $0x28] ss:$0 sps:$4 sm:$0x11]   ;;  %v3288_v56 = vld [vmem:[%s3899_s1 + $0x138] sm:$0xff]  }
  0x1b   : > { %2878 = vmatpush3.bf16.msra.mxu0 %v3229_v11  ;;  %v3264_v11 = vld [vmem:[%s3431_s10 + $0x4] sm:$0xfe]   ;;  %v940_v30 = vsel %vm712_vm2, %v937_v15, %v939_v24  ;;  %v3296_v63 = vld [vmem:[%s3431_s10 + $0x14] sm:$0xff]  }
  0x1c   : > { %2914 = vmatpush3.bf16.msra.mxu1 %v3230_v12  ;;  %2879 = vmatprep.subr.bf16.mxu0 %v3352_v1  ;;  %v713_v12 = vrot.slane %v3262_v8, 1  ;;  %v936_v14 = vrot.slane %v3264_v11, 1  ;;  %v944_v51 = vsel %vm712_vm2, %v941_v33, %v943_v44  ;;  %v1178_v8 = vshrl.u32 %v3296_v63, 16 }
  0x1d   : > { %2915 = vmatprep.subr.bf16.mxu1 %v3352_v1  ;;  %v1181_v9 = vshll.u32 %v3296_v63, 16  ;;  %v3321_v63 = vld [vmem:[%s3431_s10 + $0x10] sm:$0xff]  }
  0x1e   : > { %v715_v19 = vsel %vm712_vm2, %v713_v12, %v714_v13  ;;  %v938_v20 = vsel %vm712_vm2, %v936_v14, %v937_v15  ;;  %v3294_v14 = vld [vmem:[%s3899_s1 + $0x180] sm:$0xff]   ;;  %v1180_v15 = vrot.slane %v1178_v8, 1  ;;  %v1885_v8 = vshll.u32 %v3321_v63, 16 }
  0x1f   : > { %2880 = vmatpush3.bf16.msra.mxu0 %v3231_v16  ;;  %v3266_v16 = vld [vmem:[%s3899_s1 + $0x100] sm:$0xff]  }
  0x20   : > { %2916 = vmatpush3.bf16.msra.mxu1 %v3232_v17  ;;  %2881 = vmatprep.subr.bf16.mxu0 %v3352_v1  ;;  %v3268_v17 = vld [vmem:[%s3431_s10 + $0x10] sm:$0xff]  }
  0x21   : > { %2917 = vmatprep.subr.bf16.mxu1 %v3352_v1  ;;  %v716_v23 = vrot.slane %v3268_v17, 1  ;;  %v3301_v17 = vld [vmem:[%s3431_s10 + $0x1c] sm:$0xff]  }
  0x23   : > { %2882 = vmatpush3.bf16.msra.mxu0 %v3233_v21  ;;  %v3270_v21 = vld [vmem:[%s3899_s1 + $0x140] sm:$0xff]  }
  0x24   : > { %2918 = vmatpush3.bf16.msra.mxu1 %v3234_v22  ;;  %2939 = vmatprep.subr.bf16.mxu0 %v3352_v1  ;;  %v3267_v22 = vld [vmem:[%s3899_s1 + $0x108] sm:$0xff]  }
  0x25   : > { %2975 = vmatprep.subr.bf16.mxu1 %v3352_v1 }
  0x26   : > { %2884 = vmatmul.mubr.bf16.vlgmr.msra.gmra.mrb[0].mxu0 %v3235_v26  ;;  %v3272_v26 = vld [vmem:[%s3899_s1 + $0x148] sm:$0xff]  }
  0x27   : > { %2920 = vmatmul.mubr.bf16.vlgmr.msra.gmra.mrb[0].mxu1 %v467_v28  ;;  %2940 = vmatpush3.bf16.msra.mxu0 %v3238_v27  ;;  %v3273_v27 = vld [vmem:[%s3431_s10 + $0x18] sm:$0xff]   ;;  %v717_v28 = vsel %vm712_vm2, %v714_v13, %v716_v23 }
  0x28   : > { %2941 = vmatprep.subr.bf16.mxu0 %v3352_v1  ;;  %2887 = vmatprep.mubr.msk.bf16.mxu0 %vm3353_vm0, %v3352_v1 }
  0x29   : > { %2923 = vmatprep.mubr.msk.bf16.mxu1 %vm3353_vm0, %v3352_v1  ;;  %2976 = vmatpush3.bf16.msra.mxu1 %v3242_v31  ;;  %v3276_v31 = vld [vmem:[%s3899_s1 + $0x150] sm:$0xff]  }
  0x2a   : > { %2977 = vmatprep.subr.bf16.mxu1 %v3352_v1 }
  0x2b   : > { %2942 = vmatpush3.bf16.msra.mxu0 %v3239_v32  ;;  %v718_v32 = vrot.slane %v3273_v27, 1  ;;  %v3300_v27 = vld [vmem:[%s3899_s1 + $0x1c8] sm:$0xff]  }
  0x2c   : > { %2943 = vmatprep.subr.bf16.mxu0 %v3352_v1 }
  0x2d   : > { %2978 = vmatpush3.bf16.msra.mxu1 %v3244_v36  ;;  %v719_v36 = vsel %vm712_vm2, %v716_v23, %v718_v32  ;;  %v3295_v23 = vld [vmem:[%s3899_s1 + $0x188] sm:$0xff]  }
  0x2e   : > { %2888 = vmatmul.mubr.bf16.gmra.mrb[4].mxu0 %v3240_v37  ;;  %2979 = vmatprep.subr.bf16.mxu1 %v3352_v1  ;;  %v3277_v37 = vld [vmem:[%s3899_s1 + $0x120] sm:$0xff]  }
  0x2f   : > { %2924 = vmatmul.mubr.bf16.gmra.mrb[4].mxu1 %v475_v39  ;;  %2944 = vmatpush3.bf16.msra.mxu0 %v3243_v38  ;;  %v3279_v38 = vld [vmem:[%s3431_s10 + $0x20] sm:$0xff]   ;;  %v942_v39 = vsel %vm712_vm2, %v939_v24, %v941_v33 }
  0x30   : > { %2891 = vmatprep.mubr.msk.bf16.mxu0 %vm3353_vm0, %v3352_v1  ;;  %2927 = vmatprep.mubr.msk.bf16.mxu1 %vm3353_vm0, %v3352_v1 }
  0x31   : > { %2945 = vmatprep.subr.bf16.mxu0 %v3352_v1  ;;  %2980 = vmatpush3.bf16.msra.mxu1 %v3248_v42  ;;  %v720_v42 = vrot.slane %v3279_v38, 1 }
  0x32   : > { %2981 = vmatprep.subr.bf16.mxu1 %v3352_v1 }
  0x33   : > { %2946 = vmatpush3.bf16.msra.mxu0 %v3247_v43  ;;  %v3282_v43 = vld [vmem:[%s3899_s1 + $0x128] sm:$0xff]  }
  0x34   : > { %2947 = vmatprep.subr.bf16.mxu0 %v3352_v1 }
  0x35   : > { %2982 = vmatpush3.bf16.msra.mxu1 %v3250_v47  ;;  %v3291_v47 = vld [vmem:[%s3431_s10 + $0xc] sm:$0xff]  }
  0x36   : > { %2892 = vmatmul.mubr.bf16.gmra.mrb[8].mxu0 %v3245_v48  ;;  %2983 = vmatprep.subr.bf16.mxu1 %v3352_v1  ;;  %v3286_v48 = vld [vmem:[%s3431_s10 + $0x2c] ss:$0 sps:$4 sm:$0x11]   ;;  %v1169_v54 = vshrl.u32 %v3291_v47, 16  ;;  %v1172_v57 = vshll.u32 %v3291_v47, 16 }
  0x37   : > { %2928 = vmatmul.mubr.bf16.gmra.mrb[8].mxu1 %v483_v50  ;;  %2948 = vmatpush3.bf16.msra.mxu0 %v3249_v49  ;;  %v721_v49 = vsel %vm712_vm2, %v718_v32, %v720_v42  ;;  %v3290_v50 = vld [vmem:[%s3431_s10 + $0x4] sm:$0xfe]   ;;  %v945_v60 = vrot.slane %v3286_v48, 1 }
  0x38   : > { %2895 = vmatprep.mubr.msk.bf16.mxu0 %vm3353_vm0, %v3352_v1  ;;  %2931 = vmatprep.mubr.msk.bf16.mxu1 %vm3353_vm0, %v3352_v1  ;;  %v1174_v5 = vrot.slane %v1172_v57, 2  ;;  %v3307_v32 = vld [vmem:[%s3431_s10 + $0x24] sm:$0xff]  }
  0x39   : > { %2949 = vmatprep.subr.bf16.mxu0 %v3352_v1  ;;  %2984 = vmatpush3.bf16.msra.mxu1 %v3253_v53  ;;  %v3287_v53 = vld [vmem:[%s3899_s1 + $0x170] sm:$0xff]   ;;  %v946_v7 = vsel %vm712_vm2, %v943_v44, %v945_v60  ;;  %v1196_v38 = vshrl.u32 %v3307_v32, 16  ;;  %v3308_v48 = vld [vmem:[%s3431_s10 + $0x24] sm:$0xff]  }
  0x3a   : > { %2985 = vmatprep.subr.bf16.mxu1 %v3352_v1 }
  0x3b   : > { %2950 = vmatpush3.bf16.msra.mxu0 %v3254_v55  ;;  %v722_v55 = vrot.slane %v3285_v46, 1 }
  0x3c   : > { %2951 = vmatprep.subr.bf16.mxu0 %v3352_v1 }
  0x3d   : > { %2986 = vmatpush3.bf16.msra.mxu1 %v3255_v58  ;;  %v1161_v58 = vshrl.u32 %v3290_v50, 16 }
  0x3e   : > { %2896 = vmatmul.mubr.bf16.gmra.mrb[12].mxu0 %v3251_v59  ;;  %2987 = vmatprep.subr.bf16.mxu1 %v3352_v1  ;;  %v1164_v59 = vshll.u32 %v3290_v50, 16 }
  0x3f   : > { %2932 = vmatmul.mubr.bf16.gmra.mrb[12].mxu1 %v491_v61  ;;  %2899 = vmatprep.mubr.msk.bf16.mxu0 %vm3353_vm0, %v3352_v1  ;;  %v3289_v61 = vld [vmem:[%s3899_s1 + $0x178] sm:$0xff]  }
  0x40   : > { %2935 = vmatprep.mubr.msk.bf16.mxu1 %vm3353_vm0, %v3352_v1  ;;  %2952 = vmatpush3.bf16.msra.mxu0 %v3256_v62  ;;  %v1171_v62 = vrot.slane %v1169_v54, 1  ;;  %v1166_v4 = vrot.slane %v1164_v59, 2  ;;  %v1433_v54 = vrot.slane %v3308_v48, 2  ;;  %v3314_v59 = vld [vmem:[%s3431_s10 + $0x2c] ss:$0 sps:$4 sm:$0x33]  }
  0x41   : > { %2988 = vmatpush3.bf16.msra.mxu1 %v3259_v0  ;;  %2953 = vmatprep.subr.bf16.mxu0 %v3352_v1  ;;  %v3292_v0 = vld [vmem:[%s3431_s10 + $0x4] sm:$0xfc]  }
  0x42   : > { %2989 = vmatprep.subr.bf16.mxu1 %v3352_v1  ;;  %v1175_v11 = vor.u32 %v1174_v5, %v1171_v62  ;;  %v1426_v12 = vrot.slane %v3292_v0, 2  ;;  %v3320_v62 = vld [vmem:[%s3431_s10 + $0x8] sm:$0xfc]   ;;  %v3315_v0 = vld [vmem:[%s3899_s1 + $0x1f0] sm:$0xff]  }
  0x43   : > { %v1874_v5 = vshrl.u32 %v3320_v62, 16 }
  0x44   : > { %2954 = vmatpush3.bf16.msra.mxu0 %v3260_v2  ;;  %v723_v2 = vsel %vm712_vm2, %v720_v42, %v722_v55  ;;  %v3305_v42 = vld [vmem:[%s3899_s1 + $0x1a0] sm:$0xff]   ;;  %v3311_v55 = vld [vmem:[%s3899_s1 + $0x1e8] sm:$0xff]  }
  0x45   : > { %2990 = vmatpush3.bf16.msra.mxu1 %v3261_v6  ;;  %3011 = vmatprep.subr.bf16.mxu0 %v3352_v1  ;;  %v3293_v6 = vld [vmem:[%s3431_s10 + $0xc] sm:$0xff]  }
  0x46   : > { %2900 = vmatmul.mubr.bf16.gmra.mrb[16].mxu0 %v3257_v3  ;;  %3047 = vmatprep.subr.bf16.mxu1 %v3352_v1  ;;  %v1163_v3 = vrot.slane %v1161_v58, 1  ;;  %v1427_v13 = vrot.slane %v3293_v6, 2  ;;  %v1877_v6 = vshll.u32 %v3320_v62, 16  ;;  %v3335_v62 = vld [vmem:[%s3431_s10 + $0x30] ss:$0 sps:$4 sm:$0x33]  }
  0x47   : > { %2936 = vmatmul.mubr.bf16.gmra.mrb[16].mxu1 %v499_v10  ;;  %2955 = vmatprep.mubr.msk.bf16.mxu0 %vm3353_vm0, %v3352_v1 }
  0x48   : > { %2991 = vmatprep.mubr.msk.bf16.mxu1 %vm3353_vm0, %v3352_v1  ;;  %v1167_v10 = vor.u32 %v1166_v4, %v1163_v3  ;;  %v1435_v3 = vrot.slane %v3314_v59, 2  ;;  %v3316_v4 = vld [vmem:[%s3899_s1 + $0x1b8] sm:$0xff]  }
  0x4a   : > { %v1176_v18 = vsel %vm1159_vm3, %v1167_v10, %v1175_v11 }
  0x4e   : > { %2956 = vmatmul.mubr.bf16.vlgmr.msra.gmra.mrb[20].mxu0 %v715_v19  ;;  %v1428_v19 = vsel %vm1425_vm4, %v1426_v12, %v1427_v13  ;;  %v3318_v12 = vld [vmem:[%s3431_s10 + $0x8] sm:$0xfc]  }
  0x4f   : > { %2992 = vmatmul.mubr.bf16.vlgmr.msra.gmra.mrb[20].mxu1 %v938_v20  ;;  %3012 = vmatpush3.bf16.msra.mxu0 %v3266_v16  ;;  %v1183_v16 = vrot.slane %v1181_v9, 2  ;;  %v3297_v20 = vld [vmem:[%s3431_s10 + $0x14] sm:$0xff]  }
  0x50   : > { %3013 = vmatprep.subr.bf16.mxu0 %v3352_v1  ;;  %2959 = vmatprep.mubr.msk.bf16.mxu0 %vm3353_vm0, %v3352_v1  ;;  %v3317_v9 = vld [vmem:[%s3899_s1 + $0x1f8] sm:$0xff]  }
  0x51   : > { %2995 = vmatprep.mubr.msk.bf16.mxu1 %vm3353_vm0, %v3352_v1  ;;  %3048 = vmatpush3.bf16.msra.mxu1 %v3270_v21  ;;  %v3298_v21 = vld [vmem:[%s3899_s1 + $0x1c0] sm:$0xff]   ;;  %v1184_v24 = vor.u32 %v1183_v16, %v1180_v15  ;;  %v1879_v15 = vrot.slane %v1877_v6, 3  ;;  %v3337_v6 = vld [vmem:[%s3899_s1 + $0x238] sm:$0xff]  }
  0x52   : > { %3049 = vmatprep.subr.bf16.mxu1 %v3352_v1 }
  0x53   : > { %3014 = vmatpush3.bf16.msra.mxu0 %v3267_v22  ;;  %v1187_v22 = vshrl.u32 %v3301_v17, 16 }
  0x54   : > { %3015 = vmatprep.subr.bf16.mxu0 %v3352_v1 }
  0x55   : > { %3050 = vmatpush3.bf16.msra.mxu1 %v3272_v26  ;;  %v1429_v26 = vrot.slane %v3297_v20, 2  ;;  %v1189_v29 = vrot.slane %v1187_v22, 1 }
  0x56   : > { %2960 = vmatmul.mubr.bf16.gmra.mrb[24].mxu0 %v717_v28  ;;  %3051 = vmatprep.subr.bf16.mxu1 %v3352_v1  ;;  %v3299_v28 = vld [vmem:[%s3899_s1 + $0x190] sm:$0xff]  }
  0x57   : > { %2996 = vmatmul.mubr.bf16.gmra.mrb[24].mxu1 %v940_v30  ;;  %3016 = vmatpush3.bf16.msra.mxu0 %v3271_v25  ;;  %v1190_v25 = vshll.u32 %v3301_v17, 16  ;;  %v1185_v30 = vsel %vm1159_vm3, %v1175_v11, %v1184_v24  ;;  %v1430_v33 = vsel %vm1425_vm4, %v1427_v13, %v1429_v26  ;;  %v1436_v11 = vsel %vm1425_vm4, %v1433_v54, %v1435_v3  ;;  %v3319_v13 = vld [vmem:[%s3431_s10 + $0x10] sm:$0xff]  }
  0x58   : > { %2963 = vmatprep.mubr.msk.bf16.mxu0 %vm3353_vm0, %v3352_v1  ;;  %2999 = vmatprep.mubr.msk.bf16.mxu1 %vm3353_vm0, %v3352_v1  ;;  %v1887_v17 = vrot.slane %v1885_v8, 3  ;;  %v1650_v20 = vrot.slane %v3319_v13, 2  ;;  %v3338_v8 = vld [vmem:[%s3431_s10 + $0x8] sm:$0xf8]  }
  0x59   : > { %3017 = vmatprep.subr.bf16.mxu0 %v3352_v1  ;;  %3052 = vmatpush3.bf16.msra.mxu1 %v3276_v31  ;;  %v1192_v31 = vrot.slane %v1190_v25, 2  ;;  %v2139_v13 = vrot.slane %v3338_v8, 3 }
  0x5a   : > { %3053 = vmatprep.subr.bf16.mxu1 %v3352_v1 }
  0x5b   : > { %3018 = vmatpush3.bf16.msra.mxu0 %v3275_v34  ;;  %v3302_v34 = vld [vmem:[%s3431_s10 + $0x1c] sm:$0xff]  }
  0x5c   : > { %3019 = vmatprep.subr.bf16.mxu0 %v3352_v1  ;;  %v1431_v40 = vrot.slane %v3302_v34, 2 }
  0x5d   : > { %3054 = vmatpush3.bf16.msra.mxu1 %v3278_v35  ;;  %v3304_v35 = vld [vmem:[%s3899_s1 + $0x1d0] sm:$0xff]  }
  0x5e   : > { %2964 = vmatmul.mubr.bf16.gmra.mrb[28].mxu0 %v719_v36  ;;  %3055 = vmatprep.subr.bf16.mxu1 %v3352_v1  ;;  %v1193_v36 = vor.u32 %v1192_v31, %v1189_v29  ;;  %v1432_v47 = vsel %vm1425_vm4, %v1429_v26, %v1431_v40  ;;  %v1434_v60 = vsel %vm1425_vm4, %v1431_v40, %v1433_v54  ;;  %v3322_v26 = vld [vmem:[%s3899_s1 + $0x200] sm:$0xff]  }
  0x5f   : > { %3000 = vmatmul.mubr.bf16.gmra.mrb[28].mxu1 %v942_v39  ;;  %3020 = vmatpush3.bf16.msra.mxu0 %v3277_v37  ;;  %v3303_v37 = vld [vmem:[%s3899_s1 + $0x198] sm:$0xff]   ;;  %v1199_v39 = vshll.u32 %v3307_v32, 16  ;;  %v3328_v31 = vld [vmem:[%s3431_s10 + $0x20] sm:$0xff]   ;;  %v3323_v32 = vld [vmem:[%s3899_s1 + $0x208] sm:$0xff]  }
  0x60   : > { %2967 = vmatprep.mubr.msk.bf16.mxu0 %vm3353_vm0, %v3352_v1  ;;  %3003 = vmatprep.mubr.msk.bf16.mxu1 %vm3353_vm0, %v3352_v1  ;;  %v1194_v44 = vsel %vm1159_vm3, %v1184_v24, %v1193_v36 }
  0x61   : > { %3021 = vmatprep.subr.bf16.mxu0 %v3352_v1  ;;  %3056 = vmatpush3.bf16.msra.mxu1 %v3281_v41  ;;  %v3306_v41 = vld [vmem:[%s3899_s1 + $0x1d8] sm:$0xff]   ;;  %v1201_v46 = vrot.slane %v1199_v39, 2  ;;  %v3327_v39 = vld [vmem:[%s3431_s10 + $0x20] sm:$0xff]  }
  0x62   : > { %3057 = vmatprep.subr.bf16.mxu1 %v3352_v1 }
  0x63   : > { %3022 = vmatpush3.bf16.msra.mxu0 %v3282_v43  ;;  %v3313_v43 = vld [vmem:[%s3431_s10 + $0x2c] ss:$0 sps:$4 sm:$0x33]  }
  0x64   : > { %3023 = vmatprep.subr.bf16.mxu0 %v3352_v1 }
  0x65   : > { %3058 = vmatpush3.bf16.msra.mxu1 %v3283_v45  ;;  %v1198_v45 = vrot.slane %v1196_v38, 1  ;;  %v3326_v38 = vld [vmem:[%s3899_s1 + $0x210] sm:$0xff]  }
  0x66   : > { %2968 = vmatmul.mubr.bf16.gmra.mrb[32].mxu0 %v721_v49  ;;  %3059 = vmatprep.subr.bf16.mxu1 %v3352_v1  ;;  %v3309_v49 = vld [vmem:[%s3899_s1 + $0x1e0] sm:$0xff]  }
  0x67   : > { %3004 = vmatmul.mubr.bf16.gmra.mrb[32].mxu1 %v944_v51  ;;  %2971 = vmatprep.mubr.msk.bf16.mxu0 %vm3353_vm0, %v3352_v1  ;;  %v1202_v50 = vor.u32 %v1201_v46, %v1198_v45  ;;  %v3310_v51 = vld [vmem:[%s3899_s1 + $0x1a8] sm:$0xff]   ;;  %v3329_v45 = vld [vmem:[%s3899_s1 + $0x218] sm:$0xff]  }
  0x68   : > { %3007 = vmatprep.mubr.msk.bf16.mxu1 %vm3353_vm0, %v3352_v1  ;;  %3024 = vmatpush3.bf16.msra.mxu0 %v3284_v52  ;;  %v1205_v52 = vshrl.u32 %v3313_v43, 16 }
  0x69   : > { %3060 = vmatpush3.bf16.msra.mxu1 %v3287_v53  ;;  %3025 = vmatprep.subr.bf16.mxu0 %v3352_v1  ;;  %v1208_v53 = vshll.u32 %v3313_v43, 16  ;;  %v3332_v43 = vld [vmem:[%s3431_s10 + $0x28] sm:$0xff]  }
  0x6a   : > { %3061 = vmatprep.subr.bf16.mxu1 %v3352_v1  ;;  %v1207_v57 = vrot.slane %v1205_v52, 1  ;;  %v1912_v48 = vshll.u32 %v3332_v43, 16 }
  0x6b   : > { %v1210_v58 = vrot.slane %v1208_v53, 2 }
  0x6c   : > { %3026 = vmatpush3.bf16.msra.mxu0 %v3288_v56  ;;  %v1203_v56 = vsel %vm1159_vm3, %v1193_v36, %v1202_v50  ;;  %v1903_v36 = vshll.u32 %v3328_v31, 16  ;;  %v1914_v54 = vrot.slane %v1912_v48, 3 }
  0x6d   : > { %3062 = vmatpush3.bf16.msra.mxu1 %v3289_v61  ;;  %3083 = vmatprep.subr.bf16.mxu0 %v3352_v1  ;;  %v3312_v61 = vld [vmem:[%s3899_s1 + $0x1b0] sm:$0xff]  }
  0x6e   : > { %2972 = vmatmul.mubr.bf16.gmra.mrb[36].mxu0 %v723_v2  ;;  %3119 = vmatprep.subr.bf16.mxu1 %v3352_v1  ;;  %v1211_v2 = vor.u32 %v1210_v58, %v1207_v57  ;;  %v3333_v57 = vld [vmem:[%s3899_s1 + $0x228] sm:$0xff]  }
  0x6f   : > { %3008 = vmatmul.mubr.bf16.gmra.mrb[36].mxu1 %v946_v7  ;;  %3027 = vmatprep.mubr.msk.bf16.mxu0 %vm3353_vm0, %v3352_v1  ;;  %v1882_v7 = vshrl.u32 %v3321_v63, 16 }
  0x70   : > { %3063 = vmatprep.mubr.msk.bf16.mxu1 %vm3353_vm0, %v3352_v1  ;;  %v1212_v10 = vsel %vm1159_vm3, %v1202_v50, %v1211_v2  ;;  %v3330_v50 = vld [vmem:[%s3899_s1 + $0x220] sm:$0xff]  }
  0x71   : > { %v1884_v16 = vrot.slane %v1882_v7, 2 }
  0x73   : > { %v1888_v22 = vor.u32 %v1887_v17, %v1884_v16 }
  0x76   : > { %3028 = vmatmul.mubr.bf16.vlgmr.msra.gmra.mrb[40].mxu0 %v1176_v18  ;;  %v3325_v18 = vld [vmem:[%s3431_s10 + $0x18] sm:$0xff]  }
  0x77   : > { %3064 = vmatmul.mubr.bf16.vlgmr.msra.gmra.mrb[40].mxu1 %v1428_v19  ;;  %3084 = vmatpush3.bf16.msra.mxu0 %v3294_v14  ;;  %v1876_v14 = vrot.slane %v1874_v5, 2  ;;  %v1649_v19 = vrot.slane %v3318_v12, 2  ;;  %v1894_v24 = vshll.u32 %v3325_v18, 16  ;;  %v3341_v12 = vld [vmem:[%s3431_s10 + $0x28] sm:$0xff]  }
  0x78   : > { %3085 = vmatprep.subr.bf16.mxu0 %v3352_v1  ;;  %3031 = vmatprep.mubr.msk.bf16.mxu0 %vm3353_vm0, %v3352_v1  ;;  %v2146_v16 = vrot.slane %v3341_v12, 3 }
  0x79   : > { %3067 = vmatprep.mubr.msk.bf16.mxu1 %vm3353_vm0, %v3352_v1  ;;  %3120 = vmatpush3.bf16.msra.mxu1 %v3298_v21  ;;  %v1880_v21 = vor.u32 %v1879_v15, %v1876_v14  ;;  %v1651_v25 = vsel %vm1425_vm4, %v1649_v19, %v1650_v20 }
  0x7a   : > { %3121 = vmatprep.subr.bf16.mxu1 %v3352_v1 }
  0x7b   : > { %3086 = vmatpush3.bf16.msra.mxu0 %v3295_v23  ;;  %v1891_v23 = vshrl.u32 %v3325_v18, 16  ;;  %v3342_v18 = vld [vmem:[%s3431_s10 + $0x18] sm:$0xff]  }
  0x7c   : > { %3087 = vmatprep.subr.bf16.mxu0 %v3352_v1 }
  0x7d   : > { %3122 = vmatpush3.bf16.msra.mxu1 %v3300_v27  ;;  %v3324_v27 = vld [vmem:[%s3431_s10 + $0x18] sm:$0xff]   ;;  %v1893_v29 = vrot.slane %v1891_v23, 2 }
  0x7e   : > { %3032 = vmatmul.mubr.bf16.gmra.mrb[44].mxu0 %v1185_v30  ;;  %3123 = vmatprep.subr.bf16.mxu1 %v3352_v1  ;;  %v1896_v30 = vrot.slane %v1894_v24, 3 }
  0x7f   : > { %3068 = vmatmul.mubr.bf16.gmra.mrb[44].mxu1 %v1430_v33  ;;  %3088 = vmatpush3.bf16.msra.mxu0 %v3299_v28  ;;  %v1889_v28 = vsel %vm1872_vm5, %v1880_v21, %v1888_v22  ;;  %v1652_v33 = vrot.slane %v3324_v27, 2  ;;  %v2142_v21 = vrot.slane %v3342_v18, 3 }
  0x80   : > { %3035 = vmatprep.mubr.msk.bf16.mxu0 %vm3353_vm0, %v3352_v1  ;;  %3071 = vmatprep.mubr.msk.bf16.mxu1 %vm3353_vm0, %v3352_v1  ;;  %v1897_v34 = vor.u32 %v1896_v30, %v1893_v29 }
  0x81   : > { %3089 = vmatprep.subr.bf16.mxu0 %v3352_v1  ;;  %3124 = vmatpush3.bf16.msra.mxu1 %v3304_v35  ;;  %v1900_v35 = vshrl.u32 %v3328_v31, 16 }
  0x82   : > { %3125 = vmatprep.subr.bf16.mxu1 %v3352_v1  ;;  %v1898_v40 = vsel %vm1872_vm5, %v1888_v22, %v1897_v34 }
  0x83   : > { %3090 = vmatpush3.bf16.msra.mxu0 %v3303_v37  ;;  %v1653_v37 = vsel %vm1425_vm4, %v1650_v20, %v1652_v33  ;;  %v3343_v20 = vld [vmem:[%s3431_s10 + $0x30] ss:$0 sps:$4 sm:$0x77]  }
  0x84   : > { %3091 = vmatprep.subr.bf16.mxu0 %v3352_v1  ;;  %v2148_v22 = vrot.slane %v3343_v20, 3 }
  0x85   : > { %3126 = vmatpush3.bf16.msra.mxu1 %v3306_v41  ;;  %v1902_v41 = vrot.slane %v1900_v35, 2 }
  0x86   : > { %3036 = vmatmul.mubr.bf16.gmra.mrb[48].mxu0 %v1194_v44  ;;  %3127 = vmatprep.subr.bf16.mxu1 %v3352_v1  ;;  %v1654_v44 = vrot.slane %v3327_v39, 2  ;;  %v2149_v24 = vsel %vm2138_vm6, %v2146_v16, %v2148_v22 }
  0x87   : > { %3072 = vmatmul.mubr.bf16.gmra.mrb[48].mxu1 %v1432_v47  ;;  %3092 = vmatpush3.bf16.msra.mxu0 %v3305_v42  ;;  %v1905_v42 = vrot.slane %v1903_v36, 3  ;;  %v1909_v47 = vshrl.u32 %v3332_v43, 16 }
  0x88   : > { %3039 = vmatprep.mubr.msk.bf16.mxu0 %vm3353_vm0, %v3352_v1  ;;  %3075 = vmatprep.mubr.msk.bf16.mxu1 %vm3353_vm0, %v3352_v1 }
  0x89   : > { %3093 = vmatprep.subr.bf16.mxu0 %v3352_v1  ;;  %3128 = vmatpush3.bf16.msra.mxu1 %v3309_v49  ;;  %v1906_v46 = vor.u32 %v1905_v42, %v1902_v41  ;;  %v1655_v49 = vsel %vm1425_vm4, %v1652_v33, %v1654_v44  ;;  %v1911_v53 = vrot.slane %v1909_v47, 2 }
  0x8a   : > { %3129 = vmatprep.subr.bf16.mxu1 %v3352_v1 }
  0x8b   : > { %3094 = vmatpush3.bf16.msra.mxu0 %v3310_v51  ;;  %v3331_v51 = vld [vmem:[%s3431_s10 + $0x28] sm:$0xff]   ;;  %v1907_v52 = vsel %vm1872_vm5, %v1897_v34, %v1906_v46  ;;  %v1915_v58 = vor.u32 %v1914_v54, %v1911_v53 }
  0x8c   : > { %3095 = vmatprep.subr.bf16.mxu0 %v3352_v1 }
  0x8d   : > { %3130 = vmatpush3.bf16.msra.mxu1 %v3311_v55  ;;  %v3336_v55 = vld [vmem:[%s3431_s10 + $0x30] ss:$0 sps:$4 sm:$0x77]   ;;  %v1916_v63 = vsel %vm1872_vm5, %v1906_v46, %v1915_v58 }
  0x8e   : > { %3040 = vmatmul.mubr.bf16.gmra.mrb[52].mxu0 %v1203_v56  ;;  %3131 = vmatprep.subr.bf16.mxu1 %v3352_v1  ;;  %v1656_v56 = vrot.slane %v3331_v51, 2  ;;  %v1918_v59 = vshrl.u32 %v3336_v55, 16 }
  0x8f   : > { %3076 = vmatmul.mubr.bf16.gmra.mrb[52].mxu1 %v1434_v60  ;;  %3043 = vmatprep.mubr.msk.bf16.mxu0 %vm3353_vm0, %v3352_v1  ;;  %v1921_v60 = vshll.u32 %v3336_v55, 16 }
  0x90   : > { %3079 = vmatprep.mubr.msk.bf16.mxu1 %vm3353_vm0, %v3352_v1  ;;  %3096 = vmatpush3.bf16.msra.mxu0 %v3312_v61  ;;  %v1657_v61 = vsel %vm1425_vm4, %v1654_v44, %v1656_v56  ;;  %v1920_v2 = vrot.slane %v1918_v59, 2 }
  0x91   : > { %3132 = vmatpush3.bf16.msra.mxu1 %v3315_v0  ;;  %3097 = vmatprep.subr.bf16.mxu0 %v3352_v1  ;;  %v3334_v0 = vld [vmem:[%s3899_s1 + $0x230] sm:$0xff]   ;;  %v1923_v3 = vrot.slane %v1921_v60, 3 }
  0x92   : > { %3133 = vmatprep.subr.bf16.mxu1 %v3352_v1 }
  0x93   : > { %v1924_v5 = vor.u32 %v1923_v3, %v1920_v2 }
  0x94   : > { %3098 = vmatpush3.bf16.msra.mxu0 %v3316_v4  ;;  %v1658_v4 = vrot.slane %v3335_v62, 2 }
  0x95   : > { %3134 = vmatpush3.bf16.msra.mxu1 %v3317_v9  ;;  %3155 = vmatprep.subr.bf16.mxu0 %v3352_v1  ;;  %v3339_v9 = vld [vmem:[%s3431_s10 + $0x10] sm:$0xff]  }
  0x96   : > { %3044 = vmatmul.mubr.bf16.gmra.mrb[56].mxu0 %v1212_v10  ;;  %3191 = vmatprep.subr.bf16.mxu1 %v3352_v1  ;;  %v1659_v7 = vsel %vm1425_vm4, %v1656_v56, %v1658_v4  ;;  %v1925_v10 = vsel %vm1872_vm5, %v1915_v58, %v1924_v5  ;;  %v2140_v14 = vrot.slane %v3339_v9, 3 }
  0x97   : > { %3080 = vmatmul.mubr.bf16.gmra.mrb[56].mxu1 %v1436_v11  ;;  %3099 = vmatprep.mubr.msk.bf16.mxu0 %vm3353_vm0, %v3352_v1  ;;  %v3340_v11 = vld [vmem:[%s3431_s10 + $0x20] sm:$0xff]  }
  0x98   : > { %3135 = vmatprep.mubr.msk.bf16.mxu1 %vm3353_vm0, %v3352_v1  ;;  %v2144_v15 = vrot.slane %v3340_v11, 3  ;;  %v2141_v17 = vsel %vm2138_vm6, %v2139_v13, %v2140_v14  ;;  %v2143_v23 = vsel %vm2138_vm6, %v2140_v14, %v2142_v21 }
  0x9a   : > { %v2147_v19 = vsel %vm2138_vm6, %v2144_v15, %v2146_v16 }
  0x9e   : > { %3100 = vmatmul.mubr.bf16.vlgmr.msra.gmra.mrb[60].mxu0 %v1651_v25  ;;  %v2145_v25 = vsel %vm2138_vm6, %v2142_v21, %v2144_v15 }
  0x9f   : > { %3136 = vmatmul.mubr.bf16.vlgmr.msra.gmra.mrb[60].mxu1 %v1889_v28  ;;  %3156 = vmatpush3.bf16.msra.mxu0 %v3322_v26 }
  0xa0   : > { %3157 = vmatprep.subr.bf16.mxu0 %v3352_v1  ;;  %3103 = vmatprep.mubr.msk.bf16.mxu0 %vm3353_vm0, %v3352_v1 }
  0xa1   : > { %3139 = vmatprep.mubr.msk.bf16.mxu1 %vm3353_vm0, %v3352_v1  ;;  %3199 = vmatpush3.bf16.msra.mxu1 %v3322_v26 }
  0xa2   : > { %3192 = vmatprep.subr.bf16.mxu1 %v3352_v1 }
  0xa3   : > { %3158 = vmatpush3.bf16.msra.mxu0 %v3323_v32 }
  0xa4   : > { %3159 = vmatprep.subr.bf16.mxu0 %v3352_v1 }
  0xa5   : > { %3200 = vmatpush3.bf16.msra.mxu1 %v3323_v32 }
  0xa6   : > { %3104 = vmatmul.mubr.bf16.gmra.mrb[64].mxu0 %v1653_v37  ;;  %3193 = vmatprep.subr.bf16.mxu1 %v3352_v1 }
  0xa7   : > { %3140 = vmatmul.mubr.bf16.gmra.mrb[64].mxu1 %v1898_v40  ;;  %3160 = vmatpush3.bf16.msra.mxu0 %v3326_v38 }
  0xa8   : > { %3107 = vmatprep.mubr.msk.bf16.mxu0 %vm3353_vm0, %v3352_v1  ;;  %3143 = vmatprep.mubr.msk.bf16.mxu1 %vm3353_vm0, %v3352_v1 }
  0xa9   : > { %3161 = vmatprep.subr.bf16.mxu0 %v3352_v1  ;;  %3201 = vmatpush3.bf16.msra.mxu1 %v3326_v38 }
  0xaa   : > { %3194 = vmatprep.subr.bf16.mxu1 %v3352_v1 }
  0xab   : > { %3162 = vmatpush3.bf16.msra.mxu0 %v3329_v45 }
  0xac   : > { %3163 = vmatprep.subr.bf16.mxu0 %v3352_v1 }
  0xad   : > { %3202 = vmatpush3.bf16.msra.mxu1 %v3329_v45 }
  0xae   : > { %3108 = vmatmul.mubr.bf16.gmra.mrb[68].mxu0 %v1655_v49  ;;  %3195 = vmatprep.subr.bf16.mxu1 %v3352_v1 }
  0xaf   : > { %3144 = vmatmul.mubr.bf16.gmra.mrb[68].mxu1 %v1907_v52  ;;  %3164 = vmatpush3.bf16.msra.mxu0 %v3330_v50 }
  0xb0   : > { %3111 = vmatprep.mubr.msk.bf16.mxu0 %vm3353_vm0, %v3352_v1  ;;  %3147 = vmatprep.mubr.msk.bf16.mxu1 %vm3353_vm0, %v3352_v1 }
  0xb1   : > { %3203 = vmatpush3.bf16.msra.mxu1 %v3330_v50  ;;  %3165 = vmatprep.subr.bf16.mxu0 %v3352_v1 }
  0xb2   : > { %3196 = vmatprep.subr.bf16.mxu1 %v3352_v1 }
  0xb3   : > { %3166 = vmatpush3.bf16.msra.mxu0 %v3333_v57 }
  0xb4   : > { %3167 = vmatprep.subr.bf16.mxu0 %v3352_v1 }
  0xb5   : > { %3204 = vmatpush3.bf16.msra.mxu1 %v3333_v57 }
  0xb6   : > { %3112 = vmatmul.mubr.bf16.gmra.mrb[72].mxu0 %v1657_v61  ;;  %3197 = vmatprep.subr.bf16.mxu1 %v3352_v1 }
  0xb7   : > { %3148 = vmatmul.mubr.bf16.gmra.mrb[72].mxu1 %v1916_v63  ;;  %3115 = vmatprep.mubr.msk.bf16.mxu0 %vm3353_vm0, %v3352_v1 }
  0xb8   : > { %3151 = vmatprep.mubr.msk.bf16.mxu1 %vm3353_vm0, %v3352_v1  ;;  %3168 = vmatpush3.bf16.msra.mxu0 %v3334_v0 }
  0xb9   : > { %3205 = vmatpush3.bf16.msra.mxu1 %v3334_v0  ;;  %3169 = vmatprep.subr.bf16.mxu0 %v3352_v1 }
  0xba   : > { %3198 = vmatprep.subr.bf16.mxu1 %v3352_v1 }
  0xbc   : > { %3170 = vmatpush3.bf16.msra.mxu0 %v3337_v6 }
  0xbd   : > { %3206 = vmatpush3.bf16.msra.mxu1 %v3337_v6 }
  0xbe   : > { %3116 = vmatmul.mubr.bf16.gmra.mrb[76].mxu0 %v1659_v7 }
  0xbf   : > { %3152 = vmatmul.mubr.bf16.gmra.mrb[76].mxu1 %v1925_v10  ;;  %3171 = vmatprep.mubr.msk.bf16.mxu0 %vm3353_vm0, %v3352_v1 }
  0xc0   : > { %3183 = vmatprep.mubr.msk.bf16.mxu1 %vm3353_vm0, %v3352_v1 }
  0xc6   : > { %3172 = vmatmul.mubr.bf16.vlgmr.msra.gmra.mrb[80].mxu0 %v2141_v17 }
  0xc7   : > { %3184 = vmatmul.mubr.bf16.vlgmr.msra.gmra.mrb[80].mxu1 %v2147_v19  ;;  %3175 = vmatprep.mubr.msk.bf16.mxu0 %vm3353_vm0, %v3352_v1 }
  0xc8   : > { %3187 = vmatprep.mubr.msk.bf16.mxu1 %vm3353_vm0, %v3352_v1 }
  0xce   : > { %3176 = vmatmul.mubr.bf16.gmra.mrb[84].mxu0 %v2143_v23 }
  0xcf   : > { %3188 = vmatmul.mubr.bf16.gmra.mrb[84].mxu1 %v2149_v24  ;;  %3179 = vmatprep.mubr.msk.bf16.mxu0 %vm3353_vm0, %v3352_v1 }
  0xd6   : > { %3180 = vmatmul.mubr.bf16.gmra.mrb[88].mxu0 %v2145_v25 }
  0xf9   : > { %v330_v26 = vpop.f32.mrb[0].mxu0 }
  0xfa   : > { %v587_v27 = vpop.f32.mrb[0].mxu1  ;;  %v2885_v28 = vpop.f32.mrb[1].mxu0 }
  0xfb   : > { %v626_v29 = vadd.f32 %v587_v27, %v330_v26  ;;  %v2921_v30 = vpop.f32.mrb[1].mxu1  ;;  %v333_v31 = vpop.f32.mrb[2].mxu0 }
  0xfc   : > { %v590_v32 = vpop.f32.mrb[2].mxu1  ;;  %v2886_v33 = vpop.f32.mrb[3].mxu0 }
  0xfd   : > { %v627_v34 = vadd.f32 %v590_v32, %v333_v31  ;;  %v2922_v35 = vpop.f32.mrb[3].mxu1 }
 0x101   : > { %v338_v36 = vpop.f32.mrb[4].mxu0 }
 0x102   : > { %v595_v37 = vpop.f32.mrb[4].mxu1  ;;  %v2889_v38 = vpop.f32.mrb[5].mxu0 }
 0x103   : > { %v628_v39 = vadd.f32 %v595_v37, %v338_v36  ;;  %v2925_v40 = vpop.f32.mrb[5].mxu1  ;;  %v341_v41 = vpop.f32.mrb[6].mxu0 }
 0x104   : > { %v598_v1 = vpop.f32.mrb[6].mxu1  ;;  %v2890_v42 = vpop.f32.mrb[7].mxu0 }
 0x105   : > { %v629_v43 = vadd.f32 %v598_v1, %v341_v41  ;;  %v2926_v44 = vpop.f32.mrb[7].mxu1 }
 0x109   : > { %v346_v45 = vpop.f32.mrb[8].mxu0 }
 0x10a   : > { %v603_v46 = vpop.f32.mrb[8].mxu1  ;;  %v2893_v47 = vpop.f32.mrb[9].mxu0 }
 0x10b   : > { %v630_v48 = vadd.f32 %v603_v46, %v346_v45  ;;  %v2929_v49 = vpop.f32.mrb[9].mxu1  ;;  %v349_v50 = vpop.f32.mrb[10].mxu0 }
 0x10c   : > { %v606_v51 = vpop.f32.mrb[10].mxu1  ;;  %v2894_v52 = vpop.f32.mrb[11].mxu0 }
 0x10d   : > { %v631_v53 = vadd.f32 %v606_v51, %v349_v50  ;;  %v2930_v54 = vpop.f32.mrb[11].mxu1 }
 0x111   : > { %v354_v55 = vpop.f32.mrb[12].mxu0 }
 0x112   : > { %v611_v56 = vpop.f32.mrb[12].mxu1  ;;  %v2897_v57 = vpop.f32.mrb[13].mxu0 }
 0x113   : > { %v632_v58 = vadd.f32 %v611_v56, %v354_v55  ;;  %v2933_v59 = vpop.f32.mrb[13].mxu1  ;;  %v357_v60 = vpop.f32.mrb[14].mxu0 }
 0x114   : > { %v614_v61 = vpop.f32.mrb[14].mxu1  ;;  %v2898_v62 = vpop.f32.mrb[15].mxu0 }
 0x115   : > { %v633_v63 = vadd.f32 %v614_v61, %v357_v60  ;;  %v2934_v0 = vpop.f32.mrb[15].mxu1 }
 0x119   : > { %v362_v2 = vpop.f32.mrb[16].mxu0 }
 0x11a   : > { %v619_v3 = vpop.f32.mrb[16].mxu1  ;;  %v2901_v4 = vpop.f32.mrb[17].mxu0 }
 0x11b   : > { %v634_v5 = vadd.f32 %v619_v3, %v362_v2  ;;  %v2937_v6 = vpop.f32.mrb[17].mxu1  ;;  %v365_v7 = vpop.f32.mrb[18].mxu0 }
 0x11c   : > { %v622_v8 = vpop.f32.mrb[18].mxu1  ;;  %v2902_v9 = vpop.f32.mrb[19].mxu0 }
 0x11d   : > { %v635_v10 = vadd.f32 %v622_v8, %v365_v7  ;;  %v2938_v11 = vpop.f32.mrb[19].mxu1 }
 0x121   : > { %v811_v12 = vpop.f32.mrb[20].mxu0 }
 0x122   : > { %v850_v13 = vadd.f32 %v811_v12, %v626_v29  ;;  %v2957_v14 = vpop.f32.mrb[21].mxu0  ;;  %v1034_v15 = vpop.f32.mrb[20].mxu1 }
 0x123   : > { %v814_v16 = vpop.f32.mrb[22].mxu0  ;;  %v2993_v17 = vpop.f32.mrb[21].mxu1 }
 0x124   : > { %v851_v18 = vadd.f32 %v814_v16, %v627_v34  ;;  %v1073_v19 = vadd.f32 %v1034_v15, %v850_v13  ;;  %v2958_v20 = vpop.f32.mrb[23].mxu0  ;;  %v1037_v21 = vpop.f32.mrb[22].mxu1 }
 0x125   : > { %v2994_v22 = vpop.f32.mrb[23].mxu1 }
 0x126   : > { %v1074_v23 = vadd.f32 %v1037_v21, %v851_v18 }
 0x129   : > { %v819_v24 = vpop.f32.mrb[24].mxu0 }
 0x12a   : > { %v852_v25 = vadd.f32 %v819_v24, %v628_v39  ;;  %v2961_v26 = vpop.f32.mrb[25].mxu0  ;;  %v1042_v27 = vpop.f32.mrb[24].mxu1 }
 0x12b   : > { %v822_v28 = vpop.f32.mrb[26].mxu0  ;;  %v2997_v30 = vpop.f32.mrb[25].mxu1 }
 0x12c   : > { %v853_v31 = vadd.f32 %v822_v28, %v629_v43  ;;  %v1075_v32 = vadd.f32 %v1042_v27, %v852_v25  ;;  %v2962_v33 = vpop.f32.mrb[27].mxu0  ;;  %v1045_v29 = vpop.f32.mrb[26].mxu1 }
 0x12d   : > { %v2998_v35 = vpop.f32.mrb[27].mxu1 }
 0x12e   : > { %v1076_v36 = vadd.f32 %v1045_v29, %v853_v31 }
 0x131   : > { %v827_v37 = vpop.f32.mrb[28].mxu0 }
 0x132   : > { %v854_v38 = vadd.f32 %v827_v37, %v630_v48  ;;  %v2965_v34 = vpop.f32.mrb[29].mxu0  ;;  %v1050_v40 = vpop.f32.mrb[28].mxu1 }
 0x133   : > { %v830_v41 = vpop.f32.mrb[30].mxu0  ;;  %v3001_v1 = vpop.f32.mrb[29].mxu1 }
 0x134   : > { %v855_v42 = vadd.f32 %v830_v41, %v631_v53  ;;  %v1077_v44 = vadd.f32 %v1050_v40, %v854_v38  ;;  %v2966_v45 = vpop.f32.mrb[31].mxu0  ;;  %v1053_v39 = vpop.f32.mrb[30].mxu1 }
 0x135   : > { %v3002_v46 = vpop.f32.mrb[31].mxu1 }
 0x136   : > { %v1078_v47 = vadd.f32 %v1053_v39, %v855_v42 }
 0x139   : > { %v835_v49 = vpop.f32.mrb[32].mxu0 }
 0x13a   : > { %v856_v50 = vadd.f32 %v835_v49, %v632_v58  ;;  %v2969_v43 = vpop.f32.mrb[33].mxu0  ;;  %v1058_v51 = vpop.f32.mrb[32].mxu1 }
 0x13b   : > { %v838_v52 = vpop.f32.mrb[34].mxu0  ;;  %v3005_v54 = vpop.f32.mrb[33].mxu1 }
 0x13c   : > { %v857_v55 = vadd.f32 %v838_v52, %v633_v63  ;;  %v1079_v56 = vadd.f32 %v1058_v51, %v856_v50  ;;  %v2970_v57 = vpop.f32.mrb[35].mxu0  ;;  %v1061_v48 = vpop.f32.mrb[34].mxu1 }
 0x13d   : > { %v3006_v59 = vpop.f32.mrb[35].mxu1 }
 0x13e   : > { %v1080_v60 = vadd.f32 %v1061_v48, %v857_v55 }
 0x141   : > { %v843_v61 = vpop.f32.mrb[36].mxu0 }
 0x142   : > { %v858_v62 = vadd.f32 %v843_v61, %v634_v5  ;;  %v2973_v53 = vpop.f32.mrb[37].mxu0  ;;  %v1066_v0 = vpop.f32.mrb[36].mxu1 }
 0x143   : > { %v846_v2 = vpop.f32.mrb[38].mxu0  ;;  %v3009_v3 = vpop.f32.mrb[37].mxu1 }
 0x144   : > { %v859_v4 = vadd.f32 %v846_v2, %v635_v10  ;;  %v1081_v6 = vadd.f32 %v1066_v0, %v858_v62  ;;  %v2974_v7 = vpop.f32.mrb[39].mxu0  ;;  %v1069_v58 = vpop.f32.mrb[38].mxu1 }
 0x145   : > { %v3010_v8 = vpop.f32.mrb[39].mxu1 }
 0x146   : > { %v1082_v9 = vadd.f32 %v1069_v58, %v859_v4 }
 0x149   : > { %v1300_v11 = vpop.f32.mrb[40].mxu0 }
 0x14a   : > { %v1339_v12 = vadd.f32 %v1300_v11, %v1073_v19  ;;  %v3029_v63 = vpop.f32.mrb[41].mxu0  ;;  %v1524_v13 = vpop.f32.mrb[40].mxu1 }
 0x14b   : > { %v1303_v14 = vpop.f32.mrb[42].mxu0  ;;  %v3065_v15 = vpop.f32.mrb[41].mxu1 }
 0x14c   : > { %v1340_v16 = vadd.f32 %v1303_v14, %v1074_v23  ;;  %v1563_v17 = vadd.f32 %v1524_v13, %v1339_v12  ;;  %v3030_v18 = vpop.f32.mrb[43].mxu0  ;;  %v1527_v5 = vpop.f32.mrb[42].mxu1 }
 0x14d   : > { %v3066_v20 = vpop.f32.mrb[43].mxu1 }
 0x14e   : > { %v1564_v21 = vadd.f32 %v1527_v5, %v1340_v16 }
 0x151   : > { %v1308_v22 = vpop.f32.mrb[44].mxu0 }
 0x152   : > { %v1341_v24 = vadd.f32 %v1308_v22, %v1075_v32  ;;  %v3033_v10 = vpop.f32.mrb[45].mxu0  ;;  %v1532_v25 = vpop.f32.mrb[44].mxu1 }
 0x153   : > { %v1311_v26 = vpop.f32.mrb[46].mxu0  ;;  %v3069_v27 = vpop.f32.mrb[45].mxu1 }
 0x154   : > { %v1342_v28 = vadd.f32 %v1311_v26, %v1076_v36  ;;  %v1565_v30 = vadd.f32 %v1532_v25, %v1341_v24  ;;  %v3034_v31 = vpop.f32.mrb[47].mxu0  ;;  %v1535_v19 = vpop.f32.mrb[46].mxu1 }
 0x155   : > { %v3070_v33 = vpop.f32.mrb[47].mxu1 }
 0x156   : > { %v1566_v29 = vadd.f32 %v1535_v19, %v1342_v28 }
 0x159   : > { %v1316_v35 = vpop.f32.mrb[48].mxu0 }
 0x15a   : > { %v1343_v37 = vadd.f32 %v1316_v35, %v1077_v44  ;;  %v3037_v23 = vpop.f32.mrb[49].mxu0  ;;  %v1540_v38 = vpop.f32.mrb[48].mxu1 }
 0x15b   : > { %v1319_v34 = vpop.f32.mrb[50].mxu0  ;;  %v3073_v40 = vpop.f32.mrb[49].mxu1 }
 0x15c   : > { %v1344_v41 = vadd.f32 %v1319_v34, %v1078_v47  ;;  %v1567_v1 = vadd.f32 %v1540_v38, %v1343_v37  ;;  %v3038_v42 = vpop.f32.mrb[51].mxu0  ;;  %v1543_v32 = vpop.f32.mrb[50].mxu1 }
 0x15d   : > { %v3074_v45 = vpop.f32.mrb[51].mxu1 }
 0x15e   : > { %v1568_v39 = vadd.f32 %v1543_v32, %v1344_v41 }
 0x161   : > { %v1324_v46 = vpop.f32.mrb[52].mxu0 }
 0x162   : > { %v1345_v49 = vadd.f32 %v1324_v46, %v1079_v56  ;;  %v3041_v36 = vpop.f32.mrb[53].mxu0  ;;  %v1548_v50 = vpop.f32.mrb[52].mxu1 }
 0x163   : > { %v1327_v43 = vpop.f32.mrb[54].mxu0  ;;  %v3077_v51 = vpop.f32.mrb[53].mxu1 }
 0x164   : > { %v1346_v52 = vadd.f32 %v1327_v43, %v1080_v60  ;;  %v1569_v54 = vadd.f32 %v1548_v50, %v1345_v49  ;;  %v3042_v55 = vpop.f32.mrb[55].mxu0  ;;  %v1551_v44 = vpop.f32.mrb[54].mxu1 }
 0x165   : > { %v3078_v57 = vpop.f32.mrb[55].mxu1 }
 0x166   : > { %v1570_v48 = vadd.f32 %v1551_v44, %v1346_v52 }
 0x169   : > { %v1332_v59 = vpop.f32.mrb[56].mxu0 }
 0x16a   : > { %v1347_v61 = vadd.f32 %v1332_v59, %v1081_v6  ;;  %v3045_v47 = vpop.f32.mrb[57].mxu0  ;;  %v1556_v62 = vpop.f32.mrb[56].mxu1 }
 0x16b   : > { %v1335_v53 = vpop.f32.mrb[58].mxu0  ;;  %v3081_v0 = vpop.f32.mrb[57].mxu1 }
 0x16c   : > { %v1348_v2 = vadd.f32 %v1335_v53, %v1082_v9  ;;  %v1571_v3 = vadd.f32 %v1556_v62, %v1347_v61  ;;  %v3046_v4 = vpop.f32.mrb[59].mxu0  ;;  %v1559_v56 = vpop.f32.mrb[58].mxu1 }
 0x16d   : > { %v3082_v7 = vpop.f32.mrb[59].mxu1 }
 0x16e   : > { %v1572_v58 = vadd.f32 %v1559_v56, %v1348_v2 }
 0x171   : > { %v1747_v8 = vpop.f32.mrb[60].mxu0 }
 0x172   : > { %v1786_v11 = vadd.f32 %v1747_v8, %v1563_v17  ;;  %v3101_v60 = vpop.f32.mrb[61].mxu0  ;;  %v2013_v12 = vpop.f32.mrb[60].mxu1 }
 0x173   : > { %v1750_v63 = vpop.f32.mrb[62].mxu0  ;;  %v3137_v13 = vpop.f32.mrb[61].mxu1 }
 0x174   : > { %v1787_v14 = vadd.f32 %v1750_v63, %v1564_v21  ;;  %v2052_v15 = vadd.f32 %v2013_v12, %v1786_v11  ;;  %v3102_v16 = vpop.f32.mrb[63].mxu0  ;;  %v2016_v6 = vpop.f32.mrb[62].mxu1 }
 0x175   : > { %v3138_v18 = vpop.f32.mrb[63].mxu1 }
 0x176   : > { %v2053_v5 = vadd.f32 %v2016_v6, %v1787_v14 }
 0x179   : > { %v1755_v20 = vpop.f32.mrb[64].mxu0 }
 0x17a   : > { %v1788_v22 = vadd.f32 %v1755_v20, %v1565_v30  ;;  %v3105_v9 = vpop.f32.mrb[65].mxu0  ;;  %v2021_v24 = vpop.f32.mrb[64].mxu1 }
 0x17b   : > { %v1758_v10 = vpop.f32.mrb[66].mxu0  ;;  %v3141_v25 = vpop.f32.mrb[65].mxu1 }
 0x17c   : > { %v1789_v26 = vadd.f32 %v1758_v10, %v1566_v29  ;;  %v3869_v27 = vadd.f32 %v2021_v24, %v1788_v22  ;;  %v3106_v17 = vpop.f32.mrb[67].mxu0  ;;  %v2024_v28 = vpop.f32.mrb[66].mxu1 }
 0x17d   : > { %v3142_v31 = vpop.f32.mrb[67].mxu1 }
 0x17e   : > { %v3871_v19 = vadd.f32 %v2024_v28, %v1789_v26 }
 0x181   : > { %v1763_v21 = vpop.f32.mrb[68].mxu0 }
 0x182   : > { %v1790_v33 = vadd.f32 %v1763_v21, %v1567_v1  ;;  %v3109_v35 = vpop.f32.mrb[69].mxu0  ;;  %v2029_v37 = vpop.f32.mrb[68].mxu1 }
 0x183   : > { %v1766_v23 = vpop.f32.mrb[70].mxu0  ;;  %v3145_v38 = vpop.f32.mrb[69].mxu1 }
 0x184   : > { %v1791_v34 = vadd.f32 %v1766_v23, %v1568_v39  ;;  %v3873_v30 = vadd.f32 %v2029_v37, %v1790_v33  ;;  %v3110_v40 = vpop.f32.mrb[71].mxu0  ;;  %v2032_v41 = vpop.f32.mrb[70].mxu1 }
 0x185   : > { %v3146_v42 = vpop.f32.mrb[71].mxu1 }
 0x186   : > { %v3875_v29 = vadd.f32 %v2032_v41, %v1791_v34 }
 0x189   : > { %v1771_v32 = vpop.f32.mrb[72].mxu0 }
 0x18a   : > { %v1792_v45 = vadd.f32 %v1771_v32, %v1569_v54  ;;  %v3113_v46 = vpop.f32.mrb[73].mxu0  ;;  %v2037_v49 = vpop.f32.mrb[72].mxu1 }
 0x18b   : > { %v1774_v36 = vpop.f32.mrb[74].mxu0  ;;  %v3149_v50 = vpop.f32.mrb[73].mxu1 }
 0x18c   : > { %v1793_v43 = vadd.f32 %v1774_v36, %v1570_v48  ;;  %v2058_v1 = vadd.f32 %v2037_v49, %v1792_v45  ;;  %v3114_v51 = vpop.f32.mrb[75].mxu0  ;;  %v2040_v52 = vpop.f32.mrb[74].mxu1  ;;  %v2698_v48 = vld [vmem:[%s3900_s2] ss:$0 sm:$0xff] }
 0x18d   : > { %v3150_v55 = vpop.f32.mrb[75].mxu1 }
 0x18e   : > { %v2059_v44 = vadd.f32 %v2040_v52, %v1793_v43 }
 0x191   : > { %v1779_v39 = vpop.f32.mrb[76].mxu0 }
 0x192   : > { %v1794_v57 = vadd.f32 %v1779_v39, %v1571_v3  ;;  %v3117_v59 = vpop.f32.mrb[77].mxu0  ;;  %v2045_v61 = vpop.f32.mrb[76].mxu1 }
 0x193   : > { %v1782_v47 = vpop.f32.mrb[78].mxu0  ;;  %v3153_v62 = vpop.f32.mrb[77].mxu1 }
 0x194   : > { %v1795_v53 = vadd.f32 %v1782_v47, %v1572_v58  ;;  %v2060_v0 = vadd.f32 %v2045_v61, %v1794_v57  ;;  %v3118_v2 = vpop.f32.mrb[79].mxu0  ;;  %v2048_v54 = vpop.f32.mrb[78].mxu1 }
 0x195   : > { %v3154_v4 = vpop.f32.mrb[79].mxu1 }
 0x196   : > { %v2061_v56 = vadd.f32 %v2048_v54, %v1795_v53 }
 0x199   : > { %v2237_v7 = vpop.f32.mrb[80].mxu0 }
 0x19a   : > { %v2276_v8 = vadd.f32 %v2237_v7, %v2052_v15  ;;  %v2261_v11 = vpop.f32.mrb[80].mxu1  ;;  %v3173_v60 = vpop.f32.mrb[81].mxu0 }
 0x19b   : > { %v2282_v3 = vadd.f32 %v2261_v11, %v2058_v1  ;;  %v3185_v12 = vpop.f32.mrb[81].mxu1  ;;  %v2240_v63 = vpop.f32.mrb[82].mxu0 }
 0x19c   : > { %v2313_v13 = vadd.f32 %v2698_v48, %v2276_v8  ;;  %v2277_v14 = vadd.f32 %v2240_v63, %v2053_v5  ;;  %v2264_v58 = vpop.f32.mrb[82].mxu1  ;;  %v3174_v16 = vpop.f32.mrb[83].mxu0 }
 0x19d   : > { %v2319_v6 = vadd.f32 %v2698_v48, %v2282_v3  ;;  %v2283_v18 = vadd.f32 %v2264_v58, %v2059_v44  ;;  %v3186_v20 = vpop.f32.mrb[83].mxu1 }
 0x19e   : > { %v2314_v22 = vadd.f32 %v2698_v48, %v2277_v14  ;;  %v2323_v24 = vmax.f32 %v2313_v13, 0.0 }
 0x19f   : > { %v2320_v9 = vadd.f32 %v2698_v48, %v2283_v18  ;;  %v2329_v25 = vmax.f32 %v2319_v6, 0.0 }
 0x1a0   : > { %v2324_v10 = vmax.f32 %v2314_v22, 0.0 }
 0x1a1   : > { %v2330_v15 = vmax.f32 %v2320_v9, 0.0  ;;  %v2245_v5 = vpop.f32.mrb[84].mxu0 }
 0x1a2   : > { %v2724_v26 = vpack.c.bf16 %v2324_v10, %v2323_v24  ;;  %v2278_v17 = vadd.f32 %v2245_v5, %v3869_v27  ;;  %v2269_v28 = vpop.f32.mrb[84].mxu1  ;;  %v3177_v31 = vpop.f32.mrb[85].mxu0 }
 0x1a3   : > { %v2739_v21 = vpack.c.bf16 %v2330_v15, %v2329_v25  ;;  %v2284_v33 = vadd.f32 %v2269_v28, %v2060_v0  ;;  %v3189_v35 = vpop.f32.mrb[85].mxu1  ;;  %v2248_v37 = vpop.f32.mrb[86].mxu0 }
 0x1a4   : > { %2725 = vst [vmem:[%s3884_s21] sm:$0xff] %v2724_v26   ;;  %v2315_v23 = vadd.f32 %v2698_v48, %v2278_v17  ;;  %v2279_v38 = vadd.f32 %v2248_v37, %v3871_v19  ;;  %v2272_v34 = vpop.f32.mrb[86].mxu1  ;;  %v3178_v40 = vpop.f32.mrb[87].mxu0 }
 0x1a5   : > { %2748 = vst [vmem:[%s3884_s21 + $0x18] sm:$0xff] %v2739_v21   ;;  %v2321_v41 = vadd.f32 %v2698_v48, %v2284_v33  ;;  %v2285_v42 = vadd.f32 %v2272_v34, %v2061_v56  ;;  %v3190_v32 = vpop.f32.mrb[87].mxu1 }
 0x1a6   : > { %v2316_v45 = vadd.f32 %v2698_v48, %v2279_v38  ;;  %v2325_v46 = vmax.f32 %v2315_v23, 0.0 }
 0x1a7   : > { %v2322_v27 = vadd.f32 %v2698_v48, %v2285_v42  ;;  %v2331_v36 = vmax.f32 %v2321_v41, 0.0 }
 0x1a8   : > { %v2326_v49 = vmax.f32 %v2316_v45, 0.0 }
 0x1a9   : > { %v2332_v50 = vmax.f32 %v2322_v27, 0.0  ;;  %v2253_v43 = vpop.f32.mrb[88].mxu0 }
 0x1aa   : > { %v2729_v1 = vpack.c.bf16 %v2326_v49, %v2325_v46  ;;  %v2280_v51 = vadd.f32 %v2253_v43, %v3873_v30  ;;  %v3181_v19 = vpop.f32.mrb[89].mxu0 }
 0x1ab   : > { %v2744_v52 = vpack.c.bf16 %v2332_v50, %v2331_v36  ;;  %v2256_v55 = vpop.f32.mrb[90].mxu0 }
 0x1ac   : > { %2746 = vst [vmem:[%s3884_s21 + $0x8] sm:$0xff] %v2729_v1   ;;  %v2317_v44 = vadd.f32 %v2698_v48, %v2280_v51  ;;  %v2281_v39 = vadd.f32 %v2256_v55, %v3875_v29  ;;  %v3182_v57 = vpop.f32.mrb[91].mxu0 }
 0x1ad   : > { %2749 = vst [vmem:[%s3884_s21 + $0x20] sm:$0xff] %v2744_v52  }
 0x1ae   : > { %v2318_v59 = vadd.f32 %v2698_v48, %v2281_v39  ;;  %v2327_v61 = vmax.f32 %v2317_v44, 0.0 }
 0x1b0   : > { %v2328_v47 = vmax.f32 %v2318_v59, 0.0 }
 0x1b2   : > { %v2734_v62 = vpack.c.bf16 %v2328_v47, %v2327_v61 }
 0x1b4   : > { %2747 = vst [vmem:[%s3884_s21 + $0x10] sm:$0xff] %v2734_v62  }
 0x1b5 PF: > { %s13_s12 = sadd.s32 1, %s3350_s12  }
 0x1b6   : > { %p10_p4 = scmp.ge.s32.totalorder %s13_s12, 4  }
 0x1b8   :  { %12 = sbr.rel (!%p10_p4) target bundleno = 1 (0x1), region = 70 }

// kernel: model_forward.3
= control target key start
LH: loop header
LB: loop body
LE: loop exit
PB: predicated region body
PF: predicated region fallthrough
CT: control target
= control target key end

     0   :  { %s7567_s12 = smov 0   ;;  %s8260_s0 = inlined_call_operand.vmem [shape: bf16[2,342,128], index: 0, kind: input, shape index: {}]   ;;  %s8261_s1 = inlined_call_operand.vmem [shape: bf16[9,128,128], index: 1, kind: input, shape index: {}]   ;;  %s8262_s2 = inlined_call_operand.vmem [shape: f32[1,128], index: 2, kind: input, shape index: {}]   ;;  %s8263_s3 = inlined_call_operand.vmem [shape: bf16[2,288,128], index: 3, kind: output, shape index: {}]  }
   0x1 LB: > { %s5714_s13 = sadd.s32 4294967295, %s7545_s12   ;;  %p5718_p0 = scmp.ge.s32.totalorder %s7545_s12, 1  ;;  %s7545_s12 = sphi %s7567_s12, %s13_s12  }
   0x2   : > { %p137_p1 = scmp.lt.s32.totalorder %s7545_s12, 3 }
   0x4   : > { %p138_p2 = pnand %p5718_p0, %p137_p1 }
   0x5   : > { %v7289_v0 = vld [vmem:[%s8261_s1] sm:$0xff] (!%p138_p2)   ;;  %v7291_v2 = vld [vmem:[%s8261_s1 + $0x8] sm:$0xff] (!%p138_p2)   ;;  %p161_p3 = scmp.lt.s32.totalorder (!%p138_p2), %s5714_s13, 1  ;;  %v7293_v4 = vld [vmem:[%s8261_s1 + $0x10] sm:$0xff] (!%p138_p2)   ;;  %vm2602_vm0 = vsmask.f32 (!%p138_p2), 6400 }
   0x6   : > { %141 = sbr.rel (%p138_p2) target bundleno = 582 (0x246), region = 32  ;;  %v7290_v1 = vld [vmem:[%s8261_s1 + $0x100] sm:$0xff] (!%p138_p2)   ;;  %6507 = vmatprep.subr.bf16.mxu1 (!%p138_p2), %v7289_v0  ;;  %v7292_v3 = vld [vmem:[%s8261_s1 + $0x108] sm:$0xff] (!%p138_p2)   ;;  %v7294_v5 = vld [vmem:[%s8261_s1 + $0x110] sm:$0xff] (!%p138_p2)   ;;  %vm3271_vm1 = vcmask (!%p138_p2), 1045504   ;;  %vm1531_vm3 = vcmask (!%p138_p2), 1046528  }
   0x7   : > { %6715 = vmatprep.subr.bf16.mxu0 (!%p138_p2), %v7290_v1  ;;  %6508 = vmatpush3.bf16.msra.mxu1 (!%p138_p2), %v7289_v0  ;;  %v7295_v6 = vld [vmem:[%s8261_s1 + $0x18] sm:$0xff] (!%p138_p2)   ;;  %v7297_v8 = vld [vmem:[%s8261_s1 + $0x20] sm:$0xff] (!%p138_p2)   ;;  %v7299_v10 = vld [vmem:[%s8261_s1 + $0x28] sm:$0xff] (!%p138_p2)   ;;  %vm884_vm2 = vsmask.f32 (!%p138_p2), 7424  ;;  %vm5011_vm5 = vcmask (!%p138_p2), 1044480  }
   0x8   : > { %6716 = vmatpush3.bf16.msra.mxu0 (!%p138_p2), %v7290_v1  ;;  %6509 = vmatprep.subr.bf16.mxu1 (!%p138_p2), %v7291_v2  ;;  %v7296_v7 = vld [vmem:[%s8261_s1 + $0x118] sm:$0xff] (!%p138_p2)   ;;  %v7298_v9 = vld [vmem:[%s8261_s1 + $0x120] sm:$0xff] (!%p138_p2)   ;;  %v7300_v11 = vld [vmem:[%s8261_s1 + $0x128] sm:$0xff] (!%p138_p2)   ;;  %vm4342_vm4 = vsmask.f32 (!%p138_p2), 5376 }
   0x9   : > { %6717 = vmatprep.subr.bf16.mxu0 (!%p138_p2), %v7292_v3  ;;  %v7301_v15 = vld [vmem:[%s8261_s1 + $0x30] sm:$0xff] (!%p138_p2)   ;;  %v7303_v26 = vld [vmem:[%s8261_s1 + $0x38] sm:$0xff] (!%p138_p2)   ;;  %v7309_v33 = vld [vmem:[%s8261_s1 + $0x40] sm:$0xff] (!%p138_p2)  }
   0xa   : > { %v7302_v16 = vld [vmem:[%s8261_s1 + $0x130] sm:$0xff] (!%p138_p2)   ;;  %v7304_v29 = vld [vmem:[%s8261_s1 + $0x138] sm:$0xff] (!%p138_p2)   ;;  %v7311_v39 = vld [vmem:[%s8261_s1 + $0x140] sm:$0xff] (!%p138_p2)  }
   0xb   : > { %6510 = vmatpush3.bf16.msra.mxu1 (!%p138_p2), %v7291_v2  ;;  %v7312_v43 = vld [vmem:[%s8261_s1 + $0x148] sm:$0xff] (!%p138_p2)   ;;  %v7317_v58 = vld [vmem:[%s8261_s1 + $0x150] sm:$0xff] (!%p138_p2)  }
   0xc   : > { %6718 = vmatpush3.bf16.msra.mxu0 (!%p138_p2), %v7292_v3  ;;  %6511 = vmatprep.subr.bf16.mxu1 (!%p138_p2), %v7293_v4  ;;  %v7318_v52 = vld [vmem:[%s8261_s1 + $0x48] sm:$0xff] (!%p138_p2)   ;;  %v7325_v1 = vld [vmem:[%s8261_s1 + $0x50] sm:$0xff] (!%p138_p2)  }
   0xd   : > { %s8265_s13 = smov (!%p161_p3, %s5714_s13), 1  ;;  %6719 = vmatprep.subr.bf16.mxu0 %v7294_v5 }
   0xe   : > { %s7279_s30 = smul.u32 172, %s8265_s13 }
   0xf   : > { %6512 = vmatpush3.bf16.msra.mxu1 %v7293_v4  ;;  %s7280_s7 = smul.u32 144, %s8265_s13 }
  0x10   : > { %6720 = vmatpush3.bf16.msra.mxu0 %v7294_v5  ;;  %6513 = vmatprep.subr.bf16.mxu1 %v7295_v6  ;;  %s7617_s16 = scalar_lea.vmem %s8260_s0, %s7279_s30  ;;  %v7319_v5 = vld [vmem:[%s8261_s1 + $0x158] sm:$0xff]  }
  0x11   : > { %6721 = vmatprep.subr.bf16.mxu0 %v7296_v7  ;;  %v7305_v12 = vld [vmem:[%s7617_s16] sm:$0xff]   ;;  %v7306_v13 = vld [vmem:[%s7617_s16 + $0x8] sm:$0xfe]   ;;  %v7307_v14 = vld [vmem:[%s7617_s16 + $0x10] sm:$0xff]   ;;  %s8201_s10 = scalar_lea.vmem %s8263_s3, %s7280_s7 }
  0x12   : > { %6523 = vmatprep.mubr.bf16.mxu1 %v7305_v12  ;;  %v2604_v17 = vshrl.u32 %v7306_v13, 16  ;;  %v2607_v18 = vshll.u32 %v7306_v13, 16  ;;  %v2612_v19 = vshrl.u32 %v7307_v14, 16  ;;  %v2615_v20 = vshll.u32 %v7307_v14, 16  ;;  %v7310_v25 = vld [vmem:[%s7617_s16 + $0x18] sm:$0xff]   ;;  %v7314_v36 = vld [vmem:[%s7617_s16 + $0x20] sm:$0xff]  }
  0x13   : > { %6514 = vmatpush3.bf16.msra.mxu1 %v7295_v6  ;;  %v2621_v30 = vshrl.u32 %v7310_v25, 16  ;;  %v2624_v31 = vshll.u32 %v7310_v25, 16  ;;  %v7308_v37 = vld [vmem:[%s7617_s16 + $0x8] sm:$0xff]   ;;  %v2630_v40 = vshrl.u32 %v7314_v36, 16  ;;  %v2633_v41 = vshll.u32 %v7314_v36, 16  ;;  %v7313_v48 = vld [vmem:[%s7617_s16 + $0x10] sm:$0xff]  }
  0x14   : > { %6722 = vmatpush3.bf16.msra.mxu0 %v7296_v7  ;;  %6515 = vmatprep.subr.bf16.mxu1 %v7297_v8  ;;  %v2606_v21 = vrot.slane %v2604_v17, 1  ;;  %v2609_v22 = vrot.slane %v2607_v18, 2  ;;  %v2614_v23 = vrot.slane %v2612_v19, 1  ;;  %v2617_v24 = vrot.slane %v2615_v20, 2  ;;  %v7316_v42 = vld [vmem:[%s7617_s16 + $0x28] sm:$0xff]   ;;  %v7321_v54 = vld [vmem:[%s7617_s16 + $0x30] sm:$0xff]  }
  0x15   : > { %6723 = vmatprep.subr.bf16.mxu0 %v7298_v9  ;;  %v2623_v34 = vrot.slane %v2621_v30, 1  ;;  %v2626_v35 = vrot.slane %v2624_v31, 2  ;;  %v2632_v44 = vrot.slane %v2630_v40, 1  ;;  %v2635_v45 = vrot.slane %v2633_v41, 2  ;;  %v7315_v56 = vld [vmem:[%s7617_s16 + $0x18] sm:$0xff]   ;;  %v7320_v2 = vld [vmem:[%s7617_s16 + $0x20] sm:$0xff]  }
  0x16   : > { %v2610_v27 = vor.u32 %v2609_v22, %v2606_v21  ;;  %v2618_v28 = vor.u32 %v2617_v24, %v2614_v23  ;;  %v2639_v46 = vshrl.u32 %v7316_v42, 16  ;;  %v2642_v49 = vshll.u32 %v7316_v42, 16  ;;  %v7323_v61 = vld [vmem:[%s7617_s16 + $0x38] sm:$0xff]   ;;  %v7322_v13 = vld [vmem:[%s7617_s16 + $0x28] sm:$0xff]   ;;  %v7327_v22 = vld [vmem:[%s7617_s16 + $0x30] sm:$0xff]  }
  0x17   : > { %6516 = vmatpush3.bf16.msra.mxu1 %v7297_v8  ;;  %v2627_v38 = vor.u32 %v2626_v35, %v2623_v34  ;;  %v2636_v50 = vor.u32 %v2635_v45, %v2632_v44  ;;  %v2648_v59 = vshrl.u32 %v7321_v54, 16  ;;  %v2651_v60 = vshll.u32 %v7321_v54, 16  ;;  %v7332_v19 = vld [vmem:[%s8261_s1 + $0x58] sm:$0xff]   ;;  %v7326_v25 = vld [vmem:[%s8261_s1 + $0x168] sm:$0xff]   ;;  %v7339_v35 = vld [vmem:[%s8261_s1 + $0x60] sm:$0xff]  }
  0x18   : > { %6724 = vmatpush3.bf16.msra.mxu0 %v7298_v9  ;;  %6517 = vmatprep.subr.bf16.mxu1 %v7299_v10  ;;  %v2619_v32 = vsel %vm2602_vm0, %v2610_v27, %v2618_v28  ;;  %v2641_v51 = vrot.slane %v2639_v46, 1  ;;  %v2644_v53 = vrot.slane %v2642_v49, 2  ;;  %v2657_v0 = vshrl.u32 %v7323_v61, 16  ;;  %v7328_v9 = vld [vmem:[%s7617_s16 + $0x40] sm:$0xff]   ;;  %v7335_v30 = vld [vmem:[%s7617_s16 + $0x8] sm:$0xfc]  }
  0x19   : > { %6725 = vmatprep.subr.bf16.mxu0 %v7300_v11  ;;  %6731 = vmatprep.mubr.bf16.mxu0 %v2619_v32  ;;  %v2628_v47 = vsel %vm2602_vm0, %v2618_v28, %v2627_v38  ;;  %v2637_v55 = vsel %vm2602_vm0, %v2627_v38, %v2636_v50  ;;  %v2650_v62 = vrot.slane %v2648_v59, 1  ;;  %v2653_v63 = vrot.slane %v2651_v60, 2  ;;  %v7336_v28 = vld [vmem:[%s7617_s16 + $0x10] sm:$0xff]   ;;  %v7329_v36 = vld [vmem:[%s7617_s16 + $0x38] sm:$0xff]   ;;  %v7334_v38 = vld [vmem:[%s7617_s16 + $0x40] sm:$0xff]  }
  0x1a   : > { %v2645_v57 = vor.u32 %v2644_v53, %v2641_v51  ;;  %v2660_v3 = vshll.u32 %v7323_v61, 16  ;;  %v2659_v7 = vrot.slane %v2657_v0, 1  ;;  %v2669_v12 = vshll.u32 %v7328_v9, 16  ;;  %v7331_v32 = vld [vmem:[%s8261_s1 + $0x170] sm:$0xff]   ;;  %v7338_v40 = vld [vmem:[%s7617_s16 + $0x18] sm:$0xff]   ;;  %v7341_v42 = vld [vmem:[%s7617_s16 + $0x20] sm:$0xff]  }
  0x1b   : > { %6518 = vmatpush3.bf16.msra.mxu1 %v7299_v10  ;;  %v2654_v6 = vor.u32 %v2653_v63, %v2650_v62  ;;  %v3272_v34 = vrot.slane %v7335_v30, 2  ;;  %v7337_v44 = vld [vmem:[%s7617_s16 + $0x48] sm:$0xff]   ;;  %v3275_v45 = vrot.slane %v7338_v40, 2  ;;  %v7340_v46 = vld [vmem:[%s7617_s16 + $0x50] sm:$0xff]   ;;  %v7349_v60 = vld [vmem:[%s7617_s16 + $0x38] sm:$0xff]  }
  0x1c   : > { %6726 = vmatpush3.bf16.msra.mxu0 %v7300_v11  ;;  %6519 = vmatprep.subr.bf16.mxu1 %v7301_v15  ;;  %v2646_v4 = vsel %vm2602_vm0, %v2636_v50, %v2645_v57  ;;  %v2662_v8 = vrot.slane %v2660_v3, 2  ;;  %v2666_v11 = vshrl.u32 %v7328_v9, 16  ;;  %v2671_v18 = vrot.slane %v2669_v12, 2  ;;  %v7343_v49 = vld [vmem:[%s7617_s16 + $0x28] sm:$0xff]   ;;  %v7347_v50 = vld [vmem:[%s7617_s16 + $0x30] sm:$0xff]   ;;  %v7358_v62 = vld [vmem:[%s8261_s1 + $0x78] sm:$0xff]  }
  0x1d   : > { %6727 = vmatprep.subr.bf16.mxu0 %v7302_v16  ;;  %v2655_v10 = vsel %vm2602_vm0, %v2645_v57, %v2654_v6  ;;  %v7351_v54 = vld [vmem:[%s8261_s1 + $0x70] sm:$0xff]   ;;  %v7346_v57 = vld [vmem:[%s7617_s16 + $0x60] sm:$0xff]  }
  0x1e   : > { %v2663_v14 = vor.u32 %v2662_v8, %v2659_v7  ;;  %v2668_v17 = vrot.slane %v2666_v11, 1  ;;  %v7356_v59 = vld [vmem:[%s8261_s1 + $0x190] sm:$0xff]   ;;  %v7353_v0 = vld [vmem:[%s7617_s16 + $0x40] sm:$0xff]  }
  0x1f   : > { %6520 = vmatpush3.bf16.msra.mxu1 %v7301_v15  ;;  %v7330_v15 = vld [vmem:[%s7617_s16 + $0x48] sm:$0xff]   ;;  %v3285_v3 = vrot.slane %v7353_v0, 2  ;;  %v7359_v8 = vld [vmem:[%s7617_s16 + $0x50] sm:$0xff]   ;;  %v7363_v9 = vld [vmem:[%s7617_s16] sm:$0xff]  }
  0x20   : > { %6728 = vmatpush3.bf16.msra.mxu0 %v7302_v16  ;;  %6521 = vmatprep.subr.bf16.mxu1 %v7303_v26  ;;  %v7324_v16 = vld [vmem:[%s8261_s1 + $0x160] sm:$0xff]   ;;  %v2675_v20 = vshrl.u32 %v7330_v15, 16  ;;  %v2678_v21 = vshll.u32 %v7330_v15, 16  ;;  %v2672_v23 = vor.u32 %v2671_v18, %v2668_v17  ;;  %v2664_v24 = vsel %vm2602_vm0, %v2654_v6, %v2663_v14  ;;  %v7355_v6 = vld [vmem:[%s7617_s16 + $0x48] sm:$0xff]   ;;  %v7354_v17 = vld [vmem:[%s7617_s16 + $0x78] sm:$0xff]  }
  0x21   : > { %6729 = vmatprep.subr.bf16.mxu0 %v7304_v29  ;;  %v7747_v11 = vld [vmem:[%s8261_s1 + $0x80] sm:$0xff]   ;;  %v3287_v12 = vrot.slane %v7355_v6, 2  ;;  %v7374_v0 = vld [vmem:[%s8261_s1 + $0x88] sm:$0xff]  }
  0x22   : > { %v2680_v27 = vrot.slane %v2678_v21, 2  ;;  %v7369_v15 = vld [vmem:[%s8261_s1 + $0x1a0] sm:$0xff]  }
  0x23   : > { %6522 = vmatpush3.bf16.msra.mxu1 %v7303_v26  ;;  %v2677_v26 = vrot.slane %v2675_v20, 1  ;;  %v7357_v18 = vld [vmem:[%s7617_s16 + $0x80] sm:$0xff]   ;;  %v886_v20 = vshrl.u32 %v7363_v9, 16  ;;  %v3288_v21 = vsel %vm3271_vm1, %v3285_v3, %v3287_v12 }
  0x24   : > { %6730 = vmatpush3.bf16.msra.mxu0 %v7304_v29  ;;  %6559 = vmatprep.subr.bf16.mxu1 %v7309_v33  ;;  %v2673_v29 = vsel %vm2602_vm0, %v2663_v14, %v2672_v23  ;;  %v888_v14 = vshll.u32 %v7363_v9, 16  ;;  %v7382_v9 = vld [vmem:[%s7617_s16 + $0x38] sm:$0xff]  }
  0x25   : > { %6767 = vmatprep.subr.bf16.mxu0 %v7311_v39  ;;  %v7686_v31 = vor.u32 %v2680_v27, %v2677_v26  ;;  %v7375_v26 = vld [vmem:[%s8261_s1 + $0x1a8] sm:$0xff]   ;;  %v7366_v27 = vld [vmem:[%s7617_s16 + $0x10] sm:$0xff]  }
  0x26   : > { %6524 = vmatmul.mubr.bf16.vlgmr.msra.gmra.mrb[0].mxu1 %v7308_v37  ;;  %v7333_v37 = vld [vmem:[%s8261_s1 + $0x178] sm:$0xff]  }
  0x27   : > { %6732 = vmatmul.mubr.bf16.vlgmr.msra.gmra.mrb[0].mxu0 %v2628_v47  ;;  %6560 = vmatpush3.bf16.msra.mxu1 %v7309_v33  ;;  %v3273_v33 = vrot.slane %v7336_v28, 2  ;;  %v3277_v47 = vrot.slane %v7341_v42, 2  ;;  %v905_v42 = vshrl.u32 %v7366_v27, 16 }
  0x28   : > { %6768 = vmatpush3.bf16.msra.mxu0 %v7311_v39  ;;  %6527 = vmatprep.mubr.bf16.mxu1 %v7313_v48  ;;  %v2682_v39 = vsel %vm2602_vm0, %v2672_v23, %v7686_v31  ;;  %v7344_v48 = vld [vmem:[%s8261_s1 + $0x180] sm:$0xff]  }
  0x29   : > { %6769 = vmatprep.subr.bf16.mxu0 %v7312_v43  ;;  %6735 = vmatprep.mubr.bf16.mxu0 %v2637_v55  ;;  %v3274_v41 = vsel %vm3271_vm1, %v3272_v34, %v3273_v33  ;;  %v3276_v51 = vsel %vm3271_vm1, %v3273_v33, %v3275_v45  ;;  %v3278_v53 = vsel %vm3271_vm1, %v3275_v45, %v3277_v47  ;;  %v7342_v55 = vld [vmem:[%s7617_s16 + $0x58] sm:$0xff]   ;;  %v7360_v34 = vld [vmem:[%s7617_s16 + $0x88] sm:$0xff]   ;;  %v7381_v45 = vld [vmem:[%s8261_s1 + $0x1b0] sm:$0xff]  }
  0x2a   : > { %6561 = vmatprep.subr.bf16.mxu1 %v7318_v52  ;;  %v7370_v33 = vld [vmem:[%s7617_s16 + $0x18] sm:$0xff]  }
  0x2b   : > { %6562 = vmatpush3.bf16.msra.mxu1 %v7318_v52  ;;  %v7350_v52 = vld [vmem:[%s8261_s1 + $0x188] sm:$0xff]  }
  0x2c   : > { %6770 = vmatpush3.bf16.msra.mxu0 %v7312_v43  ;;  %6563 = vmatprep.subr.bf16.mxu1 %v7325_v1  ;;  %v7345_v43 = vld [vmem:[%s8261_s1 + $0x68] sm:$0xff]  }
  0x2d   : > { %6771 = vmatprep.subr.bf16.mxu0 %v7317_v58 }
  0x2e   : > { %6528 = vmatmul.mubr.bf16.gmra.mrb[4].mxu1 %v7315_v56  ;;  %v3279_v56 = vrot.slane %v7343_v49, 2  ;;  %v7376_v49 = vld [vmem:[%s7617_s16 + $0x28] sm:$0xff]  }
  0x2f   : > { %6736 = vmatmul.mubr.bf16.gmra.mrb[4].mxu0 %v2646_v4  ;;  %6531 = vmatprep.mubr.bf16.mxu1 %v7320_v2  ;;  %v7362_v2 = vld [vmem:[%s8261_s1 + $0x198] sm:$0xff]   ;;  %v7348_v4 = vld [vmem:[%s7617_s16 + $0x68] sm:$0xff]  }
  0x30   : > { %6772 = vmatpush3.bf16.msra.mxu0 %v7317_v58  ;;  %6739 = vmatprep.mubr.bf16.mxu0 %v2655_v10  ;;  %v3281_v58 = vrot.slane %v7347_v50, 2  ;;  %v3280_v61 = vsel %vm3271_vm1, %v3277_v47, %v3279_v56 }
  0x31   : > { %6773 = vmatprep.subr.bf16.mxu0 %v7319_v5  ;;  %6564 = vmatpush3.bf16.msra.mxu1 %v7325_v1  ;;  %v3283_v1 = vrot.slane %v7349_v60, 2  ;;  %v925_v60 = vshll.u32 %v7376_v49, 16 }
  0x32   : > { %6565 = vmatprep.subr.bf16.mxu1 %v7332_v19  ;;  %v3282_v63 = vsel %vm3271_vm1, %v3279_v56, %v3281_v58  ;;  %v7373_v56 = vld [vmem:[%s7617_s16 + $0x78] sm:$0xff]  }
  0x33   : > { %v3284_v7 = vsel %vm3271_vm1, %v3281_v58, %v3283_v1  ;;  %v3286_v10 = vsel %vm3271_vm1, %v3283_v1, %v3285_v3  ;;  %v7387_v58 = vld [vmem:[%s8261_s1 + $0x1b8] sm:$0xff]   ;;  %v927_v6 = vrot.slane %v925_v60, 1 }
  0x34   : > { %6774 = vmatpush3.bf16.msra.mxu0 %v7319_v5  ;;  %v7352_v5 = vld [vmem:[%s7617_s16 + $0x70] sm:$0xff]  }
  0x35   : > { %6775 = vmatprep.subr.bf16.mxu0 %v7324_v16  ;;  %6566 = vmatpush3.bf16.msra.mxu1 %v7332_v19  ;;  %v7361_v19 = vld [vmem:[%s7617_s16 + $0x58] sm:$0xff]  }
  0x36   : > { %6532 = vmatmul.mubr.bf16.gmra.mrb[8].mxu1 %v7322_v13  ;;  %6567 = vmatprep.subr.bf16.mxu1 %v7339_v35  ;;  %v7364_v13 = vld [vmem:[%s7617_s16 + $0x8] sm:$0xff]   ;;  %v3291_v28 = vrot.slane %v7361_v19, 2  ;;  %v7384_v19 = vld [vmem:[%s7617_s16 + $0x40] sm:$0xff]  }
  0x37   : > { %6740 = vmatmul.mubr.bf16.gmra.mrb[8].mxu0 %v2664_v24  ;;  %6535 = vmatprep.mubr.bf16.mxu1 %v7327_v22  ;;  %v890_v22 = vrot.slane %v888_v14, 1  ;;  %v893_v23 = vshll.u32 %v7364_v13, 16 }
  0x38   : > { %6776 = vmatpush3.bf16.msra.mxu0 %v7324_v16  ;;  %6743 = vmatprep.mubr.bf16.mxu0 %v2673_v29  ;;  %v3289_v16 = vrot.slane %v7359_v8, 2  ;;  %v7380_v8 = vld [vmem:[%s8261_s1 + $0x90] sm:$0xff]  }
  0x39   : > { %6777 = vmatprep.subr.bf16.mxu0 %v7326_v25  ;;  %6568 = vmatpush3.bf16.msra.mxu1 %v7339_v35  ;;  %v891_v29 = vor.u32 %v890_v22, %v886_v20  ;;  %v895_v30 = vrot.slane %v893_v23, 1  ;;  %v897_v35 = vshrl.u32 %v7364_v13, 16  ;;  %v7379_v13 = vld [vmem:[%s7617_s16 + $0x88] sm:$0xff]  }
  0x3a   : > { %6569 = vmatprep.subr.bf16.mxu1 %v7345_v43  ;;  %v3290_v24 = vsel %vm3271_vm1, %v3287_v12, %v3289_v16  ;;  %v7805_v23 = vld [vmem:[%s7617_s16 + $0x48] sm:$0xff]  }
  0x3b   : > { %v896_v40 = vsel %vm884_vm2, %v891_v29, %v895_v30 }
  0x3c   : > { %6778 = vmatpush3.bf16.msra.mxu0 %v7326_v25  ;;  %v7365_v25 = vld [vmem:[%s7617_s16 + $0x60] sm:$0xff]  }
  0x3d   : > { %6779 = vmatprep.subr.bf16.mxu0 %v7331_v32  ;;  %6570 = vmatpush3.bf16.msra.mxu1 %v7345_v43  ;;  %v909_v43 = vshll.u32 %v7370_v33, 16 }
  0x3e   : > { %6536 = vmatmul.mubr.bf16.gmra.mrb[12].mxu1 %v7329_v36  ;;  %6571 = vmatprep.subr.bf16.mxu1 %v7351_v54  ;;  %v901_v36 = vshll.u32 %v7366_v27, 16 }
  0x3f   : > { %6744 = vmatmul.mubr.bf16.gmra.mrb[12].mxu0 %v2682_v39  ;;  %6539 = vmatprep.mubr.bf16.mxu1 %v7334_v38  ;;  %v7371_v38 = vld [vmem:[%s7617_s16 + $0x70] sm:$0xff]   ;;  %v3292_v39 = vsel %vm3271_vm1, %v3289_v16, %v3291_v28 }
  0x40   : > { %6780 = vmatpush3.bf16.msra.mxu0 %v7331_v32  ;;  %6783 = vmatprep.mubr.bf16.mxu0 %v3274_v41  ;;  %v3293_v32 = vrot.slane %v7365_v25, 2  ;;  %v903_v47 = vrot.slane %v901_v36, 1 }
  0x41   : > { %6781 = vmatprep.subr.bf16.mxu0 %v7333_v37  ;;  %6572 = vmatpush3.bf16.msra.mxu1 %v7351_v54 }
  0x42   : > { %6573 = vmatprep.subr.bf16.mxu1 %v7358_v62  ;;  %v3294_v41 = vsel %vm3271_vm1, %v3291_v28, %v3293_v32  ;;  %v907_v50 = vor.u32 %v905_v42, %v903_v47 }
  0x44   : > { %6782 = vmatpush3.bf16.msra.mxu0 %v7333_v37  ;;  %v7368_v37 = vld [vmem:[%s7617_s16 + $0x68] sm:$0xff]  }
  0x45   : > { %6819 = vmatprep.subr.bf16.mxu0 %v7344_v48  ;;  %6574 = vmatpush3.bf16.msra.mxu1 %v7358_v62 }
  0x46   : > { %6540 = vmatmul.mubr.bf16.gmra.mrb[16].mxu1 %v7337_v44  ;;  %6611 = vmatprep.subr.bf16.mxu1 %v7747_v11  ;;  %v7372_v44 = vld [vmem:[%s7617_s16 + $0x20] sm:$0xff]  }
  0x47   : > { %6784 = vmatmul.mubr.bf16.vlgmr.msra.gmra.mrb[0].mxu0 %v3276_v51  ;;  %6543 = vmatprep.mubr.bf16.mxu1 %v7340_v46  ;;  %v899_v46 = vor.u32 %v897_v35, %v895_v30  ;;  %v911_v51 = vrot.slane %v909_v43, 1  ;;  %v945_v30 = vshrl.u32 %v7382_v9, 16  ;;  %v953_v35 = vshrl.u32 %v7384_v19, 16  ;;  %v7399_v43 = vld [vmem:[%s8261_s1 + $0xa8] sm:$0xff]  }
  0x48   : > { %6787 = vmatprep.mubr.bf16.mxu0 %v3278_v53  ;;  %6820 = vmatpush3.bf16.msra.mxu0 %v7344_v48  ;;  %v3295_v48 = vrot.slane %v7368_v37, 2  ;;  %v917_v53 = vshll.u32 %v7372_v44, 16  ;;  %v957_v37 = vshll.u32 %v7805_v23, 16 }
  0x49   : > { %6821 = vmatprep.subr.bf16.mxu0 %v7350_v52  ;;  %v904_v54 = vsel %vm884_vm2, %v899_v46, %v903_v47  ;;  %v912_v62 = vsel %vm884_vm2, %v907_v50, %v911_v51 }
  0x4a   : > { %v919_v1 = vrot.slane %v917_v53, 1  ;;  %v7405_v53 = vld [vmem:[%s8261_s1 + $0xb0] sm:$0xff]  }
  0x4c   : > { %6822 = vmatpush3.bf16.msra.mxu0 %v7350_v52  ;;  %v3297_v52 = vrot.slane %v7371_v38, 2  ;;  %v7390_v38 = vld [vmem:[%s7617_s16 + $0x18] sm:$0xff]  }
  0x4d   : > { %6823 = vmatprep.subr.bf16.mxu0 %v7356_v59  ;;  %v3808_v50 = vrot.slane %v7390_v38, 2 }
  0x4e   : > { %6544 = vmatmul.mubr.bf16.gmra.mrb[20].mxu1 %v7342_v55  ;;  %v913_v55 = vshrl.u32 %v7370_v33, 16  ;;  %v7393_v33 = vld [vmem:[%s8261_s1 + $0xa0] sm:$0xff]  }
  0x4f   : > { %6788 = vmatmul.mubr.bf16.gmra.mrb[4].mxu0 %v3280_v61  ;;  %6547 = vmatprep.mubr.bf16.mxu1 %v7346_v57  ;;  %v921_v57 = vshrl.u32 %v7372_v44, 16  ;;  %v7377_v61 = vld [vmem:[%s7617_s16 + $0x80] sm:$0xff]  }
  0x50   : > { %6791 = vmatprep.mubr.bf16.mxu0 %v3282_v63  ;;  %6824 = vmatpush3.bf16.msra.mxu0 %v7356_v59  ;;  %v3296_v59 = vsel %vm3271_vm1, %v3293_v32, %v3295_v48  ;;  %v3298_v63 = vsel %vm3271_vm1, %v3295_v48, %v3297_v52  ;;  %v915_v3 = vor.u32 %v913_v55, %v911_v51  ;;  %v7385_v32 = vld [vmem:[%s7617_s16 + $0x98] ss:$0 sps:$4 sm:$0x33]   ;;  %v959_v48 = vrot.slane %v957_v37, 1 }
  0x51   : > { %6825 = vmatprep.subr.bf16.mxu0 %v7362_v2  ;;  %v3307_v47 = vrot.slane %v7385_v32, 2  ;;  %v7394_v51 = vld [vmem:[%s7617_s16 + $0x58] sm:$0xff]  }
  0x54   : > { %6826 = vmatpush3.bf16.msra.mxu0 %v7362_v2  ;;  %v7378_v2 = vld [vmem:[%s7617_s16 + $0x30] sm:$0xff]  }
  0x55   : > { %6827 = vmatprep.subr.bf16.mxu0 %v7369_v15  ;;  %v933_v12 = vshll.u32 %v7378_v2, 16  ;;  %v937_v14 = vshrl.u32 %v7378_v2, 16 }
  0x56   : > { %6548 = vmatmul.mubr.bf16.gmra.mrb[24].mxu1 %v7348_v4  ;;  %v3299_v4 = vrot.slane %v7373_v56, 2  ;;  %v961_v56 = vshrl.u32 %v7805_v23, 16  ;;  %v7857_v23 = vld [vmem:[%s8261_s1 + $0xc0] sm:$0xff]  }
  0x57   : > { %6792 = vmatmul.mubr.bf16.gmra.mrb[8].mxu0 %v3284_v7  ;;  %6551 = vmatprep.mubr.bf16.mxu1 %v7352_v5  ;;  %v923_v5 = vor.u32 %v921_v57, %v919_v1  ;;  %v3301_v7 = vrot.slane %v7377_v61, 2  ;;  %v935_v22 = vrot.slane %v933_v12, 1  ;;  %v7392_v57 = vld [vmem:[%s7617_s16 + $0x20] sm:$0xff]   ;;  %v973_v61 = vshll.u32 %v7394_v51, 16 }
  0x58   : > { %6795 = vmatprep.mubr.bf16.mxu0 %v3286_v10  ;;  %6828 = vmatpush3.bf16.msra.mxu0 %v7369_v15  ;;  %v929_v10 = vshrl.u32 %v7376_v49, 16  ;;  %v7383_v15 = vld [vmem:[%s7617_s16 + $0x90] sm:$0xff]   ;;  %v3300_v16 = vsel %vm3271_vm1, %v3297_v52, %v3299_v4 }
  0x59   : > { %6829 = vmatprep.subr.bf16.mxu0 %v7375_v26  ;;  %v3302_v20 = vsel %vm3271_vm1, %v3299_v4, %v3301_v7  ;;  %v939_v27 = vor.u32 %v937_v14, %v935_v22  ;;  %v3305_v29 = vrot.slane %v7383_v15, 2  ;;  %v7400_v4 = vld [vmem:[%s7617_s16 + $0x68] sm:$0xff]  }
  0x5a   : > { %v931_v25 = vor.u32 %v929_v10, %v927_v6  ;;  %v7397_v10 = vld [vmem:[%s7617_s16 + $0x30] sm:$0xff]   ;;  %v993_v32 = vshrl.u32 %v7400_v4, 16 }
  0x5c   : > { %6830 = vmatpush3.bf16.msra.mxu0 %v7375_v26  ;;  %v3303_v26 = vrot.slane %v7379_v13, 2  ;;  %v936_v36 = vsel %vm884_vm2, %v931_v25, %v935_v22  ;;  %v977_v13 = vshrl.u32 %v7394_v51, 16  ;;  %v3814_v22 = vrot.slane %v7397_v10, 2 }
  0x5d   : > { %6831 = vmatprep.subr.bf16.mxu0 %v7381_v45 }
  0x5e   : > { %6552 = vmatmul.mubr.bf16.gmra.mrb[28].mxu1 %v7354_v17  ;;  %v928_v17 = vsel %vm884_vm2, %v923_v5, %v927_v6  ;;  %v3306_v42 = vsel %vm3271_vm1, %v3303_v26, %v3305_v29  ;;  %v3810_v5 = vrot.slane %v7392_v57, 2 }
  0x5f   : > { %6796 = vmatmul.mubr.bf16.gmra.mrb[12].mxu0 %v3288_v21  ;;  %6555 = vmatprep.mubr.bf16.mxu1 %v7357_v18  ;;  %v941_v18 = vshll.u32 %v7382_v9, 16  ;;  %v7386_v21 = vld [vmem:[%s8261_s1 + $0x98] sm:$0xff]  }
  0x60   : > { %6799 = vmatprep.mubr.bf16.mxu0 %v3290_v24  ;;  %6832 = vmatpush3.bf16.msra.mxu0 %v7381_v45  ;;  %v7810_v24 = vld [vmem:[%s8261_s1 + $0x1c0] sm:$0xff]   ;;  %v7391_v45 = vld [vmem:[%s7617_s16 + $0x50] sm:$0xff]   ;;  %v3811_v14 = vsel %vm3271_vm1, %v3808_v50, %v3810_v5 }
  0x61   : > { %6833 = vmatprep.subr.bf16.mxu0 %v7387_v58  ;;  %v943_v28 = vrot.slane %v941_v18, 1  ;;  %v969_v60 = vshrl.u32 %v7391_v45, 16 }
  0x63   : > { %v947_v46 = vor.u32 %v945_v30, %v943_v28  ;;  %v7410_v30 = vld [vmem:[%s8261_s1 + $0x1d0] sm:$0xff]  }
  0x64   : > { %6834 = vmatpush3.bf16.msra.mxu0 %v7387_v58  ;;  %v3308_v58 = vsel %vm3271_vm1, %v3305_v29, %v3307_v47 }
  0x65   : > { %6871 = vmatprep.subr.bf16.mxu0 %v7810_v24 }
  0x66   : > { %6556 = vmatmul.mubr.bf16.gmra.mrb[32].mxu1 %v7360_v34  ;;  %v949_v34 = vshll.u32 %v7384_v19, 16 }
  0x67   : > { %6800 = vmatmul.mubr.bf16.gmra.mrb[16].mxu0 %v3292_v39  ;;  %6575 = vmatprep.mubr.bf16.mxu1 %v896_v40  ;;  %v3304_v39 = vsel %vm3271_vm1, %v3301_v7, %v3303_v26  ;;  %v944_v40 = vsel %vm884_vm2, %v939_v27, %v943_v28  ;;  %v975_v7 = vrot.slane %v973_v61, 1  ;;  %v7406_v27 = vld [vmem:[%s7617_s16 + $0x78] sm:$0xff]   ;;  %v7414_v61 = vld [vmem:[%s7617_s16 + $0x90] ss:$0 sps:$4 sm:$0x11]  }
  0x68   : > { %6803 = vmatprep.mubr.bf16.mxu0 %v3294_v41  ;;  %v7389_v41 = vld [vmem:[%s7617_s16 + $0x10] sm:$0xfc]   ;;  %v951_v44 = vrot.slane %v949_v34, 1  ;;  %v1005_v38 = vshll.u32 %v7406_v27, 16  ;;  %v1009_v51 = vshrl.u32 %v7406_v27, 16  ;;  %v1029_v10 = vshll.u32 %v7414_v61, 16 }
  0x69   : > { %v3807_v52 = vrot.slane %v7389_v41, 2  ;;  %v979_v25 = vor.u32 %v977_v13, %v975_v7  ;;  %v7416_v41 = vld [vmem:[%s8261_s1 + $0x1d8] sm:$0xff]   ;;  %v7422_v27 = vld [vmem:[%s7617_s16 + $0x70] sm:$0xff]  }
  0x6a   : > { %v955_v49 = vor.u32 %v953_v35, %v951_v44  ;;  %v952_v55 = vsel %vm884_vm2, %v947_v46, %v951_v44  ;;  %v7403_v35 = vld [vmem:[%s7617_s16 + $0x40] sm:$0xff]   ;;  %v1007_v47 = vrot.slane %v1005_v38, 1  ;;  %v7440_v61 = vld [vmem:[%s8261_s1 + $0xd8] sm:$0xff]  }
  0x6b   : > { %v7426_v38 = vld [vmem:[%s7617_s16 + $0x20] sm:$0xff]  }
  0x6e   : > { %6576 = vmatmul.mubr.bf16.vlgmr.msra.gmra.mrb[0].mxu1 %v904_v54  ;;  %v965_v54 = vshll.u32 %v7391_v45, 16  ;;  %v3818_v45 = vrot.slane %v7403_v35, 2  ;;  %v3830_v35 = vrot.slane %v7422_v27, 2 }
  0x6f   : > { %6804 = vmatmul.mubr.bf16.gmra.mrb[20].mxu0 %v3296_v59  ;;  %6612 = vmatpush3.bf16.msra.mxu1 %v7747_v11  ;;  %v920_v11 = vsel %vm884_vm2, %v915_v3, %v919_v1  ;;  %v960_v59 = vsel %vm884_vm2, %v955_v49, %v959_v48  ;;  %v7412_v1 = vld [vmem:[%s8261_s1 + $0xb8] sm:$0xff]   ;;  %v963_v3 = vor.u32 %v961_v56, %v959_v48  ;;  %v7411_v48 = vld [vmem:[%s7617_s16 + $0x88] sm:$0xff]  }
  0x70   : > { %6579 = vmatprep.mubr.bf16.mxu1 %v912_v62  ;;  %6807 = vmatprep.mubr.bf16.mxu0 %v3298_v63  ;;  %v7395_v62 = vld [vmem:[%s7617_s16 + $0x28] sm:$0xff]   ;;  %v7396_v63 = vld [vmem:[%s7617_s16 + $0x60] sm:$0xff]   ;;  %v967_v2 = vrot.slane %v965_v54, 1  ;;  %v7409_v54 = vld [vmem:[%s7617_s16 + $0x50] sm:$0xff]  }
  0x71   : > { %6613 = vmatprep.subr.bf16.mxu1 %v7374_v0  ;;  %v981_v9 = vshll.u32 %v7396_v63, 16 }
  0x72   : > { %v971_v6 = vor.u32 %v969_v60, %v967_v2  ;;  %v968_v12 = vsel %vm884_vm2, %v963_v3, %v967_v2 }
  0x73   : > { %6614 = vmatpush3.bf16.msra.mxu1 %v7374_v0  ;;  %v3809_v0 = vsel %vm3271_vm1, %v3807_v52, %v3808_v50  ;;  %v983_v19 = vrot.slane %v981_v9, 1  ;;  %v7423_v50 = vld [vmem:[%s8261_s1 + $0x1e0] sm:$0xff]  }
  0x74   : > { %6615 = vmatprep.subr.bf16.mxu1 %v7380_v8  ;;  %v976_v15 = vsel %vm884_vm2, %v971_v6, %v975_v7  ;;  %v1025_v6 = vshrl.u32 %v7411_v48, 16  ;;  %v7415_v7 = vld [vmem:[%s7617_s16 + $0x60] sm:$0xff]  }
  0x75   : > { %v984_v34 = vsel %vm884_vm2, %v979_v25, %v983_v19 }
  0x76   : > { %6580 = vmatmul.mubr.bf16.gmra.mrb[4].mxu1 %v920_v11  ;;  %v989_v11 = vshll.u32 %v7400_v4, 16 }
  0x77   : > { %6808 = vmatmul.mubr.bf16.gmra.mrb[24].mxu0 %v3300_v16  ;;  %6583 = vmatprep.mubr.bf16.mxu1 %v928_v17  ;;  %v985_v16 = vshrl.u32 %v7396_v63, 16  ;;  %v7401_v17 = vld [vmem:[%s7617_s16 + $0x38] sm:$0xff]  }
  0x78   : > { %6811 = vmatprep.mubr.bf16.mxu0 %v3302_v20  ;;  %6616 = vmatpush3.bf16.msra.mxu1 %v7380_v8  ;;  %v3812_v8 = vrot.slane %v7395_v62, 2  ;;  %v7402_v20 = vld [vmem:[%s7617_s16 + $0x70] sm:$0xff]   ;;  %v991_v26 = vrot.slane %v989_v11, 1  ;;  %v3816_v29 = vrot.slane %v7401_v17, 2  ;;  %v7429_v62 = vld [vmem:[%s8261_s1 + $0x1e8] sm:$0xff]  }
  0x79   : > { %6617 = vmatprep.subr.bf16.mxu1 %v7386_v21  ;;  %v987_v28 = vor.u32 %v985_v16, %v983_v19  ;;  %v7441_v16 = vld [vmem:[%s8261_s1 + $0x1f8] sm:$0xff]   ;;  %v3826_v19 = vrot.slane %v7415_v7, 2  ;;  %v7438_v7 = vld [vmem:[%s7617_s16 + $0x40] sm:$0xff]  }
  0x7a   : > { %v3813_v18 = vsel %vm3271_vm1, %v3810_v5, %v3812_v8  ;;  %v3815_v37 = vsel %vm3271_vm1, %v3812_v8, %v3814_v22  ;;  %v995_v44 = vor.u32 %v993_v32, %v991_v26  ;;  %v3819_v56 = vsel %vm3271_vm1, %v3816_v29, %v3818_v45  ;;  %v7435_v5 = vld [vmem:[%s8261_s1 + $0x1f0] sm:$0xff]   ;;  %v7418_v8 = vld [vmem:[%s7617_s16 + $0x8] sm:$0xff]  }
  0x7c   : > { %6618 = vmatpush3.bf16.msra.mxu1 %v7386_v21  ;;  %v7404_v21 = vld [vmem:[%s8261_s1 + $0x1c8] sm:$0xff]  }
  0x7d   : > { %6619 = vmatprep.subr.bf16.mxu1 %v7393_v33 }
  0x7e   : > { %6584 = vmatmul.mubr.bf16.gmra.mrb[8].mxu1 %v936_v36  ;;  %v1001_v36 = vshrl.u32 %v7402_v20, 16 }
  0x7f   : > { %6812 = vmatmul.mubr.bf16.gmra.mrb[28].mxu0 %v3304_v39  ;;  %6587 = vmatprep.mubr.bf16.mxu1 %v944_v40  ;;  %v7407_v39 = vld [vmem:[%s7617_s16 + $0x48] sm:$0xff]   ;;  %v3817_v40 = vsel %vm3271_vm1, %v3814_v22, %v3816_v29 }
  0x80   : > { %6815 = vmatprep.mubr.bf16.mxu0 %v3306_v42  ;;  %6620 = vmatpush3.bf16.msra.mxu1 %v7393_v33  ;;  %v997_v33 = vshll.u32 %v7402_v20, 16  ;;  %v3820_v49 = vrot.slane %v7407_v39, 2 }
  0x81   : > { %6621 = vmatprep.subr.bf16.mxu1 %v7399_v43 }
  0x82   : > { %v999_v42 = vrot.slane %v997_v33, 1  ;;  %v3821_v60 = vsel %vm3271_vm1, %v3818_v45, %v3820_v49  ;;  %v7425_v33 = vld [vmem:[%s7617_s16 + $0x78] sm:$0xff]  }
  0x84   : > { %6622 = vmatpush3.bf16.msra.mxu1 %v7399_v43  ;;  %v7408_v43 = vld [vmem:[%s7617_s16 + $0x80] sm:$0xff]   ;;  %v1003_v46 = vor.u32 %v1001_v36, %v999_v42 }
  0x85   : > { %6623 = vmatprep.subr.bf16.mxu1 %v7405_v53  ;;  %v1013_v52 = vshll.u32 %v7408_v43, 16 }
  0x86   : > { %6588 = vmatmul.mubr.bf16.gmra.mrb[12].mxu1 %v952_v55  ;;  %v1017_v55 = vshrl.u32 %v7408_v43, 16  ;;  %v1008_v57 = vsel %vm884_vm2, %v1003_v46, %v1007_v47  ;;  %v7430_v43 = vld [vmem:[%s7617_s16 + $0x28] sm:$0xff]  }
  0x87   : > { %6816 = vmatmul.mubr.bf16.gmra.mrb[32].mxu0 %v3308_v58  ;;  %6591 = vmatprep.mubr.bf16.mxu1 %v960_v59  ;;  %v1021_v58 = vshll.u32 %v7411_v48, 16  ;;  %v7413_v59 = vld [vmem:[%s7617_s16 + $0x58] sm:$0xff]   ;;  %v1015_v63 = vrot.slane %v1013_v52, 1  ;;  %v7431_v46 = vld [vmem:[%s7617_s16 + $0x88] sm:$0xff]  }
  0x88   : > { %6835 = vmatprep.mubr.bf16.mxu0 %v3809_v0  ;;  %6624 = vmatpush3.bf16.msra.mxu1 %v7405_v53  ;;  %v1000_v53 = vsel %vm884_vm2, %v995_v44, %v999_v42  ;;  %v1011_v0 = vor.u32 %v1009_v51, %v1007_v47  ;;  %v3824_v4 = vrot.slane %v7413_v59, 2  ;;  %v7428_v42 = vld [vmem:[%s8261_s1 + $0xc8] sm:$0xff]   ;;  %v1539_v47 = vrot.slane %v7426_v38, 1  ;;  %v7434_v51 = vld [vmem:[%s8261_s1 + $0xd0] sm:$0xff]   ;;  %v7444_v59 = vld [vmem:[%s7617_s16 + $0x18] sm:$0xff]  }
  0x89   : > { %6625 = vmatprep.subr.bf16.mxu1 %v7412_v1  ;;  %v1019_v2 = vor.u32 %v1017_v55, %v1015_v63  ;;  %v1023_v3 = vrot.slane %v1021_v58, 1  ;;  %v3836_v52 = vrot.slane %v7431_v46, 2  ;;  %v7938_v55 = vld [vmem:[%s7617_s16 + $0x98] sm:$0xff]  }
  0x8a   : > { %v1016_v9 = vsel %vm884_vm2, %v1011_v0, %v1015_v63  ;;  %v7466_v46 = vld [vmem:[%s8261_s1 + $0xf8] sm:$0xff]  }
  0x8b   : > { %v1024_v11 = vsel %vm884_vm2, %v1019_v2, %v1023_v3  ;;  %v1027_v17 = vor.u32 %v1025_v6, %v1023_v3  ;;  %v7447_v6 = vld [vmem:[%s8261_s1 + $0xe0] sm:$0xff]  }
  0x8c   : > { %6626 = vmatpush3.bf16.msra.mxu1 %v7412_v1  ;;  %v3822_v1 = vrot.slane %v7409_v54, 2  ;;  %v7935_v54 = vld [vmem:[%s7617_s16 + $0x38] sm:$0xff]  }
  0x8d   : > { %6663 = vmatprep.subr.bf16.mxu1 %v7857_v23  ;;  %v1545_v0 = vrot.slane %v7935_v54, 1 }
  0x8e   : > { %6592 = vmatmul.mubr.bf16.gmra.mrb[16].mxu1 %v968_v12  ;;  %v7419_v12 = vld [vmem:[%s7617_s16 + $0x68] sm:$0xff]   ;;  %v3823_v13 = vsel %vm3271_vm1, %v3820_v49, %v3822_v1  ;;  %v1541_v49 = vrot.slane %v7430_v43, 1  ;;  %v7455_v43 = vld [vmem:[%s7617_s16 + $0x38] sm:$0xff]  }
  0x8f   : > { %6836 = vmatmul.mubr.bf16.vlgmr.msra.gmra.mrb[0].mxu0 %v3811_v14  ;;  %6595 = vmatprep.mubr.bf16.mxu1 %v976_v15  ;;  %v7417_v14 = vld [vmem:[%s7617_s16] sm:$0xfe]   ;;  %v3825_v15 = vsel %vm3271_vm1, %v3822_v1, %v3824_v4  ;;  %v3828_v22 = vrot.slane %v7419_v12, 2  ;;  %v3840_v1 = vrot.slane %v7938_v55, 2  ;;  %v4391_v54 = vshll.u32 %v7455_v43, 16 }
  0x90   : > { %6839 = vmatprep.mubr.bf16.mxu0 %v3813_v18  ;;  %6872 = vmatpush3.bf16.msra.mxu0 %v7810_v24  ;;  %v992_v24 = vsel %vm884_vm2, %v987_v28, %v991_v26  ;;  %v1031_v18 = vrot.slane %v1029_v10, 1  ;;  %v1532_v20 = vrot.slane %v7417_v14, 1  ;;  %v7420_v26 = vld [vmem:[%s7617_s16 + $0x10] sm:$0xff]   ;;  %v3827_v28 = vsel %vm3271_vm1, %v3824_v4, %v3826_v19  ;;  %v7442_v10 = vld [vmem:[%s7617_s16 + $0x48] sm:$0xff]   ;;  %v7446_v12 = vld [vmem:[%s7617_s16 + $0x20] sm:$0xff]  }
  0x91   : > { %6873 = vmatprep.subr.bf16.mxu0 %v7404_v21  ;;  %v3829_v32 = vsel %vm3271_vm1, %v3826_v19, %v3828_v22  ;;  %v1542_v58 = vsel %vm1531_vm3, %v1539_v47, %v1541_v49  ;;  %v4352_v4 = vshrl.u32 %v7444_v59, 16  ;;  %v4364_v27 = vshll.u32 %v7446_v12, 16  ;;  %v7450_v55 = vld [vmem:[%s7617_s16 + $0x60] sm:$0xff]  }
  0x92   : > { %v1032_v25 = vsel %vm884_vm2, %v1027_v17, %v1031_v18 }
  0x93   : > { %v4354_v18 = vrot.slane %v4352_v4, 2  ;;  %v1555_v4 = vrot.slane %v7450_v55, 1  ;;  %v7468_v55 = vld [vmem:[%s7617_s16 + $0x90] ss:$0 sps:$4 sm:$0x11]  }
  0x94   : > { %6874 = vmatpush3.bf16.msra.mxu0 %v7404_v21  ;;  %v1533_v21 = vrot.slane %v7418_v8, 1  ;;  %v7439_v8 = vld [vmem:[%s7617_s16 + $0xa0] ss:$0 sps:$4 sm:$0x33]  }
  0x95   : > { %6875 = vmatprep.subr.bf16.mxu0 %v7410_v30 }
  0x96   : > { %6596 = vmatmul.mubr.bf16.gmra.mrb[20].mxu1 %v984_v34  ;;  %v1534_v29 = vsel %vm1531_vm3, %v1532_v20, %v1533_v21  ;;  %v1535_v34 = vrot.slane %v7420_v26, 1  ;;  %v7453_v20 = vld [vmem:[%s8261_s1 + $0xe8] sm:$0xff]   ;;  %v1549_v26 = vrot.slane %v7442_v10, 1 }
  0x97   : > { %6840 = vmatmul.mubr.bf16.gmra.mrb[4].mxu0 %v3815_v37  ;;  %6599 = vmatprep.mubr.bf16.mxu1 %v992_v24  ;;  %v3832_v37 = vrot.slane %v7425_v33, 2  ;;  %v7914_v24 = vld [vmem:[%s8261_s1 + $0x200] sm:$0xff]   ;;  %v7459_v33 = vld [vmem:[%s8261_s1 + $0xf0] sm:$0xff]  }
  0x98   : > { %6843 = vmatprep.mubr.bf16.mxu0 %v3817_v40  ;;  %6876 = vmatpush3.bf16.msra.mxu0 %v7410_v30  ;;  %v7424_v30 = vld [vmem:[%s7617_s16 + $0x18] sm:$0xff]   ;;  %v1536_v39 = vsel %vm1531_vm3, %v1533_v21, %v1535_v34  ;;  %v7427_v40 = vld [vmem:[%s7617_s16 + $0x80] sm:$0xff]   ;;  %v1547_v21 = vrot.slane %v7438_v7, 1 }
  0x99   : > { %6877 = vmatprep.subr.bf16.mxu0 %v7416_v41  ;;  %v1537_v36 = vrot.slane %v7424_v30, 1  ;;  %v3833_v45 = vsel %vm3271_vm1, %v3830_v35, %v3832_v37  ;;  %v3834_v48 = vrot.slane %v7427_v40, 2  ;;  %v4366_v40 = vrot.slane %v4364_v27, 3 }
  0x9b   : > { %v1538_v44 = vsel %vm1531_vm3, %v1535_v34, %v1537_v36  ;;  %v7445_v34 = vld [vmem:[%s7617_s16 + $0x50] sm:$0xff]  }
  0x9c   : > { %6878 = vmatpush3.bf16.msra.mxu0 %v7416_v41  ;;  %v3831_v41 = vsel %vm3271_vm1, %v3828_v22, %v3830_v35  ;;  %v4361_v22 = vshrl.u32 %v7446_v12, 16  ;;  %v7451_v35 = vld [vmem:[%s7617_s16 + $0x30] sm:$0xff]  }
  0x9d   : > { %6879 = vmatprep.subr.bf16.mxu0 %v7423_v50 }
  0x9e   : > { %6600 = vmatmul.mubr.bf16.gmra.mrb[24].mxu1 %v1000_v53  ;;  %v7433_v53 = vld [vmem:[%s7617_s16 + $0x90] sm:$0xff]  }
  0x9f   : > { %6844 = vmatmul.mubr.bf16.gmra.mrb[8].mxu0 %v3819_v56  ;;  %6603 = vmatprep.mubr.bf16.mxu1 %v1008_v57  ;;  %v7443_v56 = vld [vmem:[%s7617_s16 + $0x10] sm:$0xfc]   ;;  %v3835_v57 = vsel %vm3271_vm1, %v3832_v37, %v3834_v48  ;;  %v3838_v63 = vrot.slane %v7433_v53, 2  ;;  %v4363_v37 = vrot.slane %v4361_v22, 2  ;;  %v4388_v53 = vshrl.u32 %v7455_v43, 16 }
  0xa0   : > { %6847 = vmatprep.mubr.bf16.mxu0 %v3821_v60  ;;  %6880 = vmatpush3.bf16.msra.mxu0 %v7423_v50  ;;  %v7432_v50 = vld [vmem:[%s7617_s16 + $0x30] sm:$0xff]   ;;  %v3837_v60 = vsel %vm3271_vm1, %v3834_v48, %v3836_v52  ;;  %v4344_v2 = vshrl.u32 %v7443_v56, 16  ;;  %v4347_v3 = vshll.u32 %v7443_v56, 16  ;;  %v4379_v48 = vshrl.u32 %v7451_v35, 16 }
  0xa1   : > { %6881 = vmatprep.subr.bf16.mxu0 %v7429_v62 }
  0xa2   : > { %v4346_v14 = vrot.slane %v4344_v2, 2  ;;  %v4349_v17 = vrot.slane %v4347_v3, 3  ;;  %v4381_v56 = vrot.slane %v4379_v48, 2  ;;  %v7458_v2 = vld [vmem:[%s8261_s1 + $0x208] sm:$0xff]   ;;  %v7996_v3 = vld [vmem:[%s8261_s1 + $0x100] sm:$0xff]  }
  0xa4   : > { %6882 = vmatpush3.bf16.msra.mxu0 %v7429_v62  ;;  %v1543_v62 = vrot.slane %v7432_v50, 1 }
  0xa5   : > { %6883 = vmatprep.subr.bf16.mxu0 %v7435_v5 }
  0xa6   : > { %6604 = vmatmul.mubr.bf16.gmra.mrb[28].mxu1 %v1016_v9  ;;  %v1544_v9 = vsel %vm1531_vm3, %v1541_v49, %v1543_v62  ;;  %v4367_v49 = vor.u32 %v4366_v40, %v4363_v37  ;;  %v7476_v37 = vld [vmem:[%s8261_s1 + $0x220] sm:$0xff]  }
  0xa7   : > { %6848 = vmatmul.mubr.bf16.gmra.mrb[12].mxu0 %v3823_v13  ;;  %6607 = vmatprep.mubr.bf16.mxu1 %v1024_v11  ;;  %v3839_v13 = vsel %vm3271_vm1, %v3836_v52, %v3838_v63  ;;  %v1546_v11 = vsel %vm1531_vm3, %v1543_v62, %v1545_v0  ;;  %v7461_v62 = vld [vmem:[%s7617_s16 + $0x48] sm:$0xff]  }
  0xa8   : > { %6851 = vmatprep.mubr.bf16.mxu0 %v3825_v15  ;;  %6884 = vmatpush3.bf16.msra.mxu0 %v7435_v5  ;;  %v4355_v5 = vshll.u32 %v7444_v59, 16  ;;  %v7449_v15 = vld [vmem:[%s7617_s16 + $0x28] sm:$0xff]   ;;  %v4406_v10 = vshrl.u32 %v7461_v62, 16 }
  0xa9   : > { %6885 = vmatprep.subr.bf16.mxu0 %v7441_v16 }
  0xaa   : > { %v4357_v19 = vrot.slane %v4355_v5, 3  ;;  %v4408_v22 = vrot.slane %v4406_v10, 2 }
  0xac   : > { %6886 = vmatpush3.bf16.msra.mxu0 %v7441_v16  ;;  %v3841_v16 = vsel %vm3271_vm1, %v3838_v63, %v3840_v1  ;;  %v4358_v30 = vor.u32 %v4357_v19, %v4354_v18 }
  0xad   : > { %6923 = vmatprep.subr.bf16.mxu0 %v7914_v24 }
  0xae   : > { %6608 = vmatmul.mubr.bf16.gmra.mrb[32].mxu1 %v1032_v25  ;;  %v3842_v25 = vrot.slane %v7439_v8, 2  ;;  %v4368_v59 = vsel %vm4342_vm4, %v4358_v30, %v4367_v49  ;;  %v7456_v8 = vld [vmem:[%s7617_s16 + $0x70] sm:$0xff]  }
  0xaf   : > { %6852 = vmatmul.mubr.bf16.gmra.mrb[16].mxu0 %v3827_v28  ;;  %6627 = vmatprep.mubr.bf16.mxu1 %v1534_v29  ;;  %v4370_v28 = vshrl.u32 %v7449_v15, 16  ;;  %v4350_v29 = vor.u32 %v4349_v17, %v4346_v14  ;;  %v7464_v14 = vld [vmem:[%s8261_s1 + $0x210] sm:$0xff]   ;;  %v1559_v27 = vrot.slane %v7456_v8, 1  ;;  %v7491_v8 = vld [vmem:[%s8261_s1 + $0x238] sm:$0xff]  }
  0xb0   : > { %6855 = vmatprep.mubr.bf16.mxu0 %v3829_v32  ;;  %v4373_v32 = vshll.u32 %v7449_v15, 16  ;;  %v3843_v38 = vsel %vm3271_vm1, %v3840_v1, %v3842_v25  ;;  %v4393_v1 = vrot.slane %v4391_v54, 3  ;;  %v7463_v15 = vld [vmem:[%s7617_s16 + $0x50] sm:$0xff]  }
  0xb6   : > { %6628 = vmatmul.mubr.bf16.vlgmr.msra.gmra.mrb[0].mxu1 %v1536_v39  ;;  %v1550_v39 = vsel %vm1531_vm3, %v1547_v21, %v1549_v26 }
  0xb7   : > { %6856 = vmatmul.mubr.bf16.gmra.mrb[20].mxu0 %v3831_v41  ;;  %6664 = vmatpush3.bf16.msra.mxu1 %v7857_v23  ;;  %v1540_v23 = vsel %vm1531_vm3, %v1537_v36, %v1539_v47  ;;  %v1548_v36 = vsel %vm1531_vm3, %v1545_v0, %v1547_v21  ;;  %v7448_v41 = vld [vmem:[%s7617_s16 + $0x58] sm:$0xff]   ;;  %v1551_v47 = vrot.slane %v7445_v34, 1  ;;  %v4390_v0 = vrot.slane %v4388_v53, 2 }
  0xb8   : > { %6631 = vmatprep.mubr.bf16.mxu1 %v1538_v44  ;;  %6859 = vmatprep.mubr.bf16.mxu0 %v3833_v45  ;;  %v4359_v44 = vsel %vm4342_vm4, %v4350_v29, %v4358_v30  ;;  %v4375_v45 = vrot.slane %v4373_v32, 3  ;;  %v1553_v50 = vrot.slane %v7448_v41, 1  ;;  %v4415_v29 = vshrl.u32 %v7463_v15, 16 }
  0xb9   : > { %6665 = vmatprep.subr.bf16.mxu1 %v7428_v42  ;;  %v4394_v12 = vor.u32 %v4393_v1, %v4390_v0  ;;  %v4418_v30 = vshll.u32 %v7463_v15, 16  ;;  %v7475_v0 = vld [vmem:[%s7617_s16 + $0x70] sm:$0xff]  }
  0xba   : > { %v1556_v17 = vsel %vm1531_vm3, %v1553_v50, %v1555_v4  ;;  %v4417_v41 = vrot.slane %v4415_v29, 2 }
  0xbb   : > { %6666 = vmatpush3.bf16.msra.mxu1 %v7428_v42  ;;  %v4372_v42 = vrot.slane %v4370_v28, 2 }
  0xbc   : > { %6667 = vmatprep.subr.bf16.mxu1 %v7434_v51 }
  0xbd   : > { %v4376_v52 = vor.u32 %v4375_v45, %v4372_v42  ;;  %v4420_v42 = vrot.slane %v4418_v30, 3 }
  0xbe   : > { %6632 = vmatmul.mubr.bf16.gmra.mrb[4].mxu1 %v1540_v23  ;;  %v1552_v23 = vsel %vm1531_vm3, %v1549_v26, %v1551_v47  ;;  %v7470_v26 = vld [vmem:[%s8261_s1 + $0x218] sm:$0xff]  }
  0xbf   : > { %6860 = vmatmul.mubr.bf16.gmra.mrb[24].mxu0 %v3835_v57  ;;  %6635 = vmatprep.mubr.bf16.mxu1 %v1542_v58  ;;  %v7983_v57 = vld [vmem:[%s7617_s16 + $0x68] sm:$0xff]   ;;  %v7457_v58 = vld [vmem:[%s7617_s16 + $0x40] sm:$0xff]   ;;  %v4377_v63 = vsel %vm4342_vm4, %v4367_v49, %v4376_v52  ;;  %v4421_v53 = vor.u32 %v4420_v42, %v4417_v41  ;;  %v7485_v41 = vld [vmem:[%s7617_s16 + $0x90] sm:$0xff]  }
  0xc0   : > { %6863 = vmatprep.mubr.bf16.mxu0 %v3837_v60  ;;  %6668 = vmatpush3.bf16.msra.mxu1 %v7434_v51  ;;  %v4382_v51 = vshll.u32 %v7451_v35, 16  ;;  %v1554_v60 = vsel %vm1531_vm3, %v1551_v47, %v1553_v50  ;;  %v1557_v5 = vrot.slane %v7983_v57, 1  ;;  %v7462_v35 = vld [vmem:[%s7617_s16 + $0x80] sm:$0xff]   ;;  %v7481_v49 = vld [vmem:[%s8261_s1 + $0x228] sm:$0xff]  }
  0xc1   : > { %6669 = vmatprep.subr.bf16.mxu1 %v7440_v61  ;;  %v7471_v57 = vld [vmem:[%s7617_s16 + $0x8] sm:$0xfe]  }
  0xc2   : > { %v1560_v40 = vsel %vm1531_vm3, %v1557_v5, %v1559_v27  ;;  %v2067_v10 = vrot.slane %v7471_v57, 1 }
  0xc4   : > { %6670 = vmatpush3.bf16.msra.mxu1 %v7440_v61  ;;  %v4384_v61 = vrot.slane %v4382_v51, 3  ;;  %v1563_v51 = vrot.slane %v7462_v35, 1 }
  0xc5   : > { %6671 = vmatprep.subr.bf16.mxu1 %v7447_v6 }
  0xc6   : > { %6636 = vmatmul.mubr.bf16.gmra.mrb[8].mxu1 %v1544_v9  ;;  %v4385_v7 = vor.u32 %v4384_v61, %v4381_v56  ;;  %v4400_v9 = vshll.u32 %v7457_v58, 16  ;;  %v7472_v61 = vld [vmem:[%s7617_s16 + $0x10] sm:$0xff]  }
  0xc7   : > { %6864 = vmatmul.mubr.bf16.gmra.mrb[28].mxu0 %v3839_v13  ;;  %6639 = vmatprep.mubr.bf16.mxu1 %v1546_v11  ;;  %v8003_v13 = vld [vmem:[%s7617_s16 + $0x78] sm:$0xff]   ;;  %v4409_v11 = vshll.u32 %v7461_v62, 16 }
  0xc8   : > { %6867 = vmatprep.mubr.bf16.mxu0 %v3841_v16  ;;  %6672 = vmatpush3.bf16.msra.mxu1 %v7447_v6  ;;  %v4397_v6 = vshrl.u32 %v7457_v58, 16  ;;  %v7467_v16 = vld [vmem:[%s7617_s16 + $0x58] sm:$0xff]   ;;  %v4386_v18 = vsel %vm4342_vm4, %v4376_v52, %v4385_v7  ;;  %v4395_v21 = vsel %vm4342_vm4, %v4385_v7, %v4394_v12  ;;  %v1561_v28 = vrot.slane %v8003_v13, 1 }
  0xc9   : > { %6673 = vmatprep.subr.bf16.mxu1 %v7453_v20  ;;  %v4411_v25 = vrot.slane %v4409_v11, 3  ;;  %v4424_v32 = vshrl.u32 %v7467_v16, 16  ;;  %v2068_v11 = vrot.slane %v7472_v61, 1 }
  0xca   : > { %v4399_v19 = vrot.slane %v4397_v6, 2  ;;  %v1564_v62 = vsel %vm1531_vm3, %v1561_v28, %v1563_v51 }
  0xcb   : > { %v4412_v34 = vor.u32 %v4411_v25, %v4408_v22  ;;  %v4426_v45 = vrot.slane %v4424_v32, 2  ;;  %v2069_v25 = vsel %vm1531_vm3, %v2067_v10, %v2068_v11 }
  0xcc   : > { %6674 = vmatpush3.bf16.msra.mxu1 %v7453_v20  ;;  %v4402_v20 = vrot.slane %v4400_v9, 3  ;;  %v1567_v9 = vrot.slane %v7468_v55, 1 }
  0xcd   : > { %6675 = vmatprep.subr.bf16.mxu1 %v7459_v33  ;;  %v4422_v1 = vsel %vm4342_vm4, %v4412_v34, %v4421_v53 }
  0xce   : > { %6640 = vmatmul.mubr.bf16.gmra.mrb[12].mxu1 %v1548_v36  ;;  %v4427_v36 = vshll.u32 %v7467_v16, 16 }
  0xcf   : > { %6868 = vmatmul.mubr.bf16.gmra.mrb[32].mxu0 %v3843_v38  ;;  %6643 = vmatprep.mubr.bf16.mxu1 %v1550_v39  ;;  %v8023_v38 = vld [vmem:[%s7617_s16 + $0x88] sm:$0xff]   ;;  %v7469_v39 = vld [vmem:[%s7617_s16 + $0x60] sm:$0xff]  }
  0xd0   : > { %6887 = vmatprep.mubr.bf16.mxu0 %v4359_v44  ;;  %6676 = vmatpush3.bf16.msra.mxu1 %v7459_v33  ;;  %v4403_v33 = vor.u32 %v4402_v20, %v4399_v19  ;;  %v1562_v44 = vsel %vm1531_vm3, %v1559_v27, %v1561_v28  ;;  %v4429_v48 = vrot.slane %v4427_v36, 3  ;;  %v4433_v50 = vshrl.u32 %v7469_v39, 16  ;;  %v7477_v20 = vld [vmem:[%s7617_s16 + $0x20] sm:$0xff]   ;;  %v7483_v27 = vld [vmem:[%s7617_s16 + $0x88] sm:$0xff]  }
  0xd1   : > { %6677 = vmatprep.subr.bf16.mxu1 %v7466_v46  ;;  %v4436_v52 = vshll.u32 %v7469_v39, 16  ;;  %v1565_v54 = vrot.slane %v8023_v38, 1  ;;  %v4478_v36 = vshrl.u32 %v7483_v27, 16  ;;  %v2072_v38 = vrot.slane %v7477_v20, 1  ;;  %v7492_v20 = vld [vmem:[%s7617_s16 + $0x50] sm:$0xff]  }
  0xd2   : > { %v4404_v43 = vsel %vm4342_vm4, %v4394_v12, %v4403_v33  ;;  %v4413_v47 = vsel %vm4342_vm4, %v4403_v33, %v4412_v34  ;;  %v4430_v56 = vor.u32 %v4429_v48, %v4426_v45  ;;  %v4451_v12 = vshrl.u32 %v7475_v0, 16 }
  0xd4   : > { %6678 = vmatpush3.bf16.msra.mxu1 %v7466_v46  ;;  %v7473_v46 = vld [vmem:[%s7617_s16 + $0x68] sm:$0xff]   ;;  %v4431_v6 = vsel %vm4342_vm4, %v4421_v53, %v4430_v56  ;;  %v4453_v19 = vrot.slane %v4451_v12, 2  ;;  %v4487_v53 = vshrl.u32 %v7485_v41, 16 }
  0xd5   : > { %6975 = vmatprep.subr.bf16.mxu1 %v7996_v3  ;;  %v4445_v58 = vshll.u32 %v7473_v46, 16 }
  0xd6   : > { %6644 = vmatmul.mubr.bf16.gmra.mrb[16].mxu1 %v1552_v23  ;;  %v4442_v23 = vshrl.u32 %v7473_v46, 16 }
  0xd7   : > { %6888 = vmatmul.mubr.bf16.vlgmr.msra.gmra.mrb[0].mxu0 %v4368_v59  ;;  %6647 = vmatprep.mubr.bf16.mxu1 %v1554_v60  ;;  %v7486_v59 = vld [vmem:[%s8261_s1 + $0x230] sm:$0xff]   ;;  %v4435_v60 = vrot.slane %v4433_v50, 2  ;;  %v4447_v7 = vrot.slane %v4445_v58, 3 }
  0xd8   : > { %6891 = vmatprep.mubr.bf16.mxu0 %v4377_v63  ;;  %6924 = vmatpush3.bf16.msra.mxu0 %v7914_v24  ;;  %v1558_v24 = vsel %vm1531_vm3, %v1555_v4, %v1557_v5  ;;  %v4438_v63 = vrot.slane %v4436_v52, 3  ;;  %v4444_v4 = vrot.slane %v4442_v23, 2  ;;  %v7478_v5 = vld [vmem:[%s7617_s16 + $0x78] sm:$0xff]   ;;  %v4490_v23 = vshll.u32 %v7485_v41, 16  ;;  %v7498_v41 = vld [vmem:[%s7617_s16 + $0x28] sm:$0xff]  }
  0xd9   : > { %6925 = vmatprep.subr.bf16.mxu0 %v7458_v2  ;;  %v4460_v16 = vshrl.u32 %v7478_v5, 16 }
  0xda   : > { %v4439_v13 = vor.u32 %v4438_v63, %v4435_v60  ;;  %v4448_v15 = vor.u32 %v4447_v7, %v4444_v4  ;;  %v7484_v60 = vld [vmem:[%s7617_s16 + $0x38] sm:$0xff]   ;;  %v7487_v4 = vld [vmem:[%s7617_s16 + $0x40] sm:$0xff]  }
  0xdb   : > { %v4462_v29 = vrot.slane %v4460_v16, 2  ;;  %v2080_v10 = vrot.slane %v7487_v4, 1  ;;  %v7489_v16 = vld [vmem:[%s7617_s16 + $0x48] sm:$0xff]  }
  0xdc   : > { %6926 = vmatpush3.bf16.msra.mxu0 %v7458_v2  ;;  %v1566_v2 = vsel %vm1531_vm3, %v1563_v51, %v1565_v54  ;;  %v4440_v22 = vsel %vm4342_vm4, %v4430_v56, %v4439_v13  ;;  %v4449_v28 = vsel %vm4342_vm4, %v4439_v13, %v4448_v15  ;;  %v7532_v56 = vld [vmem:[%s8261_s1 + $0x108] sm:$0xff]  }
  0xdd   : > { %6927 = vmatprep.subr.bf16.mxu0 %v7464_v14 }
  0xde   : > { %6648 = vmatmul.mubr.bf16.gmra.mrb[20].mxu1 %v1556_v17  ;;  %v4463_v17 = vshll.u32 %v7478_v5, 16 }
  0xdf   : > { %6892 = vmatmul.mubr.bf16.gmra.mrb[4].mxu0 %v4386_v18  ;;  %6651 = vmatprep.mubr.bf16.mxu1 %v1558_v24  ;;  %v7474_v18 = vld [vmem:[%s7617_s16 + $0x18] sm:$0xff]   ;;  %v1568_v24 = vsel %vm1531_vm3, %v1565_v54, %v1567_v9 }
  0xe0   : > { %6895 = vmatprep.mubr.bf16.mxu0 %v4395_v21  ;;  %6928 = vmatpush3.bf16.msra.mxu0 %v7464_v14  ;;  %v4454_v14 = vshll.u32 %v7475_v0, 16  ;;  %v7480_v21 = vld [vmem:[%s7617_s16 + $0x80] sm:$0xff]   ;;  %v4465_v30 = vrot.slane %v4463_v17, 3  ;;  %v2070_v32 = vrot.slane %v7474_v18, 1 }
  0xe1   : > { %6929 = vmatprep.subr.bf16.mxu0 %v7470_v26  ;;  %v4469_v33 = vshrl.u32 %v7480_v21, 16  ;;  %v4472_v34 = vshll.u32 %v7480_v21, 16 }
  0xe2   : > { %v4466_v39 = vor.u32 %v4465_v30, %v4462_v29  ;;  %v2071_v42 = vsel %vm1531_vm3, %v2068_v11, %v2070_v32  ;;  %v2073_v50 = vsel %vm1531_vm3, %v2070_v32, %v2072_v38  ;;  %v2084_v29 = vrot.slane %v7492_v20, 1 }
  0xe3   : > { %v4474_v46 = vrot.slane %v4472_v34, 3 }
  0xe4   : > { %6930 = vmatpush3.bf16.msra.mxu0 %v7470_v26  ;;  %v4456_v26 = vrot.slane %v4454_v14, 3  ;;  %v7534_v14 = vld [vmem:[%s8261_s1 + $0x118] sm:$0xff]  }
  0xe5   : > { %6931 = vmatprep.subr.bf16.mxu0 %v7476_v37 }
  0xe6   : > { %6652 = vmatmul.mubr.bf16.gmra.mrb[24].mxu1 %v1560_v40  ;;  %v4457_v35 = vor.u32 %v4456_v26, %v4453_v19  ;;  %v7479_v40 = vld [vmem:[%s7617_s16 + $0x28] sm:$0xff]   ;;  %v7535_v26 = vld [vmem:[%s8261_s1 + $0x120] sm:$0xff]  }
  0xe7   : > { %6896 = vmatmul.mubr.bf16.gmra.mrb[8].mxu0 %v4404_v43  ;;  %6655 = vmatprep.mubr.bf16.mxu1 %v1562_v44  ;;  %v4471_v43 = vrot.slane %v4469_v33, 2  ;;  %v7482_v44 = vld [vmem:[%s7617_s16 + $0x30] sm:$0xff]   ;;  %v2074_v52 = vrot.slane %v7479_v40, 1  ;;  %v7536_v33 = vld [vmem:[%s8261_s1 + $0x128] sm:$0xff]  }
  0xe8   : > { %6899 = vmatprep.mubr.bf16.mxu0 %v4413_v47  ;;  %6932 = vmatpush3.bf16.msra.mxu0 %v7476_v37  ;;  %v4481_v37 = vshll.u32 %v7483_v27, 16  ;;  %v4458_v45 = vsel %vm4342_vm4, %v4448_v15, %v4457_v35  ;;  %v4480_v47 = vrot.slane %v4478_v36, 2  ;;  %v4467_v51 = vsel %vm4342_vm4, %v4457_v35, %v4466_v39  ;;  %v7495_v35 = vld [vmem:[%s7617_s16 + $0x58] sm:$0xff]  }
  0xe9   : > { %6933 = vmatprep.subr.bf16.mxu0 %v7481_v49  ;;  %v4475_v54 = vor.u32 %v4474_v46, %v4471_v43  ;;  %v2076_v55 = vrot.slane %v7482_v44, 1  ;;  %v2075_v61 = vsel %vm1531_vm3, %v2072_v38, %v2074_v52  ;;  %v2082_v27 = vrot.slane %v7489_v16, 1  ;;  %v7496_v38 = vld [vmem:[%s7617_s16 + $0x20] sm:$0xff]  }
  0xea   : > { %v4483_v48 = vrot.slane %v4481_v37, 3  ;;  %v2086_v43 = vrot.slane %v7495_v35, 1  ;;  %v5015_v44 = vrot.slane %v7496_v38, 3  ;;  %v5017_v46 = vrot.slane %v7498_v41, 3 }
  0xeb   : > { %v4476_v63 = vsel %vm4342_vm4, %v4466_v39, %v4475_v54  ;;  %v2077_v0 = vsel %vm1531_vm3, %v2074_v52, %v2076_v55  ;;  %v2083_v34 = vsel %vm1531_vm3, %v2080_v10, %v2082_v27  ;;  %v2085_v37 = vsel %vm1531_vm3, %v2082_v27, %v2084_v29  ;;  %v7497_v39 = vld [vmem:[%s7617_s16 + $0x60] sm:$0xff]   ;;  %v7500_v52 = vld [vmem:[%s7617_s16 + $0x30] sm:$0xff]  }
  0xec   : > { %6934 = vmatpush3.bf16.msra.mxu0 %v7481_v49  ;;  %v7488_v49 = vld [vmem:[%s7617_s16 + $0x98] sm:$0xff]   ;;  %v4484_v57 = vor.u32 %v4483_v48, %v4480_v47  ;;  %v2087_v48 = vsel %vm1531_vm3, %v2084_v29, %v2086_v43 }
  0xed   : > { %6935 = vmatprep.subr.bf16.mxu0 %v7486_v59  ;;  %v4496_v58 = vshrl.u32 %v7488_v49, 16  ;;  %v7538_v47 = vld [vmem:[%s8261_s1 + $0x138] sm:$0xff]  }
  0xee   : > { %6656 = vmatmul.mubr.bf16.gmra.mrb[28].mxu1 %v1564_v62  ;;  %v4489_v62 = vrot.slane %v4487_v53, 2  ;;  %v4485_v5 = vsel %vm4342_vm4, %v4475_v54, %v4484_v57  ;;  %v7501_v53 = vld [vmem:[%s7617_s16 + $0x70] sm:$0xff]   ;;  %v5018_v54 = vsel %vm5011_vm5, %v5015_v44, %v5017_v46 }
  0xef   : > { %6900 = vmatmul.mubr.bf16.gmra.mrb[12].mxu0 %v4422_v1  ;;  %6659 = vmatprep.mubr.bf16.mxu1 %v1566_v2  ;;  %v4492_v1 = vrot.slane %v4490_v23, 3  ;;  %v7533_v2 = vld [vmem:[%s8261_s1 + $0x110] sm:$0xff]  }
  0xf0   : > { %6903 = vmatprep.mubr.bf16.mxu0 %v4431_v6  ;;  %6936 = vmatpush3.bf16.msra.mxu0 %v7486_v59  ;;  %v4499_v59 = vshll.u32 %v7488_v49, 16  ;;  %v4498_v6 = vrot.slane %v4496_v58, 2  ;;  %v7499_v49 = vld [vmem:[%s7617_s16 + $0x68] sm:$0xff]  }
  0xf1   : > { %6937 = vmatprep.subr.bf16.mxu0 %v7491_v8  ;;  %v4493_v9 = vor.u32 %v4492_v1, %v4489_v62  ;;  %v2090_v23 = vrot.slane %v7499_v49, 1  ;;  %v7506_v1 = vld [vmem:[%s7617_s16 + $0x48] sm:$0xff]   ;;  %v7516_v49 = vld [vmem:[%s7617_s16 + $0x70] sm:$0xff]  }
  0xf2   : > { %v4501_v7 = vrot.slane %v4499_v59, 3 }
  0xf3   : > { %v4494_v17 = vsel %vm4342_vm4, %v4484_v57, %v4493_v9  ;;  %v2092_v57 = vrot.slane %v7501_v53, 1 }
  0xf4   : > { %6938 = vmatpush3.bf16.msra.mxu0 %v7491_v8  ;;  %v2078_v8 = vrot.slane %v7484_v60, 1  ;;  %v4502_v11 = vor.u32 %v4501_v7, %v4498_v6  ;;  %v7503_v60 = vld [vmem:[%s7617_s16 + $0x78] sm:$0xff]   ;;  %v5025_v6 = vrot.slane %v7506_v1, 3 }
  0xf5   : > { %v2093_v62 = vsel %vm1531_vm3, %v2090_v23, %v2092_v57 }
  0xf6   : > { %6660 = vmatmul.mubr.bf16.gmra.mrb[32].mxu1 %v1568_v24  ;;  %v2079_v15 = vsel %vm1531_vm3, %v2076_v55, %v2078_v8  ;;  %v2081_v18 = vsel %vm1531_vm3, %v2078_v8, %v2080_v10  ;;  %v4503_v21 = vsel %vm4342_vm4, %v4493_v9, %v4502_v11  ;;  %v7502_v55 = vld [vmem:[%s7617_s16 + $0x38] sm:$0xff]   ;;  %v7507_v8 = vld [vmem:[%s7617_s16 + $0x88] sm:$0xff]  }
  0xf7   : > { %6904 = vmatmul.mubr.bf16.gmra.mrb[16].mxu0 %v4440_v22  ;;  %6679 = vmatprep.mubr.bf16.mxu1 %v2069_v25  ;;  %v7493_v22 = vld [vmem:[%s7617_s16 + $0x10] sm:$0xf8]   ;;  %v7494_v25 = vld [vmem:[%s7617_s16 + $0x18] sm:$0xff]   ;;  %v5021_v58 = vrot.slane %v7502_v55, 3  ;;  %v2098_v16 = vrot.slane %v7507_v8, 1  ;;  %v7522_v8 = vld [vmem:[%s7617_s16 + $0x88] sm:$0xff]  }
  0xf8   : > { %6907 = vmatprep.mubr.bf16.mxu0 %v4449_v28  ;;  %v5012_v30 = vrot.slane %v7493_v22, 3  ;;  %v5013_v32 = vrot.slane %v7494_v25, 3  ;;  %v7511_v22 = vld [vmem:[%s7617_s16 + $0x98] ss:$0 sps:$4 sm:$0x11]  }
  0xf9   : > { %v7515_v25 = vld [vmem:[%s7617_s16 + $0x58] sm:$0xff]   ;;  %v2102_v35 = vrot.slane %v7511_v22, 1  ;;  %v7524_v22 = vld [vmem:[%s7617_s16 + $0x90] sm:$0xff]  }
  0xfa   : > { %v5014_v40 = vsel %vm5011_vm5, %v5012_v30, %v5013_v32 }
  0xfe   : > { %6680 = vmatmul.mubr.bf16.vlgmr.msra.gmra.mrb[0].mxu1 %v2071_v42  ;;  %v7537_v42 = vld [vmem:[%s8261_s1 + $0x130] sm:$0xff]  }
  0xff   : > { %6908 = vmatmul.mubr.bf16.gmra.mrb[20].mxu0 %v4458_v45  ;;  %6983 = vmatpush3.bf16.msra.mxu1 %v7996_v3  ;;  %v7490_v3 = vld [vmem:[%s7617_s16 + $0xa0] ss:$0 sps:$4 sm:$0x77]   ;;  %v2088_v45 = vrot.slane %v7497_v39, 1 }
 0x100   : > { %6683 = vmatprep.mubr.bf16.mxu1 %v2073_v50  ;;  %6911 = vmatprep.mubr.bf16.mxu0 %v4467_v51  ;;  %v4505_v12 = vshrl.u32 %v7490_v3, 16  ;;  %v4508_v13 = vshll.u32 %v7490_v3, 16  ;;  %v5016_v50 = vsel %vm5011_vm5, %v5013_v32, %v5015_v44  ;;  %v7504_v3 = vld [vmem:[%s7617_s16 + $0x40] sm:$0xff]  }
 0x101   : > { %6976 = vmatprep.subr.bf16.mxu1 %v7532_v56  ;;  %v2089_v51 = vsel %vm1531_vm3, %v2086_v43, %v2088_v45  ;;  %v2091_v59 = vsel %vm1531_vm3, %v2088_v45, %v2090_v23  ;;  %v5023_v4 = vrot.slane %v7504_v3, 3  ;;  %v7517_v32 = vld [vmem:[%s7617_s16 + $0x60] sm:$0xff]  }
 0x102   : > { %v4507_v24 = vrot.slane %v4505_v12, 2  ;;  %v4510_v19 = vrot.slane %v4508_v13, 3  ;;  %v7508_v12 = vld [vmem:[%s7617_s16 + $0x50] sm:$0xff]   ;;  %v2705_v41 = vshll.u32 %v7517_v32, 16 }
 0x103   : > { %6984 = vmatpush3.bf16.msra.mxu1 %v7532_v56  ;;  %v5019_v56 = vrot.slane %v7500_v52, 3  ;;  %v5024_v9 = vsel %vm5011_vm5, %v5021_v58, %v5023_v4  ;;  %v7509_v13 = vld [vmem:[%s7617_s16 + $0x90] sm:$0xff]  }
 0x104   : > { %6977 = vmatprep.subr.bf16.mxu1 %v7533_v2  ;;  %v4511_v28 = vor.u32 %v4510_v19, %v4507_v24  ;;  %v7521_v52 = vld [vmem:[%s7617_s16 + $0x70] sm:$0xff]  }
 0x106   : > { %6684 = vmatmul.mubr.bf16.gmra.mrb[4].mxu1 %v2075_v61  ;;  %v4512_v36 = vsel %vm4342_vm4, %v4502_v11, %v4511_v28  ;;  %v5020_v61 = vsel %vm5011_vm5, %v5017_v46, %v5019_v56  ;;  %v7513_v11 = vld [vmem:[%s7617_s16 + $0x50] sm:$0xff]   ;;  %v7512_v28 = vld [vmem:[%s7617_s16 + $0x60] sm:$0xff]   ;;  %v7519_v46 = vld [vmem:[%s7617_s16 + $0x68] sm:$0xff]  }
 0x107   : > { %6912 = vmatmul.mubr.bf16.gmra.mrb[24].mxu0 %v4476_v63  ;;  %6687 = vmatprep.mubr.bf16.mxu1 %v2077_v0  ;;  %v7505_v63 = vld [vmem:[%s7617_s16 + $0x80] sm:$0xff]   ;;  %v5022_v0 = vsel %vm5011_vm5, %v5019_v56, %v5021_v58  ;;  %v2684_v24 = vshrl.u32 %v7513_v11, 16  ;;  %v2687_v19 = vshll.u32 %v7513_v11, 16  ;;  %v5031_v38 = vrot.slane %v7512_v28, 3 }
 0x108   : > { %6915 = vmatprep.mubr.bf16.mxu0 %v4485_v5  ;;  %6985 = vmatpush3.bf16.msra.mxu1 %v7533_v2  ;;  %v2094_v2 = vrot.slane %v7503_v60, 1  ;;  %v2096_v5 = vrot.slane %v7505_v63, 1  ;;  %v2711_v23 = vshrl.u32 %v7519_v46, 16  ;;  %v2714_v56 = vshll.u32 %v7519_v46, 16  ;;  %v7523_v63 = vld [vmem:[%s7617_s16 + $0x78] sm:$0xff]  }
 0x109   : > { %6978 = vmatprep.subr.bf16.mxu1 %v7534_v14  ;;  %v2686_v29 = vrot.slane %v2684_v24, 1  ;;  %v2689_v30 = vrot.slane %v2687_v19, 2  ;;  %v2720_v58 = vshrl.u32 %v7521_v52, 16  ;;  %v7527_v19 = vld [vmem:[%s7617_s16 + $0x88] sm:$0xff]  }
 0x10a   : > { %v2095_v7 = vsel %vm1531_vm3, %v2092_v57, %v2094_v2  ;;  %v2097_v10 = vsel %vm1531_vm3, %v2094_v2, %v2096_v5  ;;  %v5035_v57 = vrot.slane %v7516_v49, 3  ;;  %v2716_v3 = vrot.slane %v2714_v56, 2  ;;  %v7520_v2 = vld [vmem:[%s7617_s16 + $0x80] sm:$0xff]  }
 0x10b   : > { %v2690_v39 = vor.u32 %v2689_v30, %v2686_v29  ;;  %v7526_v29 = vld [vmem:[%s7617_s16 + $0x98] sm:$0xff]  }
 0x10c   : > { %6986 = vmatpush3.bf16.msra.mxu1 %v7534_v14  ;;  %v5026_v14 = vsel %vm5011_vm5, %v5023_v4, %v5025_v6  ;;  %v2722_v4 = vrot.slane %v2720_v58, 1 }
 0x10d   : > { %6979 = vmatprep.subr.bf16.mxu1 %v7535_v26 }
 0x10e   : > { %6688 = vmatmul.mubr.bf16.gmra.mrb[8].mxu1 %v2079_v15  ;;  %v7510_v15 = vld [vmem:[%s7617_s16 + $0x58] sm:$0xff]  }
 0x10f   : > { %6916 = vmatmul.mubr.bf16.gmra.mrb[28].mxu0 %v4494_v17  ;;  %6691 = vmatprep.mubr.bf16.mxu1 %v2081_v18  ;;  %v5027_v17 = vrot.slane %v7508_v12, 3  ;;  %v2100_v18 = vrot.slane %v7509_v13, 1  ;;  %v5029_v20 = vrot.slane %v7510_v15, 3  ;;  %v2732_v12 = vshll.u32 %v7523_v63, 16 }
 0x110   : > { %6919 = vmatprep.mubr.bf16.mxu0 %v4503_v21  ;;  %6987 = vmatpush3.bf16.msra.mxu1 %v7535_v26  ;;  %v2099_v21 = vsel %vm1531_vm3, %v2096_v5, %v2098_v16  ;;  %v5039_v13 = vrot.slane %v7520_v2, 3 }
 0x111   : > { %6980 = vmatprep.subr.bf16.mxu1 %v7536_v33  ;;  %v5028_v26 = vsel %vm5011_vm5, %v5025_v6, %v5027_v17  ;;  %v2101_v27 = vsel %vm1531_vm3, %v2098_v16, %v2100_v18  ;;  %v2103_v43 = vsel %vm1531_vm3, %v2100_v18, %v2102_v35  ;;  %v7525_v6 = vld [vmem:[%s7617_s16 + $0x80] sm:$0xff]   ;;  %v5041_v16 = vrot.slane %v7522_v8, 3 }
 0x112   : > { %v2741_v15 = vshll.u32 %v7525_v6, 16  ;;  %v2734_v24 = vrot.slane %v2732_v12, 2 }
 0x113   : > { %v5042_v28 = vsel %vm5011_vm5, %v5039_v13, %v5041_v16 }
 0x114   : > { %6988 = vmatpush3.bf16.msra.mxu1 %v7536_v33  ;;  %v5030_v33 = vsel %vm5011_vm5, %v5027_v17, %v5029_v20 }
 0x115   : > { %6981 = vmatprep.subr.bf16.mxu1 %v7537_v42 }
 0x116   : > { %6692 = vmatmul.mubr.bf16.gmra.mrb[12].mxu1 %v2083_v34  ;;  %v7514_v34 = vld [vmem:[%s7617_s16 + $0x68] sm:$0xff]  }
 0x117   : > { %6920 = vmatmul.mubr.bf16.gmra.mrb[32].mxu0 %v4512_v36  ;;  %6695 = vmatprep.mubr.bf16.mxu1 %v2085_v37  ;;  %v2693_v36 = vshrl.u32 %v7515_v25, 16  ;;  %v2696_v37 = vshll.u32 %v7515_v25, 16 }
 0x118   : > { %6939 = vmatprep.mubr.bf16.mxu0 %v5014_v40  ;;  %6989 = vmatpush3.bf16.msra.mxu1 %v7537_v42  ;;  %v2702_v40 = vshrl.u32 %v7517_v32, 16  ;;  %v5033_v42 = vrot.slane %v7514_v34, 3  ;;  %v2747_v32 = vshrl.u32 %v7527_v19, 16  ;;  %v5043_v34 = vrot.slane %v7524_v22, 3 }
 0x119   : > { %6982 = vmatprep.subr.bf16.mxu1 %v7538_v47  ;;  %v2695_v44 = vrot.slane %v2693_v36, 1  ;;  %v2698_v45 = vrot.slane %v2696_v37, 2 }
 0x11a   : > { %v5034_v53 = vsel %vm5011_vm5, %v5031_v38, %v5033_v42 }
 0x11b   : > { %v2699_v55 = vor.u32 %v2698_v45, %v2695_v44  ;;  %v7528_v45 = vld [vmem:[%s7617_s16 + $0xa0] ss:$0 sps:$4 sm:$0x77]  }
 0x11c   : > { %6990 = vmatpush3.bf16.msra.mxu1 %v7538_v47  ;;  %v5032_v47 = vsel %vm5011_vm5, %v5029_v20, %v5031_v38  ;;  %v5045_v38 = vrot.slane %v7526_v29, 3 }
 0x11e   : > { %6696 = vmatmul.mubr.bf16.gmra.mrb[16].mxu1 %v2087_v48  ;;  %v2691_v48 = vsel %vm2602_vm0, %v7686_v31, %v2690_v39 }
 0x11f   : > { %6940 = vmatmul.mubr.bf16.vlgmr.msra.gmra.mrb[0].mxu0 %v5016_v50  ;;  %6699 = vmatprep.mubr.bf16.mxu1 %v2089_v51  ;;  %v2704_v50 = vrot.slane %v2702_v40, 1  ;;  %v2707_v51 = vrot.slane %v2705_v41, 2  ;;  %v2749_v40 = vrot.slane %v2747_v32, 1 }
 0x120   : > { %6943 = vmatprep.mubr.bf16.mxu0 %v5018_v54  ;;  %v7518_v54 = vld [vmem:[%s7617_s16 + $0x78] sm:$0xff]  }
 0x121   : > { %v2708_v31 = vor.u32 %v2707_v51, %v2704_v50  ;;  %v5037_v60 = vrot.slane %v7518_v54, 3 }
 0x123   : > { %v2709_v1 = vsel %vm2602_vm0, %v2699_v55, %v2708_v31  ;;  %v5040_v20 = vsel %vm5011_vm5, %v5037_v60, %v5039_v13  ;;  %v8191_v13 = vld [vmem:[%s8262_s2] ss:$0 sm:$0xff] }
 0x126   : > { %6700 = vmatmul.mubr.bf16.gmra.mrb[20].mxu1 %v2091_v59  ;;  %v2723_v59 = vshll.u32 %v7521_v52, 16  ;;  %v5047_v52 = vrot.slane %v7528_v45, 3 }
 0x127   : > { %6944 = vmatmul.mubr.bf16.gmra.mrb[4].mxu0 %v5020_v61  ;;  %6703 = vmatprep.mubr.bf16.mxu1 %v2093_v62  ;;  %v2700_v61 = vsel %vm2602_vm0, %v2690_v39, %v2699_v55  ;;  %v2713_v62 = vrot.slane %v2711_v23, 1 }
 0x128   : > { %6947 = vmatprep.mubr.bf16.mxu0 %v5022_v0  ;;  %v5036_v0 = vsel %vm5011_vm5, %v5033_v42, %v5035_v57  ;;  %v2725_v5 = vrot.slane %v2723_v59, 2  ;;  %v7530_v42 = vld [vmem:[%s7617_s16 + $0x98] ss:$0 sps:$4 sm:$0x33]   ;;  %v5048_v56 = vsel %vm5011_vm5, %v5045_v38, %v5047_v52 }
 0x129   : > { %v2765_v50 = vshrl.u32 %v7530_v42, 16  ;;  %v2768_v51 = vshll.u32 %v7530_v42, 16 }
 0x12a   : > { %v2726_v11 = vor.u32 %v2725_v5, %v2722_v4 }
 0x12b   : > { %v2767_v55 = vrot.slane %v2765_v50, 1  ;;  %v2770_v23 = vrot.slane %v2768_v51, 2 }
 0x12e   : > { %6704 = vmatmul.mubr.bf16.gmra.mrb[24].mxu1 %v2095_v7  ;;  %v5038_v7 = vsel %vm5011_vm5, %v5035_v57, %v5037_v60 }
 0x12f   : > { %6948 = vmatmul.mubr.bf16.gmra.mrb[8].mxu0 %v5024_v9  ;;  %6707 = vmatprep.mubr.bf16.mxu1 %v2097_v10  ;;  %v2717_v9 = vor.u32 %v2716_v3, %v2713_v62  ;;  %v2729_v10 = vshrl.u32 %v7523_v63, 16 }
 0x130   : > { %6951 = vmatprep.mubr.bf16.mxu0 %v5026_v14  ;;  %v2738_v14 = vshrl.u32 %v7525_v6, 16 }
 0x131   : > { %v2718_v17 = vsel %vm2602_vm0, %v2708_v31, %v2717_v9  ;;  %v2731_v18 = vrot.slane %v2729_v10, 1  ;;  %v2771_v31 = vor.u32 %v2770_v23, %v2767_v55 }
 0x132   : > { %v2740_v25 = vrot.slane %v2738_v14, 1 }
 0x133   : > { %v2735_v30 = vor.u32 %v2734_v24, %v2731_v18 }
 0x135   : > { %v2736_v39 = vsel %vm2602_vm0, %v2726_v11, %v2735_v30 }
 0x136   : > { %6708 = vmatmul.mubr.bf16.gmra.mrb[28].mxu1 %v2099_v21  ;;  %v2727_v21 = vsel %vm2602_vm0, %v2717_v9, %v2726_v11 }
 0x137   : > { %6952 = vmatmul.mubr.bf16.gmra.mrb[12].mxu0 %v5028_v26  ;;  %6711 = vmatprep.mubr.bf16.mxu1 %v2101_v27  ;;  %v2743_v26 = vrot.slane %v2741_v15, 2  ;;  %v7529_v27 = vld [vmem:[%s7617_s16 + $0x90] sm:$0xff]  }
 0x138   : > { %6955 = vmatprep.mubr.bf16.mxu0 %v5030_v33  ;;  %v2750_v33 = vshll.u32 %v7527_v19, 16  ;;  %v2756_v36 = vshrl.u32 %v7529_v27, 16  ;;  %v2759_v37 = vshll.u32 %v7529_v27, 16 }
 0x139   : > { %v2744_v35 = vor.u32 %v2743_v26, %v2740_v25 }
 0x13a   : > { %v2752_v41 = vrot.slane %v2750_v33, 2  ;;  %v2758_v46 = vrot.slane %v2756_v36, 1 }
 0x13b   : > { %v2745_v44 = vsel %vm2602_vm0, %v2735_v30, %v2744_v35 }
 0x13c   : > { %v2753_v49 = vor.u32 %v2752_v41, %v2749_v40 }
 0x13e   : > { %6712 = vmatmul.mubr.bf16.gmra.mrb[32].mxu1 %v2103_v43  ;;  %v5044_v43 = vsel %vm5011_vm5, %v5041_v16, %v5043_v34  ;;  %v2754_v54 = vsel %vm2602_vm0, %v2744_v35, %v2753_v49 }
 0x13f   : > { %6956 = vmatmul.mubr.bf16.gmra.mrb[16].mxu0 %v5032_v47  ;;  %6747 = vmatprep.mubr.bf16.mxu1 %v2691_v48  ;;  %v2761_v47 = vrot.slane %v2759_v37, 2  ;;  %v5046_v48 = vsel %vm5011_vm5, %v5043_v34, %v5045_v38 }
 0x140   : > { %6959 = vmatprep.mubr.bf16.mxu0 %v5034_v53 }
 0x141   : > { %v2762_v53 = vor.u32 %v2761_v47, %v2758_v46 }
 0x143   : > { %v2763_v57 = vsel %vm2602_vm0, %v2753_v49, %v2762_v53  ;;  %v2772_v58 = vsel %vm2602_vm0, %v2762_v53, %v2771_v31 }
 0x146   : > { %6748 = vmatmul.mubr.bf16.vlgmr.msra.gmra.mrb[16].mxu1 %v2700_v61 }
 0x147   : > { %6960 = vmatmul.mubr.bf16.gmra.mrb[20].mxu0 %v5036_v0  ;;  %6751 = vmatprep.mubr.bf16.mxu1 %v2709_v1 }
 0x148   : > { %6963 = vmatprep.mubr.bf16.mxu0 %v5038_v7 }
 0x14e   : > { %6752 = vmatmul.mubr.bf16.gmra.mrb[20].mxu1 %v2718_v17 }
 0x14f   : > { %6964 = vmatmul.mubr.bf16.gmra.mrb[24].mxu0 %v5040_v20  ;;  %6755 = vmatprep.mubr.bf16.mxu1 %v2727_v21 }
 0x150   : > { %6967 = vmatprep.mubr.bf16.mxu0 %v5042_v28 }
 0x156   : > { %6756 = vmatmul.mubr.bf16.gmra.mrb[24].mxu1 %v2736_v39 }
 0x157   : > { %6968 = vmatmul.mubr.bf16.gmra.mrb[28].mxu0 %v5044_v43  ;;  %6759 = vmatprep.mubr.bf16.mxu1 %v2745_v44 }
 0x158   : > { %6971 = vmatprep.mubr.bf16.mxu0 %v5046_v48 }
 0x15e   : > { %6760 = vmatmul.mubr.bf16.gmra.mrb[28].mxu1 %v2754_v54 }
 0x15f   : > { %6972 = vmatmul.mubr.bf16.gmra.mrb[32].mxu0 %v5048_v56  ;;  %6763 = vmatprep.mubr.bf16.mxu1 %v2763_v57 }
 0x166   : > { %6764 = vmatmul.mubr.bf16.gmra.mrb[32].mxu1 %v2772_v58 }
 0x1d1   : > { %v6681_v59 = vpop.f32.mrb[0].mxu1 }
 0x1d2   : > { %v2204_v60 = vpop.f32.mrb[1].mxu1 }
 0x1d3   : > { %v6682_v61 = vpop.f32.mrb[2].mxu1 }
 0x1d4   : > { %v2207_v62 = vpop.f32.mrb[3].mxu1 }
 0x1d9   : > { %v6685_v3 = vpop.f32.mrb[4].mxu1 }
 0x1da   : > { %v2220_v63 = vpop.f32.mrb[5].mxu1 }
 0x1db   : > { %v6686_v0 = vpop.f32.mrb[6].mxu1 }
 0x1dc   : > { %v2223_v1 = vpop.f32.mrb[7].mxu1 }
 0x1e1   : > { %v6689_v2 = vpop.f32.mrb[8].mxu1 }
 0x1e2   : > { %v2236_v4 = vpop.f32.mrb[9].mxu1 }
 0x1e3   : > { %v6690_v5 = vpop.f32.mrb[10].mxu1 }
 0x1e4   : > { %v2239_v6 = vpop.f32.mrb[11].mxu1 }
 0x1e9   : > { %v8180_v7 = vpop.f32.mrb[12].mxu1 }
 0x1ea   : > { %v8182_v8 = vpop.f32.mrb[13].mxu1 }
 0x1eb   : > { %v8184_v9 = vpop.f32.mrb[14].mxu1 }
 0x1ec   : > { %v8186_v10 = vpop.f32.mrb[15].mxu1 }
 0x1f2   : > { %v6941_v12 = vpop.f32.mrb[0].mxu0 }
 0x1f3   : > { %v6991_v11 = vadd.f32 %v6941_v12, %v6681_v59  ;;  %v5149_v14 = vpop.f32.mrb[1].mxu0 }
 0x1f4   : > { %v6992_v15 = vadd.f32 %v5149_v14, %v2204_v60  ;;  %v6942_v16 = vpop.f32.mrb[2].mxu0 }
 0x1f5   : > { %v5409_v17 = vadd.f32 %v6991_v11, %v8191_v13  ;;  %v6993_v18 = vadd.f32 %v6942_v16, %v6682_v61  ;;  %v5152_v24 = vpop.f32.mrb[3].mxu0 }
 0x1f6   : > { %v5407_v19 = vadd.f32 %v6992_v15, %v8191_v13  ;;  %v6994_v20 = vadd.f32 %v5152_v24, %v2207_v62 }
 0x1f7   : > { %v5410_v21 = vadd.f32 %v6993_v18, %v8191_v13  ;;  %v5445_v25 = vmax.f32 %v5409_v17, 0.0 }
 0x1f8   : > { %v5408_v22 = vadd.f32 %v6994_v20, %v8191_v13  ;;  %v5443_v27 = vmax.f32 %v5407_v19, 0.0 }
 0x1f9   : > { %v5446_v26 = vmax.f32 %v5410_v21, 0.0 }
 0x1fa   : > { %v5444_v28 = vmax.f32 %v5408_v22, 0.0  ;;  %v6945_v29 = vpop.f32.mrb[4].mxu0 }
 0x1fb   : > { %v6174_v30 = vpack.c.bf16 %v5446_v26, %v5445_v25  ;;  %v6995_v32 = vadd.f32 %v6945_v29, %v6685_v3  ;;  %v5165_v33 = vpop.f32.mrb[5].mxu0 }
 0x1fc   : > { %v6169_v34 = vpack.c.bf16 %v5444_v28, %v5443_v27  ;;  %v6996_v35 = vadd.f32 %v5165_v33, %v2220_v63  ;;  %v6946_v36 = vpop.f32.mrb[6].mxu0 }
 0x1fd   : > { %6256 = vst [vmem:[%s8201_s10 + $0x8] sm:$0xff] %v6174_v30   ;;  %v5413_v37 = vadd.f32 %v6995_v32, %v8191_v13  ;;  %v6997_v38 = vadd.f32 %v6946_v36, %v6686_v0  ;;  %v5168_v39 = vpop.f32.mrb[7].mxu0 }
 0x1fe   : > { %6170 = vst [vmem:[%s8201_s10] sm:$0xff] %v6169_v34   ;;  %v5411_v40 = vadd.f32 %v6996_v35, %v8191_v13  ;;  %v6998_v41 = vadd.f32 %v5168_v39, %v2223_v1 }
 0x1ff   : > { %v5414_v42 = vadd.f32 %v6997_v38, %v8191_v13  ;;  %v5449_v44 = vmax.f32 %v5413_v37, 0.0 }
 0x200   : > { %v5412_v43 = vadd.f32 %v6998_v41, %v8191_v13  ;;  %v5447_v46 = vmax.f32 %v5411_v40, 0.0 }
 0x201   : > { %v5450_v45 = vmax.f32 %v5414_v42, 0.0 }
 0x202   : > { %v5448_v47 = vmax.f32 %v5412_v43, 0.0  ;;  %v6949_v48 = vpop.f32.mrb[8].mxu0 }
 0x203   : > { %v6184_v49 = vpack.c.bf16 %v5450_v45, %v5449_v44  ;;  %v6999_v50 = vadd.f32 %v6949_v48, %v6689_v2  ;;  %v5181_v51 = vpop.f32.mrb[9].mxu0 }
 0x204   : > { %v6179_v52 = vpack.c.bf16 %v5448_v47, %v5447_v46  ;;  %v7000_v53 = vadd.f32 %v5181_v51, %v2236_v4  ;;  %v6950_v54 = vpop.f32.mrb[10].mxu0 }
 0x205   : > { %6258 = vst [vmem:[%s8201_s10 + $0x18] sm:$0xff] %v6184_v49   ;;  %v5417_v55 = vadd.f32 %v6999_v50, %v8191_v13  ;;  %v7001_v23 = vadd.f32 %v6950_v54, %v6690_v5  ;;  %v5184_v56 = vpop.f32.mrb[11].mxu0 }
 0x206   : > { %6257 = vst [vmem:[%s8201_s10 + $0x10] sm:$0xff] %v6179_v52   ;;  %v5415_v57 = vadd.f32 %v7000_v53, %v8191_v13  ;;  %v7002_v31 = vadd.f32 %v5184_v56, %v2239_v6 }
 0x207   : > { %v5418_v58 = vadd.f32 %v7001_v23, %v8191_v13  ;;  %v5453_v60 = vmax.f32 %v5417_v55, 0.0 }
 0x208   : > { %v5416_v59 = vadd.f32 %v7002_v31, %v8191_v13  ;;  %v5451_v62 = vmax.f32 %v5415_v57, 0.0 }
 0x209   : > { %v5454_v61 = vmax.f32 %v5418_v58, 0.0 }
 0x20a   : > { %v5452_v3 = vmax.f32 %v5416_v59, 0.0  ;;  %v6953_v63 = vpop.f32.mrb[12].mxu0 }
 0x20b   : > { %v6194_v0 = vpack.c.bf16 %v5454_v61, %v5453_v60  ;;  %v7003_v1 = vadd.f32 %v6953_v63, %v8180_v7  ;;  %v5197_v2 = vpop.f32.mrb[13].mxu0 }
 0x20c   : > { %v6189_v4 = vpack.c.bf16 %v5452_v3, %v5451_v62  ;;  %v7004_v5 = vadd.f32 %v5197_v2, %v8182_v8  ;;  %v6954_v12 = vpop.f32.mrb[14].mxu0 }
 0x20d   : > { %6260 = vst [vmem:[%s8201_s10 + $0x28] sm:$0xff] %v6194_v0   ;;  %v5421_v6 = vadd.f32 %v7003_v1, %v8191_v13  ;;  %v7005_v11 = vadd.f32 %v6954_v12, %v8184_v9  ;;  %v5200_v14 = vpop.f32.mrb[15].mxu0 }
 0x20e   : > { %6259 = vst [vmem:[%s8201_s10 + $0x20] sm:$0xff] %v6189_v4   ;;  %v5419_v15 = vadd.f32 %v7004_v5, %v8191_v13  ;;  %v7006_v16 = vadd.f32 %v5200_v14, %v8186_v10 }
 0x20f   : > { %v5422_v7 = vadd.f32 %v7005_v11, %v8191_v13  ;;  %v5457_v18 = vmax.f32 %v5421_v6, 0.0 }
 0x210   : > { %v5420_v17 = vadd.f32 %v7006_v16, %v8191_v13  ;;  %v5455_v24 = vmax.f32 %v5419_v15, 0.0 }
 0x211   : > { %v5458_v8 = vmax.f32 %v5422_v7, 0.0 }
 0x212   : > { %v5456_v19 = vmax.f32 %v5420_v17, 0.0  ;;  %v6957_v20 = vpop.f32.mrb[16].mxu0 }
 0x213   : > { %v6204_v21 = vpack.c.bf16 %v5458_v8, %v5457_v18  ;;  %v5213_v22 = vpop.f32.mrb[17].mxu0 }
 0x214   : > { %v6199_v9 = vpack.c.bf16 %v5456_v19, %v5455_v24  ;;  %v6958_v25 = vpop.f32.mrb[18].mxu0 }
 0x215   : > { %6262 = vst [vmem:[%s8201_s10 + $0x38] sm:$0xff] %v6204_v21   ;;  %v5216_v26 = vpop.f32.mrb[19].mxu0 }
 0x216   : > { %6261 = vst [vmem:[%s8201_s10 + $0x30] sm:$0xff] %v6199_v9  }
 0x219   : > { %v6749_v27 = vpop.f32.mrb[16].mxu1 }
 0x21a   : > { %v7007_v28 = vadd.f32 %v6957_v20, %v6749_v27  ;;  %v6961_v29 = vpop.f32.mrb[20].mxu0  ;;  %v2937_v10 = vpop.f32.mrb[17].mxu1 }
 0x21b   : > { %v7008_v30 = vadd.f32 %v5213_v22, %v2937_v10  ;;  %v5229_v32 = vpop.f32.mrb[21].mxu0  ;;  %v6750_v33 = vpop.f32.mrb[18].mxu1 }
 0x21c   : > { %v5425_v34 = vadd.f32 %v7007_v28, %v8191_v13  ;;  %v7009_v35 = vadd.f32 %v6958_v25, %v6750_v33  ;;  %v6962_v36 = vpop.f32.mrb[22].mxu0  ;;  %v2940_v37 = vpop.f32.mrb[19].mxu1 }
 0x21d   : > { %v5423_v38 = vadd.f32 %v7008_v30, %v8191_v13  ;;  %v7010_v39 = vadd.f32 %v5216_v26, %v2940_v37  ;;  %v5232_v40 = vpop.f32.mrb[23].mxu0 }
 0x21e   : > { %v5426_v41 = vadd.f32 %v7009_v35, %v8191_v13  ;;  %v5461_v43 = vmax.f32 %v5425_v34, 0.0 }
 0x21f   : > { %v5424_v42 = vadd.f32 %v7010_v39, %v8191_v13  ;;  %v5459_v45 = vmax.f32 %v5423_v38, 0.0 }
 0x220   : > { %v5462_v44 = vmax.f32 %v5426_v41, 0.0 }
 0x221   : > { %v5460_v46 = vmax.f32 %v5424_v42, 0.0  ;;  %v6753_v47 = vpop.f32.mrb[20].mxu1 }
 0x222   : > { %v6214_v48 = vpack.c.bf16 %v5462_v44, %v5461_v43  ;;  %v7011_v49 = vadd.f32 %v6961_v29, %v6753_v47  ;;  %v6965_v50 = vpop.f32.mrb[24].mxu0  ;;  %v2953_v51 = vpop.f32.mrb[21].mxu1 }
 0x223   : > { %v6209_v52 = vpack.c.bf16 %v5460_v46, %v5459_v45  ;;  %v7012_v53 = vadd.f32 %v5229_v32, %v2953_v51  ;;  %v5245_v54 = vpop.f32.mrb[25].mxu0  ;;  %v6754_v55 = vpop.f32.mrb[22].mxu1 }
 0x224   : > { %6264 = vst [vmem:[%s8201_s10 + $0x48] sm:$0xff] %v6214_v48   ;;  %v5429_v23 = vadd.f32 %v7011_v49, %v8191_v13  ;;  %v7013_v56 = vadd.f32 %v6962_v36, %v6754_v55  ;;  %v6966_v57 = vpop.f32.mrb[26].mxu0  ;;  %v2956_v31 = vpop.f32.mrb[23].mxu1 }
 0x225   : > { %6263 = vst [vmem:[%s8201_s10 + $0x40] sm:$0xff] %v6209_v52   ;;  %v5427_v58 = vadd.f32 %v7012_v53, %v8191_v13  ;;  %v7014_v59 = vadd.f32 %v5232_v40, %v2956_v31  ;;  %v5248_v60 = vpop.f32.mrb[27].mxu0 }
 0x226   : > { %v5430_v61 = vadd.f32 %v7013_v56, %v8191_v13  ;;  %v5465_v3 = vmax.f32 %v5429_v23, 0.0 }
 0x227   : > { %v5428_v62 = vadd.f32 %v7014_v59, %v8191_v13  ;;  %v5463_v0 = vmax.f32 %v5427_v58, 0.0 }
 0x228   : > { %v5466_v63 = vmax.f32 %v5430_v61, 0.0 }
 0x229   : > { %v5464_v1 = vmax.f32 %v5428_v62, 0.0  ;;  %v6757_v2 = vpop.f32.mrb[24].mxu1 }
 0x22a   : > { %v6224_v4 = vpack.c.bf16 %v5466_v63, %v5465_v3  ;;  %v7015_v5 = vadd.f32 %v6965_v50, %v6757_v2  ;;  %v6969_v12 = vpop.f32.mrb[28].mxu0  ;;  %v2969_v6 = vpop.f32.mrb[25].mxu1 }
 0x22b   : > { %v6219_v11 = vpack.c.bf16 %v5464_v1, %v5463_v0  ;;  %v7016_v14 = vadd.f32 %v5245_v54, %v2969_v6  ;;  %v5261_v15 = vpop.f32.mrb[29].mxu0  ;;  %v6758_v16 = vpop.f32.mrb[26].mxu1 }
 0x22c   : > { %6266 = vst [vmem:[%s8201_s10 + $0x58] sm:$0xff] %v6224_v4   ;;  %v5433_v7 = vadd.f32 %v7015_v5, %v8191_v13  ;;  %v7017_v17 = vadd.f32 %v6966_v57, %v6758_v16  ;;  %v6970_v18 = vpop.f32.mrb[30].mxu0  ;;  %v2972_v8 = vpop.f32.mrb[27].mxu1 }
 0x22d   : > { %6265 = vst [vmem:[%s8201_s10 + $0x50] sm:$0xff] %v6219_v11   ;;  %v5431_v24 = vadd.f32 %v7016_v14, %v8191_v13  ;;  %v7018_v19 = vadd.f32 %v5248_v60, %v2972_v8  ;;  %v5264_v20 = vpop.f32.mrb[31].mxu0 }
 0x22e   : > { %v5434_v21 = vadd.f32 %v7017_v17, %v8191_v13  ;;  %v5469_v9 = vmax.f32 %v5433_v7, 0.0 }
 0x22f   : > { %v5432_v22 = vadd.f32 %v7018_v19, %v8191_v13  ;;  %v5467_v26 = vmax.f32 %v5431_v24, 0.0 }
 0x230   : > { %v5470_v25 = vmax.f32 %v5434_v21, 0.0 }
 0x231   : > { %v5468_v27 = vmax.f32 %v5432_v22, 0.0  ;;  %v6761_v28 = vpop.f32.mrb[28].mxu1 }
 0x232   : > { %v6234_v29 = vpack.c.bf16 %v5470_v25, %v5469_v9  ;;  %v7019_v10 = vadd.f32 %v6969_v12, %v6761_v28  ;;  %v6973_v30 = vpop.f32.mrb[32].mxu0  ;;  %v2985_v32 = vpop.f32.mrb[29].mxu1 }
 0x233   : > { %v6229_v33 = vpack.c.bf16 %v5468_v27, %v5467_v26  ;;  %v7020_v34 = vadd.f32 %v5261_v15, %v2985_v32  ;;  %v5277_v35 = vpop.f32.mrb[33].mxu0  ;;  %v6762_v36 = vpop.f32.mrb[30].mxu1 }
 0x234   : > { %6268 = vst [vmem:[%s8201_s10 + $0x68] sm:$0xff] %v6234_v29   ;;  %v5437_v37 = vadd.f32 %v7019_v10, %v8191_v13  ;;  %v7021_v38 = vadd.f32 %v6970_v18, %v6762_v36  ;;  %v6974_v39 = vpop.f32.mrb[34].mxu0  ;;  %v2988_v40 = vpop.f32.mrb[31].mxu1 }
 0x235   : > { %6267 = vst [vmem:[%s8201_s10 + $0x60] sm:$0xff] %v6229_v33   ;;  %v5435_v41 = vadd.f32 %v7020_v34, %v8191_v13  ;;  %v7022_v42 = vadd.f32 %v5264_v20, %v2988_v40  ;;  %v5280_v43 = vpop.f32.mrb[35].mxu0 }
 0x236   : > { %v5438_v44 = vadd.f32 %v7021_v38, %v8191_v13  ;;  %v5473_v46 = vmax.f32 %v5437_v37, 0.0 }
 0x237   : > { %v5436_v45 = vadd.f32 %v7022_v42, %v8191_v13  ;;  %v5471_v48 = vmax.f32 %v5435_v41, 0.0 }
 0x238   : > { %v5474_v47 = vmax.f32 %v5438_v44, 0.0 }
 0x239   : > { %v5472_v49 = vmax.f32 %v5436_v45, 0.0  ;;  %v6765_v50 = vpop.f32.mrb[32].mxu1 }
 0x23a   : > { %v6244_v51 = vpack.c.bf16 %v5474_v47, %v5473_v46  ;;  %v7023_v52 = vadd.f32 %v6973_v30, %v6765_v50  ;;  %v3001_v53 = vpop.f32.mrb[33].mxu1 }
 0x23b   : > { %v6239_v54 = vpack.c.bf16 %v5472_v49, %v5471_v48  ;;  %v7024_v55 = vadd.f32 %v5277_v35, %v3001_v53  ;;  %v6766_v23 = vpop.f32.mrb[34].mxu1 }
 0x23c   : > { %6270 = vst [vmem:[%s8201_s10 + $0x78] sm:$0xff] %v6244_v51   ;;  %v5441_v56 = vadd.f32 %v7023_v52, %v8191_v13  ;;  %v7025_v57 = vadd.f32 %v6974_v39, %v6766_v23  ;;  %v3004_v31 = vpop.f32.mrb[35].mxu1 }
 0x23d   : > { %6269 = vst [vmem:[%s8201_s10 + $0x70] sm:$0xff] %v6239_v54   ;;  %v5439_v58 = vadd.f32 %v7024_v55, %v8191_v13  ;;  %v7026_v59 = vadd.f32 %v5280_v43, %v3004_v31 }
 0x23e   : > { %v5442_v60 = vadd.f32 %v7025_v57, %v8191_v13  ;;  %v5477_v62 = vmax.f32 %v5441_v56, 0.0 }
 0x23f   : > { %v5440_v61 = vadd.f32 %v7026_v59, %v8191_v13  ;;  %v5475_v63 = vmax.f32 %v5439_v58, 0.0 }
 0x240   : > { %v5478_v3 = vmax.f32 %v5442_v60, 0.0 }
 0x241   : > { %v5476_v0 = vmax.f32 %v5440_v61, 0.0 }
 0x242   : > { %v6254_v1 = vpack.c.bf16 %v5478_v3, %v5477_v62 }
 0x243   : > { %v6249_v2 = vpack.c.bf16 %v5476_v0, %v5475_v63 }
 0x244   : > { %6272 = vst [vmem:[%s8201_s10 + $0x88] sm:$0xff] %v6254_v1  }
 0x245   : > { %6271 = vst [vmem:[%s8201_s10 + $0x80] sm:$0xff] %v6249_v2  }
 0x246 PF: > { %s13_s12 = sadd.s32 1, %s7545_s12  }
 0x247   : > { %p10_p4 = scmp.ge.s32.totalorder %s13_s12, 4  }
 0x249   :  { %12 = sbr.rel (!%p10_p4) target bundleno = 1 (0x1), region = 70 }

// kernel: model_forward.5
= control target key start
LH: loop header
LB: loop body
LE: loop exit
PB: predicated region body
PF: predicated region fallthrough
CT: control target
= control target key end

     0   :  { %s14554_s24 = smov 0   ;;  %s15986_s0 = inlined_call_operand.vmem [shape: bf16[2,342,128], index: 0, kind: input, shape index: {}]   ;;  %s15987_s1 = inlined_call_operand.vmem [shape: bf16[2,342,128], index: 1, kind: input, shape index: {}]   ;;  %s15988_s2 = inlined_call_operand.vmem [shape: bf16[9,128,128], index: 2, kind: input, shape index: {}]   ;;  %s15989_s3 = inlined_call_operand.vmem [shape: bf16[9,128,128], index: 3, kind: input, shape index: {}]   ;;  %s15990_s4 = inlined_call_operand.vmem [shape: f32[1,128], index: 4, kind: input, shape index: {}]   ;;  %s15991_s5 = inlined_call_operand.vmem [shape: bf16[128,128], index: 5, kind: input, shape index: {}]   ;;  %s15992_s6 = inlined_call_operand.vmem [shape: f32[1,128], index: 6, kind: input, shape index: {}]   ;;  %s15993_s7 = inlined_call_operand.vmem [shape: f32[2,288,128], index: 7, kind: output, shape index: {}]  }
   0x1 LB: > { %s11126_s25 = sadd.s32 4294967295, %s14512_s24   ;;  %p11130_p0 = scmp.ge.s32.totalorder %s14512_s24, 1  ;;  %s14512_s24 = sphi %s14554_s24, %s17_s24  }
   0x2   : > { %p247_p1 = scmp.lt.s32.totalorder %s14512_s24, 3 }
   0x4   : > { %p248_p2 = pnand %p11130_p0, %p247_p1 }
   0x5   : > { %v14006_v0 = vld [vmem:[%s15988_s2] sm:$0xff] (!%p248_p2)   ;;  %v14008_v2 = vld [vmem:[%s15988_s2 + $0x8] sm:$0xff] (!%p248_p2)   ;;  %p284_p3 = scmp.lt.s32.totalorder (!%p248_p2), %s11126_s25, 1  ;;  %v14010_v4 = vld [vmem:[%s15988_s2 + $0x10] sm:$0xff] (!%p248_p2)   ;;  %vm4939_vm0 = vsmask.f32 (!%p248_p2), 6400 }
   0x6   : > { %251 = sbr.rel (%p248_p2) target bundleno = 1153 (0x481), region = 48  ;;  %v14007_v1 = vld [vmem:[%s15988_s2 + $0x100] sm:$0xff] (!%p248_p2)   ;;  %12380 = vmatprep.subr.bf16.mxu1 (!%p248_p2), %v14006_v0  ;;  %v14009_v3 = vld [vmem:[%s15988_s2 + $0x108] sm:$0xff] (!%p248_p2)   ;;  %v14011_v5 = vld [vmem:[%s15988_s2 + $0x110] sm:$0xff] (!%p248_p2)   ;;  %vm6276_vm1 = vcmask (!%p248_p2), 1045504   ;;  %vm2798_vm3 = vcmask (!%p248_p2), 1046528  }
   0x7   : > { %12796 = vmatprep.subr.bf16.mxu0 (!%p248_p2), %v14007_v1  ;;  %12381 = vmatpush3.bf16.msra.mxu1 (!%p248_p2), %v14006_v0  ;;  %v14012_v6 = vld [vmem:[%s15988_s2 + $0x18] sm:$0xff] (!%p248_p2)   ;;  %v14014_v8 = vld [vmem:[%s15988_s2 + $0x20] sm:$0xff] (!%p248_p2)   ;;  %v14016_v10 = vld [vmem:[%s15988_s2 + $0x28] sm:$0xff] (!%p248_p2)   ;;  %vm1505_vm2 = vsmask.f32 (!%p248_p2), 7424  ;;  %vm9754_vm5 = vcmask (!%p248_p2), 1044480  }
   0x8   : > { %12797 = vmatpush3.bf16.msra.mxu0 (!%p248_p2), %v14007_v1  ;;  %12382 = vmatprep.subr.bf16.mxu1 (!%p248_p2), %v14008_v2  ;;  %v14013_v7 = vld [vmem:[%s15988_s2 + $0x118] sm:$0xff] (!%p248_p2)   ;;  %v14015_v9 = vld [vmem:[%s15988_s2 + $0x120] sm:$0xff] (!%p248_p2)   ;;  %v14017_v11 = vld [vmem:[%s15988_s2 + $0x128] sm:$0xff] (!%p248_p2)   ;;  %vm8417_vm4 = vsmask.f32 (!%p248_p2), 5376 }
   0x9   : > { %12798 = vmatprep.subr.bf16.mxu0 (!%p248_p2), %v14009_v3  ;;  %v14018_v15 = vld [vmem:[%s15988_s2 + $0x30] sm:$0xff] (!%p248_p2)   ;;  %v14020_v22 = vld [vmem:[%s15988_s2 + $0x38] sm:$0xff] (!%p248_p2)   ;;  %v14027_v40 = vld [vmem:[%s15989_s3 + $0x100] sm:$0xff] (!%p248_p2)  }
   0xa   : > { %v14019_v16 = vld [vmem:[%s15988_s2 + $0x130] sm:$0xff] (!%p248_p2)   ;;  %v14021_v31 = vld [vmem:[%s15988_s2 + $0x138] sm:$0xff] (!%p248_p2)   ;;  %v14028_v52 = vld [vmem:[%s15989_s3 + $0x108] sm:$0xff] (!%p248_p2)  }
   0xb   : > { %12383 = vmatpush3.bf16.msra.mxu1 (!%p248_p2), %v14008_v2  ;;  %v14033_v59 = vld [vmem:[%s15989_s3 + $0x110] sm:$0xff] (!%p248_p2)  }
   0xc   : > { %12799 = vmatpush3.bf16.msra.mxu0 (!%p248_p2), %v14009_v3  ;;  %12384 = vmatprep.subr.bf16.mxu1 (!%p248_p2), %v14010_v4  ;;  %v14034_v3 = vld [vmem:[%s15989_s3 + $0x118] sm:$0xff] (!%p248_p2)  }
   0xd   : > { %s15995_s25 = smov (!%p284_p3, %s11126_s25), 1  ;;  %12800 = vmatprep.subr.bf16.mxu0 %v14011_v5 }
   0xe   : > { %s13996_s19 = smul.u32 172, %s15995_s25 }
   0xf   : > { %12385 = vmatpush3.bf16.msra.mxu1 %v14010_v4  ;;  %s13997_s26 = smul.u32 288, %s15995_s25 }
  0x10   : > { %12801 = vmatpush3.bf16.msra.mxu0 %v14011_v5  ;;  %12386 = vmatprep.subr.bf16.mxu1 %v14012_v6  ;;  %s14606_s9 = scalar_lea.vmem %s15986_s0, %s13996_s19  ;;  %s14656_s8 = scalar_lea.vmem %s15987_s1, %s13996_s19 }
  0x11   : > { %12802 = vmatprep.subr.bf16.mxu0 %v14013_v7  ;;  %v14022_v12 = vld [vmem:[%s14606_s9] sm:$0xff]   ;;  %v14023_v13 = vld [vmem:[%s14606_s9 + $0x8] sm:$0xfe]   ;;  %v14024_v14 = vld [vmem:[%s14606_s9 + $0x10] sm:$0xff]   ;;  %s15909_s30 = scalar_lea.vmem %s15993_s7, %s13997_s26 }
  0x12   : > { %12396 = vmatprep.mubr.bf16.mxu1 %v14022_v12  ;;  %v4941_v17 = vshrl.u32 %v14023_v13, 16  ;;  %v4944_v18 = vshll.u32 %v14023_v13, 16  ;;  %v4949_v19 = vshrl.u32 %v14024_v14, 16  ;;  %v4952_v20 = vshll.u32 %v14024_v14, 16  ;;  %v14026_v21 = vld [vmem:[%s14606_s9 + $0x18] sm:$0xff]   ;;  %v14030_v34 = vld [vmem:[%s14606_s9 + $0x20] sm:$0xff]  }
  0x13   : > { %12387 = vmatpush3.bf16.msra.mxu1 %v14012_v6  ;;  %v4958_v27 = vshrl.u32 %v14026_v21, 16  ;;  %v4961_v28 = vshll.u32 %v14026_v21, 16  ;;  %v4967_v36 = vshrl.u32 %v14030_v34, 16  ;;  %v4970_v37 = vshll.u32 %v14030_v34, 16  ;;  %v14032_v38 = vld [vmem:[%s14606_s9 + $0x28] sm:$0xff]   ;;  %v14029_v46 = vld [vmem:[%s14606_s9 + $0x10] sm:$0xff]  }
  0x14   : > { %12803 = vmatpush3.bf16.msra.mxu0 %v14013_v7  ;;  %12388 = vmatprep.subr.bf16.mxu1 %v14014_v8  ;;  %v4943_v23 = vrot.slane %v4941_v17, 1  ;;  %v4946_v24 = vrot.slane %v4944_v18, 2  ;;  %v4951_v25 = vrot.slane %v4949_v19, 1  ;;  %v4954_v26 = vrot.slane %v4952_v20, 2  ;;  %v14025_v44 = vld [vmem:[%s14606_s9 + $0x8] sm:$0xff]   ;;  %v14036_v51 = vld [vmem:[%s14606_s9 + $0x30] sm:$0xff]  }
  0x15   : > { %12804 = vmatprep.subr.bf16.mxu0 %v14015_v9  ;;  %v4960_v32 = vrot.slane %v4958_v27, 1  ;;  %v4963_v33 = vrot.slane %v4961_v28, 2  ;;  %v4969_v41 = vrot.slane %v4967_v36, 1  ;;  %v4972_v42 = vrot.slane %v4970_v37, 2  ;;  %v14038_v56 = vld [vmem:[%s14606_s9 + $0x38] sm:$0xff]   ;;  %v14035_v63 = vld [vmem:[%s14606_s9 + $0x20] sm:$0xff]  }
  0x16   : > { %v4947_v29 = vor.u32 %v4946_v24, %v4943_v23  ;;  %v4955_v30 = vor.u32 %v4954_v26, %v4951_v25  ;;  %v4976_v43 = vshrl.u32 %v14032_v38, 16  ;;  %v4979_v45 = vshll.u32 %v14032_v38, 16  ;;  %v14031_v57 = vld [vmem:[%s14606_s9 + $0x18] sm:$0xff]   ;;  %v14042_v2 = vld [vmem:[%s14606_s9 + $0x40] sm:$0xff]   ;;  %v14041_v18 = vld [vmem:[%s14606_s9 + $0x30] sm:$0xff]  }
  0x17   : > { %12389 = vmatpush3.bf16.msra.mxu1 %v14014_v8  ;;  %v4964_v39 = vor.u32 %v4963_v33, %v4960_v32  ;;  %v4973_v47 = vor.u32 %v4972_v42, %v4969_v41  ;;  %v4985_v54 = vshrl.u32 %v14036_v51, 16  ;;  %v4988_v55 = vshll.u32 %v14036_v51, 16  ;;  %v14039_v17 = vld [vmem:[%s15989_s3 + $0x120] sm:$0xff]   ;;  %v14048_v20 = vld [vmem:[%s14656_s8 + $0x8] sm:$0xfe]   ;;  %v14049_v21 = vld [vmem:[%s14656_s8 + $0x10] sm:$0xff]  }
  0x18   : > { %12805 = vmatpush3.bf16.msra.mxu0 %v14015_v9  ;;  %12390 = vmatprep.subr.bf16.mxu1 %v14016_v10  ;;  %v4956_v35 = vsel %vm4939_vm0, %v4947_v29, %v4955_v30  ;;  %v4978_v48 = vrot.slane %v4976_v43, 1  ;;  %v4981_v50 = vrot.slane %v4979_v45, 2  ;;  %v4994_v62 = vshrl.u32 %v14038_v56, 16  ;;  %v14040_v23 = vld [vmem:[%s15989_s3 + $0x128] sm:$0xff]   ;;  %v14045_v36 = vld [vmem:[%s15989_s3 + $0x130] sm:$0xff]   ;;  %v14047_v41 = vld [vmem:[%s14606_s9 + $0x40] sm:$0xff]  }
  0x19   : > { %12806 = vmatprep.subr.bf16.mxu0 %v14017_v11  ;;  %12812 = vmatprep.mubr.bf16.mxu0 %v4956_v35  ;;  %v4965_v49 = vsel %vm4939_vm0, %v4955_v30, %v4964_v39  ;;  %v4974_v53 = vsel %vm4939_vm0, %v4964_v39, %v4973_v47  ;;  %v4987_v60 = vrot.slane %v4985_v54, 1  ;;  %v4990_v61 = vrot.slane %v4988_v55, 2  ;;  %v14043_v39 = vld [vmem:[%s14606_s9 + $0x38] sm:$0xff]  }
  0x1a   : > { %v4982_v58 = vor.u32 %v4981_v50, %v4978_v48  ;;  %v4997_v0 = vshll.u32 %v14038_v56, 16  ;;  %v4996_v4 = vrot.slane %v4994_v62, 1  ;;  %v5003_v7 = vshrl.u32 %v14042_v2, 16  ;;  %v14057_v50 = vld [vmem:[%s14656_s8 + $0x28] sm:$0xff]   ;;  %v14061_v62 = vld [vmem:[%s14656_s8 + $0x30] sm:$0xff]  }
  0x1b   : > { %12391 = vmatpush3.bf16.msra.mxu1 %v14016_v10  ;;  %v4991_v1 = vor.u32 %v4990_v61, %v4987_v60  ;;  %v5006_v8 = vshll.u32 %v14042_v2, 16  ;;  %v14044_v10 = vld [vmem:[%s14606_s9 + $0x48] sm:$0xff]   ;;  %v5609_v26 = vshrl.u32 %v14048_v20, 16  ;;  %v5612_v27 = vshll.u32 %v14048_v20, 16 }
  0x1c   : > { %12807 = vmatpush3.bf16.msra.mxu0 %v14017_v11  ;;  %12392 = vmatprep.subr.bf16.mxu1 %v14018_v15  ;;  %v4999_v5 = vrot.slane %v4997_v0, 2  ;;  %v4983_v6 = vsel %vm4939_vm0, %v4973_v47, %v4982_v58  ;;  %v5005_v11 = vrot.slane %v5003_v7, 1  ;;  %v5012_v14 = vshrl.u32 %v14044_v10, 16  ;;  %v14059_v56 = vld [vmem:[%s15989_s3 + $0x8] sm:$0xff]  }
  0x1d   : > { %12808 = vmatprep.subr.bf16.mxu0 %v14019_v16  ;;  %v4992_v9 = vsel %vm4939_vm0, %v4982_v58, %v4991_v1  ;;  %v5008_v12 = vrot.slane %v5006_v8, 2  ;;  %v5617_v28 = vshrl.u32 %v14049_v21, 16  ;;  %v5620_v29 = vshll.u32 %v14049_v21, 16  ;;  %v14058_v8 = vld [vmem:[%s15988_s2 + $0x148] sm:$0xff]  }
  0x1e   : > { %v5000_v13 = vor.u32 %v4999_v5, %v4996_v4  ;;  %v5014_v24 = vrot.slane %v5012_v14, 1  ;;  %v5611_v32 = vrot.slane %v5609_v26, 1  ;;  %v5614_v33 = vrot.slane %v5612_v27, 2  ;;  %v14064_v4 = vld [vmem:[%s14656_s8 + $0x38] sm:$0xff]   ;;  %v14071_v26 = vld [vmem:[%s14656_s8 + $0x48] sm:$0xff]  }
  0x1f   : > { %12393 = vmatpush3.bf16.msra.mxu1 %v14018_v15  ;;  %v5015_v15 = vshll.u32 %v14044_v10, 16  ;;  %v5009_v19 = vor.u32 %v5008_v12, %v5005_v11  ;;  %v5619_v34 = vrot.slane %v5617_v28, 1  ;;  %v5622_v35 = vrot.slane %v5620_v29, 2 }
  0x20   : > { %12809 = vmatpush3.bf16.msra.mxu0 %v14019_v16  ;;  %12394 = vmatprep.subr.bf16.mxu1 %v14020_v22  ;;  %v14037_v16 = vld [vmem:[%s14606_s9 + $0x28] sm:$0xff]   ;;  %v5615_v42 = vor.u32 %v5614_v33, %v5611_v32  ;;  %v5644_v58 = vshrl.u32 %v14057_v50, 16  ;;  %v5647_v61 = vshll.u32 %v14057_v50, 16  ;;  %v5656_v2 = vshll.u32 %v14061_v62, 16 }
  0x21   : > { %12810 = vmatprep.subr.bf16.mxu0 %v14021_v31  ;;  %v5017_v25 = vrot.slane %v5015_v15, 2  ;;  %v5010_v30 = vsel %vm4939_vm0, %v5000_v13, %v5009_v19  ;;  %v5623_v43 = vor.u32 %v5622_v35, %v5619_v34  ;;  %v5662_v12 = vshrl.u32 %v14064_v4, 16  ;;  %v14068_v15 = vld [vmem:[%s14656_s8 + $0x40] sm:$0xff]   ;;  %v14073_v32 = vld [vmem:[%s15989_s3 + $0x28] sm:$0xff]   ;;  %v14075_v35 = vld [vmem:[%s14656_s8 + $0x50] sm:$0xff]  }
  0x22   : > { %v5649_v7 = vrot.slane %v5647_v61, 2  ;;  %v5658_v11 = vrot.slane %v5656_v2, 2  ;;  %v5665_v14 = vshll.u32 %v14064_v4, 16  ;;  %v5671_v20 = vshrl.u32 %v14068_v15, 16  ;;  %v14069_v61 = vld [vmem:[%s14606_s9 + $0x78] sm:$0xff]  }
  0x23   : > { %12395 = vmatpush3.bf16.msra.mxu1 %v14020_v22  ;;  %v5001_v22 = vsel %vm4939_vm0, %v4991_v1, %v5000_v13  ;;  %v5653_v1 = vshrl.u32 %v14061_v62, 16  ;;  %v14066_v13 = vld [vmem:[%s15989_s3 + $0x18] sm:$0xff]   ;;  %v5674_v21 = vshll.u32 %v14068_v15, 16  ;;  %v5680_v33 = vshrl.u32 %v14071_v26, 16  ;;  %v14074_v62 = vld [vmem:[%s14606_s9 + $0x80] sm:$0xff]  }
  0x24   : > { %12811 = vmatpush3.bf16.msra.mxu0 %v14021_v31  ;;  %v14051_v31 = vld [vmem:[%s14656_s8 + $0x18] sm:$0xff]   ;;  %v5673_v29 = vrot.slane %v5671_v20, 1  ;;  %v5683_v34 = vshll.u32 %v14071_v26, 16  ;;  %v14081_v15 = vld [vmem:[%s14656_s8] sm:$0xff]  }
  0x25   : > { %12848 = vmatprep.subr.bf16.mxu0 %v14027_v40  ;;  %v5626_v37 = vshrl.u32 %v14051_v31, 16  ;;  %v5629_v38 = vshll.u32 %v14051_v31, 16  ;;  %v5655_v10 = vrot.slane %v5653_v1, 1  ;;  %v14072_v31 = vld [vmem:[%s15988_s2 + $0x158] sm:$0xff]  }
  0x26   : > { %12397 = vmatmul.mubr.bf16.vlgmr.msra.gmra.mrb[0].mxu1 %v14025_v44 }
  0x27   : > { %12813 = vmatmul.mubr.bf16.vlgmr.msra.gmra.mrb[0].mxu0 %v4965_v49  ;;  %12400 = vmatprep.mubr.bf16.mxu1 %v14029_v46  ;;  %v5628_v44 = vrot.slane %v5626_v37, 1  ;;  %v5631_v45 = vrot.slane %v5629_v38, 2  ;;  %v14054_v46 = vld [vmem:[%s14656_s8 + $0x20] sm:$0xff]   ;;  %v14062_v37 = vld [vmem:[%s14606_s9 + $0x68] sm:$0xff]  }
  0x28   : > { %12849 = vmatpush3.bf16.msra.mxu0 %v14027_v40  ;;  %12816 = vmatprep.mubr.bf16.mxu0 %v4974_v53  ;;  %v14675_v40 = vor.u32 %v5017_v25, %v5014_v24  ;;  %v5635_v47 = vshrl.u32 %v14054_v46, 16  ;;  %v5638_v48 = vshll.u32 %v14054_v46, 16  ;;  %v14056_v49 = vld [vmem:[%s15989_s3] sm:$0xff]   ;;  %v5624_v53 = vsel %vm4939_vm0, %v5615_v42, %v5623_v43  ;;  %v14077_v42 = vld [vmem:[%s15989_s3 + $0x30] sm:$0xff]   ;;  %v14078_v46 = vld [vmem:[%s14656_s8 + $0x58] sm:$0xff]  }
  0x29   : > { %12850 = vmatprep.subr.bf16.mxu0 %v14028_v52  ;;  %12432 = vmatprep.subr.bf16.mxu1 %v14056_v49  ;;  %v5632_v60 = vor.u32 %v5631_v45, %v5628_v44  ;;  %v5664_v24 = vrot.slane %v5662_v12, 1  ;;  %v5667_v25 = vrot.slane %v5665_v14, 2  ;;  %v5682_v44 = vrot.slane %v5680_v33, 1  ;;  %v14086_v33 = vld [vmem:[%s14656_s8 + $0x10] sm:$0xff]  }
  0x2a   : > { %v5019_v51 = vsel %vm4939_vm0, %v5009_v19, %v14675_v40  ;;  %v5637_v54 = vrot.slane %v5635_v47, 1  ;;  %v5640_v55 = vrot.slane %v5638_v48, 2  ;;  %12433 = vmatpush3.bf16.msra.mxu1 %v14056_v49  ;;  %v5659_v19 = vor.u32 %v5658_v11, %v5655_v10  ;;  %v14080_v49 = vld [vmem:[%s15988_s2 + $0x160] sm:$0xff]   ;;  %v14076_v10 = vld [vmem:[%s14606_s9 + $0x88] sm:$0xff]  }
  0x2b   : > { %12434 = vmatprep.subr.bf16.mxu1 %v14059_v56  ;;  %v5633_v5 = vsel %vm4939_vm0, %v5623_v43, %v5632_v60  ;;  %v14067_v43 = vld [vmem:[%s14606_s9 + $0x70] sm:$0xff]   ;;  %v5685_v45 = vrot.slane %v5683_v34, 2 }
  0x2c   : > { %12851 = vmatpush3.bf16.msra.mxu0 %v14028_v52  ;;  %v14046_v52 = vld [vmem:[%s15989_s3 + $0x138] sm:$0xff]   ;;  %v5641_v0 = vor.u32 %v5640_v55, %v5637_v54  ;;  %v5698_v54 = vshrl.u32 %v14078_v46, 16 }
  0x2d   : > { %12852 = vmatprep.subr.bf16.mxu0 %v14033_v59  ;;  %v5686_v55 = vor.u32 %v5685_v45, %v5682_v44  ;;  %v14774_v45 = vld [vmem:[%s15989_s3 + $0x140] sm:$0xff]  }
  0x2e   : > { %12401 = vmatmul.mubr.bf16.gmra.mrb[4].mxu1 %v14031_v57  ;;  %v14052_v57 = vld [vmem:[%s15988_s2 + $0x140] sm:$0xff]   ;;  %v5700_v1 = vrot.slane %v5698_v54, 1 }
  0x2f   : > { %12817 = vmatmul.mubr.bf16.gmra.mrb[4].mxu0 %v4983_v6  ;;  %12404 = vmatprep.mubr.bf16.mxu1 %v14035_v63  ;;  %v14053_v63 = vld [vmem:[%s14606_s9 + $0x50] sm:$0xff]   ;;  %v5646_v6 = vrot.slane %v5644_v58, 1 }
  0x30   : > { %12853 = vmatpush3.bf16.msra.mxu0 %v14033_v59  ;;  %12820 = vmatprep.mubr.bf16.mxu0 %v4992_v9  ;;  %v14050_v59 = vld [vmem:[%s14606_s9 + $0x48] sm:$0xff]   ;;  %v5642_v9 = vsel %vm4939_vm0, %v5632_v60, %v5641_v0 }
  0x31   : > { %12854 = vmatprep.subr.bf16.mxu0 %v14034_v3  ;;  %12435 = vmatpush3.bf16.msra.mxu1 %v14059_v56  ;;  %v5701_v56 = vshll.u32 %v14078_v46, 16 }
  0x33   : > { %v5703_v2 = vrot.slane %v5701_v56, 2 }
  0x34   : > { %12855 = vmatpush3.bf16.msra.mxu0 %v14034_v3  ;;  %v14063_v3 = vld [vmem:[%s15989_s3 + $0x10] sm:$0xff]  }
  0x35   : > { %12856 = vmatprep.subr.bf16.mxu0 %v14039_v17  ;;  %12436 = vmatprep.subr.bf16.mxu1 %v14063_v3  ;;  %v5704_v11 = vor.u32 %v5703_v2, %v5700_v1  ;;  %v14095_v1 = vld [vmem:[%s14656_s8 + $0x30] sm:$0xff]   ;;  %v14101_v2 = vld [vmem:[%s14606_s9 + $0x8] sm:$0xfc]  }
  0x36   : > { %12405 = vmatmul.mubr.bf16.gmra.mrb[8].mxu1 %v14037_v16  ;;  %v14055_v16 = vld [vmem:[%s14606_s9 + $0x58] sm:$0xff]  }
  0x37   : > { %12821 = vmatmul.mubr.bf16.gmra.mrb[8].mxu0 %v5001_v22  ;;  %12408 = vmatprep.mubr.bf16.mxu1 %v14041_v18  ;;  %v14065_v18 = vld [vmem:[%s15988_s2 + $0x150] sm:$0xff]   ;;  %v14070_v22 = vld [vmem:[%s15989_s3 + $0x20] sm:$0xff]  }
  0x38   : > { %12857 = vmatpush3.bf16.msra.mxu0 %v14039_v17  ;;  %12824 = vmatprep.mubr.bf16.mxu0 %v5010_v30  ;;  %v5650_v17 = vor.u32 %v5649_v7, %v5646_v6  ;;  %v5676_v30 = vrot.slane %v5674_v21, 2  ;;  %v14087_v6 = vld [vmem:[%s14656_s8 + $0x70] sm:$0xff]  }
  0x39   : > { %12858 = vmatprep.subr.bf16.mxu0 %v14040_v23  ;;  %12437 = vmatpush3.bf16.msra.mxu1 %v14063_v3  ;;  %v5728_v14 = vshll.u32 %v14087_v6, 16 }
  0x3a   : > { %12438 = vmatprep.subr.bf16.mxu1 %v14066_v13  ;;  %v5651_v27 = vsel %vm4939_vm0, %v5641_v0, %v5650_v17  ;;  %v5660_v28 = vsel %vm4939_vm0, %v5650_v17, %v5659_v19  ;;  %v5677_v38 = vor.u32 %v5676_v30, %v5673_v29  ;;  %v14083_v29 = vld [vmem:[%s14656_s8 + $0x8] sm:$0xff]  }
  0x3c   : > { %12859 = vmatpush3.bf16.msra.mxu0 %v14040_v23  ;;  %v14060_v23 = vld [vmem:[%s14606_s9 + $0x60] sm:$0xff]   ;;  %v5687_v0 = vsel %vm4939_vm0, %v5677_v38, %v5686_v55 }
  0x3d   : > { %12860 = vmatprep.subr.bf16.mxu0 %v14045_v36  ;;  %12439 = vmatpush3.bf16.msra.mxu1 %v14066_v13  ;;  %v5725_v13 = vshrl.u32 %v14087_v6, 16 }
  0x3e   : > { %12409 = vmatmul.mubr.bf16.gmra.mrb[12].mxu1 %v14043_v39  ;;  %12440 = vmatprep.subr.bf16.mxu1 %v14070_v22  ;;  %v5689_v39 = vshrl.u32 %v14075_v35, 16 }
  0x3f   : > { %12825 = vmatmul.mubr.bf16.gmra.mrb[12].mxu0 %v5019_v51  ;;  %12412 = vmatprep.mubr.bf16.mxu1 %v14047_v41  ;;  %v5692_v41 = vshll.u32 %v14075_v35, 16 }
  0x40   : > { %12861 = vmatpush3.bf16.msra.mxu0 %v14045_v36  ;;  %12864 = vmatprep.mubr.bf16.mxu0 %v5624_v53  ;;  %v5668_v36 = vor.u32 %v5667_v25, %v5664_v24  ;;  %v5691_v48 = vrot.slane %v5689_v39, 1  ;;  %v14082_v53 = vld [vmem:[%s14656_s8 + $0x60] sm:$0xff]   ;;  %v14097_v25 = vld [vmem:[%s15988_s2 + $0x178] sm:$0xff]  }
  0x41   : > { %12862 = vmatprep.subr.bf16.mxu0 %v14046_v52  ;;  %12441 = vmatpush3.bf16.msra.mxu1 %v14070_v22  ;;  %v5694_v51 = vrot.slane %v5692_v41, 2  ;;  %v5710_v58 = vshll.u32 %v14082_v53, 16  ;;  %v5727_v22 = vrot.slane %v5725_v13, 1  ;;  %v14096_v41 = vld [vmem:[%s14656_s8 + $0x90] sm:$0xff]   ;;  %v6277_v13 = vrot.slane %v14101_v2, 2 }
  0x42   : > { %12442 = vmatprep.subr.bf16.mxu1 %v14073_v32  ;;  %v5669_v47 = vsel %vm4939_vm0, %v5659_v19, %v5668_v36  ;;  %v5678_v50 = vsel %vm4939_vm0, %v5668_v36, %v5677_v38  ;;  %v14092_v19 = vld [vmem:[%s14656_s8 + $0x80] sm:$0xff]  }
  0x43   : > { %v5695_v60 = vor.u32 %v5694_v51, %v5691_v48  ;;  %v5764_v48 = vshll.u32 %v14096_v41, 16  ;;  %v14091_v51 = vld [vmem:[%s14656_s8 + $0x20] sm:$0xff]  }
  0x44   : > { %12863 = vmatpush3.bf16.msra.mxu0 %v14046_v52  ;;  %v14079_v52 = vld [vmem:[%s15989_s3 + $0x38] sm:$0xff]  }
  0x45   : > { %12900 = vmatprep.subr.bf16.mxu0 %v14052_v57  ;;  %12443 = vmatpush3.bf16.msra.mxu1 %v14073_v32  ;;  %v5696_v3 = vsel %vm4939_vm0, %v5686_v55, %v5695_v60  ;;  %v5705_v20 = vsel %vm4939_vm0, %v5695_v60, %v5704_v11  ;;  %v14094_v32 = vld [vmem:[%s14656_s8 + $0x88] sm:$0xff]   ;;  %v14109_v55 = vld [vmem:[%s15988_s2 + $0x40] sm:$0xff]  }
  0x46   : > { %12413 = vmatmul.mubr.bf16.gmra.mrb[16].mxu1 %v14050_v59  ;;  %12444 = vmatprep.subr.bf16.mxu1 %v14077_v42  ;;  %v14085_v59 = vld [vmem:[%s15988_s2 + $0x168] sm:$0xff]   ;;  %v5755_v44 = vshll.u32 %v14094_v32, 16 }
  0x47   : > { %12865 = vmatmul.mubr.bf16.vlgmr.msra.gmra.mrb[0].mxu0 %v5633_v5  ;;  %12416 = vmatprep.mubr.bf16.mxu1 %v14053_v63  ;;  %v14084_v63 = vld [vmem:[%s14656_s8 + $0x68] sm:$0xff]   ;;  %v5712_v5 = vrot.slane %v5710_v58, 2  ;;  %v5766_v58 = vrot.slane %v5764_v48, 2 }
  0x48   : > { %12901 = vmatpush3.bf16.msra.mxu0 %v14052_v57  ;;  %12868 = vmatprep.mubr.bf16.mxu0 %v5642_v9  ;;  %v5707_v57 = vshrl.u32 %v14082_v53, 16  ;;  %v5716_v7 = vshrl.u32 %v14084_v63, 16  ;;  %v14090_v9 = vld [vmem:[%s15988_s2 + $0x170] sm:$0xff]   ;;  %v5757_v54 = vrot.slane %v5755_v44, 2  ;;  %v14124_v48 = vld [vmem:[%s14606_s9 + $0x48] sm:$0xff]  }
  0x49   : > { %12902 = vmatprep.subr.bf16.mxu0 %v14058_v8  ;;  %12445 = vmatpush3.bf16.msra.mxu1 %v14077_v42  ;;  %v5752_v42 = vshrl.u32 %v14094_v32, 16  ;;  %v14108_v32 = vld [vmem:[%s14656_s8 + $0x58] sm:$0xff]  }
  0x4a   : > { %12446 = vmatprep.subr.bf16.mxu1 %v14079_v52  ;;  %v5709_v4 = vrot.slane %v5707_v57, 1 }
  0x4c   : > { %12903 = vmatpush3.bf16.msra.mxu0 %v14058_v8  ;;  %v5719_v8 = vshll.u32 %v14084_v63, 16  ;;  %v5713_v12 = vor.u32 %v5712_v5, %v5709_v4  ;;  %v14093_v63 = vld [vmem:[%s14656_s8 + $0x28] sm:$0xff]  }
  0x4d   : > { %12904 = vmatprep.subr.bf16.mxu0 %v14065_v18  ;;  %12447 = vmatpush3.bf16.msra.mxu1 %v14079_v52  ;;  %v5754_v52 = vrot.slane %v5752_v42, 1 }
  0x4e   : > { %12417 = vmatmul.mubr.bf16.gmra.mrb[20].mxu1 %v14055_v16  ;;  %v5718_v16 = vrot.slane %v5716_v7, 1  ;;  %v5721_v17 = vrot.slane %v5719_v8, 2  ;;  %v5714_v21 = vsel %vm4939_vm0, %v5704_v11, %v5713_v12  ;;  %12484 = vmatprep.subr.bf16.mxu1 %v14109_v55  ;;  %v14102_v8 = vld [vmem:[%s14606_s9 + $0x10] sm:$0xff]  }
  0x4f   : > { %12869 = vmatmul.mubr.bf16.gmra.mrb[4].mxu0 %v5651_v27  ;;  %12420 = vmatprep.mubr.bf16.mxu1 %v14060_v23  ;;  %v5730_v23 = vrot.slane %v5728_v14, 2  ;;  %v5758_v60 = vor.u32 %v5757_v54, %v5754_v52  ;;  %v6278_v14 = vrot.slane %v14102_v8, 2  ;;  %v6292_v54 = vrot.slane %v14124_v48, 2  ;;  %v14149_v48 = vld [vmem:[%s14606_s9 + $0x38] sm:$0xff]  }
  0x50   : > { %12872 = vmatprep.mubr.bf16.mxu0 %v5660_v28  ;;  %12905 = vmatpush3.bf16.msra.mxu0 %v14065_v18  ;;  %v14089_v18 = vld [vmem:[%s14656_s8 + $0x78] sm:$0xff]   ;;  %v5722_v26 = vor.u32 %v5721_v17, %v5718_v16  ;;  %v5743_v28 = vshrl.u32 %v14092_v19, 16 }
  0x51   : > { %12906 = vmatprep.subr.bf16.mxu0 %v14072_v31  ;;  %v5734_v24 = vshrl.u32 %v14089_v18, 16  ;;  %v5737_v27 = vshll.u32 %v14089_v18, 16  ;;  %v5731_v30 = vor.u32 %v5730_v23, %v5727_v22  ;;  %v14104_v16 = vld [vmem:[%s14606_s9 + $0x18] sm:$0xff]   ;;  %v14107_v18 = vld [vmem:[%s14606_s9 + $0x20] sm:$0xff]  }
  0x52   : > { %v5723_v34 = vsel %vm4939_vm0, %v5713_v12, %v5722_v26  ;;  %v14100_v12 = vld [vmem:[%s14656_s8 + $0x40] sm:$0xff]   ;;  %v6280_v22 = vrot.slane %v14104_v16, 2  ;;  %v6282_v23 = vrot.slane %v14107_v18, 2 }
  0x53   : > { %v5736_v35 = vrot.slane %v5734_v24, 1  ;;  %v5739_v36 = vrot.slane %v5737_v27, 2  ;;  %v5732_v38 = vsel %vm4939_vm0, %v5722_v26, %v5731_v30  ;;  %v14130_v24 = vld [vmem:[%s15988_s2 + $0x70] sm:$0xff]   ;;  %v14110_v26 = vld [vmem:[%s14606_s9 + $0x28] sm:$0xff]  }
  0x54   : > { %12907 = vmatpush3.bf16.msra.mxu0 %v14072_v31  ;;  %v5746_v31 = vshll.u32 %v14092_v19, 16  ;;  %v6279_v19 = vsel %vm6276_vm1, %v6277_v13, %v6278_v14  ;;  %v6281_v27 = vsel %vm6276_vm1, %v6278_v14, %v6280_v22 }
  0x55   : > { %12908 = vmatprep.subr.bf16.mxu0 %v14080_v49 }
  0x56   : > { %12421 = vmatmul.mubr.bf16.gmra.mrb[24].mxu1 %v14062_v37  ;;  %v5745_v37 = vrot.slane %v5743_v28, 1  ;;  %v5748_v39 = vrot.slane %v5746_v31, 2  ;;  %v14111_v28 = vld [vmem:[%s15989_s3 + $0x148] sm:$0xff]   ;;  %v14132_v31 = vld [vmem:[%s15988_s2 + $0x78] sm:$0xff]  }
  0x57   : > { %12873 = vmatmul.mubr.bf16.gmra.mrb[8].mxu0 %v5669_v47  ;;  %12424 = vmatprep.mubr.bf16.mxu1 %v14067_v43  ;;  %v5740_v43 = vor.u32 %v5739_v36, %v5736_v35  ;;  %v5761_v47 = vshrl.u32 %v14096_v41, 16  ;;  %v14118_v35 = vld [vmem:[%s15989_s3 + $0x150] sm:$0xff]   ;;  %v14113_v36 = vld [vmem:[%s14656_s8 + $0x60] sm:$0xff]   ;;  %v14125_v41 = vld [vmem:[%s15989_s3 + $0x158] sm:$0xff]  }
  0x58   : > { %12876 = vmatprep.mubr.bf16.mxu0 %v5678_v50  ;;  %12909 = vmatpush3.bf16.msra.mxu0 %v14080_v49  ;;  %v5749_v46 = vor.u32 %v5748_v39, %v5745_v37  ;;  %v14088_v49 = vld [vmem:[%s14656_s8 + $0x18] sm:$0xff]   ;;  %v14121_v39 = vld [vmem:[%s14606_s9 + $0x40] sm:$0xff]  }
  0x59   : > { %12910 = vmatprep.subr.bf16.mxu0 %v14085_v59  ;;  %v14099_v50 = vld [vmem:[%s14656_s8 + $0x98] ss:$0 sps:$4 sm:$0x33]   ;;  %v5741_v53 = vsel %vm4939_vm0, %v5731_v30, %v5740_v43  ;;  %v5763_v57 = vrot.slane %v5761_v47, 1  ;;  %v14114_v30 = vld [vmem:[%s14606_s9 + $0x30] sm:$0xff]   ;;  %v14133_v47 = vld [vmem:[%s15989_s3 + $0x160] sm:$0xff]  }
  0x5a   : > { %v5750_v56 = vsel %vm4939_vm0, %v5740_v43, %v5749_v46  ;;  %v5759_v4 = vsel %vm4939_vm0, %v5749_v46, %v5758_v60  ;;  %v14117_v37 = vld [vmem:[%s14606_s9 + $0x38] sm:$0xff]   ;;  %v14115_v43 = vld [vmem:[%s14656_s8 + $0x68] sm:$0xff]   ;;  %v6290_v46 = vrot.slane %v14121_v39, 2  ;;  %v14146_v39 = vld [vmem:[%s14606_s9 + $0x80] sm:$0xff]  }
  0x5b   : > { %v6288_v44 = vrot.slane %v14117_v37, 2 }
  0x5c   : > { %12911 = vmatpush3.bf16.msra.mxu0 %v14085_v59  ;;  %v14112_v59 = vld [vmem:[%s15988_s2 + $0x48] sm:$0xff]  }
  0x5d   : > { %12912 = vmatprep.subr.bf16.mxu0 %v14090_v9  ;;  %v6291_v52 = vsel %vm6276_vm1, %v6288_v44, %v6290_v46 }
  0x5e   : > { %12425 = vmatmul.mubr.bf16.gmra.mrb[28].mxu1 %v14069_v61  ;;  %v5770_v61 = vshrl.u32 %v14099_v50, 16 }
  0x5f   : > { %12877 = vmatmul.mubr.bf16.gmra.mrb[12].mxu0 %v5687_v0  ;;  %12428 = vmatprep.mubr.bf16.mxu1 %v14074_v62  ;;  %v5773_v62 = vshll.u32 %v14099_v50, 16  ;;  %v5767_v0 = vor.u32 %v5766_v58, %v5763_v57  ;;  %v14144_v58 = vld [vmem:[%s15989_s3 + $0x170] sm:$0xff]  }
  0x60   : > { %12880 = vmatprep.mubr.bf16.mxu0 %v5696_v3  ;;  %12913 = vmatpush3.bf16.msra.mxu0 %v14090_v9  ;;  %v14116_v3 = vld [vmem:[%s15988_s2 + $0x50] sm:$0xff]   ;;  %v5772_v5 = vrot.slane %v5770_v61, 1  ;;  %v14119_v9 = vld [vmem:[%s15988_s2 + $0x58] sm:$0xff]   ;;  %v14127_v61 = vld [vmem:[%s14656_s8 + $0x80] sm:$0xff]  }
  0x61   : > { %12914 = vmatprep.subr.bf16.mxu0 %v14097_v25  ;;  %v5775_v6 = vrot.slane %v5773_v62, 2  ;;  %v5768_v7 = vsel %vm4939_vm0, %v5758_v60, %v5767_v0  ;;  %v14131_v60 = vld [vmem:[%s14606_s9 + $0x58] sm:$0xff]  }
  0x63   : > { %v5776_v11 = vor.u32 %v5775_v6, %v5772_v5  ;;  %v6296_v5 = vrot.slane %v14131_v60, 2  ;;  %v14137_v6 = vld [vmem:[%s14606_s9 + $0x10] sm:$0xff]  }
  0x64   : > { %12915 = vmatpush3.bf16.msra.mxu0 %v14097_v25  ;;  %v14106_v25 = vld [vmem:[%s14656_s8 + $0x50] sm:$0xff]   ;;  %v1522_v14 = vshll.u32 %v14137_v6, 16  ;;  %v1526_v18 = vshrl.u32 %v14137_v6, 16 }
  0x65   : > { %12952 = vmatprep.subr.bf16.mxu0 %v14774_v45  ;;  %v5777_v17 = vsel %vm4939_vm0, %v5767_v0, %v5776_v11  ;;  %v6293_v0 = vsel %vm6276_vm1, %v6290_v46, %v6292_v54  ;;  %v14871_v11 = vld [vmem:[%s15988_s2 + $0x180] sm:$0xff]   ;;  %v14150_v60 = vld [vmem:[%s14606_s9 + $0x90] sm:$0xff]  }
  0x66   : > { %12429 = vmatmul.mubr.bf16.gmra.mrb[32].mxu1 %v14076_v10  ;;  %v14098_v10 = vld [vmem:[%s14656_s8 + $0x38] sm:$0xff]   ;;  %v6310_v6 = vrot.slane %v14150_v60, 2  ;;  %v14168_v60 = vld [vmem:[%s14656_s8 + $0x30] sm:$0xff]  }
  0x67   : > { %12881 = vmatmul.mubr.bf16.gmra.mrb[16].mxu0 %v5705_v20  ;;  %12448 = vmatprep.mubr.bf16.mxu1 %v14081_v15  ;;  %v14123_v15 = vld [vmem:[%s15988_s2 + $0x60] sm:$0xff]   ;;  %v14126_v20 = vld [vmem:[%s15988_s2 + $0x68] sm:$0xff]  }
  0x68   : > { %12884 = vmatprep.mubr.bf16.mxu0 %v5714_v21  ;;  %v14103_v21 = vld [vmem:[%s14656_s8 + $0x48] sm:$0xff]  }
  0x6e   : > { %12449 = vmatmul.mubr.bf16.vlgmr.msra.gmra.mrb[0].mxu1 %v14083_v29  ;;  %v6283_v29 = vsel %vm6276_vm1, %v6280_v22, %v6282_v23 }
  0x6f   : > { %12885 = vmatmul.mubr.bf16.gmra.mrb[20].mxu0 %v5723_v34  ;;  %12452 = vmatprep.mubr.bf16.mxu1 %v14086_v33  ;;  %v6284_v33 = vrot.slane %v14110_v26, 2  ;;  %v6286_v34 = vrot.slane %v14114_v30, 2  ;;  %v14145_v26 = vld [vmem:[%s14606_s9 + $0x28] sm:$0xff]  }
  0x70   : > { %12888 = vmatprep.mubr.bf16.mxu0 %v5732_v38  ;;  %12485 = vmatpush3.bf16.msra.mxu1 %v14109_v55  ;;  %v14135_v55 = vld [vmem:[%s14606_s9 + $0x8] sm:$0xff]  }
  0x71   : > { %12486 = vmatprep.subr.bf16.mxu1 %v14112_v59  ;;  %v6285_v38 = vsel %vm6276_vm1, %v6282_v23, %v6284_v33  ;;  %v6287_v42 = vsel %vm6276_vm1, %v6284_v33, %v6286_v34  ;;  %v6289_v50 = vsel %vm6276_vm1, %v6286_v34, %v6288_v44  ;;  %v1514_v2 = vshll.u32 %v14135_v55, 16  ;;  %v14142_v23 = vld [vmem:[%s14606_s9 + $0x20] sm:$0xff]   ;;  %v14166_v44 = vld [vmem:[%s15989_s3 + $0x48] sm:$0xff]  }
  0x72   : > { %v1518_v13 = vshrl.u32 %v14135_v55, 16  ;;  %v14148_v55 = vld [vmem:[%s14606_s9 + $0x88] sm:$0xff]  }
  0x73   : > { %v1516_v8 = vrot.slane %v1514_v2, 1  ;;  %v14154_v2 = vld [vmem:[%s14606_s9 + $0x48] sm:$0xff]  }
  0x74   : > { %12487 = vmatpush3.bf16.msra.mxu1 %v14112_v59  ;;  %v14122_v59 = vld [vmem:[%s14656_s8 + $0x78] sm:$0xff]  }
  0x75   : > { %12488 = vmatprep.subr.bf16.mxu1 %v14116_v3 }
  0x76   : > { %12453 = vmatmul.mubr.bf16.gmra.mrb[4].mxu1 %v14088_v49  ;;  %v14128_v49 = vld [vmem:[%s14606_s9 + $0x50] sm:$0xff]  }
  0x77   : > { %12889 = vmatmul.mubr.bf16.gmra.mrb[24].mxu0 %v5741_v53  ;;  %12456 = vmatprep.mubr.bf16.mxu1 %v14091_v51  ;;  %v14134_v51 = vld [vmem:[%s14606_s9] sm:$0xff]   ;;  %v14139_v53 = vld [vmem:[%s15989_s3 + $0x168] sm:$0xff]   ;;  %v6294_v57 = vrot.slane %v14128_v49, 2 }
  0x78   : > { %12892 = vmatprep.mubr.bf16.mxu0 %v5750_v56  ;;  %12489 = vmatpush3.bf16.msra.mxu1 %v14116_v3  ;;  %v1509_v56 = vshll.u32 %v14134_v51, 16  ;;  %v1507_v62 = vshrl.u32 %v14134_v51, 16  ;;  %v14170_v51 = vld [vmem:[%s15989_s3 + $0x50] sm:$0xff]  }
  0x79   : > { %12490 = vmatprep.subr.bf16.mxu1 %v14119_v9  ;;  %v6295_v3 = vsel %vm6276_vm1, %v6292_v54, %v6294_v57  ;;  %v6297_v16 = vsel %vm6276_vm1, %v6294_v57, %v6296_v5  ;;  %v1550_v54 = vshrl.u32 %v14145_v26, 16 }
  0x7c   : > { %12491 = vmatpush3.bf16.msra.mxu1 %v14119_v9  ;;  %v14140_v9 = vld [vmem:[%s14606_s9 + $0x18] sm:$0xff]  }
  0x7d   : > { %12492 = vmatprep.subr.bf16.mxu1 %v14123_v15  ;;  %v1534_v34 = vshrl.u32 %v14140_v9, 16 }
  0x7e   : > { %12457 = vmatmul.mubr.bf16.gmra.mrb[8].mxu1 %v14093_v63  ;;  %v14136_v63 = vld [vmem:[%s14606_s9 + $0x60] sm:$0xff]  }
  0x7f   : > { %12893 = vmatmul.mubr.bf16.gmra.mrb[28].mxu0 %v5759_v4  ;;  %12460 = vmatprep.mubr.bf16.mxu1 %v14095_v1  ;;  %v1511_v1 = vrot.slane %v1509_v56, 1  ;;  %v14151_v4 = vld [vmem:[%s15989_s3 + $0x178] sm:$0xff]  }
  0x80   : > { %12896 = vmatprep.mubr.bf16.mxu0 %v5768_v7  ;;  %12493 = vmatpush3.bf16.msra.mxu1 %v14123_v15  ;;  %v14138_v15 = vld [vmem:[%s14606_s9 + $0x68] sm:$0xff]  }
  0x81   : > { %12494 = vmatprep.subr.bf16.mxu1 %v14126_v20  ;;  %v1512_v7 = vor.u32 %v1511_v1, %v1507_v62  ;;  %v14173_v62 = vld [vmem:[%s15989_s3 + $0x58] sm:$0xff]  }
  0x84   : > { %12495 = vmatpush3.bf16.msra.mxu1 %v14126_v20  ;;  %v14141_v20 = vld [vmem:[%s14606_s9 + $0x70] sm:$0xff]  }
  0x85   : > { %12496 = vmatprep.subr.bf16.mxu1 %v14130_v24  ;;  %v6302_v30 = vrot.slane %v14141_v20, 2  ;;  %v14180_v20 = vld [vmem:[%s15989_s3 + $0x68] sm:$0xff]  }
  0x86   : > { %12461 = vmatmul.mubr.bf16.gmra.mrb[12].mxu1 %v14098_v10  ;;  %v6298_v10 = vrot.slane %v14136_v63, 2 }
  0x87   : > { %12897 = vmatmul.mubr.bf16.gmra.mrb[32].mxu0 %v5777_v17  ;;  %12464 = vmatprep.mubr.bf16.mxu1 %v14100_v12  ;;  %v14129_v12 = vld [vmem:[%s14656_s8 + $0x88] sm:$0xff]   ;;  %v1517_v17 = vsel %vm1505_vm2, %v1512_v7, %v1516_v8  ;;  %v14177_v7 = vld [vmem:[%s15989_s3 + $0x60] sm:$0xff]  }
  0x88   : > { %12916 = vmatprep.mubr.bf16.mxu0 %v6279_v19  ;;  %12497 = vmatpush3.bf16.msra.mxu1 %v14130_v24  ;;  %v1530_v19 = vshll.u32 %v14140_v9, 16  ;;  %v6299_v22 = vsel %vm6276_vm1, %v6296_v5, %v6298_v10  ;;  %v1524_v24 = vrot.slane %v1522_v14, 1  ;;  %v1578_v14 = vshll.u32 %v14154_v2, 16 }
  0x89   : > { %12498 = vmatprep.subr.bf16.mxu1 %v14132_v31 }
  0x8c   : > { %12499 = vmatpush3.bf16.msra.mxu1 %v14132_v31  ;;  %v1538_v31 = vshll.u32 %v14142_v23, 16 }
  0x8e   : > { %12465 = vmatmul.mubr.bf16.gmra.mrb[16].mxu1 %v14103_v21  ;;  %v14163_v21 = vld [vmem:[%s15989_s3 + $0x40] sm:$0xff]  }
  0x8f   : > { %12917 = vmatmul.mubr.bf16.vlgmr.msra.gmra.mrb[0].mxu0 %v6281_v27  ;;  %12468 = vmatprep.mubr.bf16.mxu1 %v14106_v25  ;;  %v1520_v25 = vor.u32 %v1518_v13, %v1516_v8  ;;  %v6300_v27 = vrot.slane %v14138_v15, 2  ;;  %v1566_v8 = vshrl.u32 %v14149_v48, 16  ;;  %v14156_v15 = vld [vmem:[%s14656_s8 + $0x10] sm:$0xff]  }
  0x90   : > { %12953 = vmatpush3.bf16.msra.mxu0 %v14774_v45  ;;  %12920 = vmatprep.mubr.bf16.mxu0 %v6283_v29  ;;  %v14120_v45 = vld [vmem:[%s14656_s8 + $0x70] sm:$0xff]   ;;  %v1532_v29 = vrot.slane %v1530_v19, 1 }
  0x91   : > { %12954 = vmatprep.subr.bf16.mxu0 %v14111_v28  ;;  %12536 = vmatprep.subr.bf16.mxu1 %v14163_v21  ;;  %v1525_v33 = vsel %vm1505_vm2, %v1520_v25, %v1524_v24 }
  0x94   : > { %12955 = vmatpush3.bf16.msra.mxu0 %v14111_v28  ;;  %v1528_v28 = vor.u32 %v1526_v18, %v1524_v24  ;;  %v14155_v18 = vld [vmem:[%s14656_s8 + $0x8] sm:$0xfc]  }
  0x95   : > { %12956 = vmatprep.subr.bf16.mxu0 %v14118_v35 }
  0x96   : > { %12469 = vmatmul.mubr.bf16.gmra.mrb[20].mxu1 %v14108_v32  ;;  %v14143_v32 = vld [vmem:[%s14606_s9 + $0x78] sm:$0xff]   ;;  %v1533_v37 = vsel %vm1505_vm2, %v1528_v28, %v1532_v29 }
  0x97   : > { %12921 = vmatmul.mubr.bf16.gmra.mrb[4].mxu0 %v6285_v38  ;;  %12472 = vmatprep.mubr.bf16.mxu1 %v14113_v36  ;;  %v6301_v36 = vsel %vm6276_vm1, %v6298_v10, %v6300_v27  ;;  %v1542_v38 = vshrl.u32 %v14142_v23, 16  ;;  %v6304_v46 = vrot.slane %v14143_v32, 2  ;;  %v14153_v10 = vld [vmem:[%s14606_s9 + $0x98] ss:$0 sps:$4 sm:$0x33]  }
  0x98   : > { %12924 = vmatprep.mubr.bf16.mxu0 %v6287_v42  ;;  %12957 = vmatpush3.bf16.msra.mxu0 %v14118_v35  ;;  %v1546_v35 = vshll.u32 %v14145_v26, 16  ;;  %v1540_v42 = vrot.slane %v1538_v31, 1  ;;  %v6312_v24 = vrot.slane %v14153_v10, 2  ;;  %v1580_v26 = vrot.slane %v1578_v14, 1  ;;  %v14160_v28 = vld [vmem:[%s14606_s9 + $0x58] sm:$0xff]  }
  0x99   : > { %12958 = vmatprep.subr.bf16.mxu0 %v14125_v41  ;;  %v6305_v57 = vsel %vm6276_vm1, %v6302_v30, %v6304_v46 }
  0x9a   : > { %v1544_v49 = vor.u32 %v1542_v38, %v1540_v42  ;;  %v1594_v38 = vshll.u32 %v14160_v28, 16 }
  0x9c   : > { %12959 = vmatpush3.bf16.msra.mxu0 %v14125_v41  ;;  %v6303_v41 = vsel %vm6276_vm1, %v6300_v27, %v6302_v30  ;;  %v6813_v27 = vrot.slane %v14156_v15, 2  ;;  %v14184_v30 = vld [vmem:[%s15989_s3 + $0x70] sm:$0xff]  }
  0x9d   : > { %12960 = vmatprep.subr.bf16.mxu0 %v14133_v47 }
  0x9e   : > { %12473 = vmatmul.mubr.bf16.gmra.mrb[24].mxu1 %v14115_v43  ;;  %v14147_v43 = vld [vmem:[%s14606_s9 + $0x30] sm:$0xff]  }
  0x9f   : > { %12925 = vmatmul.mubr.bf16.gmra.mrb[8].mxu0 %v6289_v50  ;;  %12476 = vmatprep.mubr.bf16.mxu1 %v14120_v45  ;;  %v1536_v45 = vor.u32 %v1534_v34, %v1532_v29  ;;  %v6306_v50 = vrot.slane %v14146_v39, 2  ;;  %v1558_v56 = vshrl.u32 %v14147_v43, 16  ;;  %v6812_v29 = vrot.slane %v14155_v18, 2  ;;  %v14158_v34 = vld [vmem:[%s14656_s8 + $0x18] sm:$0xff]   ;;  %v14161_v39 = vld [vmem:[%s14656_s8 + $0x20] sm:$0xff]  }
  0xa0   : > { %12928 = vmatprep.mubr.bf16.mxu0 %v6291_v52  ;;  %12961 = vmatpush3.bf16.msra.mxu0 %v14133_v47  ;;  %v1548_v47 = vrot.slane %v1546_v35, 1  ;;  %v1554_v52 = vshll.u32 %v14147_v43, 16  ;;  %v6313_v35 = vsel %vm6276_vm1, %v6310_v6, %v6312_v24  ;;  %v14179_v18 = vld [vmem:[%s15988_s2 + $0x198] sm:$0xff]  }
  0xa1   : > { %12962 = vmatprep.subr.bf16.mxu0 %v14139_v53 }
  0xa2   : > { %v1556_v63 = vrot.slane %v1554_v52, 1  ;;  %v1552_v1 = vor.u32 %v1550_v54, %v1548_v47  ;;  %v14164_v54 = vld [vmem:[%s14656_s8 + $0x28] sm:$0xff]  }
  0xa4   : > { %12963 = vmatpush3.bf16.msra.mxu0 %v14139_v53  ;;  %v1541_v53 = vsel %vm1505_vm2, %v1536_v45, %v1540_v42  ;;  %v1557_v13 = vsel %vm1505_vm2, %v1552_v1, %v1556_v63  ;;  %v14186_v42 = vld [vmem:[%s15989_s3 + $0x78] sm:$0xff]   ;;  %v6819_v1 = vrot.slane %v14164_v54, 2 }
  0xa5   : > { %12964 = vmatprep.subr.bf16.mxu0 %v14144_v58 }
  0xa6   : > { %12477 = vmatmul.mubr.bf16.gmra.mrb[28].mxu1 %v14122_v59  ;;  %v1562_v59 = vshll.u32 %v14149_v48, 16  ;;  %v1596_v48 = vrot.slane %v1594_v38, 1 }
  0xa7   : > { %12929 = vmatmul.mubr.bf16.gmra.mrb[12].mxu0 %v6293_v0  ;;  %12480 = vmatprep.mubr.bf16.mxu1 %v14127_v61  ;;  %v6307_v61 = vsel %vm6276_vm1, %v6304_v46, %v6306_v50  ;;  %v14152_v0 = vld [vmem:[%s14606_s9 + $0x40] sm:$0xff]   ;;  %v6815_v46 = vrot.slane %v14158_v34, 2 }
  0xa8   : > { %12932 = vmatprep.mubr.bf16.mxu0 %v6295_v3  ;;  %12965 = vmatpush3.bf16.msra.mxu0 %v14144_v58  ;;  %v1549_v58 = vsel %vm1505_vm2, %v1544_v49, %v1548_v47  ;;  %v6308_v3 = vrot.slane %v14148_v55, 2  ;;  %v1564_v5 = vrot.slane %v1562_v59, 1  ;;  %v1570_v9 = vshll.u32 %v14152_v0, 16  ;;  %v14167_v49 = vld [vmem:[%s14606_s9 + $0x68] sm:$0xff]  }
  0xa9   : > { %12966 = vmatprep.subr.bf16.mxu0 %v14151_v4  ;;  %v6816_v55 = vsel %vm6276_vm1, %v6813_v27, %v6815_v46  ;;  %v1610_v59 = vshll.u32 %v14167_v49, 16  ;;  %v1614_v10 = vshrl.u32 %v14167_v49, 16  ;;  %v14983_v49 = vld [vmem:[%s15988_s2 + $0x80] sm:$0xff]  }
  0xaa   : > { %v6311_v19 = vsel %vm6276_vm1, %v6308_v3, %v6310_v6  ;;  %v1568_v23 = vor.u32 %v1566_v8, %v1564_v5  ;;  %v14176_v8 = vld [vmem:[%s14606_s9 + $0x80] sm:$0xff]  }
  0xac   : > { %12967 = vmatpush3.bf16.msra.mxu0 %v14151_v4  ;;  %v1560_v4 = vor.u32 %v1558_v56, %v1556_v63 }
  0xad   : > { %13004 = vmatprep.subr.bf16.mxu0 %v14871_v11 }
  0xae   : > { %12481 = vmatmul.mubr.bf16.gmra.mrb[32].mxu1 %v14129_v12  ;;  %v1574_v12 = vshrl.u32 %v14152_v0, 16 }
  0xaf   : > { %12933 = vmatmul.mubr.bf16.gmra.mrb[16].mxu0 %v6297_v16  ;;  %12500 = vmatprep.mubr.bf16.mxu1 %v1517_v17  ;;  %v6309_v16 = vsel %vm6276_vm1, %v6306_v50, %v6308_v3  ;;  %v1565_v17 = vsel %vm1505_vm2, %v1560_v4, %v1564_v5  ;;  %v6817_v50 = vrot.slane %v14161_v39, 2  ;;  %v1612_v3 = vrot.slane %v1610_v59, 1  ;;  %v14174_v4 = vld [vmem:[%s14606_s9 + $0x78] sm:$0xff]   ;;  %v14183_v39 = vld [vmem:[%s14606_s9 + $0x90] ss:$0 sps:$4 sm:$0x11]  }
  0xb0   : > { %12936 = vmatprep.mubr.bf16.mxu0 %v6299_v22  ;;  %v14157_v22 = vld [vmem:[%s14606_s9 + $0x50] sm:$0xff]   ;;  %v6821_v5 = vrot.slane %v14168_v60, 2  ;;  %v1626_v15 = vshll.u32 %v14174_v4, 16 }
  0xb1   : > { %v1586_v31 = vshll.u32 %v14157_v22, 16 }
  0xb2   : > { %v1628_v24 = vrot.slane %v1626_v15, 1 }
  0xb3   : > { %v1588_v43 = vrot.slane %v1586_v31, 1 }
  0xb6   : > { %12501 = vmatmul.mubr.bf16.vlgmr.msra.gmra.mrb[0].mxu1 %v1525_v33  ;;  %v1582_v33 = vshrl.u32 %v14154_v2, 16 }
  0xb7   : > { %12937 = vmatmul.mubr.bf16.gmra.mrb[20].mxu0 %v6301_v36  ;;  %12504 = vmatprep.mubr.bf16.mxu1 %v1533_v37  ;;  %v1590_v37 = vshrl.u32 %v14157_v22, 16 }
  0xb8   : > { %12940 = vmatprep.mubr.bf16.mxu0 %v6303_v41  ;;  %12537 = vmatpush3.bf16.msra.mxu1 %v14163_v21  ;;  %v1572_v21 = vrot.slane %v1570_v9, 1  ;;  %v6814_v41 = vsel %vm6276_vm1, %v6812_v29, %v6813_v27  ;;  %v1584_v45 = vor.u32 %v1582_v33, %v1580_v26  ;;  %v14182_v33 = vld [vmem:[%s14656_s8 + $0x50] sm:$0xff]  }
  0xb9   : > { %12538 = vmatprep.subr.bf16.mxu1 %v14166_v44  ;;  %v1592_v47 = vor.u32 %v1590_v37, %v1588_v43  ;;  %v14188_v37 = vld [vmem:[%s14656_s8] sm:$0xff]  }
  0xba   : > { %v1576_v25 = vor.u32 %v1574_v12, %v1572_v21  ;;  %v1573_v32 = vsel %vm1505_vm2, %v1568_v23, %v1572_v21  ;;  %v1589_v52 = vsel %vm1505_vm2, %v1584_v45, %v1588_v43  ;;  %v14171_v12 = vld [vmem:[%s14656_s8 + $0x38] sm:$0xff]   ;;  %v1616_v21 = vor.u32 %v1614_v10, %v1612_v3 }
  0xbb   : > { %v1597_v56 = vsel %vm1505_vm2, %v1592_v47, %v1596_v48  ;;  %v6823_v22 = vrot.slane %v14171_v12, 2  ;;  %v14189_v47 = vld [vmem:[%s14656_s8 + $0x8] sm:$0xff]  }
  0xbc   : > { %12539 = vmatpush3.bf16.msra.mxu1 %v14166_v44  ;;  %v1581_v36 = vsel %vm1505_vm2, %v1576_v25, %v1580_v26  ;;  %v14162_v44 = vld [vmem:[%s14606_s9 + $0x60] sm:$0xff]   ;;  %v1630_v25 = vshrl.u32 %v14174_v4, 16  ;;  %v14181_v26 = vld [vmem:[%s14606_s9 + $0x88] sm:$0xff]   ;;  %v2160_v60 = vshll.u32 %v14189_v47, 16 }
  0xbd   : > { %12540 = vmatprep.subr.bf16.mxu1 %v14170_v51  ;;  %v6824_v34 = vsel %vm6276_vm1, %v6821_v5, %v6823_v22  ;;  %v14192_v12 = vld [vmem:[%s14656_s8 + $0x68] sm:$0xff]  }
  0xbe   : > { %12505 = vmatmul.mubr.bf16.gmra.mrb[4].mxu1 %v1541_v53  ;;  %v1598_v53 = vshrl.u32 %v14160_v28, 16  ;;  %v14187_v28 = vld [vmem:[%s15988_s2 + $0x1a0] sm:$0xff]  }
  0xbf   : > { %12941 = vmatmul.mubr.bf16.gmra.mrb[24].mxu0 %v6305_v57  ;;  %12508 = vmatprep.mubr.bf16.mxu1 %v1549_v58  ;;  %v14165_v57 = vld [vmem:[%s15988_s2 + $0x188] sm:$0xff]   ;;  %v1606_v58 = vshrl.u32 %v14162_v44, 16 }
  0xc0   : > { %12944 = vmatprep.mubr.bf16.mxu0 %v6307_v61  ;;  %12541 = vmatpush3.bf16.msra.mxu1 %v14170_v51  ;;  %v1602_v51 = vshll.u32 %v14162_v44, 16  ;;  %v6818_v61 = vsel %vm6276_vm1, %v6815_v46, %v6817_v50  ;;  %v1600_v0 = vor.u32 %v1598_v53, %v1596_v48  ;;  %v1646_v44 = vshrl.u32 %v14181_v26, 16  ;;  %v14185_v53 = vld [vmem:[%s14656_s8 + $0x58] sm:$0xff]  }
  0xc1   : > { %12542 = vmatprep.subr.bf16.mxu1 %v14173_v62  ;;  %v2155_v48 = vshll.u32 %v14188_v37, 16 }
  0xc2   : > { %v1604_v63 = vrot.slane %v1602_v51, 1  ;;  %v14198_v51 = vld [vmem:[%s15988_s2 + $0x1b0] sm:$0xff]  }
  0xc3   : > { %v2157_v59 = vrot.slane %v2155_v48, 1 }
  0xc4   : > { %12543 = vmatpush3.bf16.msra.mxu1 %v14173_v62  ;;  %v14169_v62 = vld [vmem:[%s14606_s9 + $0x70] sm:$0xff]   ;;  %v1608_v2 = vor.u32 %v1606_v58, %v1604_v63  ;;  %v1605_v9 = vsel %vm1505_vm2, %v1600_v0, %v1604_v63 }
  0xc5   : > { %12544 = vmatprep.subr.bf16.mxu1 %v14177_v7  ;;  %v1618_v6 = vshll.u32 %v14169_v62, 16  ;;  %v1622_v14 = vshrl.u32 %v14169_v62, 16  ;;  %v14205_v62 = vld [vmem:[%s15988_s2 + $0x1b8] sm:$0xff]   ;;  %v14191_v63 = vld [vmem:[%s14656_s8 + $0x10] sm:$0xff]  }
  0xc6   : > { %12509 = vmatmul.mubr.bf16.gmra.mrb[8].mxu1 %v1557_v13  ;;  %v6820_v13 = vsel %vm6276_vm1, %v6817_v50, %v6819_v1  ;;  %v6829_v50 = vrot.slane %v14182_v33, 2  ;;  %v2172_v15 = vshrl.u32 %v14191_v63, 16 }
  0xc7   : > { %12945 = vmatmul.mubr.bf16.gmra.mrb[28].mxu0 %v6309_v16  ;;  %12512 = vmatprep.mubr.bf16.mxu1 %v1565_v17  ;;  %v6822_v16 = vsel %vm6276_vm1, %v6819_v1, %v6821_v5  ;;  %v14175_v17 = vld [vmem:[%s14656_s8 + $0x40] sm:$0xff]   ;;  %v2162_v5 = vrot.slane %v2160_v60, 1  ;;  %v14208_v60 = vld [vmem:[%s14656_s8 + $0x48] sm:$0xff]  }
  0xc8   : > { %12948 = vmatprep.mubr.bf16.mxu0 %v6311_v19  ;;  %12545 = vmatpush3.bf16.msra.mxu1 %v14177_v7  ;;  %v14172_v7 = vld [vmem:[%s15988_s2 + $0x190] sm:$0xff]   ;;  %v1620_v19 = vrot.slane %v1618_v6, 1  ;;  %v6825_v27 = vrot.slane %v14175_v17, 2 }
  0xc9   : > { %12546 = vmatprep.subr.bf16.mxu1 %v14180_v20 }
  0xca   : > { %v1624_v23 = vor.u32 %v1622_v14, %v1620_v19  ;;  %v1621_v31 = vsel %vm1505_vm2, %v1616_v21, %v1620_v19  ;;  %v6826_v38 = vsel %vm6276_vm1, %v6823_v22, %v6825_v27  ;;  %v6835_v21 = vrot.slane %v14192_v12, 2 }
  0xcc   : > { %12547 = vmatpush3.bf16.msra.mxu1 %v14180_v20  ;;  %v1634_v20 = vshll.u32 %v14176_v8, 16 }
  0xcd   : > { %12548 = vmatprep.subr.bf16.mxu1 %v14184_v30 }
  0xce   : > { %12513 = vmatmul.mubr.bf16.gmra.mrb[12].mxu1 %v1573_v32  ;;  %v1636_v29 = vrot.slane %v1634_v20, 1  ;;  %v1638_v32 = vshrl.u32 %v14176_v8, 16  ;;  %v2164_v8 = vshrl.u32 %v14189_v47, 16  ;;  %v14224_v47 = vld [vmem:[%s15988_s2 + $0x90] sm:$0xff]  }
  0xcf   : > { %12949 = vmatmul.mubr.bf16.gmra.mrb[32].mxu0 %v6313_v35  ;;  %12516 = vmatprep.mubr.bf16.mxu1 %v1581_v36  ;;  %v1629_v35 = vsel %vm1505_vm2, %v1624_v23, %v1628_v24  ;;  %v1642_v36 = vshll.u32 %v14181_v26, 16  ;;  %v14199_v23 = vld [vmem:[%s14656_s8 + $0x28] sm:$0xff]  }
  0xd0   : > { %12968 = vmatprep.mubr.bf16.mxu0 %v6814_v41  ;;  %12549 = vmatpush3.bf16.msra.mxu1 %v14184_v30  ;;  %v14178_v30 = vld [vmem:[%s14656_s8 + $0x48] sm:$0xff]   ;;  %v1640_v45 = vor.u32 %v1638_v32, %v1636_v29  ;;  %v2166_v20 = vor.u32 %v2164_v8, %v2162_v5 }
  0xd1   : > { %12550 = vmatprep.subr.bf16.mxu1 %v14186_v42  ;;  %v14193_v41 = vld [vmem:[%s15988_s2 + $0x1a8] sm:$0xff]   ;;  %v6827_v43 = vrot.slane %v14178_v30, 2  ;;  %v1644_v46 = vrot.slane %v1642_v36, 1  ;;  %v14200_v30 = vld [vmem:[%s14656_s8 + $0x80] sm:$0xff]  }
  0xd3   : > { %v1645_v58 = vsel %vm1505_vm2, %v1640_v45, %v1644_v46  ;;  %v1648_v0 = vor.u32 %v1646_v44, %v1644_v46  ;;  %v14203_v45 = vld [vmem:[%s14656_s8 + $0x38] sm:$0xff]  }
  0xd4   : > { %12551 = vmatpush3.bf16.msra.mxu1 %v14186_v42  ;;  %v1632_v42 = vor.u32 %v1630_v25, %v1628_v24 }
  0xd5   : > { %12588 = vmatprep.subr.bf16.mxu1 %v14983_v49 }
  0xd6   : > { %12517 = vmatmul.mubr.bf16.gmra.mrb[16].mxu1 %v1589_v52  ;;  %v1650_v52 = vshll.u32 %v14183_v39, 16  ;;  %v1637_v54 = vsel %vm1505_vm2, %v1632_v42, %v1636_v29  ;;  %v6841_v42 = vrot.slane %v14200_v30, 2 }
  0xd7   : > { %12969 = vmatmul.mubr.bf16.vlgmr.msra.gmra.mrb[0].mxu0 %v6816_v55  ;;  %12520 = vmatprep.mubr.bf16.mxu1 %v1597_v56  ;;  %v2153_v55 = vshrl.u32 %v14188_v37, 16  ;;  %v14190_v56 = vld [vmem:[%s14656_s8 + $0x60] sm:$0xff]   ;;  %v14220_v37 = vld [vmem:[%s15988_s2 + $0x88] sm:$0xff]  }
  0xd8   : > { %13005 = vmatpush3.bf16.msra.mxu0 %v14871_v11  ;;  %12972 = vmatprep.mubr.bf16.mxu0 %v6818_v61  ;;  %v1613_v11 = vsel %vm1505_vm2, %v1608_v2, %v1612_v3  ;;  %v6830_v61 = vsel %vm6276_vm1, %v6827_v43, %v6829_v50  ;;  %v1652_v1 = vrot.slane %v1650_v52, 1  ;;  %v14194_v2 = vld [vmem:[%s14656_s8 + $0x18] sm:$0xff]   ;;  %v6831_v3 = vrot.slane %v14185_v53, 2 }
  0xd9   : > { %13006 = vmatprep.subr.bf16.mxu0 %v14165_v57  ;;  %v2158_v4 = vor.u32 %v2157_v59, %v2153_v55  ;;  %v6833_v6 = vrot.slane %v14190_v56, 2  ;;  %v2180_v29 = vshrl.u32 %v14194_v2, 16  ;;  %v2208_v55 = vshll.u32 %v14203_v45, 16  ;;  %v14204_v56 = vld [vmem:[%s14656_s8 + $0x90] sm:$0xff]  }
  0xda   : > { %v1653_v10 = vsel %vm1505_vm2, %v1648_v0, %v1652_v1  ;;  %v6845_v1 = vrot.slane %v14204_v56, 2 }
  0xdb   : > { %v2163_v14 = vsel %vm1505_vm2, %v2158_v4, %v2162_v5  ;;  %v6834_v17 = vsel %vm6276_vm1, %v6831_v3, %v6833_v6  ;;  %v2210_v0 = vrot.slane %v2208_v55, 1  ;;  %v14231_v4 = vld [vmem:[%s15988_s2 + $0xa0] sm:$0xff]  }
  0xdc   : > { %13007 = vmatpush3.bf16.msra.mxu0 %v14165_v57  ;;  %v6828_v57 = vsel %vm6276_vm1, %v6825_v27, %v6827_v43  ;;  %v14197_v27 = vld [vmem:[%s14656_s8 + $0x78] sm:$0xff]  }
  0xdd   : > { %13008 = vmatprep.subr.bf16.mxu0 %v14172_v7 }
  0xde   : > { %12521 = vmatmul.mubr.bf16.gmra.mrb[20].mxu1 %v1605_v9  ;;  %v2168_v9 = vshll.u32 %v14191_v63, 16 }
  0xdf   : > { %12973 = vmatmul.mubr.bf16.gmra.mrb[4].mxu0 %v6820_v13  ;;  %12524 = vmatprep.mubr.bf16.mxu1 %v1613_v11  ;;  %v2176_v13 = vshll.u32 %v14194_v2, 16  ;;  %v6832_v11 = vsel %vm6276_vm1, %v6829_v50, %v6831_v3  ;;  %v2196_v50 = vshrl.u32 %v14199_v23, 16  ;;  %v2212_v2 = vshrl.u32 %v14203_v45, 16  ;;  %v14207_v3 = vld [vmem:[%s14656_s8 + $0x98] ss:$0 sps:$4 sm:$0x33]  }
  0xe0   : > { %12976 = vmatprep.mubr.bf16.mxu0 %v6822_v16  ;;  %13009 = vmatpush3.bf16.msra.mxu0 %v14172_v7  ;;  %v15003_v7 = vld [vmem:[%s15989_s3 + $0x180] sm:$0xff]   ;;  %v14195_v16 = vld [vmem:[%s14656_s8 + $0x70] sm:$0xff]   ;;  %v2170_v19 = vrot.slane %v2168_v9, 1 }
  0xe1   : > { %13010 = vmatprep.subr.bf16.mxu0 %v14179_v18  ;;  %v2178_v22 = vrot.slane %v2176_v13, 1  ;;  %v6837_v25 = vrot.slane %v14195_v16, 2  ;;  %v14209_v9 = vld [vmem:[%s14606_s9 + $0x10] sm:$0xfc]  }
  0xe2   : > { %v2174_v24 = vor.u32 %v2172_v15, %v2170_v19  ;;  %v14234_v15 = vld [vmem:[%s15988_s2 + $0xa8] sm:$0xff]  }
  0xe3   : > { %v6838_v36 = vsel %vm6276_vm1, %v6835_v21, %v6837_v25  ;;  %v2182_v39 = vor.u32 %v2180_v29, %v2178_v22  ;;  %v14212_v29 = vld [vmem:[%s14606_s9 + $0x20] sm:$0xff]  }
  0xe4   : > { %13011 = vmatpush3.bf16.msra.mxu0 %v14179_v18  ;;  %v14196_v18 = vld [vmem:[%s14656_s8 + $0x20] sm:$0xff]   ;;  %v2179_v32 = vsel %vm1505_vm2, %v2174_v24, %v2178_v22  ;;  %v7347_v22 = vrot.slane %v14209_v9, 2 }
  0xe5   : > { %13012 = vmatprep.subr.bf16.mxu0 %v14187_v28  ;;  %v2184_v26 = vshll.u32 %v14196_v18, 16  ;;  %v2188_v33 = vshrl.u32 %v14196_v18, 16  ;;  %v2214_v18 = vor.u32 %v2212_v2, %v2210_v0  ;;  %v14226_v2 = vld [vmem:[%s15989_s3 + $0x190] sm:$0xff]  }
  0xe6   : > { %12525 = vmatmul.mubr.bf16.gmra.mrb[24].mxu1 %v1621_v31  ;;  %v6836_v31 = vsel %vm6276_vm1, %v6833_v6, %v6835_v21  ;;  %v2224_v6 = vshll.u32 %v14208_v60, 16 }
  0xe7   : > { %12977 = vmatmul.mubr.bf16.gmra.mrb[8].mxu0 %v6824_v34  ;;  %12528 = vmatprep.mubr.bf16.mxu1 %v1629_v35  ;;  %v2192_v34 = vshll.u32 %v14199_v23, 16  ;;  %v14201_v35 = vld [vmem:[%s14656_s8 + $0x30] sm:$0xff]   ;;  %v14214_v23 = vld [vmem:[%s14656_s8 + $0x58] sm:$0xff]  }
  0xe8   : > { %12980 = vmatprep.mubr.bf16.mxu0 %v6826_v38  ;;  %13013 = vmatpush3.bf16.msra.mxu0 %v14187_v28  ;;  %v2171_v28 = vsel %vm1505_vm2, %v2166_v20, %v2170_v19  ;;  %v2186_v38 = vrot.slane %v2184_v26, 1  ;;  %v2200_v46 = vshll.u32 %v14201_v35, 16  ;;  %v2204_v52 = vshrl.u32 %v14201_v35, 16  ;;  %v14215_v35 = vld [vmem:[%s14606_s9 + $0x28] sm:$0xff]  }
  0xe9   : > { %13014 = vmatprep.subr.bf16.mxu0 %v14193_v41  ;;  %v2194_v44 = vrot.slane %v2192_v34, 1  ;;  %v6847_v19 = vrot.slane %v14207_v3, 2  ;;  %v2226_v20 = vrot.slane %v2224_v6, 1  ;;  %v7352_v45 = vrot.slane %v14215_v35, 2  ;;  %v14225_v6 = vld [vmem:[%s14606_s9 + $0x40] sm:$0xff]  }
  0xea   : > { %v2190_v43 = vor.u32 %v2188_v33, %v2186_v38  ;;  %v2187_v48 = vsel %vm1505_vm2, %v2182_v39, %v2186_v38  ;;  %v2202_v59 = vrot.slane %v2200_v46, 1  ;;  %v2240_v33 = vshll.u32 %v14214_v23, 16  ;;  %v14216_v38 = vld [vmem:[%s14656_s8 + $0x60] sm:$0xff]  }
  0xeb   : > { %v6848_v30 = vsel %vm6276_vm1, %v6845_v1, %v6847_v19  ;;  %v2248_v46 = vshll.u32 %v14216_v38, 16 }
  0xec   : > { %13015 = vmatpush3.bf16.msra.mxu0 %v14193_v41  ;;  %v6839_v41 = vrot.slane %v14197_v27, 2  ;;  %v2206_v63 = vor.u32 %v2204_v52, %v2202_v59 }
  0xed   : > { %13016 = vmatprep.subr.bf16.mxu0 %v14198_v51 }
  0xee   : > { %12529 = vmatmul.mubr.bf16.gmra.mrb[28].mxu1 %v1637_v54  ;;  %v6840_v53 = vsel %vm6276_vm1, %v6837_v25, %v6839_v41  ;;  %v2195_v54 = vsel %vm1505_vm2, %v2190_v43, %v2194_v44  ;;  %v2211_v12 = vsel %vm1505_vm2, %v2206_v63, %v2210_v0  ;;  %v14238_v25 = vld [vmem:[%s15988_s2 + $0xb0] sm:$0xff]   ;;  %v2242_v43 = vrot.slane %v2240_v33, 1  ;;  %v14228_v0 = vld [vmem:[%s14656_s8 + $0x78] sm:$0xff]  }
  0xef   : > { %12981 = vmatmul.mubr.bf16.gmra.mrb[12].mxu0 %v6828_v57  ;;  %12532 = vmatprep.mubr.bf16.mxu1 %v1645_v58  ;;  %v14206_v57 = vld [vmem:[%s14656_s8 + $0x40] sm:$0xff]   ;;  %v14227_v58 = vld [vmem:[%s15988_s2 + $0x98] sm:$0xff]  }
  0xf0   : > { %12984 = vmatprep.mubr.bf16.mxu0 %v6830_v61  ;;  %13017 = vmatpush3.bf16.msra.mxu0 %v14198_v51  ;;  %v14202_v51 = vld [vmem:[%s14656_s8 + $0x88] sm:$0xff]   ;;  %v2198_v61 = vor.u32 %v2196_v50, %v2194_v44  ;;  %v2216_v5 = vshll.u32 %v14206_v57, 16  ;;  %v2220_v13 = vshrl.u32 %v14206_v57, 16  ;;  %v2244_v50 = vshrl.u32 %v14214_v23, 16 }
  0xf1   : > { %13018 = vmatprep.subr.bf16.mxu0 %v14205_v62  ;;  %v14221_v44 = vld [vmem:[%s14656_s8 + $0x68] sm:$0xff]   ;;  %v2250_v57 = vrot.slane %v2248_v46, 1  ;;  %v2276_v23 = vshrl.u32 %v14228_v0, 16 }
  0xf2   : > { %v2203_v8 = vsel %vm1505_vm2, %v2198_v61, %v2202_v59  ;;  %v2218_v16 = vrot.slane %v2216_v5, 1  ;;  %v2256_v55 = vshll.u32 %v14221_v44, 16  ;;  %v2246_v59 = vor.u32 %v2244_v50, %v2242_v43  ;;  %v15082_v61 = vld [vmem:[%s15989_s3 + $0x80] sm:$0xff]  }
  0xf3   : > { %v2260_v3 = vshrl.u32 %v14221_v44, 16  ;;  %v14239_v44 = vld [vmem:[%s14606_s9 + $0x60] sm:$0xff]  }
  0xf4   : > { %13019 = vmatpush3.bf16.msra.mxu0 %v14205_v62  ;;  %v6843_v62 = vrot.slane %v14202_v51, 2  ;;  %v2222_v21 = vor.u32 %v2220_v13, %v2218_v16  ;;  %v2219_v27 = vsel %vm1505_vm2, %v2214_v18, %v2218_v16  ;;  %v14219_v51 = vld [vmem:[%s15989_s3 + $0x188] sm:$0xff]   ;;  %v2258_v63 = vrot.slane %v2256_v55, 1 }
  0xf5   : > { %13056 = vmatprep.subr.bf16.mxu0 %v15003_v7  ;;  %v2251_v5 = vsel %vm1505_vm2, %v2246_v59, %v2250_v57 }
  0xf6   : > { %12533 = vmatmul.mubr.bf16.gmra.mrb[32].mxu1 %v1653_v10  ;;  %v6844_v10 = vsel %vm6276_vm1, %v6841_v42, %v6843_v62  ;;  %v2262_v16 = vor.u32 %v2260_v3, %v2258_v63  ;;  %v14248_v3 = vld [vmem:[%s14606_s9 + $0x18] sm:$0xff]  }
  0xf7   : > { %12985 = vmatmul.mubr.bf16.gmra.mrb[16].mxu0 %v6832_v11  ;;  %12552 = vmatprep.mubr.bf16.mxu1 %v2163_v14  ;;  %v14210_v11 = vld [vmem:[%s14606_s9 + $0x18] sm:$0xff]   ;;  %v6846_v14 = vsel %vm6276_vm1, %v6843_v62, %v6845_v1 }
  0xf8   : > { %12988 = vmatprep.mubr.bf16.mxu0 %v6834_v17  ;;  %v14211_v17 = vld [vmem:[%s14656_s8 + $0x50] sm:$0xff]   ;;  %v7348_v24 = vrot.slane %v14210_v11, 2  ;;  %v14233_v11 = vld [vmem:[%s15989_s3 + $0x198] sm:$0xff]  }
  0xf9   : > { %v2232_v26 = vshll.u32 %v14211_v17, 16 }
  0xfa   : > { %v7349_v34 = vsel %vm6276_vm1, %v7347_v22, %v7348_v24  ;;  %v14241_v22 = vld [vmem:[%s15989_s3 + $0x1a0] sm:$0xff]  }
  0xfe   : > { %12553 = vmatmul.mubr.bf16.vlgmr.msra.gmra.mrb[0].mxu1 %v2171_v28  ;;  %v2228_v28 = vshrl.u32 %v14208_v60, 16 }
  0xff   : > { %12989 = vmatmul.mubr.bf16.gmra.mrb[20].mxu0 %v6836_v31  ;;  %12556 = vmatprep.mubr.bf16.mxu1 %v2179_v32  ;;  %v2227_v31 = vsel %vm1505_vm2, %v2222_v21, %v2226_v20  ;;  %v2236_v32 = vshrl.u32 %v14211_v17, 16  ;;  %v7358_v17 = vrot.slane %v14225_v6, 2 }
 0x100   : > { %12992 = vmatprep.mubr.bf16.mxu0 %v6838_v36  ;;  %12589 = vmatpush3.bf16.msra.mxu1 %v14983_v49  ;;  %v6842_v49 = vsel %vm6276_vm1, %v6839_v41, %v6841_v42  ;;  %v14240_v36 = vld [vmem:[%s15988_s2 + $0xb8] sm:$0xff]   ;;  %v2230_v39 = vor.u32 %v2228_v28, %v2226_v20  ;;  %v7350_v41 = vrot.slane %v14212_v29, 2  ;;  %v14235_v20 = vld [vmem:[%s14656_s8 + $0x88] sm:$0xff]  }
 0x101   : > { %12590 = vmatprep.subr.bf16.mxu1 %v14220_v37  ;;  %v2292_v46 = vshrl.u32 %v14235_v20, 16 }
 0x102   : > { %v7351_v52 = vsel %vm6276_vm1, %v7348_v24, %v7350_v41  ;;  %v7353_v56 = vsel %vm6276_vm1, %v7350_v41, %v7352_v45 }
 0x104   : > { %12591 = vmatpush3.bf16.msra.mxu1 %v14220_v37  ;;  %v2234_v37 = vrot.slane %v2232_v26, 1  ;;  %v14232_v26 = vld [vmem:[%s14606_s9 + $0x50] sm:$0xff]  }
 0x105   : > { %12592 = vmatprep.subr.bf16.mxu1 %v14224_v47 }
 0x106   : > { %12557 = vmatmul.mubr.bf16.gmra.mrb[4].mxu1 %v2187_v48  ;;  %v2238_v42 = vor.u32 %v2236_v32, %v2234_v37  ;;  %v2235_v48 = vsel %vm1505_vm2, %v2230_v39, %v2234_v37  ;;  %v14237_v32 = vld [vmem:[%s14656_s8 + $0x90] ss:$0 sps:$4 sm:$0x11]   ;;  %v7362_v37 = vrot.slane %v14232_v26, 2 }
 0x107   : > { %12993 = vmatmul.mubr.bf16.gmra.mrb[24].mxu0 %v6840_v53  ;;  %12560 = vmatprep.mubr.bf16.mxu1 %v2195_v54  ;;  %v2252_v54 = vshrl.u32 %v14216_v38, 16  ;;  %v14256_v26 = vld [vmem:[%s14606_s9 + $0x90] sm:$0xff]  }
 0x108   : > { %12996 = vmatprep.mubr.bf16.mxu0 %v6842_v49  ;;  %12593 = vmatpush3.bf16.msra.mxu1 %v14224_v47  ;;  %v14218_v47 = vld [vmem:[%s14606_s9 + $0x30] sm:$0xff]   ;;  %v2243_v53 = vsel %vm1505_vm2, %v2238_v42, %v2242_v43  ;;  %v14222_v49 = vld [vmem:[%s14606_s9 + $0x38] sm:$0xff]   ;;  %v2296_v43 = vshll.u32 %v14237_v32, 16 }
 0x109   : > { %12594 = vmatprep.subr.bf16.mxu1 %v14227_v58  ;;  %v7354_v60 = vrot.slane %v14218_v47, 2  ;;  %v2254_v62 = vor.u32 %v2252_v54, %v2250_v57  ;;  %v7356_v1 = vrot.slane %v14222_v49, 2  ;;  %v14252_v42 = vld [vmem:[%s15989_s3 + $0x1b0] sm:$0xff]   ;;  %v14242_v47 = vld [vmem:[%s14606_s9] sm:$0xfe]   ;;  %v14259_v54 = vld [vmem:[%s15989_s3 + $0x1b8] sm:$0xff]  }
 0x10a   : > { %v2298_v55 = vrot.slane %v2296_v43, 1  ;;  %v2799_v57 = vrot.slane %v14242_v47, 1  ;;  %v14288_v47 = vld [vmem:[%s15989_s3 + $0xa8] sm:$0xff]  }
 0x10b   : > { %v2259_v9 = vsel %vm1505_vm2, %v2254_v62, %v2258_v63  ;;  %v7357_v13 = vsel %vm6276_vm1, %v7354_v60, %v7356_v1  ;;  %v7359_v28 = vsel %vm6276_vm1, %v7356_v1, %v7358_v17  ;;  %v14245_v62 = vld [vmem:[%s14606_s9 + $0x10] sm:$0xff]  }
 0x10c   : > { %12595 = vmatpush3.bf16.msra.mxu1 %v14227_v58  ;;  %v14223_v58 = vld [vmem:[%s14656_s8 + $0x70] sm:$0xff]   ;;  %v2802_v6 = vrot.slane %v14245_v62, 1 }
 0x10d   : > { %12596 = vmatprep.subr.bf16.mxu1 %v14231_v4 }
 0x10e   : > { %12561 = vmatmul.mubr.bf16.gmra.mrb[8].mxu1 %v2203_v8  ;;  %v7355_v8 = vsel %vm6276_vm1, %v7352_v45, %v7354_v60  ;;  %v15131_v60 = vld [vmem:[%s15988_s2 + $0x1c0] sm:$0xff]  }
 0x10f   : > { %12997 = vmatmul.mubr.bf16.gmra.mrb[28].mxu0 %v6844_v10  ;;  %12564 = vmatprep.mubr.bf16.mxu1 %v2211_v12  ;;  %v2272_v10 = vshll.u32 %v14228_v0, 16  ;;  %v14229_v12 = vld [vmem:[%s14606_s9 + $0x48] sm:$0xff]   ;;  %v14246_v0 = vld [vmem:[%s14606_s9 + $0x70] sm:$0xff]  }
 0x110   : > { %13000 = vmatprep.mubr.bf16.mxu0 %v6846_v14  ;;  %12597 = vmatpush3.bf16.msra.mxu1 %v14231_v4  ;;  %v2264_v4 = vshll.u32 %v14223_v58, 16  ;;  %v7360_v21 = vrot.slane %v14229_v12, 2  ;;  %v14251_v12 = vld [vmem:[%s14606_s9 + $0x80] sm:$0xff]  }
 0x111   : > { %12598 = vmatprep.subr.bf16.mxu1 %v14234_v15  ;;  %v2274_v19 = vrot.slane %v2272_v10, 1  ;;  %v14250_v10 = vld [vmem:[%s14606_s9 + $0x20] sm:$0xff]  }
 0x112   : > { %v2266_v14 = vrot.slane %v2264_v4, 1  ;;  %v7361_v33 = vsel %vm6276_vm1, %v7358_v17, %v7360_v21  ;;  %v7363_v50 = vsel %vm6276_vm1, %v7360_v21, %v7362_v37 }
 0x114   : > { %12599 = vmatpush3.bf16.msra.mxu1 %v14234_v15  ;;  %v14230_v15 = vld [vmem:[%s14656_s8 + $0x80] sm:$0xff]  }
 0x115   : > { %12600 = vmatprep.subr.bf16.mxu1 %v14238_v25  ;;  %v2280_v24 = vshll.u32 %v14230_v15, 16 }
 0x116   : > { %12565 = vmatmul.mubr.bf16.gmra.mrb[12].mxu1 %v2219_v27  ;;  %v2284_v27 = vshrl.u32 %v14230_v15, 16 }
 0x117   : > { %13001 = vmatmul.mubr.bf16.gmra.mrb[32].mxu0 %v6848_v30  ;;  %12568 = vmatprep.mubr.bf16.mxu1 %v2227_v31  ;;  %v2288_v30 = vshll.u32 %v14235_v20, 16  ;;  %v14236_v31 = vld [vmem:[%s14606_s9 + $0x58] sm:$0xff]   ;;  %v2282_v35 = vrot.slane %v2280_v24, 1  ;;  %v7374_v20 = vrot.slane %v14251_v12, 2  ;;  %v14255_v24 = vld [vmem:[%s14606_s9 + $0x30] sm:$0xff]  }
 0x118   : > { %13020 = vmatprep.mubr.bf16.mxu0 %v7349_v34  ;;  %12601 = vmatpush3.bf16.msra.mxu1 %v14238_v25  ;;  %v2267_v25 = vsel %vm1505_vm2, %v2262_v16, %v2266_v14  ;;  %v14247_v34 = vld [vmem:[%s15989_s3 + $0x1a8] sm:$0xff]   ;;  %v7364_v41 = vrot.slane %v14236_v31, 2  ;;  %v14281_v31 = vld [vmem:[%s15989_s3 + $0x98] sm:$0xff]   ;;  %v2810_v32 = vrot.slane %v14255_v24, 1 }
 0x119   : > { %12602 = vmatprep.subr.bf16.mxu1 %v14240_v36  ;;  %v2286_v38 = vor.u32 %v2284_v27, %v2282_v35  ;;  %v2290_v39 = vrot.slane %v2288_v30, 1  ;;  %v14254_v16 = vld [vmem:[%s14606_s9 + $0x88] sm:$0xff]   ;;  %v14258_v30 = vld [vmem:[%s14606_s9 + $0x98] sm:$0xff]  }
 0x11b   : > { %v2294_v49 = vor.u32 %v2292_v46, %v2290_v39 }
 0x11c   : > { %12603 = vmatpush3.bf16.msra.mxu1 %v14240_v36  ;;  %v2278_v36 = vor.u32 %v2276_v23, %v2274_v19  ;;  %v14278_v23 = vld [vmem:[%s15989_s3 + $0x90] sm:$0xff]  }
 0x11d   : > { %12640 = vmatprep.subr.bf16.mxu1 %v15082_v61  ;;  %v2299_v63 = vsel %vm1505_vm2, %v2294_v49, %v2298_v55  ;;  %v14265_v55 = vld [vmem:[%s14606_s9 + $0x50] sm:$0xff]   ;;  %v14266_v49 = vld [vmem:[%s14656_s8 + $0x20] sm:$0xff]  }
 0x11e   : > { %12569 = vmatmul.mubr.bf16.gmra.mrb[16].mxu1 %v2235_v48  ;;  %v2283_v45 = vsel %vm1505_vm2, %v2278_v36, %v2282_v35  ;;  %v14243_v48 = vld [vmem:[%s14606_s9 + $0x8] sm:$0xff]   ;;  %v7380_v35 = vrot.slane %v14258_v30, 2  ;;  %v14261_v36 = vld [vmem:[%s14606_s9 + $0xa0] ss:$0 sps:$4 sm:$0x33]  }
 0x11f   : > { %13021 = vmatmul.mubr.bf16.vlgmr.msra.gmra.mrb[0].mxu0 %v7351_v52  ;;  %12572 = vmatprep.mubr.bf16.mxu1 %v2243_v53  ;;  %v14244_v52 = vld [vmem:[%s14606_s9 + $0x68] sm:$0xff]   ;;  %v7365_v53 = vsel %vm6276_vm1, %v7362_v37, %v7364_v41  ;;  %v14285_v37 = vld [vmem:[%s15989_s3 + $0xa0] sm:$0xff]  }
 0x120   : > { %13057 = vmatpush3.bf16.msra.mxu0 %v15003_v7  ;;  %13024 = vmatprep.mubr.bf16.mxu0 %v7353_v56  ;;  %v2268_v7 = vshrl.u32 %v14223_v58, 16  ;;  %v7366_v56 = vrot.slane %v14239_v44, 2  ;;  %v2800_v58 = vrot.slane %v14243_v48, 1  ;;  %v7368_v59 = vrot.slane %v14244_v52, 2 }
 0x121   : > { %13058 = vmatprep.subr.bf16.mxu0 %v14219_v51 }
 0x122   : > { %v2270_v18 = vor.u32 %v2268_v7, %v2266_v14  ;;  %v7367_v1 = vsel %vm6276_vm1, %v7364_v41, %v7366_v56  ;;  %v7369_v4 = vsel %vm6276_vm1, %v7366_v56, %v7368_v59  ;;  %v7370_v7 = vrot.slane %v14246_v0, 2  ;;  %v14262_v41 = vld [vmem:[%s14606_s9 + $0x48] sm:$0xff]   ;;  %v14294_v0 = vld [vmem:[%s15989_s3 + $0xb8] sm:$0xff]  }
 0x124   : > { %13059 = vmatpush3.bf16.msra.mxu0 %v14219_v51  ;;  %v2275_v29 = vsel %vm1505_vm2, %v2270_v18, %v2274_v19  ;;  %v2291_v51 = vsel %vm1505_vm2, %v2286_v38, %v2290_v39  ;;  %v7371_v14 = vsel %vm6276_vm1, %v7368_v59, %v7370_v7  ;;  %v14274_v18 = vld [vmem:[%s15989_s3 + $0x88] sm:$0xff]   ;;  %v2806_v19 = vrot.slane %v14250_v10, 1  ;;  %v14260_v38 = vld [vmem:[%s14606_s9 + $0x40] sm:$0xff]  }
 0x125   : > { %13060 = vmatprep.subr.bf16.mxu0 %v14226_v2  ;;  %v2814_v48 = vrot.slane %v14260_v38, 1  ;;  %v14290_v38 = vld [vmem:[%s14656_s8 + $0x58] sm:$0xff]  }
 0x126   : > { %12573 = vmatmul.mubr.bf16.gmra.mrb[20].mxu1 %v2251_v5  ;;  %v14249_v5 = vld [vmem:[%s14606_s9 + $0x78] sm:$0xff]  }
 0x127   : > { %13025 = vmatmul.mubr.bf16.gmra.mrb[4].mxu0 %v7355_v8  ;;  %12576 = vmatprep.mubr.bf16.mxu1 %v2259_v9  ;;  %v2804_v8 = vrot.slane %v14248_v3, 1  ;;  %v7372_v9 = vrot.slane %v14249_v5, 2  ;;  %v14270_v5 = vld [vmem:[%s14606_s9 + $0x60] sm:$0xff]  }
 0x128   : > { %13028 = vmatprep.mubr.bf16.mxu0 %v7357_v13  ;;  %13061 = vmatpush3.bf16.msra.mxu0 %v14226_v2  ;;  %v2801_v2 = vsel %vm2798_vm3, %v2799_v57, %v2800_v58  ;;  %v2803_v13 = vsel %vm2798_vm3, %v2800_v58, %v2802_v6  ;;  %v14268_v57 = vld [vmem:[%s14606_s9 + $0x58] sm:$0xff]  }
 0x129   : > { %13062 = vmatprep.subr.bf16.mxu0 %v14233_v11  ;;  %v2805_v15 = vsel %vm2798_vm3, %v2802_v6, %v2804_v8  ;;  %v7373_v17 = vsel %vm6276_vm1, %v7370_v7, %v7372_v9  ;;  %v7375_v27 = vsel %vm6276_vm1, %v7372_v9, %v7374_v20  ;;  %v2820_v3 = vrot.slane %v14268_v57, 1  ;;  %v15201_v6 = vld [vmem:[%s15988_s2 + $0xc0] sm:$0xff]   ;;  %v14275_v9 = vld [vmem:[%s14606_s9 + $0x68] sm:$0xff]  }
 0x12c   : > { %13063 = vmatpush3.bf16.msra.mxu0 %v14233_v11  ;;  %v14253_v11 = vld [vmem:[%s14606_s9 + $0x28] sm:$0xff]  }
 0x12d   : > { %13064 = vmatprep.subr.bf16.mxu0 %v14241_v22  ;;  %v2808_v21 = vrot.slane %v14253_v11, 1  ;;  %v14273_v11 = vld [vmem:[%s15988_s2 + $0x1c8] sm:$0xff]  }
 0x12e   : > { %12577 = vmatmul.mubr.bf16.gmra.mrb[24].mxu1 %v2267_v25  ;;  %v2807_v25 = vsel %vm2798_vm3, %v2804_v8, %v2806_v19  ;;  %v14272_v8 = vld [vmem:[%s14656_s8 + $0x30] sm:$0xff]  }
 0x12f   : > { %13029 = vmatmul.mubr.bf16.gmra.mrb[8].mxu0 %v7359_v28  ;;  %12580 = vmatprep.mubr.bf16.mxu1 %v2275_v29  ;;  %v2809_v28 = vsel %vm2798_vm3, %v2806_v19, %v2808_v21  ;;  %v14257_v29 = vld [vmem:[%s14606_s9 + $0x38] sm:$0xff]   ;;  %v2811_v39 = vsel %vm2798_vm3, %v2808_v21, %v2810_v32  ;;  %v14277_v19 = vld [vmem:[%s14606_s9 + $0x70] sm:$0xff]   ;;  %v14279_v21 = vld [vmem:[%s14656_s8 + $0x40] sm:$0xff]  }
 0x130   : > { %13032 = vmatprep.mubr.bf16.mxu0 %v7361_v33  ;;  %13065 = vmatpush3.bf16.msra.mxu0 %v14241_v22  ;;  %v7376_v22 = vrot.slane %v14254_v16, 2  ;;  %v7378_v33 = vrot.slane %v14256_v26, 2  ;;  %v7889_v16 = vrot.slane %v14272_v8, 2 }
 0x131   : > { %13066 = vmatprep.subr.bf16.mxu0 %v14247_v34 }
 0x132   : > { %v7379_v43 = vsel %vm6276_vm1, %v7376_v22, %v7378_v33  ;;  %v7381_v46 = vsel %vm6276_vm1, %v7378_v33, %v7380_v35  ;;  %v14286_v33 = vld [vmem:[%s14656_s8 + $0x50] sm:$0xff]  }
 0x134   : > { %13067 = vmatpush3.bf16.msra.mxu0 %v14247_v34  ;;  %v2812_v34 = vrot.slane %v14257_v29, 1  ;;  %v7893_v29 = vrot.slane %v14279_v21, 2  ;;  %v14308_v21 = vld [vmem:[%s14656_s8 + $0x88] sm:$0xff]  }
 0x135   : > { %13068 = vmatprep.subr.bf16.mxu0 %v14252_v42 }
 0x136   : > { %12581 = vmatmul.mubr.bf16.gmra.mrb[28].mxu1 %v2283_v45  ;;  %v2813_v44 = vsel %vm2798_vm3, %v2810_v32, %v2812_v34  ;;  %v14263_v45 = vld [vmem:[%s14656_s8 + $0x10] sm:$0xfc]   ;;  %v2815_v56 = vsel %vm2798_vm3, %v2812_v34, %v2814_v48  ;;  %v14284_v32 = vld [vmem:[%s14606_s9 + $0x80] sm:$0xff]  }
 0x137   : > { %13033 = vmatmul.mubr.bf16.gmra.mrb[12].mxu0 %v7363_v50  ;;  %12584 = vmatprep.mubr.bf16.mxu1 %v2291_v51  ;;  %v7382_v50 = vrot.slane %v14261_v36, 2  ;;  %v2816_v51 = vrot.slane %v14262_v41, 1  ;;  %v7882_v52 = vrot.slane %v14263_v45, 2  ;;  %v14301_v41 = vld [vmem:[%s15988_s2 + $0x1e8] sm:$0xff]   ;;  %v7899_v45 = vrot.slane %v14290_v38, 2 }
 0x138   : > { %13036 = vmatprep.mubr.bf16.mxu0 %v7365_v53  ;;  %13069 = vmatpush3.bf16.msra.mxu0 %v14252_v42  ;;  %v14264_v42 = vld [vmem:[%s14656_s8 + $0x18] sm:$0xff]  }
 0x139   : > { %13070 = vmatprep.subr.bf16.mxu0 %v14259_v54  ;;  %v7883_v53 = vrot.slane %v14264_v42, 2  ;;  %v7383_v58 = vsel %vm6276_vm1, %v7380_v35, %v7382_v50  ;;  %v2817_v59 = vsel %vm2798_vm3, %v2814_v48, %v2816_v51  ;;  %v2830_v42 = vrot.slane %v14284_v32, 1  ;;  %v14293_v48 = vld [vmem:[%s14656_s8 + $0x60] sm:$0xff]  }
 0x13b   : > { %v7884_v62 = vsel %vm6276_vm1, %v7882_v52, %v7883_v53 }
 0x13c   : > { %13071 = vmatpush3.bf16.msra.mxu0 %v14259_v54  ;;  %v14292_v54 = vld [vmem:[%s15989_s3 + $0xb0] sm:$0xff]  }
 0x13d   : > { %13108 = vmatprep.subr.bf16.mxu0 %v15131_v60 }
 0x13e   : > { %12585 = vmatmul.mubr.bf16.gmra.mrb[32].mxu1 %v2299_v63  ;;  %v14269_v63 = vld [vmem:[%s14656_s8 + $0x28] sm:$0xff]  }
 0x13f   : > { %13037 = vmatmul.mubr.bf16.gmra.mrb[16].mxu0 %v7367_v1  ;;  %12604 = vmatprep.mubr.bf16.mxu1 %v2801_v2  ;;  %v2818_v1 = vrot.slane %v14265_v55, 1  ;;  %v7885_v2 = vrot.slane %v14266_v49, 2  ;;  %v14298_v55 = vld [vmem:[%s14656_s8 + $0x68] sm:$0xff]   ;;  %v14313_v49 = vld [vmem:[%s15988_s2 + $0x1f8] sm:$0xff]  }
 0x140   : > { %13040 = vmatprep.mubr.bf16.mxu0 %v7369_v4  ;;  %v7887_v4 = vrot.slane %v14269_v63, 2  ;;  %v7903_v63 = vrot.slane %v14298_v55, 2 }
 0x141   : > { %v2819_v7 = vsel %vm2798_vm3, %v2816_v51, %v2818_v1  ;;  %v7886_v10 = vsel %vm6276_vm1, %v7883_v53, %v7885_v2  ;;  %v2821_v12 = vsel %vm2798_vm3, %v2818_v1, %v2820_v3  ;;  %v14296_v51 = vld [vmem:[%s14656_s8] sm:$0xfe]   ;;  %v14299_v1 = vld [vmem:[%s14656_s8 + $0x10] sm:$0xff]  }
 0x142   : > { %v7890_v24 = vsel %vm6276_vm1, %v7887_v4, %v7889_v16 }
 0x146   : > { %12605 = vmatmul.mubr.bf16.vlgmr.msra.gmra.mrb[0].mxu1 %v2803_v13  ;;  %v7888_v13 = vsel %vm6276_vm1, %v7885_v2, %v7887_v4 }
 0x147   : > { %13041 = vmatmul.mubr.bf16.gmra.mrb[20].mxu0 %v7371_v14  ;;  %12608 = vmatprep.mubr.bf16.mxu1 %v2805_v15  ;;  %v14276_v14 = vld [vmem:[%s14656_s8 + $0x38] sm:$0xff]   ;;  %v2822_v15 = vrot.slane %v14270_v5, 1 }
 0x148   : > { %13044 = vmatprep.mubr.bf16.mxu0 %v7373_v17  ;;  %12641 = vmatpush3.bf16.msra.mxu1 %v15082_v61  ;;  %v7377_v61 = vsel %vm6276_vm1, %v7374_v20, %v7376_v22  ;;  %v2824_v17 = vrot.slane %v14275_v9, 1  ;;  %v14280_v20 = vld [vmem:[%s15988_s2 + $0x1d0] sm:$0xff]   ;;  %v14303_v9 = vld [vmem:[%s14656_s8 + $0x78] sm:$0xff]  }
 0x149   : > { %12642 = vmatprep.subr.bf16.mxu1 %v14274_v18  ;;  %v2823_v22 = vsel %vm2798_vm3, %v2820_v3, %v2822_v15  ;;  %v14300_v3 = vld [vmem:[%s14656_s8 + $0x70] sm:$0xff]  }
 0x14c   : > { %12643 = vmatpush3.bf16.msra.mxu1 %v14274_v18  ;;  %v7891_v18 = vrot.slane %v14276_v14, 2  ;;  %v14304_v14 = vld [vmem:[%s14656_s8 + $0x20] sm:$0xff]  }
 0x14d   : > { %12644 = vmatprep.subr.bf16.mxu1 %v14278_v23 }
 0x14e   : > { %12609 = vmatmul.mubr.bf16.gmra.mrb[4].mxu1 %v2807_v25  ;;  %v2825_v25 = vsel %vm2798_vm3, %v2822_v15, %v2824_v17  ;;  %v7892_v26 = vsel %vm6276_vm1, %v7889_v16, %v7891_v18  ;;  %v7894_v35 = vsel %vm6276_vm1, %v7891_v18, %v7893_v29  ;;  %v14305_v16 = vld [vmem:[%s14656_s8 + $0x80] sm:$0xff]  }
 0x14f   : > { %13045 = vmatmul.mubr.bf16.gmra.mrb[24].mxu0 %v7375_v27  ;;  %12612 = vmatprep.mubr.bf16.mxu1 %v2809_v28  ;;  %v14287_v27 = vld [vmem:[%s15988_s2 + $0x1d8] sm:$0xff]   ;;  %v2826_v28 = vrot.slane %v14277_v19, 1 }
 0x150   : > { %13048 = vmatprep.mubr.bf16.mxu0 %v7377_v61  ;;  %12645 = vmatpush3.bf16.msra.mxu1 %v14278_v23  ;;  %v14282_v23 = vld [vmem:[%s14606_s9 + $0x78] sm:$0xff]  }
 0x151   : > { %12646 = vmatprep.subr.bf16.mxu1 %v14281_v31  ;;  %v2828_v30 = vrot.slane %v14282_v23, 1  ;;  %v2827_v34 = vsel %vm2798_vm3, %v2824_v17, %v2826_v28  ;;  %v14307_v17 = vld [vmem:[%s14656_s8 + $0x28] sm:$0xff]   ;;  %v3341_v23 = vrot.slane %v14304_v14, 1 }
 0x153   : > { %v2829_v36 = vsel %vm2798_vm3, %v2826_v28, %v2828_v30  ;;  %v2831_v50 = vsel %vm2798_vm3, %v2828_v30, %v2830_v42  ;;  %v15287_v28 = vld [vmem:[%s14656_s8 + $0x38] sm:$0xff]  }
 0x154   : > { %12647 = vmatpush3.bf16.msra.mxu1 %v14281_v31  ;;  %v14295_v31 = vld [vmem:[%s15988_s2 + $0x1e0] sm:$0xff]   ;;  %v15293_v30 = vld [vmem:[%s14656_s8 + $0x98] sm:$0xff]   ;;  %v3347_v38 = vrot.slane %v15287_v28, 1 }
 0x155   : > { %12648 = vmatprep.subr.bf16.mxu1 %v14285_v37 }
 0x156   : > { %12613 = vmatmul.mubr.bf16.gmra.mrb[8].mxu1 %v2811_v39 }
 0x157   : > { %13049 = vmatmul.mubr.bf16.gmra.mrb[28].mxu0 %v7379_v43  ;;  %12616 = vmatprep.mubr.bf16.mxu1 %v2813_v44  ;;  %v7897_v43 = vrot.slane %v14286_v33, 2 }
 0x158   : > { %13052 = vmatprep.mubr.bf16.mxu0 %v7381_v46  ;;  %12649 = vmatpush3.bf16.msra.mxu1 %v14285_v37  ;;  %v14289_v37 = vld [vmem:[%s14606_s9 + $0x88] sm:$0xff]   ;;  %v14291_v46 = vld [vmem:[%s14606_s9 + $0x90] ss:$0 sps:$4 sm:$0x11]  }
 0x159   : > { %12650 = vmatprep.subr.bf16.mxu1 %v14288_v47  ;;  %v2832_v44 = vrot.slane %v14289_v37, 1  ;;  %v2834_v57 = vrot.slane %v14291_v46, 1  ;;  %v14335_v37 = vld [vmem:[%s15988_s2 + $0xd8] sm:$0xff]  }
 0x15b   : > { %v2833_v53 = vsel %vm2798_vm3, %v2830_v42, %v2832_v44  ;;  %v2835_v2 = vsel %vm2798_vm3, %v2832_v44, %v2834_v57 }
 0x15c   : > { %12651 = vmatpush3.bf16.msra.mxu1 %v14288_v47  ;;  %v14306_v47 = vld [vmem:[%s15988_s2 + $0x1f0] sm:$0xff]  }
 0x15d   : > { %12652 = vmatprep.subr.bf16.mxu1 %v14292_v54 }
 0x15e   : > { %12617 = vmatmul.mubr.bf16.gmra.mrb[12].mxu1 %v2815_v56  ;;  %v7900_v56 = vsel %vm6276_vm1, %v7897_v43, %v7899_v45 }
 0x15f   : > { %13053 = vmatmul.mubr.bf16.gmra.mrb[32].mxu0 %v7383_v58  ;;  %12620 = vmatprep.mubr.bf16.mxu1 %v2817_v59  ;;  %v7901_v58 = vrot.slane %v14293_v48, 2  ;;  %v3334_v59 = vrot.slane %v14296_v51, 1  ;;  %v15312_v48 = vld [vmem:[%s14656_s8 + $0x48] sm:$0xff]  }
 0x160   : > { %13072 = vmatprep.mubr.bf16.mxu0 %v7884_v62  ;;  %12653 = vmatpush3.bf16.msra.mxu1 %v14292_v54  ;;  %v14297_v54 = vld [vmem:[%s14656_s8 + $0x8] sm:$0xff]  }
 0x161   : > { %12654 = vmatprep.subr.bf16.mxu1 %v14294_v0  ;;  %v3335_v62 = vrot.slane %v14297_v54, 1  ;;  %v7902_v4 = vsel %vm6276_vm1, %v7899_v45, %v7901_v58  ;;  %v7904_v8 = vsel %vm6276_vm1, %v7901_v58, %v7903_v63  ;;  %v14315_v45 = vld [vmem:[%s14656_s8 + $0xa0] ss:$0 sps:$4 sm:$0x33]  }
 0x163   : > { %v3336_v5 = vsel %vm2798_vm3, %v3334_v59, %v3335_v62  ;;  %v14342_v59 = vld [vmem:[%s15988_s2 + $0xe8] sm:$0xff]  }
 0x164   : > { %12655 = vmatpush3.bf16.msra.mxu1 %v14294_v0  ;;  %v15261_v0 = vld [vmem:[%s15989_s3 + $0x1c0] sm:$0xff]  }
 0x165   : > { %12692 = vmatprep.subr.bf16.mxu1 %v15201_v6 }
 0x166   : > { %12621 = vmatmul.mubr.bf16.gmra.mrb[16].mxu1 %v2819_v7  ;;  %v14302_v7 = vld [vmem:[%s14656_s8 + $0x18] sm:$0xff]  }
 0x167   : > { %13073 = vmatmul.mubr.bf16.vlgmr.msra.gmra.mrb[0].mxu0 %v7886_v10  ;;  %12624 = vmatprep.mubr.bf16.mxu1 %v2821_v12  ;;  %v3337_v10 = vrot.slane %v14299_v1, 1  ;;  %v7905_v12 = vrot.slane %v14300_v3, 2  ;;  %v7917_v1 = vrot.slane %v14315_v45, 2  ;;  %v3351_v3 = vrot.slane %v15312_v48, 1  ;;  %v14334_v48 = vld [vmem:[%s15989_s3 + $0x1d0] sm:$0xff]  }
 0x168   : > { %13109 = vmatpush3.bf16.msra.mxu0 %v15131_v60  ;;  %13076 = vmatprep.mubr.bf16.mxu0 %v7888_v13  ;;  %v14283_v60 = vld [vmem:[%s14656_s8 + $0x48] sm:$0xff]   ;;  %v3339_v13 = vrot.slane %v14302_v7, 1 }
 0x169   : > { %13110 = vmatprep.subr.bf16.mxu0 %v14273_v11  ;;  %v7895_v61 = vrot.slane %v14283_v60, 2  ;;  %v3338_v15 = vsel %vm2798_vm3, %v3335_v62, %v3337_v10  ;;  %v7906_v18 = vsel %vm6276_vm1, %v7903_v63, %v7905_v12  ;;  %v14309_v60 = vld [vmem:[%s14656_s8 + $0x30] sm:$0xff]  }
 0x16a   : > { %v3340_v19 = vsel %vm2798_vm3, %v3337_v10, %v3339_v13  ;;  %v14346_v10 = vld [vmem:[%s15988_s2 + $0xf0] sm:$0xff]  }
 0x16b   : > { %v7896_v39 = vsel %vm6276_vm1, %v7893_v29, %v7895_v61  ;;  %v7898_v52 = vsel %vm6276_vm1, %v7895_v61, %v7897_v43  ;;  %v14332_v29 = vld [vmem:[%s15988_s2 + $0xd0] sm:$0xff]   ;;  %v14318_v61 = vld [vmem:[%s14606_s9 + $0x18] sm:$0xff]   ;;  %v14314_v43 = vld [vmem:[%s14656_s8 + $0x40] sm:$0xff]  }
 0x16c   : > { %13111 = vmatpush3.bf16.msra.mxu0 %v14273_v11  ;;  %v7907_v11 = vrot.slane %v14303_v9, 2  ;;  %v8430_v42 = vshll.u32 %v14318_v61, 16  ;;  %v3349_v62 = vrot.slane %v14314_v43, 1 }
 0x16d   : > { %13112 = vmatprep.subr.bf16.mxu0 %v14280_v20 }
 0x16e   : > { %12625 = vmatmul.mubr.bf16.gmra.mrb[20].mxu1 %v2823_v22  ;;  %v14328_v22 = vld [vmem:[%s15988_s2 + $0xc8] sm:$0xff]   ;;  %v8432_v51 = vrot.slane %v8430_v42, 3 }
 0x16f   : > { %13077 = vmatmul.mubr.bf16.gmra.mrb[4].mxu0 %v7890_v24  ;;  %12628 = vmatprep.mubr.bf16.mxu1 %v2825_v25  ;;  %v7909_v24 = vrot.slane %v14305_v16, 2  ;;  %v3343_v25 = vrot.slane %v14307_v17, 1  ;;  %v3352_v17 = vsel %vm2798_vm3, %v3349_v62, %v3351_v3  ;;  %v14337_v42 = vld [vmem:[%s14606_s9 + $0x48] sm:$0xff]  }
 0x170   : > { %13080 = vmatprep.mubr.bf16.mxu0 %v7892_v26  ;;  %13113 = vmatpush3.bf16.msra.mxu0 %v14280_v20  ;;  %v7908_v20 = vsel %vm6276_vm1, %v7905_v12, %v7907_v11  ;;  %v14310_v26 = vld [vmem:[%s14656_s8 + $0x90] sm:$0xff]  }
 0x171   : > { %13114 = vmatprep.subr.bf16.mxu0 %v14287_v27  ;;  %v7910_v32 = vsel %vm6276_vm1, %v7907_v11, %v7909_v24  ;;  %v3344_v33 = vsel %vm2798_vm3, %v3341_v23, %v3343_v25  ;;  %v3350_v11 = vsel %vm2798_vm3, %v3347_v38, %v3349_v62 }
 0x174   : > { %13115 = vmatpush3.bf16.msra.mxu0 %v14287_v27  ;;  %v7911_v27 = vrot.slane %v14308_v21, 2 }
 0x175   : > { %13116 = vmatprep.subr.bf16.mxu0 %v14295_v31 }
 0x176   : > { %12629 = vmatmul.mubr.bf16.gmra.mrb[24].mxu1 %v2827_v34  ;;  %v3345_v34 = vrot.slane %v14309_v60, 1  ;;  %v14324_v60 = vld [vmem:[%s14656_s8 + $0x60] sm:$0xff]  }
 0x177   : > { %13081 = vmatmul.mubr.bf16.gmra.mrb[8].mxu0 %v7894_v35  ;;  %12632 = vmatprep.mubr.bf16.mxu1 %v2829_v36  ;;  %v7912_v35 = vsel %vm6276_vm1, %v7909_v24, %v7911_v27  ;;  %v7913_v36 = vrot.slane %v14310_v26, 2  ;;  %v3357_v43 = vrot.slane %v14324_v60, 1 }
 0x178   : > { %13084 = vmatprep.mubr.bf16.mxu0 %v7896_v39  ;;  %13117 = vmatpush3.bf16.msra.mxu0 %v14295_v31  ;;  %v3342_v31 = vsel %vm2798_vm3, %v3339_v13, %v3341_v23  ;;  %v7915_v39 = vrot.slane %v15293_v30, 2  ;;  %v3348_v55 = vsel %vm2798_vm3, %v3345_v34, %v3347_v38  ;;  %v14322_v13 = vld [vmem:[%s14656_s8 + $0x58] sm:$0xff]  }
 0x179   : > { %13118 = vmatprep.subr.bf16.mxu0 %v14301_v41  ;;  %v7914_v54 = vsel %vm6276_vm1, %v7911_v27, %v7913_v36  ;;  %v3355_v24 = vrot.slane %v14322_v13, 1 }
 0x17a   : > { %v7916_v57 = vsel %vm6276_vm1, %v7913_v36, %v7915_v39  ;;  %v7918_v16 = vsel %vm6276_vm1, %v7915_v39, %v7917_v1 }
 0x17c   : > { %13119 = vmatpush3.bf16.msra.mxu0 %v14301_v41  ;;  %v8427_v41 = vshrl.u32 %v14318_v61, 16  ;;  %v15342_v61 = vld [vmem:[%s15989_s3 + $0xc0] sm:$0xff]  }
 0x17d   : > { %13120 = vmatprep.subr.bf16.mxu0 %v14306_v47 }
 0x17e   : > { %12633 = vmatmul.mubr.bf16.gmra.mrb[28].mxu1 %v2831_v50  ;;  %v8429_v50 = vrot.slane %v8427_v41, 2 }
 0x17f   : > { %13085 = vmatmul.mubr.bf16.gmra.mrb[12].mxu0 %v7898_v52  ;;  %12636 = vmatprep.mubr.bf16.mxu1 %v2833_v53  ;;  %v14320_v52 = vld [vmem:[%s14606_s9 + $0x20] sm:$0xff]   ;;  %v3346_v53 = vsel %vm2798_vm3, %v3343_v25, %v3345_v34  ;;  %v14327_v34 = vld [vmem:[%s15989_s3 + $0x1c8] sm:$0xff]  }
 0x180   : > { %13088 = vmatprep.mubr.bf16.mxu0 %v7900_v56  ;;  %13121 = vmatpush3.bf16.msra.mxu0 %v14306_v47  ;;  %v14339_v47 = vld [vmem:[%s15988_s2 + $0xe0] sm:$0xff]   ;;  %v8436_v63 = vshrl.u32 %v14320_v52, 16  ;;  %v8433_v7 = vor.u32 %v8432_v51, %v8429_v50  ;;  %v8481_v51 = vshrl.u32 %v14337_v42, 16 }
 0x181   : > { %13122 = vmatprep.subr.bf16.mxu0 %v14313_v49 }
 0x182   : > { %v8438_v12 = vrot.slane %v8436_v63, 2  ;;  %v8483_v63 = vrot.slane %v8481_v51, 2 }
 0x184   : > { %13123 = vmatpush3.bf16.msra.mxu0 %v14313_v49  ;;  %v14323_v49 = vld [vmem:[%s14606_s9 + $0x28] sm:$0xff]  }
 0x185   : > { %13160 = vmatprep.subr.bf16.mxu0 %v15261_v0  ;;  %v8448_v9 = vshll.u32 %v14323_v49, 16 }
 0x186   : > { %12637 = vmatmul.mubr.bf16.gmra.mrb[32].mxu1 %v2835_v2  ;;  %v8439_v2 = vshll.u32 %v14320_v52, 16  ;;  %v8484_v52 = vshll.u32 %v14337_v42, 16 }
 0x187   : > { %13089 = vmatmul.mubr.bf16.gmra.mrb[16].mxu0 %v7902_v4  ;;  %12656 = vmatprep.mubr.bf16.mxu1 %v3336_v5  ;;  %v8445_v4 = vshrl.u32 %v14323_v49, 16  ;;  %v8450_v21 = vrot.slane %v8448_v9, 3  ;;  %v14340_v49 = vld [vmem:[%s14606_s9 + $0x50] sm:$0xff]  }
 0x188   : > { %13092 = vmatprep.mubr.bf16.mxu0 %v7904_v8  ;;  %v14319_v8 = vld [vmem:[%s14656_s8 + $0x50] sm:$0xff]   ;;  %v8441_v14 = vrot.slane %v8439_v2, 3  ;;  %v8486_v1 = vrot.slane %v8484_v52, 3  ;;  %v14341_v2 = vld [vmem:[%s15989_s3 + $0x1d8] sm:$0xff]  }
 0x189   : > { %v3353_v23 = vrot.slane %v14319_v8, 1  ;;  %v8493_v8 = vshll.u32 %v14340_v49, 16 }
 0x18a   : > { %v8442_v25 = vor.u32 %v8441_v14, %v8438_v12  ;;  %v14338_v12 = vld [vmem:[%s14656_s8 + $0x80] sm:$0xff]   ;;  %v15375_v14 = vld [vmem:[%s14656_s8 + $0x88] sm:$0xff]  }
 0x18e   : > { %12657 = vmatmul.mubr.bf16.vlgmr.msra.gmra.mrb[0].mxu1 %v3338_v15  ;;  %v14326_v15 = vld [vmem:[%s14606_s9 + $0x30] sm:$0xff]  }
 0x18f   : > { %13093 = vmatmul.mubr.bf16.gmra.mrb[20].mxu0 %v7906_v18  ;;  %12660 = vmatprep.mubr.bf16.mxu1 %v3340_v19  ;;  %v8447_v18 = vrot.slane %v8445_v4, 2  ;;  %v14330_v19 = vld [vmem:[%s14606_s9 + $0x38] sm:$0xff]   ;;  %v8454_v26 = vshrl.u32 %v14326_v15, 16  ;;  %v8457_v27 = vshll.u32 %v14326_v15, 16  ;;  %v14347_v15 = vld [vmem:[%s14606_s9 + $0x60] sm:$0xff]  }
 0x190   : > { %13096 = vmatprep.mubr.bf16.mxu0 %v7908_v20  ;;  %12693 = vmatpush3.bf16.msra.mxu1 %v15201_v6  ;;  %v14317_v6 = vld [vmem:[%s14606_s9 + $0x10] sm:$0xfc]   ;;  %v8463_v28 = vshrl.u32 %v14330_v19, 16  ;;  %v8466_v30 = vshll.u32 %v14330_v19, 16  ;;  %v8508_v60 = vshrl.u32 %v14347_v15, 16 }
 0x191   : > { %12694 = vmatprep.subr.bf16.mxu1 %v14328_v22  ;;  %v8419_v44 = vshrl.u32 %v14317_v6, 16  ;;  %v8422_v46 = vshll.u32 %v14317_v6, 16  ;;  %v8443_v6 = vsel %vm8417_vm4, %v8433_v7, %v8442_v25  ;;  %v8459_v36 = vrot.slane %v8457_v27, 3 }
 0x192   : > { %v8465_v38 = vrot.slane %v8463_v28, 2  ;;  %v8468_v41 = vrot.slane %v8466_v30, 3  ;;  %v3367_v27 = vrot.slane %v15375_v14, 1  ;;  %v8511_v28 = vshll.u32 %v14347_v15, 16 }
 0x193   : > { %v8421_v56 = vrot.slane %v8419_v44, 2  ;;  %v8424_v58 = vrot.slane %v8422_v46, 3 }
 0x194   : > { %12695 = vmatpush3.bf16.msra.mxu1 %v14328_v22  ;;  %v14348_v22 = vld [vmem:[%s15988_s2 + $0xf8] sm:$0xff]   ;;  %v8469_v50 = vor.u32 %v8468_v41, %v8465_v38  ;;  %v8513_v41 = vrot.slane %v8511_v28, 3 }
 0x195   : > { %12696 = vmatprep.subr.bf16.mxu1 %v14332_v29  ;;  %v8425_v5 = vor.u32 %v8424_v58, %v8421_v56  ;;  %v14336_v56 = vld [vmem:[%s14656_s8 + $0x78] sm:$0xff]  }
 0x196   : > { %12661 = vmatmul.mubr.bf16.gmra.mrb[4].mxu1 %v3342_v31  ;;  %v14333_v31 = vld [vmem:[%s14606_s9 + $0x40] sm:$0xff]   ;;  %v3363_v4 = vrot.slane %v14336_v56, 1 }
 0x197   : > { %13097 = vmatmul.mubr.bf16.gmra.mrb[24].mxu0 %v7910_v32  ;;  %12664 = vmatprep.mubr.bf16.mxu1 %v3344_v33  ;;  %v8434_v20 = vsel %vm8417_vm4, %v8425_v5, %v8433_v7  ;;  %v3354_v32 = vsel %vm2798_vm3, %v3351_v3, %v3353_v23  ;;  %v3356_v33 = vsel %vm2798_vm3, %v3353_v23, %v3355_v24  ;;  %v8472_v44 = vshrl.u32 %v14333_v31, 16 }
 0x198   : > { %13100 = vmatprep.mubr.bf16.mxu0 %v7912_v35  ;;  %12697 = vmatpush3.bf16.msra.mxu1 %v14332_v29  ;;  %v8451_v29 = vor.u32 %v8450_v21, %v8447_v18  ;;  %v8456_v35 = vrot.slane %v8454_v26, 2  ;;  %v8490_v5 = vshrl.u32 %v14340_v49, 16  ;;  %v14352_v18 = vld [vmem:[%s14606_s9 + $0x68] sm:$0xff]   ;;  %v8495_v21 = vrot.slane %v8493_v8, 3 }
 0x199   : > { %12698 = vmatprep.subr.bf16.mxu1 %v14335_v37  ;;  %v3365_v26 = vrot.slane %v14338_v12, 1 }
 0x19a   : > { %v8452_v39 = vsel %vm8417_vm4, %v8442_v25, %v8451_v29  ;;  %v8460_v45 = vor.u32 %v8459_v36, %v8456_v35  ;;  %v14355_v25 = vld [vmem:[%s15989_s3 + $0x1e8] sm:$0xff]   ;;  %v14351_v35 = vld [vmem:[%s14606_s9 + $0x10] sm:$0xff]  }
 0x19b   : > { %v3366_v36 = vsel %vm2798_vm3, %v3363_v4, %v3365_v26  ;;  %v3870_v51 = vrot.slane %v14351_v35, 1  ;;  %v14363_v35 = vld [vmem:[%s14606_s9 + $0x38] sm:$0xff]  }
 0x19c   : > { %12699 = vmatpush3.bf16.msra.mxu1 %v14335_v37  ;;  %v14329_v37 = vld [vmem:[%s14656_s8 + $0x68] sm:$0xff]   ;;  %v8470_v62 = vsel %vm8417_vm4, %v8460_v45, %v8469_v50 }
 0x19d   : > { %12700 = vmatprep.subr.bf16.mxu1 %v14339_v47  ;;  %v3359_v46 = vrot.slane %v14329_v37, 1  ;;  %v14350_v37 = vld [vmem:[%s14606_s9 + $0x8] sm:$0xfe]  }
 0x19e   : > { %12665 = vmatmul.mubr.bf16.gmra.mrb[8].mxu1 %v3346_v53  ;;  %v14331_v53 = vld [vmem:[%s14656_s8 + $0x70] sm:$0xff]  }
 0x19f   : > { %13101 = vmatmul.mubr.bf16.gmra.mrb[28].mxu0 %v7914_v54  ;;  %12668 = vmatprep.mubr.bf16.mxu1 %v3348_v55  ;;  %v3358_v54 = vsel %vm2798_vm3, %v3355_v24, %v3357_v43  ;;  %v8474_v55 = vrot.slane %v8472_v44, 2  ;;  %v3361_v3 = vrot.slane %v14331_v53, 1  ;;  %v14357_v44 = vld [vmem:[%s14606_s9 + $0x78] sm:$0xff]  }
 0x1a0   : > { %13104 = vmatprep.mubr.bf16.mxu0 %v7916_v57  ;;  %12701 = vmatpush3.bf16.msra.mxu1 %v14339_v47  ;;  %v8475_v47 = vshll.u32 %v14333_v31, 16  ;;  %v3360_v57 = vsel %vm2798_vm3, %v3357_v43, %v3359_v46  ;;  %v14345_v31 = vld [vmem:[%s14656_s8 + $0x90] ss:$0 sps:$4 sm:$0x11]   ;;  %v14353_v53 = vld [vmem:[%s14606_s9 + $0x18] sm:$0xff]   ;;  %v8535_v56 = vshrl.u32 %v14357_v44, 16 }
 0x1a1   : > { %12702 = vmatprep.subr.bf16.mxu1 %v14342_v59  ;;  %v14354_v43 = vld [vmem:[%s14606_s9 + $0x70] sm:$0xff]  }
 0x1a2   : > { %v8477_v58 = vrot.slane %v8475_v47, 3  ;;  %v14367_v47 = vld [vmem:[%s15989_s3 + $0x1f8] sm:$0xff]  }
 0x1a4   : > { %12703 = vmatpush3.bf16.msra.mxu1 %v14342_v59  ;;  %v14344_v59 = vld [vmem:[%s14606_s9 + $0x58] sm:$0xff]   ;;  %v8478_v7 = vor.u32 %v8477_v58, %v8474_v55  ;;  %v8529_v55 = vshll.u32 %v14354_v43, 16  ;;  %v14356_v58 = vld [vmem:[%s14606_s9 + $0x20] sm:$0xff]  }
 0x1a5   : > { %12704 = vmatprep.subr.bf16.mxu1 %v14346_v10  ;;  %v8499_v9 = vshrl.u32 %v14344_v59, 16  ;;  %v8502_v13 = vshll.u32 %v14344_v59, 16  ;;  %v14359_v59 = vld [vmem:[%s14606_s9 + $0x80] sm:$0xff]   ;;  %v3874_v12 = vrot.slane %v14356_v58, 1 }
 0x1a6   : > { %12669 = vmatmul.mubr.bf16.gmra.mrb[12].mxu1 %v3350_v11  ;;  %v14349_v11 = vld [vmem:[%s15989_s3 + $0x1e0] sm:$0xff]   ;;  %v8479_v19 = vsel %vm8417_vm4, %v8469_v50, %v8478_v7  ;;  %v3869_v50 = vrot.slane %v14350_v37, 1 }
 0x1a7   : > { %13105 = vmatmul.mubr.bf16.gmra.mrb[32].mxu0 %v7918_v16  ;;  %12672 = vmatprep.mubr.bf16.mxu1 %v3352_v17  ;;  %v3362_v16 = vsel %vm2798_vm3, %v3359_v46, %v3361_v3  ;;  %v3364_v17 = vsel %vm2798_vm3, %v3361_v3, %v3363_v4  ;;  %v8504_v24 = vrot.slane %v8502_v13, 3  ;;  %v8531_v3 = vrot.slane %v8529_v55, 3  ;;  %v14362_v4 = vld [vmem:[%s14606_s9 + $0x88] sm:$0xff]  }
 0x1a8   : > { %13124 = vmatprep.mubr.bf16.mxu0 %v8434_v20  ;;  %12705 = vmatpush3.bf16.msra.mxu1 %v14346_v10  ;;  %v8487_v10 = vor.u32 %v8486_v1, %v8483_v63  ;;  %v8492_v20 = vrot.slane %v8490_v5, 2  ;;  %v3871_v1 = vsel %vm2798_vm3, %v3869_v50, %v3870_v51  ;;  %v8547_v13 = vshll.u32 %v14359_v59, 16 }
 0x1a9   : > { %12706 = vmatprep.subr.bf16.mxu1 %v14348_v22  ;;  %v8553_v14 = vshrl.u32 %v14362_v4, 16  ;;  %v8556_v15 = vshll.u32 %v14362_v4, 16 }
 0x1aa   : > { %v8488_v23 = vsel %vm8417_vm4, %v8478_v7, %v8487_v10  ;;  %v8496_v30 = vor.u32 %v8495_v21, %v8492_v20  ;;  %v8537_v7 = vrot.slane %v8535_v56, 2  ;;  %v14366_v20 = vld [vmem:[%s14606_s9 + $0x98] sm:$0xff]  }
 0x1ac   : > { %12707 = vmatpush3.bf16.msra.mxu1 %v14348_v22  ;;  %v8501_v22 = vrot.slane %v8499_v9, 2  ;;  %v8497_v38 = vsel %vm8417_vm4, %v8487_v10, %v8496_v30  ;;  %v3872_v9 = vrot.slane %v14353_v53, 1  ;;  %v8544_v10 = vshrl.u32 %v14359_v59, 16 }
 0x1ad   : > { %12744 = vmatprep.subr.bf16.mxu1 %v15342_v61  ;;  %v3880_v53 = vrot.slane %v14363_v35, 1  ;;  %v14384_v35 = vld [vmem:[%s14656_s8 + $0x38] sm:$0xff]  }
 0x1ae   : > { %12673 = vmatmul.mubr.bf16.gmra.mrb[16].mxu1 %v3354_v32  ;;  %v8505_v32 = vor.u32 %v8504_v24, %v8501_v22  ;;  %v3873_v21 = vsel %vm2798_vm3, %v3870_v51, %v3872_v9  ;;  %v8549_v22 = vrot.slane %v8547_v13, 3 }
 0x1af   : > { %13125 = vmatmul.mubr.bf16.vlgmr.msra.gmra.mrb[0].mxu0 %v8443_v6  ;;  %12676 = vmatprep.mubr.bf16.mxu1 %v3356_v33  ;;  %v8520_v33 = vshll.u32 %v14352_v18, 16  ;;  %v8510_v6 = vrot.slane %v8508_v60, 2  ;;  %v8555_v60 = vrot.slane %v8553_v14, 2 }
 0x1b0   : > { %13161 = vmatpush3.bf16.msra.mxu0 %v15261_v0  ;;  %13128 = vmatprep.mubr.bf16.mxu0 %v8452_v39  ;;  %v8461_v0 = vsel %vm8417_vm4, %v8451_v29, %v8460_v45  ;;  %v8517_v29 = vshrl.u32 %v14352_v18, 16  ;;  %v3368_v39 = vsel %vm2798_vm3, %v3365_v26, %v3367_v27  ;;  %v8506_v45 = vsel %vm8417_vm4, %v8496_v30, %v8505_v32  ;;  %v14364_v18 = vld [vmem:[%s14606_s9 + $0x90] sm:$0xff]  }
 0x1b1   : > { %13162 = vmatprep.subr.bf16.mxu0 %v14327_v34  ;;  %v8522_v46 = vrot.slane %v8520_v33, 3  ;;  %v8514_v52 = vor.u32 %v8513_v41, %v8510_v6  ;;  %v8558_v26 = vrot.slane %v8556_v15, 3  ;;  %v8562_v28 = vshrl.u32 %v14364_v18, 16 }
 0x1b2   : > { %v8519_v42 = vrot.slane %v8517_v29, 2  ;;  %v14382_v29 = vld [vmem:[%s15989_s3 + $0xc8] sm:$0xff]   ;;  %v8565_v30 = vshll.u32 %v14364_v18, 16 }
 0x1b3   : > { %v8515_v63 = vsel %vm8417_vm4, %v8505_v32, %v8514_v52  ;;  %v8559_v37 = vor.u32 %v8558_v26, %v8555_v60  ;;  %v14373_v60 = vld [vmem:[%s14606_s9 + $0x58] sm:$0xff]   ;;  %v14400_v26 = vld [vmem:[%s15989_s3 + $0xf0] sm:$0xff]  }
 0x1b4   : > { %13163 = vmatpush3.bf16.msra.mxu0 %v14327_v34  ;;  %v14360_v34 = vld [vmem:[%s15989_s3 + $0x1f0] sm:$0xff]   ;;  %v8523_v49 = vor.u32 %v8522_v46, %v8519_v42  ;;  %v8567_v41 = vrot.slane %v8565_v30, 3  ;;  %v15434_v42 = vld [vmem:[%s14606_s9 + $0x40] sm:$0xff]  }
 0x1b5   : > { %13164 = vmatprep.subr.bf16.mxu0 %v14334_v48 }
 0x1b6   : > { %12677 = vmatmul.mubr.bf16.gmra.mrb[20].mxu1 %v3358_v54  ;;  %v8526_v54 = vshrl.u32 %v14354_v43, 16  ;;  %v8524_v5 = vsel %vm8417_vm4, %v8514_v52, %v8523_v49  ;;  %v14389_v52 = vld [vmem:[%s15989_s3 + $0xd8] sm:$0xff]  }
 0x1b7   : > { %13129 = vmatmul.mubr.bf16.gmra.mrb[4].mxu0 %v8461_v0  ;;  %12680 = vmatprep.mubr.bf16.mxu1 %v3360_v57  ;;  %v8538_v0 = vshll.u32 %v14357_v44, 16  ;;  %v15406_v57 = vld [vmem:[%s15988_s2 + $0x200] sm:$0xff]  }
 0x1b8   : > { %13132 = vmatprep.mubr.bf16.mxu0 %v8470_v62  ;;  %13165 = vmatpush3.bf16.msra.mxu0 %v14334_v48  ;;  %v3369_v48 = vrot.slane %v14345_v31, 1  ;;  %v8571_v31 = vshrl.u32 %v14366_v20, 16 }
 0x1b9   : > { %13166 = vmatprep.subr.bf16.mxu0 %v14341_v2  ;;  %v8540_v8 = vrot.slane %v8538_v0, 3  ;;  %v3882_v0 = vrot.slane %v15434_v42, 1 }
 0x1ba   : > { %v3370_v62 = vsel %vm2798_vm3, %v3367_v27, %v3369_v48  ;;  %v8573_v43 = vrot.slane %v8571_v31, 2  ;;  %v14380_v31 = vld [vmem:[%s14656_s8 + $0x30] sm:$0xff]  }
 0x1bc   : > { %13167 = vmatpush3.bf16.msra.mxu0 %v14341_v2  ;;  %v8528_v2 = vrot.slane %v8526_v54, 2 }
 0x1bd   : > { %13168 = vmatprep.subr.bf16.mxu0 %v14349_v11 }
 0x1be   : > { %12681 = vmatmul.mubr.bf16.gmra.mrb[24].mxu1 %v3362_v16  ;;  %v8541_v16 = vor.u32 %v8540_v8, %v8537_v7 }
 0x1bf   : > { %13133 = vmatmul.mubr.bf16.gmra.mrb[8].mxu0 %v8479_v19  ;;  %12684 = vmatprep.mubr.bf16.mxu1 %v3364_v17  ;;  %v14358_v17 = vld [vmem:[%s14606_s9 + $0x28] sm:$0xff]   ;;  %v8546_v19 = vrot.slane %v8544_v10, 2 }
 0x1c0   : > { %13136 = vmatprep.mubr.bf16.mxu0 %v8488_v23  ;;  %13169 = vmatpush3.bf16.msra.mxu0 %v14349_v11  ;;  %v8532_v11 = vor.u32 %v8531_v3, %v8528_v2  ;;  %v14361_v23 = vld [vmem:[%s14606_s9 + $0x30] sm:$0xff]   ;;  %v3876_v32 = vrot.slane %v14358_v17, 1  ;;  %v14393_v3 = vld [vmem:[%s15989_s3 + $0xe0] sm:$0xff]  }
 0x1c1   : > { %13170 = vmatprep.subr.bf16.mxu0 %v14355_v25  ;;  %v3878_v33 = vrot.slane %v14361_v23, 1  ;;  %v8550_v6 = vor.u32 %v8549_v22, %v8546_v19 }
 0x1c2   : > { %v8533_v24 = vsel %vm8417_vm4, %v8523_v49, %v8532_v11  ;;  %v8542_v27 = vsel %vm8417_vm4, %v8532_v11, %v8541_v16  ;;  %v3877_v44 = vsel %vm2798_vm3, %v3874_v12, %v3876_v32  ;;  %v14377_v11 = vld [vmem:[%s14656_s8 + $0x28] sm:$0xff]  }
 0x1c3   : > { %v8551_v46 = vsel %vm8417_vm4, %v8541_v16, %v8550_v6  ;;  %v8560_v50 = vsel %vm8417_vm4, %v8550_v6, %v8559_v37  ;;  %v3881_v7 = vsel %vm2798_vm3, %v3878_v33, %v3880_v53  ;;  %v14396_v16 = vld [vmem:[%s15989_s3 + $0xe8] sm:$0xff]   ;;  %v9113_v22 = vshrl.u32 %v14377_v11, 16 }
 0x1c4   : > { %13171 = vmatpush3.bf16.msra.mxu0 %v14355_v25  ;;  %v3875_v25 = vsel %vm2798_vm3, %v3872_v9, %v3874_v12  ;;  %v3883_v12 = vsel %vm2798_vm3, %v3880_v53, %v3882_v0  ;;  %v9116_v23 = vshll.u32 %v14377_v11, 16  ;;  %v14381_v53 = vld [vmem:[%s15988_s2 + $0x208] sm:$0xff]  }
 0x1c5   : > { %13172 = vmatprep.subr.bf16.mxu0 %v14360_v34 }
 0x1c6   : > { %12685 = vmatmul.mubr.bf16.gmra.mrb[28].mxu1 %v3366_v36  ;;  %v8574_v36 = vshll.u32 %v14366_v20, 16  ;;  %v9118_v6 = vrot.slane %v9116_v23, 3  ;;  %v15520_v23 = vld [vmem:[%s14606_s9 + $0x90] sm:$0xff]  }
 0x1c7   : > { %13137 = vmatmul.mubr.bf16.gmra.mrb[12].mxu0 %v8497_v38  ;;  %12688 = vmatprep.mubr.bf16.mxu1 %v3368_v39  ;;  %v8564_v38 = vrot.slane %v8562_v28, 2  ;;  %v14386_v39 = vld [vmem:[%s15989_s3 + $0xd0] sm:$0xff]   ;;  %v15468_v28 = vld [vmem:[%s14606_s9 + $0x60] sm:$0xff]  }
 0x1c8   : > { %13140 = vmatprep.mubr.bf16.mxu0 %v8506_v45  ;;  %13173 = vmatpush3.bf16.msra.mxu0 %v14360_v34  ;;  %v14369_v34 = vld [vmem:[%s14606_s9 + $0xa0] ss:$0 sps:$4 sm:$0x77]   ;;  %v14371_v45 = vld [vmem:[%s14656_s8 + $0x10] sm:$0xfc]   ;;  %v8576_v48 = vrot.slane %v8574_v36, 3 }
 0x1c9   : > { %13174 = vmatprep.subr.bf16.mxu0 %v14367_v47  ;;  %v8580_v51 = vshrl.u32 %v14369_v34, 16  ;;  %v8583_v54 = vshll.u32 %v14369_v34, 16  ;;  %v9087_v55 = vshrl.u32 %v14371_v45, 16  ;;  %v9090_v56 = vshll.u32 %v14371_v45, 16  ;;  %v14402_v36 = vld [vmem:[%s15989_s3 + $0xf8] sm:$0xff]  }
 0x1ca   : > { %v8568_v49 = vor.u32 %v8567_v41, %v8564_v38  ;;  %v8577_v59 = vor.u32 %v8576_v48, %v8573_v43  ;;  %v9115_v34 = vrot.slane %v9113_v22, 2  ;;  %v3888_v38 = vrot.slane %v14373_v60, 1  ;;  %v14391_v48 = vld [vmem:[%s14656_s8 + $0x48] sm:$0xff]   ;;  %v15524_v60 = vld [vmem:[%s14606_s9 + $0x98] ss:$0 sps:$4 sm:$0x11]  }
 0x1cb   : > { %v8585_v4 = vrot.slane %v8583_v54, 3  ;;  %v9089_v8 = vrot.slane %v9087_v55, 2  ;;  %v9092_v9 = vrot.slane %v9090_v56, 3  ;;  %v9125_v41 = vshll.u32 %v14380_v31, 16  ;;  %v15490_v56 = vld [vmem:[%s14606_s9 + $0x70] sm:$0xff]  }
 0x1cc   : > { %13175 = vmatpush3.bf16.msra.mxu0 %v14367_v47  ;;  %v3879_v47 = vsel %vm2798_vm3, %v3876_v32, %v3878_v33  ;;  %v8569_v10 = vsel %vm8417_vm4, %v8559_v37, %v8568_v49  ;;  %v8578_v14 = vsel %vm8417_vm4, %v8568_v49, %v8577_v59  ;;  %v3890_v43 = vrot.slane %v15468_v28, 1  ;;  %v14406_v28 = vld [vmem:[%s14656_s8 + $0x68] sm:$0xff]  }
 0x1cd   : > { %13212 = vmatprep.subr.bf16.mxu0 %v15406_v57  ;;  %v9119_v45 = vor.u32 %v9118_v6, %v9115_v34 }
 0x1ce   : > { %12689 = vmatmul.mubr.bf16.gmra.mrb[32].mxu1 %v3370_v62  ;;  %v14368_v62 = vld [vmem:[%s14606_s9 + $0x48] sm:$0xff]   ;;  %v3891_v55 = vsel %vm2798_vm3, %v3888_v38, %v3890_v43 }
 0x1cf   : > { %13141 = vmatmul.mubr.bf16.gmra.mrb[16].mxu0 %v8515_v63  ;;  %12708 = vmatprep.mubr.bf16.mxu1 %v3871_v1  ;;  %v8582_v63 = vrot.slane %v8580_v51, 2  ;;  %v15448_v1 = vld [vmem:[%s14606_s9 + $0x50] sm:$0xff]   ;;  %v3884_v18 = vrot.slane %v14368_v62, 1  ;;  %v15496_v62 = vld [vmem:[%s15988_s2 + $0x100] sm:$0xff]  }
 0x1d0   : > { %13144 = vmatprep.mubr.bf16.mxu0 %v8524_v5  ;;  %v14374_v5 = vld [vmem:[%s14656_s8 + $0x20] sm:$0xff]   ;;  %v3886_v19 = vrot.slane %v15448_v1, 1  ;;  %v9149_v1 = vshrl.u32 %v14391_v48, 16 }
 0x1d1   : > { %v9104_v17 = vshrl.u32 %v14374_v5, 16  ;;  %v9107_v20 = vshll.u32 %v14374_v5, 16 }
 0x1d2   : > { %v3887_v33 = vsel %vm2798_vm3, %v3884_v18, %v3886_v19 }
 0x1d3   : > { %v9109_v30 = vrot.slane %v9107_v20, 3 }
 0x1d6   : > { %12709 = vmatmul.mubr.bf16.vlgmr.msra.gmra.mrb[0].mxu1 %v3873_v21  ;;  %v8586_v21 = vor.u32 %v8585_v4, %v8582_v63  ;;  %v14394_v4 = vld [vmem:[%s14656_s8 + $0x50] sm:$0xff]  }
 0x1d7   : > { %13145 = vmatmul.mubr.bf16.gmra.mrb[20].mxu0 %v8533_v24  ;;  %12712 = vmatprep.mubr.bf16.mxu1 %v3875_v25  ;;  %v9093_v24 = vor.u32 %v9092_v9, %v9089_v8  ;;  %v14385_v9 = vld [vmem:[%s14606_s9 + $0x78] sm:$0xff]   ;;  %v9161_v22 = vshll.u32 %v14394_v4, 16 }
 0x1d8   : > { %13148 = vmatprep.mubr.bf16.mxu0 %v8542_v27  ;;  %12745 = vmatpush3.bf16.msra.mxu1 %v15342_v61  ;;  %v14372_v61 = vld [vmem:[%s14656_s8 + $0x18] sm:$0xff]   ;;  %v9106_v27 = vrot.slane %v9104_v17, 2  ;;  %v8587_v32 = vsel %vm8417_vm4, %v8577_v59, %v8586_v21 }
 0x1d9   : > { %12746 = vmatprep.subr.bf16.mxu1 %v14382_v29  ;;  %v9095_v58 = vshrl.u32 %v14372_v61, 16  ;;  %v9098_v2 = vshll.u32 %v14372_v61, 16  ;;  %v3889_v61 = vsel %vm2798_vm3, %v3886_v19, %v3888_v38  ;;  %v14395_v19 = vld [vmem:[%s15988_s2 + $0x218] sm:$0xff]   ;;  %v9163_v34 = vrot.slane %v9161_v22, 3  ;;  %v14403_v38 = vld [vmem:[%s15988_s2 + $0x220] sm:$0xff]  }
 0x1da   : > { %v9110_v42 = vor.u32 %v9109_v30, %v9106_v27  ;;  %v14401_v27 = vld [vmem:[%s14656_s8 + $0x60] sm:$0xff]  }
 0x1db   : > { %v9097_v13 = vrot.slane %v9095_v58, 2  ;;  %v9100_v15 = vrot.slane %v9098_v2, 3 }
 0x1dc   : > { %12747 = vmatpush3.bf16.msra.mxu1 %v14382_v29  ;;  %v3885_v29 = vsel %vm2798_vm3, %v3882_v0, %v3884_v18  ;;  %v9120_v0 = vsel %vm8417_vm4, %v9110_v42, %v9119_v45  ;;  %v9158_v18 = vshrl.u32 %v14394_v4, 16 }
 0x1dd   : > { %12748 = vmatprep.subr.bf16.mxu1 %v14386_v39  ;;  %v9101_v25 = vor.u32 %v9100_v15, %v9097_v13  ;;  %v14398_v13 = vld [vmem:[%s14656_s8 + $0x58] sm:$0xff]   ;;  %v9151_v15 = vrot.slane %v9149_v1, 2 }
 0x1de   : > { %12713 = vmatmul.mubr.bf16.gmra.mrb[4].mxu1 %v3877_v44  ;;  %v9131_v44 = vshrl.u32 %v14384_v35, 16  ;;  %v14411_v1 = vld [vmem:[%s14656_s8 + $0x78] sm:$0xff]  }
 0x1df   : > { %13149 = vmatmul.mubr.bf16.gmra.mrb[24].mxu0 %v8551_v46  ;;  %12716 = vmatprep.mubr.bf16.mxu1 %v3879_v47  ;;  %v9102_v37 = vsel %vm8417_vm4, %v9093_v24, %v9101_v25  ;;  %v9134_v46 = vshll.u32 %v14384_v35, 16  ;;  %v14387_v47 = vld [vmem:[%s14656_s8 + $0x40] sm:$0xff]   ;;  %v9111_v54 = vsel %vm8417_vm4, %v9101_v25, %v9110_v42  ;;  %v9167_v25 = vshrl.u32 %v14398_v13, 16 }
 0x1e0   : > { %13152 = vmatprep.mubr.bf16.mxu0 %v8560_v50  ;;  %12749 = vmatpush3.bf16.msra.mxu1 %v14386_v39  ;;  %v9122_v39 = vshrl.u32 %v14380_v31, 16  ;;  %v14378_v50 = vld [vmem:[%s14606_s9 + $0x68] sm:$0xff]   ;;  %v9133_v49 = vrot.slane %v9131_v44, 2  ;;  %v9140_v59 = vshrl.u32 %v14387_v47, 16  ;;  %v9143_v63 = vshll.u32 %v14387_v47, 16 }
 0x1e1   : > { %12750 = vmatprep.subr.bf16.mxu1 %v14389_v52  ;;  %v9136_v58 = vrot.slane %v9134_v46, 3  ;;  %v3892_v2 = vrot.slane %v14378_v50, 1  ;;  %v3902_v35 = vrot.slane %v15520_v23, 1  ;;  %v9179_v42 = vshll.u32 %v14401_v27, 16 }
 0x1e2   : > { %v9124_v51 = vrot.slane %v9122_v39, 2  ;;  %v9145_v11 = vrot.slane %v9143_v63, 3 }
 0x1e3   : > { %v9137_v8 = vor.u32 %v9136_v58, %v9133_v49  ;;  %v14404_v49 = vld [vmem:[%s14656_s8 + $0x8] sm:$0xfe]  }
 0x1e4   : > { %12751 = vmatpush3.bf16.msra.mxu1 %v14389_v52  ;;  %v9127_v52 = vrot.slane %v9125_v41, 3  ;;  %v9176_v41 = vshrl.u32 %v14401_v27, 16 }
 0x1e5   : > { %12752 = vmatprep.subr.bf16.mxu1 %v14393_v3 }
 0x1e6   : > { %12717 = vmatmul.mubr.bf16.gmra.mrb[8].mxu1 %v3881_v7  ;;  %v9128_v5 = vor.u32 %v9127_v52, %v9124_v51  ;;  %v3894_v7 = vrot.slane %v15490_v56, 1  ;;  %v9178_v51 = vrot.slane %v9176_v41, 2  ;;  %v9181_v52 = vrot.slane %v9179_v42, 3 }
 0x1e7   : > { %13153 = vmatmul.mubr.bf16.gmra.mrb[28].mxu0 %v8569_v10  ;;  %12720 = vmatprep.mubr.bf16.mxu1 %v3883_v12  ;;  %v9142_v10 = vrot.slane %v9140_v59, 2  ;;  %v14388_v12 = vld [vmem:[%s15988_s2 + $0x210] sm:$0xff]  }
 0x1e8   : > { %13156 = vmatprep.mubr.bf16.mxu0 %v8578_v14  ;;  %12753 = vmatpush3.bf16.msra.mxu1 %v14393_v3  ;;  %v9152_v3 = vshll.u32 %v14391_v48, 16  ;;  %v15508_v14 = vld [vmem:[%s14606_s9 + $0x80] sm:$0xff]   ;;  %v9129_v20 = vsel %vm8417_vm4, %v9119_v45, %v9128_v5  ;;  %v3895_v21 = vsel %vm2798_vm3, %v3892_v2, %v3894_v7  ;;  %v9138_v24 = vsel %vm8417_vm4, %v9128_v5, %v9137_v8  ;;  %v14408_v45 = vld [vmem:[%s14656_s8 + $0x70] sm:$0xff]  }
 0x1e9   : > { %12754 = vmatprep.subr.bf16.mxu1 %v14396_v16  ;;  %v3898_v30 = vrot.slane %v15508_v14, 1  ;;  %v9188_v48 = vshll.u32 %v14406_v28, 16  ;;  %v9194_v58 = vshrl.u32 %v14408_v45, 16  ;;  %v14414_v59 = vld [vmem:[%s15988_s2 + $0x230] sm:$0xff]   ;;  %v9197_v63 = vshll.u32 %v14408_v45, 16  ;;  %v14407_v14 = vld [vmem:[%s14656_s8 + $0x18] sm:$0xff]  }
 0x1ea   : > { %v9154_v17 = vrot.slane %v9152_v3, 3  ;;  %v14421_v3 = vld [vmem:[%s15988_s2 + $0x238] sm:$0xff]  }
 0x1ec   : > { %12755 = vmatpush3.bf16.msra.mxu1 %v14396_v16  ;;  %v3893_v16 = vsel %vm2798_vm3, %v3890_v43, %v3892_v2  ;;  %v9155_v6 = vor.u32 %v9154_v17, %v9151_v15  ;;  %v9185_v43 = vshrl.u32 %v14406_v28, 16  ;;  %v9206_v15 = vshll.u32 %v14411_v1, 16  ;;  %v14410_v17 = vld [vmem:[%s14656_s8 + $0x20] sm:$0xff]  }
 0x1ed   : > { %12756 = vmatprep.subr.bf16.mxu1 %v14400_v26  ;;  %v4409_v27 = vrot.slane %v14410_v17, 1 }
 0x1ee   : > { %12721 = vmatmul.mubr.bf16.gmra.mrb[12].mxu1 %v3885_v29  ;;  %v3896_v29 = vrot.slane %v14385_v9, 1 }
 0x1ef   : > { %13157 = vmatmul.mubr.bf16.gmra.mrb[32].mxu0 %v8587_v32  ;;  %12724 = vmatprep.mubr.bf16.mxu1 %v3887_v33  ;;  %v9146_v32 = vor.u32 %v9145_v11, %v9142_v10  ;;  %v9160_v33 = vrot.slane %v9158_v18, 2  ;;  %v9182_v10 = vor.u32 %v9181_v52, %v9178_v51  ;;  %v14413_v18 = vld [vmem:[%s14656_s8 + $0x80] sm:$0xff]  }
 0x1f0   : > { %13176 = vmatprep.mubr.bf16.mxu0 %v9102_v37  ;;  %12757 = vmatpush3.bf16.msra.mxu1 %v14400_v26  ;;  %v9170_v26 = vshll.u32 %v14398_v13, 16  ;;  %v3904_v37 = vrot.slane %v15524_v60, 1  ;;  %v3897_v44 = vsel %vm2798_vm3, %v3894_v7, %v3896_v29  ;;  %v3899_v47 = vsel %vm2798_vm3, %v3896_v29, %v3898_v30 }
 0x1f1   : > { %12758 = vmatprep.subr.bf16.mxu1 %v14402_v36  ;;  %v9147_v46 = vsel %vm8417_vm4, %v9137_v8, %v9146_v32  ;;  %v9156_v50 = vsel %vm8417_vm4, %v9146_v32, %v9155_v6  ;;  %v4404_v8 = vrot.slane %v14404_v49, 1  ;;  %v9203_v13 = vshrl.u32 %v14411_v1, 16 }
 0x1f2   : > { %v9172_v39 = vrot.slane %v9170_v26, 3  ;;  %v4407_v60 = vrot.slane %v14407_v14, 1  ;;  %v9212_v28 = vshrl.u32 %v14413_v18, 16  ;;  %v9215_v29 = vshll.u32 %v14413_v18, 16  ;;  %v14424_v18 = vld [vmem:[%s14656_s8 + $0x50] sm:$0xff]  }
 0x1f3   : > { %v9205_v23 = vrot.slane %v9203_v13, 2 }
 0x1f4   : > { %12759 = vmatpush3.bf16.msra.mxu1 %v14402_v36  ;;  %v9169_v36 = vrot.slane %v9167_v25, 2  ;;  %v14416_v25 = vld [vmem:[%s14656_s8 + $0x88] sm:$0xff]  }
 0x1f5   : > { %13368 = vmatprep.subr.bf16.mxu1 %v15496_v62  ;;  %v9224_v32 = vshll.u32 %v14416_v25, 16 }
 0x1f6   : > { %12725 = vmatmul.mubr.bf16.gmra.mrb[16].mxu1 %v3889_v61  ;;  %v14409_v61 = vld [vmem:[%s15988_s2 + $0x228] sm:$0xff]   ;;  %v9173_v56 = vor.u32 %v9172_v39, %v9169_v36  ;;  %v9214_v36 = vrot.slane %v9212_v28, 2  ;;  %v14418_v39 = vld [vmem:[%s14656_s8 + $0x90] sm:$0xff]  }
 0x1f7   : > { %13177 = vmatmul.mubr.bf16.vlgmr.msra.gmra.mrb[0].mxu0 %v9111_v54  ;;  %12728 = vmatprep.mubr.bf16.mxu1 %v3891_v55  ;;  %v9187_v54 = vrot.slane %v9185_v43, 2  ;;  %v9190_v55 = vrot.slane %v9188_v48, 3  ;;  %v9226_v43 = vrot.slane %v9224_v32, 3  ;;  %v9230_v48 = vshrl.u32 %v14418_v39, 16  ;;  %v14428_v32 = vld [vmem:[%s14606_s9 + $0x20] sm:$0xff]  }
 0x1f8   : > { %13213 = vmatpush3.bf16.msra.mxu0 %v15406_v57  ;;  %13180 = vmatprep.mubr.bf16.mxu0 %v9120_v0  ;;  %v15511_v57 = vld [vmem:[%s14606_s9 + $0x88] sm:$0xff]   ;;  %v14405_v0 = vld [vmem:[%s14656_s8 + $0x10] sm:$0xff]  }
 0x1f9   : > { %13214 = vmatprep.subr.bf16.mxu0 %v14381_v53  ;;  %v3900_v31 = vrot.slane %v15511_v57, 1  ;;  %v4405_v9 = vrot.slane %v14405_v0, 1  ;;  %v9191_v11 = vor.u32 %v9190_v55, %v9187_v54  ;;  %v15560_v57 = vld [vmem:[%s15989_s3 + $0x200] sm:$0xff]   ;;  %v14417_v55 = vld [vmem:[%s14656_s8 + $0x38] sm:$0xff]   ;;  %v9232_v0 = vrot.slane %v9230_v48, 2 }
 0x1fb   : > { %v3901_v2 = vsel %vm2798_vm3, %v3898_v30, %v3900_v31  ;;  %v3903_v5 = vsel %vm2798_vm3, %v3900_v31, %v3902_v35  ;;  %v9192_v22 = vsel %vm8417_vm4, %v9182_v10, %v9191_v11  ;;  %v9221_v31 = vshrl.u32 %v14416_v25, 16 }
 0x1fc   : > { %13215 = vmatpush3.bf16.msra.mxu0 %v14381_v53  ;;  %v9164_v53 = vor.u32 %v9163_v34, %v9160_v33  ;;  %v4408_v33 = vsel %vm2798_vm3, %v4405_v9, %v4407_v60  ;;  %v14412_v34 = vld [vmem:[%s14656_s8 + $0x28] sm:$0xff]   ;;  %v4421_v25 = vrot.slane %v14424_v18, 1 }
 0x1fd   : > { %13216 = vmatprep.subr.bf16.mxu0 %v14388_v12  ;;  %v9223_v42 = vrot.slane %v9221_v31, 2  ;;  %v4411_v45 = vrot.slane %v14412_v34, 1 }
 0x1fe   : > { %12729 = vmatmul.mubr.bf16.gmra.mrb[20].mxu1 %v3893_v16  ;;  %v9165_v4 = vsel %vm8417_vm4, %v9155_v6, %v9164_v53  ;;  %v9174_v7 = vsel %vm8417_vm4, %v9164_v53, %v9173_v56  ;;  %v9199_v16 = vrot.slane %v9197_v63, 3  ;;  %v14499_v53 = vld [vmem:[%s15988_s2 + $0x108] sm:$0xff]   ;;  %v14423_v63 = vld [vmem:[%s14656_s8 + $0xa0] ss:$0 sps:$4 sm:$0x77]  }
 0x1ff   : > { %13181 = vmatmul.mubr.bf16.gmra.mrb[4].mxu0 %v9129_v20  ;;  %12732 = vmatprep.mubr.bf16.mxu1 %v3895_v21  ;;  %v9183_v20 = vsel %vm8417_vm4, %v9173_v56, %v9182_v10  ;;  %v4406_v21 = vsel %vm2798_vm3, %v4404_v8, %v4405_v9  ;;  %v4412_v54 = vsel %vm2798_vm3, %v4409_v27, %v4411_v45  ;;  %v9248_v8 = vshrl.u32 %v14423_v63, 16 }
 0x200   : > { %13184 = vmatprep.mubr.bf16.mxu0 %v9138_v24  ;;  %13217 = vmatpush3.bf16.msra.mxu0 %v14388_v12  ;;  %v9196_v12 = vrot.slane %v9194_v58, 2  ;;  %v9208_v24 = vrot.slane %v9206_v15, 3  ;;  %v9251_v9 = vshll.u32 %v14423_v63, 16 }
 0x201   : > { %13218 = vmatprep.subr.bf16.mxu0 %v14395_v19 }
 0x202   : > { %v9200_v26 = vor.u32 %v9199_v16, %v9196_v12  ;;  %v9209_v30 = vor.u32 %v9208_v24, %v9205_v23  ;;  %v14501_v12 = vld [vmem:[%s15988_s2 + $0x118] sm:$0xff]   ;;  %v9250_v16 = vrot.slane %v9248_v8, 2  ;;  %v9253_v17 = vrot.slane %v9251_v9, 3  ;;  %v14442_v9 = vld [vmem:[%s14656_s8 + $0x88] sm:$0xff]  }
 0x203   : > { %v4435_v18 = vrot.slane %v14442_v9, 1 }
 0x204   : > { %13219 = vmatpush3.bf16.msra.mxu0 %v14395_v19  ;;  %v3905_v19 = vsel %vm2798_vm3, %v3902_v35, %v3904_v37  ;;  %v9201_v6 = vsel %vm8417_vm4, %v9191_v11, %v9200_v26  ;;  %v4410_v35 = vsel %vm2798_vm3, %v4407_v60, %v4409_v27  ;;  %v9217_v37 = vrot.slane %v9215_v29, 3  ;;  %v14422_v11 = vld [vmem:[%s14656_s8 + $0x48] sm:$0xff]   ;;  %v14427_v29 = vld [vmem:[%s14656_s8 + $0x58] sm:$0xff]  }
 0x205   : > { %13220 = vmatprep.subr.bf16.mxu0 %v14403_v38  ;;  %v9210_v41 = vsel %vm8417_vm4, %v9200_v26, %v9209_v30  ;;  %v4419_v23 = vrot.slane %v14422_v11, 1  ;;  %v9254_v24 = vor.u32 %v9253_v17, %v9250_v16  ;;  %v14503_v27 = vld [vmem:[%s15988_s2 + $0x128] sm:$0xff]   ;;  %v14445_v11 = vld [vmem:[%s14656_s8 + $0x90] sm:$0xff]   ;;  %v14446_v16 = vld [vmem:[%s14606_s9 + $0x58] sm:$0xff]  }
 0x206   : > { %12733 = vmatmul.mubr.bf16.gmra.mrb[24].mxu1 %v3897_v44  ;;  %v14420_v44 = vld [vmem:[%s14656_s8 + $0x98] sm:$0xff]   ;;  %v14454_v17 = vld [vmem:[%s15989_s3 + $0x228] sm:$0xff]  }
 0x207   : > { %13185 = vmatmul.mubr.bf16.gmra.mrb[8].mxu0 %v9147_v46  ;;  %12736 = vmatprep.mubr.bf16.mxu1 %v3899_v47  ;;  %v9218_v46 = vor.u32 %v9217_v37, %v9214_v36  ;;  %v9239_v51 = vshrl.u32 %v14420_v44, 16  ;;  %v9242_v52 = vshll.u32 %v14420_v44, 16  ;;  %v4422_v31 = vsel %vm2798_vm3, %v4419_v23, %v4421_v25 }
 0x208   : > { %13188 = vmatprep.mubr.bf16.mxu0 %v9156_v50  ;;  %13221 = vmatpush3.bf16.msra.mxu0 %v14403_v38  ;;  %v14415_v38 = vld [vmem:[%s14656_s8 + $0x30] sm:$0xff]   ;;  %v9227_v50 = vor.u32 %v9226_v43, %v9223_v42  ;;  %v4423_v36 = vrot.slane %v14427_v29, 1  ;;  %v9758_v37 = vrot.slane %v14428_v32, 3  ;;  %v14432_v43 = vld [vmem:[%s14656_s8 + $0x68] sm:$0xff]   ;;  %v14448_v29 = vld [vmem:[%s14606_s9 + $0x60] sm:$0xff]  }
 0x209   : > { %13222 = vmatprep.subr.bf16.mxu0 %v14409_v61  ;;  %v4413_v47 = vrot.slane %v14415_v38, 1  ;;  %v9219_v56 = vsel %vm8417_vm4, %v9209_v30, %v9218_v46  ;;  %v9241_v1 = vrot.slane %v9239_v51, 2  ;;  %v4427_v51 = vrot.slane %v14432_v43, 1  ;;  %v14455_v32 = vld [vmem:[%s14606_s9 + $0x60] sm:$0xff]  }
 0x20a   : > { %v4424_v42 = vsel %vm2798_vm3, %v4421_v25, %v4423_v36 }
 0x20b   : > { %v4414_v49 = vsel %vm2798_vm3, %v4411_v45, %v4413_v47 }
 0x20c   : > { %13223 = vmatpush3.bf16.msra.mxu0 %v14409_v61  ;;  %v9233_v61 = vshll.u32 %v14418_v39, 16 }
 0x20d   : > { %13224 = vmatprep.subr.bf16.mxu0 %v14414_v59 }
 0x20e   : > { %12737 = vmatmul.mubr.bf16.gmra.mrb[28].mxu1 %v3901_v2  ;;  %v9235_v58 = vrot.slane %v9233_v61, 3  ;;  %v9244_v2 = vrot.slane %v9242_v52, 3  ;;  %v14434_v61 = vld [vmem:[%s15989_s3 + $0x208] sm:$0xff]  }
 0x20f   : > { %13189 = vmatmul.mubr.bf16.gmra.mrb[12].mxu0 %v9165_v4  ;;  %12740 = vmatprep.mubr.bf16.mxu1 %v3903_v5  ;;  %v4415_v4 = vrot.slane %v14417_v55, 1  ;;  %v14439_v55 = vld [vmem:[%s15989_s3 + $0x210] sm:$0xff]  }
 0x210   : > { %13192 = vmatprep.mubr.bf16.mxu0 %v9174_v7  ;;  %13225 = vmatpush3.bf16.msra.mxu0 %v14414_v59  ;;  %v14419_v59 = vld [vmem:[%s14656_s8 + $0x40] sm:$0xff]   ;;  %v9236_v5 = vor.u32 %v9235_v58, %v9232_v0  ;;  %v9245_v10 = vor.u32 %v9244_v2, %v9241_v1  ;;  %v14444_v1 = vld [vmem:[%s15989_s3 + $0x218] sm:$0xff]  }
 0x211   : > { %13226 = vmatprep.subr.bf16.mxu0 %v14421_v3  ;;  %v4417_v7 = vrot.slane %v14419_v59, 1  ;;  %v4416_v13 = vsel %vm2798_vm3, %v4413_v47, %v4415_v4  ;;  %v14435_v47 = vld [vmem:[%s14656_s8 + $0x70] sm:$0xff]   ;;  %v14438_v59 = vld [vmem:[%s14606_s9 + $0x40] sm:$0xff]  }
 0x212   : > { %v9237_v14 = vsel %vm8417_vm4, %v9227_v50, %v9236_v5  ;;  %v9255_v30 = vsel %vm8417_vm4, %v9245_v10, %v9254_v24  ;;  %v14459_v24 = vld [vmem:[%s15989_s3 + $0x230] sm:$0xff]  }
 0x213   : > { %v4418_v15 = vsel %vm2798_vm3, %v4415_v4, %v4417_v7  ;;  %v4420_v28 = vsel %vm2798_vm3, %v4417_v7, %v4419_v23  ;;  %v14449_v7 = vld [vmem:[%s15989_s3 + $0x220] sm:$0xff]   ;;  %v9772_v23 = vrot.slane %v14446_v16, 3 }
 0x214   : > { %13227 = vmatpush3.bf16.msra.mxu0 %v14421_v3  ;;  %v14500_v3 = vld [vmem:[%s15988_s2 + $0x110] sm:$0xff]  }
 0x215   : > { %13264 = vmatprep.subr.bf16.mxu0 %v15560_v57 }
 0x216   : > { %12741 = vmatmul.mubr.bf16.gmra.mrb[32].mxu1 %v3905_v19  ;;  %v9246_v19 = vsel %vm8417_vm4, %v9236_v5, %v9245_v10 }
 0x217   : > { %13193 = vmatmul.mubr.bf16.gmra.mrb[16].mxu0 %v9183_v20  ;;  %12760 = vmatprep.mubr.bf16.mxu1 %v4406_v21  ;;  %v14425_v20 = vld [vmem:[%s14606_s9 + $0x10] sm:$0xf8]   ;;  %v14426_v21 = vld [vmem:[%s14606_s9 + $0x18] sm:$0xff]  }
 0x218   : > { %13196 = vmatprep.mubr.bf16.mxu0 %v9192_v22  ;;  %v14502_v22 = vld [vmem:[%s15988_s2 + $0x120] sm:$0xff]   ;;  %v9755_v60 = vrot.slane %v14425_v20, 3  ;;  %v9756_v26 = vrot.slane %v14426_v21, 3  ;;  %v4437_v20 = vrot.slane %v14445_v11, 1 }
 0x21a   : > { %v9757_v34 = vsel %vm9754_vm5, %v9755_v60, %v9756_v26  ;;  %v9759_v44 = vsel %vm9754_vm5, %v9756_v26, %v9758_v37  ;;  %v14447_v60 = vld [vmem:[%s14656_s8 + $0x98] ss:$0 sps:$4 sm:$0x11]  }
 0x21b   : > { %v14452_v26 = vld [vmem:[%s14606_s9 + $0x58] sm:$0xff]  }
 0x21e   : > { %12761 = vmatmul.mubr.bf16.vlgmr.msra.gmra.mrb[0].mxu1 %v4408_v33  ;;  %v14430_v33 = vld [vmem:[%s14656_s8 + $0x60] sm:$0xff]  }
 0x21f   : > { %13197 = vmatmul.mubr.bf16.gmra.mrb[20].mxu0 %v9201_v6  ;;  %12764 = vmatprep.mubr.bf16.mxu1 %v4410_v35  ;;  %v14431_v6 = vld [vmem:[%s14606_s9 + $0x28] sm:$0xff]   ;;  %v14504_v35 = vld [vmem:[%s15988_s2 + $0x130] sm:$0xff]   ;;  %v4425_v38 = vrot.slane %v14430_v33, 1 }
 0x220   : > { %13200 = vmatprep.mubr.bf16.mxu0 %v9210_v41  ;;  %13376 = vmatpush3.bf16.msra.mxu1 %v15496_v62  ;;  %v9228_v62 = vsel %vm8417_vm4, %v9218_v46, %v9227_v50  ;;  %v9760_v39 = vrot.slane %v14431_v6, 3  ;;  %v14505_v41 = vld [vmem:[%s15988_s2 + $0x138] sm:$0xff]   ;;  %v14433_v46 = vld [vmem:[%s14606_s9 + $0x30] sm:$0xff]  }
 0x221   : > { %13369 = vmatprep.subr.bf16.mxu1 %v14499_v53  ;;  %v4426_v45 = vsel %vm2798_vm3, %v4423_v36, %v4425_v38  ;;  %v14436_v50 = vld [vmem:[%s14606_s9 + $0x38] sm:$0xff]   ;;  %v9762_v52 = vrot.slane %v14433_v46, 3  ;;  %v5030_v36 = vshrl.u32 %v14452_v26, 16 }
 0x222   : > { %v9761_v48 = vsel %vm9754_vm5, %v9758_v37, %v9760_v39  ;;  %v14466_v6 = vld [vmem:[%s15989_s3 + $0x238] sm:$0xff]   ;;  %v5033_v37 = vshll.u32 %v14452_v26, 16  ;;  %v14463_v26 = vld [vmem:[%s14606_s9 + $0x90] sm:$0xff]  }
 0x223   : > { %v9763_v0 = vsel %vm9754_vm5, %v9760_v39, %v9762_v52 }
 0x224   : > { %13377 = vmatpush3.bf16.msra.mxu1 %v14499_v53  ;;  %v4429_v53 = vrot.slane %v14435_v47, 1  ;;  %v5035_v46 = vrot.slane %v5033_v37, 2  ;;  %v14457_v47 = vld [vmem:[%s14606_s9 + $0x68] sm:$0xff]  }
 0x225   : > { %13370 = vmatprep.subr.bf16.mxu1 %v14500_v3 }
 0x226   : > { %12765 = vmatmul.mubr.bf16.gmra.mrb[4].mxu1 %v4412_v54  ;;  %v9764_v54 = vrot.slane %v14436_v50, 3  ;;  %v4430_v58 = vsel %vm2798_vm3, %v4427_v51, %v4429_v53  ;;  %v14453_v50 = vld [vmem:[%s14606_s9 + $0x70] sm:$0xff]  }
 0x227   : > { %13201 = vmatmul.mubr.bf16.gmra.mrb[24].mxu0 %v9219_v56  ;;  %12768 = vmatprep.mubr.bf16.mxu1 %v4414_v49  ;;  %v4428_v56 = vsel %vm2798_vm3, %v4425_v38, %v4427_v51  ;;  %v14437_v49 = vld [vmem:[%s14656_s8 + $0x78] sm:$0xff]   ;;  %v9774_v38 = vrot.slane %v14448_v29, 3  ;;  %v14469_v29 = vld [vmem:[%s14606_s9 + $0x90] sm:$0xff]  }
 0x228   : > { %13204 = vmatprep.mubr.bf16.mxu0 %v9228_v62  ;;  %13378 = vmatpush3.bf16.msra.mxu1 %v14500_v3  ;;  %v9765_v63 = vsel %vm9754_vm5, %v9762_v52, %v9764_v54  ;;  %v14441_v62 = vld [vmem:[%s14606_s9 + $0x48] sm:$0xff]   ;;  %v4431_v2 = vrot.slane %v14437_v49, 1  ;;  %v9766_v3 = vrot.slane %v14438_v59, 3  ;;  %v5048_v49 = vshrl.u32 %v14457_v47, 16 }
 0x229   : > { %13371 = vmatprep.subr.bf16.mxu1 %v14501_v12  ;;  %v9768_v5 = vrot.slane %v14441_v62, 3  ;;  %v5096_v37 = vshll.u32 %v14469_v29, 16 }
 0x22a   : > { %v4432_v8 = vsel %vm2798_vm3, %v4429_v53, %v4431_v2  ;;  %v9767_v10 = vsel %vm9754_vm5, %v9764_v54, %v9766_v3  ;;  %v14460_v53 = vld [vmem:[%s14606_s9 + $0x70] sm:$0xff]  }
 0x22b   : > { %v5057_v59 = vshrl.u32 %v14460_v53, 16 }
 0x22c   : > { %13379 = vmatpush3.bf16.msra.mxu1 %v14501_v12 }
 0x22d   : > { %13372 = vmatprep.subr.bf16.mxu1 %v14502_v22 }
 0x22e   : > { %12769 = vmatmul.mubr.bf16.gmra.mrb[8].mxu1 %v4416_v13  ;;  %v14443_v13 = vld [vmem:[%s14606_s9 + $0x50] sm:$0xff]  }
 0x22f   : > { %13205 = vmatmul.mubr.bf16.gmra.mrb[28].mxu0 %v9237_v14  ;;  %12772 = vmatprep.mubr.bf16.mxu1 %v4418_v15  ;;  %v14450_v14 = vld [vmem:[%s14606_s9 + $0x50] sm:$0xff]   ;;  %v9769_v15 = vsel %vm9754_vm5, %v9766_v3, %v9768_v5  ;;  %v14462_v3 = vld [vmem:[%s14606_s9 + $0x78] sm:$0xff]  }
 0x230   : > { %13208 = vmatprep.mubr.bf16.mxu0 %v9246_v19  ;;  %13380 = vmatpush3.bf16.msra.mxu1 %v14502_v22  ;;  %v9770_v19 = vrot.slane %v14443_v13, 3  ;;  %v5021_v21 = vshrl.u32 %v14450_v14, 16  ;;  %v5024_v22 = vshll.u32 %v14450_v14, 16  ;;  %v14461_v13 = vld [vmem:[%s14606_s9 + $0x88] sm:$0xff]   ;;  %v5066_v14 = vshrl.u32 %v14462_v3, 16 }
 0x231   : > { %13373 = vmatprep.subr.bf16.mxu1 %v14503_v27 }
 0x232   : > { %v9773_v33 = vsel %vm9754_vm5, %v9770_v19, %v9772_v23 }
 0x234   : > { %13381 = vmatpush3.bf16.msra.mxu1 %v14503_v27  ;;  %v9771_v27 = vsel %vm9754_vm5, %v9768_v5, %v9770_v19 }
 0x235   : > { %13374 = vmatprep.subr.bf16.mxu1 %v14504_v35 }
 0x236   : > { %12773 = vmatmul.mubr.bf16.gmra.mrb[12].mxu1 %v4420_v28  ;;  %v4438_v28 = vsel %vm2798_vm3, %v4435_v18, %v4437_v20 }
 0x237   : > { %13209 = vmatmul.mubr.bf16.gmra.mrb[32].mxu0 %v9255_v30  ;;  %12776 = vmatprep.mubr.bf16.mxu1 %v4422_v31  ;;  %v5023_v30 = vrot.slane %v5021_v21, 1  ;;  %v5026_v31 = vrot.slane %v5024_v22, 2  ;;  %v5068_v22 = vrot.slane %v5066_v14, 1 }
 0x238   : > { %13228 = vmatprep.mubr.bf16.mxu0 %v9757_v34  ;;  %13382 = vmatpush3.bf16.msra.mxu1 %v14504_v35  ;;  %v14451_v34 = vld [vmem:[%s14606_s9 + $0x68] sm:$0xff]   ;;  %v4439_v35 = vrot.slane %v14447_v60, 1 }
 0x239   : > { %13375 = vmatprep.subr.bf16.mxu1 %v14505_v41  ;;  %v5027_v39 = vor.u32 %v5026_v31, %v5023_v30  ;;  %v9776_v43 = vrot.slane %v14451_v34, 3  ;;  %v14465_v31 = vld [vmem:[%s14606_s9 + $0x98] sm:$0xff]  }
 0x23b   : > { %v9777_v54 = vsel %vm9754_vm5, %v9774_v38, %v9776_v43 }
 0x23c   : > { %13383 = vmatpush3.bf16.msra.mxu1 %v14505_v41  ;;  %v5039_v41 = vshrl.u32 %v14455_v32, 16 }
 0x23e   : > { %12777 = vmatmul.mubr.bf16.gmra.mrb[16].mxu1 %v4424_v42  ;;  %v5042_v42 = vshll.u32 %v14455_v32, 16  ;;  %v5041_v51 = vrot.slane %v5039_v41, 1 }
 0x23f   : > { %13229 = vmatmul.mubr.bf16.vlgmr.msra.gmra.mrb[0].mxu0 %v9759_v44  ;;  %12780 = vmatprep.mubr.bf16.mxu1 %v4426_v45  ;;  %v4440_v44 = vsel %vm2798_vm3, %v4437_v20, %v4439_v35  ;;  %v5032_v45 = vrot.slane %v5030_v36, 1  ;;  %v9784_v20 = vrot.slane %v14461_v13, 3  ;;  %v5093_v36 = vshrl.u32 %v14469_v29, 16 }
 0x240   : > { %13265 = vmatpush3.bf16.msra.mxu0 %v15560_v57  ;;  %13232 = vmatprep.mubr.bf16.mxu0 %v9761_v48  ;;  %v14440_v57 = vld [vmem:[%s14656_s8 + $0x80] sm:$0xff]   ;;  %v9775_v48 = vsel %vm9754_vm5, %v9772_v23, %v9774_v38  ;;  %v5044_v52 = vrot.slane %v5042_v42, 2  ;;  %v9788_v38 = vrot.slane %v14465_v31, 3 }
 0x241   : > { %13266 = vmatprep.subr.bf16.mxu0 %v14434_v61  ;;  %v4433_v4 = vrot.slane %v14440_v57, 1  ;;  %v5060_v57 = vshll.u32 %v14460_v53, 16 }
 0x243   : > { %v4434_v12 = vsel %vm2798_vm3, %v4431_v2, %v4433_v4  ;;  %v4436_v25 = vsel %vm2798_vm3, %v4433_v4, %v4435_v18  ;;  %v5062_v9 = vrot.slane %v5060_v57, 2 }
 0x244   : > { %13267 = vmatpush3.bf16.msra.mxu0 %v14434_v61  ;;  %v5028_v61 = vsel %vm4939_vm0, %v14675_v40, %v5027_v39  ;;  %v5045_v40 = vor.u32 %v5044_v52, %v5041_v51  ;;  %v14471_v51 = vld [vmem:[%s14656_s8 + $0x18] sm:$0xff]  }
 0x245   : > { %13268 = vmatprep.subr.bf16.mxu0 %v14439_v55 }
 0x246   : > { %12781 = vmatmul.mubr.bf16.gmra.mrb[20].mxu1 %v4428_v56  ;;  %v5036_v56 = vor.u32 %v5035_v46, %v5032_v45  ;;  %v14468_v46 = vld [vmem:[%s14606_s9 + $0xa0] ss:$0 sps:$4 sm:$0x77]  }
 0x247   : > { %13233 = vmatmul.mubr.bf16.gmra.mrb[4].mxu0 %v9763_v0  ;;  %12784 = vmatprep.mubr.bf16.mxu1 %v4430_v58  ;;  %v5051_v0 = vshll.u32 %v14457_v47, 16  ;;  %v9778_v58 = vrot.slane %v14453_v50, 3  ;;  %v5095_v47 = vrot.slane %v5093_v36, 1  ;;  %v14470_v50 = vld [vmem:[%s14656_s8 + $0x10] sm:$0xf8]  }
 0x248   : > { %13236 = vmatprep.mubr.bf16.mxu0 %v9765_v63  ;;  %13269 = vmatpush3.bf16.msra.mxu0 %v14439_v55  ;;  %v14456_v55 = vld [vmem:[%s14606_s9 + $0x78] sm:$0xff]   ;;  %v5037_v62 = vsel %vm4939_vm0, %v5027_v39, %v5036_v56  ;;  %v5046_v5 = vsel %vm4939_vm0, %v5036_v56, %v5045_v40 }
 0x249   : > { %13270 = vmatprep.subr.bf16.mxu0 %v14444_v1  ;;  %v9780_v63 = vrot.slane %v14456_v55, 3  ;;  %v5053_v2 = vrot.slane %v5051_v0, 2  ;;  %v9779_v4 = vsel %vm9754_vm5, %v9776_v43, %v9778_v58  ;;  %v14472_v43 = vld [vmem:[%s14606_s9 + $0x98] ss:$0 sps:$4 sm:$0x33]   ;;  %v9790_v55 = vrot.slane %v14468_v46, 3 }
 0x24a   : > { %v5102_v53 = vshrl.u32 %v14472_v43, 16  ;;  %v10291_v0 = vrot.slane %v14471_v51, 3  ;;  %v14488_v46 = vld [vmem:[%s14656_s8 + $0x98] sm:$0xff]   ;;  %v14490_v51 = vld [vmem:[%s15991_s5] sm:$0xff]  }
 0x24b   : > { %v9791_v57 = vsel %vm9754_vm5, %v9788_v38, %v9790_v55  ;;  %13316 = vmatprep.subr.bf16.mxu1 %v14490_v51 }
 0x24c   : > { %13271 = vmatpush3.bf16.msra.mxu0 %v14444_v1  ;;  %v5050_v1 = vrot.slane %v5048_v49, 1  ;;  %v10290_v49 = vrot.slane %v14470_v50, 3  ;;  %v14489_v50 = vld [vmem:[%s14656_s8 + $0xa0] ss:$0 sps:$4 sm:$0x77]  }
 0x24d   : > { %13272 = vmatprep.subr.bf16.mxu0 %v14449_v7 }
 0x24e   : > { %12785 = vmatmul.mubr.bf16.gmra.mrb[24].mxu1 %v4432_v8  ;;  %v5059_v8 = vrot.slane %v5057_v59, 1  ;;  %v5054_v11 = vor.u32 %v5053_v2, %v5050_v1  ;;  %v10292_v1 = vsel %vm9754_vm5, %v10290_v49, %v10291_v0  ;;  %v14474_v2 = vld [vmem:[%s14656_s8 + $0x28] sm:$0xff]   ;;  %v14493_v49 = vld [vmem:[%s15991_s5 + $0x18] sm:$0xff]  }
 0x24f   : > { %13237 = vmatmul.mubr.bf16.gmra.mrb[8].mxu0 %v9767_v10  ;;  %12788 = vmatprep.mubr.bf16.mxu1 %v4434_v12  ;;  %v14464_v10 = vld [vmem:[%s14606_s9 + $0x80] sm:$0xff]   ;;  %v9781_v12 = vsel %vm9754_vm5, %v9778_v58, %v9780_v63 }
 0x250   : > { %13240 = vmatprep.mubr.bf16.mxu0 %v9769_v15  ;;  %13273 = vmatpush3.bf16.msra.mxu0 %v14449_v7  ;;  %v14458_v7 = vld [vmem:[%s14606_s9 + $0x80] sm:$0xff]   ;;  %v5069_v15 = vshll.u32 %v14462_v3, 16  ;;  %v5075_v18 = vshrl.u32 %v14464_v10, 16  ;;  %v5078_v19 = vshll.u32 %v14464_v10, 16  ;;  %v5055_v21 = vsel %vm4939_vm0, %v5045_v40, %v5054_v11 }
 0x251   : > { %13274 = vmatprep.subr.bf16.mxu0 %v14454_v17  ;;  %v9782_v16 = vrot.slane %v14458_v7, 3  ;;  %v5104_v40 = vrot.slane %v5102_v53, 1  ;;  %v10325_v53 = vrot.slane %v14489_v50, 3 }
 0x252   : > { %v5071_v23 = vrot.slane %v5069_v15, 2  ;;  %v14477_v15 = vld [vmem:[%s14656_s8 + $0x40] sm:$0xff]  }
 0x253   : > { %v9785_v30 = vsel %vm9754_vm5, %v9782_v16, %v9784_v20 }
 0x254   : > { %13275 = vmatpush3.bf16.msra.mxu0 %v14454_v17  ;;  %v5063_v17 = vor.u32 %v5062_v9, %v5059_v8  ;;  %v5072_v32 = vor.u32 %v5071_v23, %v5068_v22  ;;  %v14475_v9 = vld [vmem:[%s14656_s8 + $0x30] sm:$0xff]   ;;  %v14480_v23 = vld [vmem:[%s14656_s8 + $0x58] sm:$0xff]  }
 0x255   : > { %13276 = vmatprep.subr.bf16.mxu0 %v14459_v24  ;;  %v10297_v13 = vrot.slane %v14475_v9, 3 }
 0x256   : > { %12789 = vmatmul.mubr.bf16.gmra.mrb[28].mxu1 %v4436_v25  ;;  %v9783_v25 = vsel %vm9754_vm5, %v9780_v63, %v9782_v16  ;;  %v5064_v60 = vsel %vm4939_vm0, %v5054_v11, %v5063_v17  ;;  %v5073_v39 = vsel %vm4939_vm0, %v5063_v17, %v5072_v32  ;;  %v14478_v17 = vld [vmem:[%s14656_s8 + $0x48] sm:$0xff]  }
 0x257   : > { %13241 = vmatmul.mubr.bf16.gmra.mrb[12].mxu0 %v9771_v27  ;;  %12792 = vmatprep.mubr.bf16.mxu1 %v4438_v28  ;;  %v5077_v27 = vrot.slane %v5075_v18, 1  ;;  %v5080_v28 = vrot.slane %v5078_v19, 2  ;;  %v10301_v18 = vrot.slane %v14477_v15, 3  ;;  %v10303_v19 = vrot.slane %v14478_v17, 3 }
 0x258   : > { %13244 = vmatprep.mubr.bf16.mxu0 %v9773_v33  ;;  %13277 = vmatpush3.bf16.msra.mxu0 %v14459_v24  ;;  %v14467_v24 = vld [vmem:[%s14606_s9 + $0x88] sm:$0xff]  }
 0x259   : > { %13278 = vmatprep.subr.bf16.mxu0 %v14466_v6  ;;  %v5084_v33 = vshrl.u32 %v14467_v24, 16  ;;  %v5087_v34 = vshll.u32 %v14467_v24, 16  ;;  %v5081_v35 = vor.u32 %v5080_v28, %v5077_v27  ;;  %v10304_v22 = vsel %vm9754_vm5, %v10301_v18, %v10303_v19  ;;  %v14482_v28 = vld [vmem:[%s14656_s8 + $0x68] sm:$0xff]  }
 0x25b   : > { %v5086_v41 = vrot.slane %v5084_v33, 1  ;;  %v5089_v42 = vrot.slane %v5087_v34, 2  ;;  %v5082_v45 = vsel %vm4939_vm0, %v5072_v32, %v5081_v35  ;;  %v14483_v32 = vld [vmem:[%s14656_s8 + $0x70] sm:$0xff]   ;;  %v14484_v34 = vld [vmem:[%s14656_s8 + $0x78] sm:$0xff]  }
 0x25c   : > { %13279 = vmatpush3.bf16.msra.mxu0 %v14466_v6  ;;  %v9786_v6 = vrot.slane %v14463_v26, 3  ;;  %v14481_v26 = vld [vmem:[%s14656_s8 + $0x60] sm:$0xff]  }
 0x25d   : > { %v5090_v52 = vor.u32 %v5089_v42, %v5086_v41  ;;  %v10309_v29 = vrot.slane %v14481_v26, 3 }
 0x25e   : > { %12793 = vmatmul.mubr.bf16.gmra.mrb[32].mxu1 %v4440_v44  ;;  %v9787_v44 = vsel %vm9754_vm5, %v9784_v20, %v9786_v6 }
 0x25f   : > { %13245 = vmatmul.mubr.bf16.gmra.mrb[16].mxu0 %v9775_v48  ;;  %12828 = vmatprep.mubr.bf16.mxu1 %v5028_v61  ;;  %v5098_v48 = vrot.slane %v5096_v37, 2  ;;  %v9789_v61 = vsel %vm9754_vm5, %v9786_v6, %v9788_v38  ;;  %v5091_v58 = vsel %vm4939_vm0, %v5081_v35, %v5090_v52  ;;  %v10313_v6 = vrot.slane %v14483_v32, 3  ;;  %v14485_v37 = vld [vmem:[%s14656_s8 + $0x80] sm:$0xff]  }
 0x260   : > { %13248 = vmatprep.mubr.bf16.mxu0 %v9777_v54  ;;  %v5105_v54 = vshll.u32 %v14472_v43, 16  ;;  %v10315_v35 = vrot.slane %v14484_v34, 3  ;;  %v10317_v41 = vrot.slane %v14485_v37, 3  ;;  %v15828_v32 = vld [vmem:[%s15990_s4] ss:$0 sm:$0xff] }
 0x261   : > { %v5099_v56 = vor.u32 %v5098_v48, %v5095_v47  ;;  %v10323_v48 = vrot.slane %v14488_v46, 3 }
 0x262   : > { %v5107_v59 = vrot.slane %v5105_v54, 2  ;;  %v10316_v38 = vsel %vm9754_vm5, %v10313_v6, %v10315_v35  ;;  %v10318_v43 = vsel %vm9754_vm5, %v10315_v35, %v10317_v41  ;;  %v14491_v54 = vld [vmem:[%s15991_s5 + $0x8] sm:$0xff]  }
 0x263   : > { %v5100_v63 = vsel %vm4939_vm0, %v5090_v52, %v5099_v56  ;;  %v10326_v55 = vsel %vm9754_vm5, %v10323_v48, %v10325_v53 }
 0x264   : > { %v5108_v3 = vor.u32 %v5107_v59, %v5104_v40  ;;  %v14496_v40 = vld [vmem:[%s15991_s5 + $0x30] sm:$0xff]   ;;  %v14497_v59 = vld [vmem:[%s15991_s5 + $0x38] sm:$0xff]  }
 0x266   : > { %12829 = vmatmul.mubr.bf16.vlgmr.msra.gmra.mrb[16].mxu1 %v5037_v62  ;;  %v14473_v62 = vld [vmem:[%s14656_s8 + $0x20] sm:$0xff]   ;;  %v5109_v7 = vsel %vm4939_vm0, %v5099_v56, %v5108_v3  ;;  %v14492_v56 = vld [vmem:[%s15991_s5 + $0x10] sm:$0xff]  }
 0x267   : > { %13249 = vmatmul.mubr.bf16.gmra.mrb[20].mxu0 %v9779_v4  ;;  %12832 = vmatprep.mubr.bf16.mxu1 %v5046_v5  ;;  %v10293_v4 = vrot.slane %v14473_v62, 3  ;;  %v10295_v5 = vrot.slane %v14474_v2, 3 }
 0x268   : > { %13252 = vmatprep.mubr.bf16.mxu0 %v9781_v12  ;;  %v14476_v12 = vld [vmem:[%s14656_s8 + $0x38] sm:$0xff]   ;;  %13317 = vmatpush3.bf16.msra.mxu1 %v14490_v51 }
 0x269   : > { %v10294_v8 = vsel %vm9754_vm5, %v10291_v0, %v10293_v4  ;;  %v10296_v10 = vsel %vm9754_vm5, %v10293_v4, %v10295_v5  ;;  %v10299_v11 = vrot.slane %v14476_v12, 3  ;;  %v10298_v14 = vsel %vm9754_vm5, %v10295_v5, %v10297_v13  ;;  %13318 = vmatprep.subr.bf16.mxu1 %v14491_v54  ;;  %v14494_v0 = vld [vmem:[%s15991_s5 + $0x20] sm:$0xff]  }
 0x26b   : > { %v10300_v16 = vsel %vm9754_vm5, %v10297_v13, %v10299_v11  ;;  %v10302_v20 = vsel %vm9754_vm5, %v10299_v11, %v10301_v18 }
 0x26c   : > { %13319 = vmatpush3.bf16.msra.mxu1 %v14491_v54 }
 0x26d   : > { %13320 = vmatprep.subr.bf16.mxu1 %v14492_v56 }
 0x26e   : > { %12833 = vmatmul.mubr.bf16.gmra.mrb[20].mxu1 %v5055_v21  ;;  %v14479_v21 = vld [vmem:[%s14656_s8 + $0x50] sm:$0xff]  }
 0x26f   : > { %13253 = vmatmul.mubr.bf16.gmra.mrb[24].mxu0 %v9783_v25  ;;  %12836 = vmatprep.mubr.bf16.mxu1 %v5064_v60  ;;  %v10305_v24 = vrot.slane %v14479_v21, 3  ;;  %v10307_v25 = vrot.slane %v14480_v23, 3 }
 0x270   : > { %13256 = vmatprep.mubr.bf16.mxu0 %v9785_v30  ;;  %v10311_v30 = vrot.slane %v14482_v28, 3  ;;  %13321 = vmatpush3.bf16.msra.mxu1 %v14492_v56 }
 0x271   : > { %v10306_v60 = vsel %vm9754_vm5, %v10303_v19, %v10305_v24  ;;  %v10308_v27 = vsel %vm9754_vm5, %v10305_v24, %v10307_v25  ;;  %v10310_v31 = vsel %vm9754_vm5, %v10307_v25, %v10309_v29  ;;  %13322 = vmatprep.subr.bf16.mxu1 %v14493_v49 }
 0x272   : > { %v10312_v33 = vsel %vm9754_vm5, %v10309_v29, %v10311_v30  ;;  %v10314_v36 = vsel %vm9754_vm5, %v10311_v30, %v10313_v6 }
 0x274   : > { %13323 = vmatpush3.bf16.msra.mxu1 %v14493_v49 }
 0x275   : > { %13324 = vmatprep.subr.bf16.mxu1 %v14494_v0 }
 0x276   : > { %12837 = vmatmul.mubr.bf16.gmra.mrb[24].mxu1 %v5073_v39  ;;  %v14486_v39 = vld [vmem:[%s14656_s8 + $0x88] sm:$0xff]  }
 0x277   : > { %13257 = vmatmul.mubr.bf16.gmra.mrb[28].mxu0 %v9787_v44  ;;  %12840 = vmatprep.mubr.bf16.mxu1 %v5082_v45  ;;  %v10319_v42 = vrot.slane %v14486_v39, 3  ;;  %v14487_v44 = vld [vmem:[%s14656_s8 + $0x90] sm:$0xff]  }
 0x278   : > { %13260 = vmatprep.mubr.bf16.mxu0 %v9789_v61  ;;  %v10321_v47 = vrot.slane %v14487_v44, 3  ;;  %13325 = vmatpush3.bf16.msra.mxu1 %v14494_v0 }
 0x279   : > { %v10320_v45 = vsel %vm9754_vm5, %v10317_v41, %v10319_v42 }
 0x27a   : > { %v10322_v61 = vsel %vm9754_vm5, %v10319_v42, %v10321_v47  ;;  %v10324_v52 = vsel %vm9754_vm5, %v10321_v47, %v10323_v48 }
 0x27e   : > { %12841 = vmatmul.mubr.bf16.gmra.mrb[28].mxu1 %v5091_v58  ;;  %v14495_v58 = vld [vmem:[%s15991_s5 + $0x28] sm:$0xff]  }
 0x27f   : > { %13261 = vmatmul.mubr.bf16.gmra.mrb[32].mxu0 %v9791_v57  ;;  %12844 = vmatprep.mubr.bf16.mxu1 %v5100_v63 }
 0x280   : > { %13280 = vmatprep.mubr.bf16.mxu0 %v10292_v1  ;;  %13326 = vmatprep.subr.bf16.mxu1 %v14495_v58 }
 0x281   : > { %13327 = vmatpush3.bf16.msra.mxu1 %v14495_v58 }
 0x282   : > { %13328 = vmatprep.subr.bf16.mxu1 %v14496_v40 }
 0x285   : > { %13329 = vmatpush3.bf16.msra.mxu1 %v14496_v40 }
 0x286   : > { %12845 = vmatmul.mubr.bf16.gmra.mrb[32].mxu1 %v5109_v7  ;;  %13330 = vmatprep.subr.bf16.mxu1 %v14497_v59 }
 0x287   : > { %13281 = vmatmul.mubr.bf16.vlgmr.msra.gmra.mrb[0].mxu0 %v10294_v8 }
 0x288   : > { %13284 = vmatprep.mubr.bf16.mxu0 %v10296_v10 }
 0x289   : > { %13331 = vmatpush3.bf16.msra.mxu1 %v14497_v59 }
 0x28f   : > { %13285 = vmatmul.mubr.bf16.gmra.mrb[4].mxu0 %v10298_v14 }
 0x290   : > { %13288 = vmatprep.mubr.bf16.mxu0 %v10300_v16 }
 0x297   : > { %13289 = vmatmul.mubr.bf16.gmra.mrb[8].mxu0 %v10302_v20 }
 0x298   : > { %13292 = vmatprep.mubr.bf16.mxu0 %v10304_v22 }
 0x29f   : > { %13293 = vmatmul.mubr.bf16.gmra.mrb[12].mxu0 %v10306_v60 }
 0x2a0   : > { %13296 = vmatprep.mubr.bf16.mxu0 %v10308_v27 }
 0x2a7   : > { %13297 = vmatmul.mubr.bf16.gmra.mrb[16].mxu0 %v10310_v31 }
 0x2a8   : > { %13300 = vmatprep.mubr.bf16.mxu0 %v10312_v33 }
 0x2af   : > { %13301 = vmatmul.mubr.bf16.gmra.mrb[20].mxu0 %v10314_v36 }
 0x2b0   : > { %13304 = vmatprep.mubr.bf16.mxu0 %v10316_v38 }
 0x2b7   : > { %13305 = vmatmul.mubr.bf16.gmra.mrb[24].mxu0 %v10318_v43 }
 0x2b8   : > { %13308 = vmatprep.mubr.bf16.mxu0 %v10320_v45 }
 0x2bf   : > { %13309 = vmatmul.mubr.bf16.gmra.mrb[28].mxu0 %v10322_v61 }
 0x2c0   : > { %13312 = vmatprep.mubr.bf16.mxu0 %v10324_v52 }
 0x2c7   : > { %13313 = vmatmul.mubr.bf16.gmra.mrb[32].mxu0 %v10326_v55 }
 0x2f1   : > { %v12762_v57 = vpop.f32.mrb[0].mxu1 }
 0x2f2   : > { %v4541_v63 = vpop.f32.mrb[1].mxu1 }
 0x2f3   : > { %v12763_v62 = vpop.f32.mrb[2].mxu1 }
 0x2f4   : > { %v4544_v1 = vpop.f32.mrb[3].mxu1 }
 0x2f9   : > { %v12766_v2 = vpop.f32.mrb[4].mxu1 }
 0x2fa   : > { %v4557_v3 = vpop.f32.mrb[5].mxu1 }
 0x2fb   : > { %v12767_v4 = vpop.f32.mrb[6].mxu1 }
 0x2fc   : > { %v4560_v5 = vpop.f32.mrb[7].mxu1 }
 0x301   : > { %v15775_v7 = vpop.f32.mrb[8].mxu1 }
 0x302   : > { %v15777_v8 = vpop.f32.mrb[9].mxu1 }
 0x303   : > { %v15779_v9 = vpop.f32.mrb[10].mxu1 }
 0x304   : > { %v15781_v10 = vpop.f32.mrb[11].mxu1 }
 0x309   : > { %v15783_v12 = vpop.f32.mrb[12].mxu1 }
 0x30a   : > { %v15785_v13 = vpop.f32.mrb[13].mxu1 }
 0x30b   : > { %v15787_v11 = vpop.f32.mrb[14].mxu1 }
 0x30c   : > { %v15789_v14 = vpop.f32.mrb[15].mxu1 }
 0x339   : > { %v15791_v15 = vpop.f32.mrb[16].mxu1 }
 0x33a   : > { %v15793_v16 = vpop.f32.mrb[17].mxu1 }
 0x33b   : > { %v15795_v17 = vpop.f32.mrb[18].mxu1 }
 0x33c   : > { %v15797_v18 = vpop.f32.mrb[19].mxu1 }
 0x341   : > { %v15799_v19 = vpop.f32.mrb[20].mxu1 }
 0x342   : > { %v15801_v20 = vpop.f32.mrb[21].mxu1 }
 0x343   : > { %v15803_v21 = vpop.f32.mrb[22].mxu1 }
 0x344   : > { %v15805_v22 = vpop.f32.mrb[23].mxu1 }
 0x349   : > { %v15807_v23 = vpop.f32.mrb[24].mxu1 }
 0x34a   : > { %v15809_v24 = vpop.f32.mrb[25].mxu1 }
 0x34b   : > { %v15811_v25 = vpop.f32.mrb[26].mxu1 }
 0x34c   : > { %v15813_v60 = vpop.f32.mrb[27].mxu1 }
 0x351   : > { %v15815_v26 = vpop.f32.mrb[28].mxu1 }
 0x352   : > { %v15817_v27 = vpop.f32.mrb[29].mxu1 }
 0x353   : > { %v15819_v28 = vpop.f32.mrb[30].mxu1 }
 0x354   : > { %v15821_v29 = vpop.f32.mrb[31].mxu1 }
 0x359   : > { %v15823_v30 = vpop.f32.mrb[32].mxu1 }
 0x35a   : > { %v13282_v31 = vpop.f32.mrb[0].mxu0  ;;  %v15830_v33 = vpop.f32.mrb[33].mxu1 }
 0x35b   : > { %v13384_v34 = vadd.f32 %v13282_v31, %v12762_v57  ;;  %v10427_v6 = vpop.f32.mrb[1].mxu0  ;;  %v15832_v35 = vpop.f32.mrb[34].mxu1 }
 0x35c   : > { %v13385_v36 = vadd.f32 %v10427_v6, %v4541_v63  ;;  %v13283_v37 = vpop.f32.mrb[2].mxu0  ;;  %v15834_v38 = vpop.f32.mrb[35].mxu1 }
 0x35d   : > { %v10687_v39 = vadd.f32 %v13384_v34, %v15828_v32  ;;  %v13386_v41 = vadd.f32 %v13283_v37, %v12763_v62  ;;  %v10430_v42 = vpop.f32.mrb[3].mxu0 }
 0x35e   : > { %v10685_v43 = vadd.f32 %v13385_v36, %v15828_v32  ;;  %v13387_v44 = vadd.f32 %v10430_v42, %v4544_v1 }
 0x35f   : > { %v10688_v45 = vadd.f32 %v13386_v41, %v15828_v32  ;;  %v10723_v47 = vmax.f32 %v10687_v39, 0.0 }
 0x360   : > { %v10686_v46 = vadd.f32 %v13387_v44, %v15828_v32  ;;  %v10721_v61 = vmax.f32 %v10685_v43, 0.0 }
 0x361   : > { %v10724_v48 = vmax.f32 %v10688_v45, 0.0 }
 0x362   : > { %v10722_v50 = vmax.f32 %v10686_v46, 0.0  ;;  %v13286_v51 = vpop.f32.mrb[4].mxu0 }
 0x363   : > { %v10758_v52 = vpack.c.bf16 %v10724_v48, %v10723_v47  ;;  %v13388_v53 = vadd.f32 %v13286_v51, %v12766_v2  ;;  %v10443_v54 = vpop.f32.mrb[5].mxu0 }
 0x364   : > { %v13389_v55 = vadd.f32 %v10443_v54, %v4557_v3  ;;  %v13287_v56 = vpop.f32.mrb[6].mxu0  ;;  %v10757_v49 = vpack.c.bf16 %v10722_v50, %v10721_v61 }
 0x365   : > { %v10691_v0 = vadd.f32 %v13388_v53, %v15828_v32  ;;  %v13390_v58 = vadd.f32 %v13287_v56, %v12767_v4  ;;  %v10446_v40 = vpop.f32.mrb[7].mxu0 }
 0x366   : > { %v10689_v59 = vadd.f32 %v13389_v55, %v15828_v32  ;;  %v13391_v57 = vadd.f32 %v10446_v40, %v4560_v5  ;;  %13332 = vmatprep.mubr.bf16.mxu1 %v10757_v49 }
 0x367   : > { %v10692_v63 = vadd.f32 %v13390_v58, %v15828_v32  ;;  %13333 = vmatmul.mubr.bf16.vlgmr.msra.gmra.mrb[36].mxu1 %v10758_v52  ;;  %v10727_v1 = vmax.f32 %v10691_v0, 0.0 }
 0x368   : > { %v10690_v62 = vadd.f32 %v13391_v57, %v15828_v32  ;;  %v10725_v2 = vmax.f32 %v10689_v59, 0.0 }
 0x369   : > { %v10728_v31 = vmax.f32 %v10692_v63, 0.0 }
 0x36a   : > { %v10726_v34 = vmax.f32 %v10690_v62, 0.0  ;;  %v13290_v3 = vpop.f32.mrb[8].mxu0 }
 0x36b   : > { %v13392_v6 = vadd.f32 %v13290_v3, %v15775_v7  ;;  %v10459_v36 = vpop.f32.mrb[9].mxu0  ;;  %v10760_v37 = vpack.c.bf16 %v10728_v31, %v10727_v1 }
 0x36c   : > { %v13393_v4 = vadd.f32 %v10459_v36, %v15777_v8  ;;  %v13291_v39 = vpop.f32.mrb[10].mxu0  ;;  %v10759_v41 = vpack.c.bf16 %v10726_v34, %v10725_v2 }
 0x36d   : > { %v10695_v5 = vadd.f32 %v13392_v6, %v15828_v32  ;;  %v13394_v42 = vadd.f32 %v13291_v39, %v15779_v9  ;;  %v10462_v43 = vpop.f32.mrb[11].mxu0 }
 0x36e   : > { %v10693_v44 = vadd.f32 %v13393_v4, %v15828_v32  ;;  %v13395_v45 = vadd.f32 %v10462_v43, %v15781_v10  ;;  %13336 = vmatprep.mubr.bf16.mxu1 %v10759_v41 }
 0x36f   : > { %v10696_v46 = vadd.f32 %v13394_v42, %v15828_v32  ;;  %13337 = vmatmul.mubr.bf16.gmra.mrb[40].mxu1 %v10760_v37  ;;  %v10731_v47 = vmax.f32 %v10695_v5, 0.0 }
 0x370   : > { %v10694_v7 = vadd.f32 %v13395_v45, %v15828_v32  ;;  %v10729_v8 = vmax.f32 %v10693_v44, 0.0 }
 0x371   : > { %v10732_v48 = vmax.f32 %v10696_v46, 0.0 }
 0x372   : > { %v10730_v61 = vmax.f32 %v10694_v7, 0.0  ;;  %v13294_v50 = vpop.f32.mrb[12].mxu0 }
 0x373   : > { %v13396_v51 = vadd.f32 %v13294_v50, %v15783_v12  ;;  %v10475_v52 = vpop.f32.mrb[13].mxu0  ;;  %v10762_v9 = vpack.c.bf16 %v10732_v48, %v10731_v47 }
 0x374   : > { %v13397_v53 = vadd.f32 %v10475_v52, %v15785_v13  ;;  %v13295_v54 = vpop.f32.mrb[14].mxu0  ;;  %v10761_v55 = vpack.c.bf16 %v10730_v61, %v10729_v8 }
 0x375   : > { %v10699_v10 = vadd.f32 %v13396_v51, %v15828_v32  ;;  %v13398_v56 = vadd.f32 %v13295_v54, %v15787_v11  ;;  %v10478_v49 = vpop.f32.mrb[15].mxu0 }
 0x376   : > { %v10697_v0 = vadd.f32 %v13397_v53, %v15828_v32  ;;  %v13399_v58 = vadd.f32 %v10478_v49, %v15789_v14  ;;  %13340 = vmatprep.mubr.bf16.mxu1 %v10761_v55 }
 0x377   : > { %v10700_v40 = vadd.f32 %v13398_v56, %v15828_v32  ;;  %13341 = vmatmul.mubr.bf16.gmra.mrb[44].mxu1 %v10762_v9  ;;  %v10735_v59 = vmax.f32 %v10699_v10, 0.0 }
 0x378   : > { %v10698_v12 = vadd.f32 %v13399_v58, %v15828_v32  ;;  %v10733_v13 = vmax.f32 %v10697_v0, 0.0 }
 0x379   : > { %v10736_v57 = vmax.f32 %v10700_v40, 0.0 }
 0x37a   : > { %v10734_v63 = vmax.f32 %v10698_v12, 0.0  ;;  %v13298_v62 = vpop.f32.mrb[16].mxu0 }
 0x37b   : > { %v13400_v1 = vadd.f32 %v13298_v62, %v15791_v15  ;;  %v10491_v31 = vpop.f32.mrb[17].mxu0  ;;  %v10764_v11 = vpack.c.bf16 %v10736_v57, %v10735_v59 }
 0x37c   : > { %v13401_v2 = vadd.f32 %v10491_v31, %v15793_v16  ;;  %v13299_v34 = vpop.f32.mrb[18].mxu0  ;;  %v10763_v3 = vpack.c.bf16 %v10734_v63, %v10733_v13 }
 0x37d   : > { %v10703_v14 = vadd.f32 %v13400_v1, %v15828_v32  ;;  %v13402_v6 = vadd.f32 %v13299_v34, %v15795_v17  ;;  %v10494_v36 = vpop.f32.mrb[19].mxu0 }
 0x37e   : > { %v10701_v37 = vadd.f32 %v13401_v2, %v15828_v32  ;;  %v13403_v4 = vadd.f32 %v10494_v36, %v15797_v18  ;;  %13344 = vmatprep.mubr.bf16.mxu1 %v10763_v3 }
 0x37f   : > { %v10704_v39 = vadd.f32 %v13402_v6, %v15828_v32  ;;  %13345 = vmatmul.mubr.bf16.gmra.mrb[48].mxu1 %v10764_v11  ;;  %v10739_v41 = vmax.f32 %v10703_v14, 0.0 }
 0x380   : > { %v10702_v15 = vadd.f32 %v13403_v4, %v15828_v32  ;;  %v10737_v16 = vmax.f32 %v10701_v37, 0.0 }
 0x381   : > { %v10740_v5 = vmax.f32 %v10704_v39, 0.0 }
 0x382   : > { %v10738_v42 = vmax.f32 %v10702_v15, 0.0  ;;  %v13302_v43 = vpop.f32.mrb[20].mxu0 }
 0x383   : > { %v13404_v44 = vadd.f32 %v13302_v43, %v15799_v19  ;;  %v10507_v45 = vpop.f32.mrb[21].mxu0  ;;  %v10766_v17 = vpack.c.bf16 %v10740_v5, %v10739_v41 }
 0x384   : > { %v13405_v46 = vadd.f32 %v10507_v45, %v15801_v20  ;;  %v13303_v7 = vpop.f32.mrb[22].mxu0  ;;  %v10765_v47 = vpack.c.bf16 %v10738_v42, %v10737_v16 }
 0x385   : > { %v10707_v18 = vadd.f32 %v13404_v44, %v15828_v32  ;;  %v13406_v48 = vadd.f32 %v13303_v7, %v15803_v21  ;;  %v10510_v8 = vpop.f32.mrb[23].mxu0 }
 0x386   : > { %v10705_v61 = vadd.f32 %v13405_v46, %v15828_v32  ;;  %v13407_v50 = vadd.f32 %v10510_v8, %v15805_v22  ;;  %13348 = vmatprep.mubr.bf16.mxu1 %v10765_v47 }
 0x387   : > { %v10708_v51 = vadd.f32 %v13406_v48, %v15828_v32  ;;  %13349 = vmatmul.mubr.bf16.gmra.mrb[52].mxu1 %v10766_v17  ;;  %v10743_v52 = vmax.f32 %v10707_v18, 0.0 }
 0x388   : > { %v10706_v19 = vadd.f32 %v13407_v50, %v15828_v32  ;;  %v10741_v20 = vmax.f32 %v10705_v61, 0.0 }
 0x389   : > { %v10744_v9 = vmax.f32 %v10708_v51, 0.0 }
 0x38a   : > { %v10742_v53 = vmax.f32 %v10706_v19, 0.0  ;;  %v13306_v54 = vpop.f32.mrb[24].mxu0 }
 0x38b   : > { %v13408_v55 = vadd.f32 %v13306_v54, %v15807_v23  ;;  %v10523_v10 = vpop.f32.mrb[25].mxu0  ;;  %v10768_v21 = vpack.c.bf16 %v10744_v9, %v10743_v52 }
 0x38c   : > { %v13409_v56 = vadd.f32 %v10523_v10, %v15809_v24  ;;  %v13307_v49 = vpop.f32.mrb[26].mxu0  ;;  %v10767_v0 = vpack.c.bf16 %v10742_v53, %v10741_v20 }
 0x38d   : > { %v10711_v22 = vadd.f32 %v13408_v55, %v15828_v32  ;;  %v13410_v58 = vadd.f32 %v13307_v49, %v15811_v25  ;;  %v10526_v40 = vpop.f32.mrb[27].mxu0 }
 0x38e   : > { %v10709_v12 = vadd.f32 %v13409_v56, %v15828_v32  ;;  %v13411_v59 = vadd.f32 %v10526_v40, %v15813_v60  ;;  %13352 = vmatprep.mubr.bf16.mxu1 %v10767_v0 }
 0x38f   : > { %v10712_v57 = vadd.f32 %v13410_v58, %v15828_v32  ;;  %13353 = vmatmul.mubr.bf16.gmra.mrb[56].mxu1 %v10768_v21  ;;  %v10747_v13 = vmax.f32 %v10711_v22, 0.0 }
 0x390   : > { %v10710_v23 = vadd.f32 %v13411_v59, %v15828_v32  ;;  %v10745_v24 = vmax.f32 %v10709_v12, 0.0 }
 0x391   : > { %v10748_v63 = vmax.f32 %v10712_v57, 0.0 }
 0x392   : > { %v10746_v62 = vmax.f32 %v10710_v23, 0.0  ;;  %v13310_v1 = vpop.f32.mrb[28].mxu0 }
 0x393   : > { %v13412_v31 = vadd.f32 %v13310_v1, %v15815_v26  ;;  %v10539_v11 = vpop.f32.mrb[29].mxu0  ;;  %v10770_v25 = vpack.c.bf16 %v10748_v63, %v10747_v13 }
 0x394   : > { %v13413_v2 = vadd.f32 %v10539_v11, %v15817_v27  ;;  %v13311_v34 = vpop.f32.mrb[30].mxu0  ;;  %v10769_v3 = vpack.c.bf16 %v10746_v62, %v10745_v24 }
 0x395   : > { %v10715_v60 = vadd.f32 %v13412_v31, %v15828_v32  ;;  %v13414_v14 = vadd.f32 %v13311_v34, %v15819_v28  ;;  %v10542_v6 = vpop.f32.mrb[31].mxu0 }
 0x396   : > { %v10713_v36 = vadd.f32 %v13413_v2, %v15828_v32  ;;  %v13415_v37 = vadd.f32 %v10542_v6, %v15821_v29  ;;  %13356 = vmatprep.mubr.bf16.mxu1 %v10769_v3 }
 0x397   : > { %v10716_v4 = vadd.f32 %v13414_v14, %v15828_v32  ;;  %13357 = vmatmul.mubr.bf16.gmra.mrb[60].mxu1 %v10770_v25  ;;  %v10751_v39 = vmax.f32 %v10715_v60, 0.0 }
 0x398   : > { %v10714_v26 = vadd.f32 %v13415_v37, %v15828_v32  ;;  %v10749_v27 = vmax.f32 %v10713_v36, 0.0 }
 0x399   : > { %v10752_v15 = vmax.f32 %v10716_v4, 0.0 }
 0x39a   : > { %v10750_v41 = vmax.f32 %v10714_v26, 0.0  ;;  %v13314_v5 = vpop.f32.mrb[32].mxu0 }
 0x39b   : > { %v13416_v16 = vadd.f32 %v13314_v5, %v15823_v30  ;;  %v10555_v42 = vpop.f32.mrb[33].mxu0  ;;  %v10772_v28 = vpack.c.bf16 %v10752_v15, %v10751_v39 }
 0x39c   : > { %v13417_v43 = vadd.f32 %v10555_v42, %v15830_v33  ;;  %v13315_v44 = vpop.f32.mrb[34].mxu0  ;;  %v10771_v45 = vpack.c.bf16 %v10750_v41, %v10749_v27 }
 0x39d   : > { %v10719_v29 = vadd.f32 %v13416_v16, %v15828_v32  ;;  %v13418_v17 = vadd.f32 %v13315_v44, %v15832_v35  ;;  %v10558_v46 = vpop.f32.mrb[35].mxu0  ;;  %v15904_v35 = vld [vmem:[%s15992_s6] ss:$0 sm:$0xff] }
 0x39e   : > { %v10717_v7 = vadd.f32 %v13417_v43, %v15828_v32  ;;  %v13419_v47 = vadd.f32 %v10558_v46, %v15834_v38  ;;  %13360 = vmatprep.mubr.bf16.mxu1 %v10771_v45 }
 0x39f   : > { %v10720_v18 = vadd.f32 %v13418_v17, %v15828_v32  ;;  %13361 = vmatmul.mubr.bf16.gmra.mrb[64].mxu1 %v10772_v28  ;;  %v10755_v48 = vmax.f32 %v10719_v29, 0.0 }
 0x3a0   : > { %v10718_v30 = vadd.f32 %v13419_v47, %v15828_v32  ;;  %v10753_v8 = vmax.f32 %v10717_v7, 0.0 }
 0x3a1   : > { %v10756_v33 = vmax.f32 %v10720_v18, 0.0 }
 0x3a2   : > { %v10754_v61 = vmax.f32 %v10718_v30, 0.0 }
 0x3a3   : > { %v10774_v50 = vpack.c.bf16 %v10756_v33, %v10755_v48 }
 0x3a4   : > { %v10773_v51 = vpack.c.bf16 %v10754_v61, %v10753_v8 }
 0x3a6   : > { %13364 = vmatprep.mubr.bf16.mxu1 %v10773_v51 }
 0x3a7   : > { %13365 = vmatmul.mubr.bf16.gmra.mrb[68].mxu1 %v10774_v50 }
 0x43a   : > { %v13334_v32 = vpop.f32.mrb[36].mxu1 }
 0x43b   : > { %v10889_v38 = vadd.f32 %v13334_v32, %v15904_v35  ;;  %v10880_v19 = vpop.f32.mrb[37].mxu1 }
 0x43c   : > { %v10881_v52 = vadd.f32 %v15904_v35, %v10880_v19  ;;  %v13335_v9 = vpop.f32.mrb[38].mxu1 }
 0x43d   : > { %11025 = vst [vmem:[%s15909_s30 + $0x10] sm:$0xff] %v10889_v38  ;;  %v10892_v20 = vadd.f32 %v13335_v9, %v15904_v35  ;;  %v10883_v53 = vpop.f32.mrb[39].mxu1 }
 0x43e   : > { %11023 = vst [vmem:[%s15909_s30] sm:$0xff] %v10881_v52  ;;  %v10884_v54 = vadd.f32 %v15904_v35, %v10883_v53 }
 0x43f   : > { %11026 = vst [vmem:[%s15909_s30 + $0x18] sm:$0xff] %v10892_v20 }
 0x440   : > { %11024 = vst [vmem:[%s15909_s30 + $0x8] sm:$0xff] %v10884_v54 }
 0x442   : > { %v13338_v55 = vpop.f32.mrb[40].mxu1 }
 0x443   : > { %v10905_v10 = vadd.f32 %v13338_v55, %v15904_v35  ;;  %v10896_v21 = vpop.f32.mrb[41].mxu1 }
 0x444   : > { %v10897_v56 = vadd.f32 %v15904_v35, %v10896_v21  ;;  %v13339_v49 = vpop.f32.mrb[42].mxu1 }
 0x445   : > { %11029 = vst [vmem:[%s15909_s30 + $0x30] sm:$0xff] %v10905_v10  ;;  %v10908_v0 = vadd.f32 %v13339_v49, %v15904_v35  ;;  %v10899_v22 = vpop.f32.mrb[43].mxu1 }
 0x446   : > { %11027 = vst [vmem:[%s15909_s30 + $0x20] sm:$0xff] %v10897_v56  ;;  %v10900_v58 = vadd.f32 %v15904_v35, %v10899_v22 }
 0x447   : > { %11030 = vst [vmem:[%s15909_s30 + $0x38] sm:$0xff] %v10908_v0 }
 0x448   : > { %11028 = vst [vmem:[%s15909_s30 + $0x28] sm:$0xff] %v10900_v58 }
 0x44a   : > { %v13342_v40 = vpop.f32.mrb[44].mxu1 }
 0x44b   : > { %v10921_v12 = vadd.f32 %v13342_v40, %v15904_v35  ;;  %v10912_v59 = vpop.f32.mrb[45].mxu1 }
 0x44c   : > { %v10913_v57 = vadd.f32 %v15904_v35, %v10912_v59  ;;  %v13343_v23 = vpop.f32.mrb[46].mxu1 }
 0x44d   : > { %11033 = vst [vmem:[%s15909_s30 + $0x50] sm:$0xff] %v10921_v12  ;;  %v10924_v13 = vadd.f32 %v13343_v23, %v15904_v35  ;;  %v10915_v63 = vpop.f32.mrb[47].mxu1 }
 0x44e   : > { %11031 = vst [vmem:[%s15909_s30 + $0x40] sm:$0xff] %v10913_v57  ;;  %v10916_v24 = vadd.f32 %v15904_v35, %v10915_v63 }
 0x44f   : > { %11034 = vst [vmem:[%s15909_s30 + $0x58] sm:$0xff] %v10924_v13 }
 0x450   : > { %11032 = vst [vmem:[%s15909_s30 + $0x48] sm:$0xff] %v10916_v24 }
 0x452   : > { %v13346_v62 = vpop.f32.mrb[48].mxu1 }
 0x453   : > { %v10937_v1 = vadd.f32 %v13346_v62, %v15904_v35  ;;  %v10928_v31 = vpop.f32.mrb[49].mxu1 }
 0x454   : > { %v10929_v11 = vadd.f32 %v15904_v35, %v10928_v31  ;;  %v13347_v25 = vpop.f32.mrb[50].mxu1 }
 0x455   : > { %11037 = vst [vmem:[%s15909_s30 + $0x70] sm:$0xff] %v10937_v1  ;;  %v10940_v2 = vadd.f32 %v13347_v25, %v15904_v35  ;;  %v10931_v34 = vpop.f32.mrb[51].mxu1 }
 0x456   : > { %11035 = vst [vmem:[%s15909_s30 + $0x60] sm:$0xff] %v10929_v11  ;;  %v10932_v3 = vadd.f32 %v15904_v35, %v10931_v34 }
 0x457   : > { %11038 = vst [vmem:[%s15909_s30 + $0x78] sm:$0xff] %v10940_v2 }
 0x458   : > { %11036 = vst [vmem:[%s15909_s30 + $0x68] sm:$0xff] %v10932_v3 }
 0x45a   : > { %v13350_v60 = vpop.f32.mrb[52].mxu1 }
 0x45b   : > { %v10953_v14 = vadd.f32 %v13350_v60, %v15904_v35  ;;  %v10944_v6 = vpop.f32.mrb[53].mxu1 }
 0x45c   : > { %v10945_v36 = vadd.f32 %v15904_v35, %v10944_v6  ;;  %v13351_v37 = vpop.f32.mrb[54].mxu1 }
 0x45d   : > { %11041 = vst [vmem:[%s15909_s30 + $0x90] sm:$0xff] %v10953_v14  ;;  %v10956_v4 = vadd.f32 %v13351_v37, %v15904_v35  ;;  %v10947_v26 = vpop.f32.mrb[55].mxu1 }
 0x45e   : > { %11039 = vst [vmem:[%s15909_s30 + $0x80] sm:$0xff] %v10945_v36  ;;  %v10948_v39 = vadd.f32 %v15904_v35, %v10947_v26 }
 0x45f   : > { %11042 = vst [vmem:[%s15909_s30 + $0x98] sm:$0xff] %v10956_v4 }
 0x460   : > { %11040 = vst [vmem:[%s15909_s30 + $0x88] sm:$0xff] %v10948_v39 }
 0x462   : > { %v13354_v15 = vpop.f32.mrb[56].mxu1 }
 0x463   : > { %v10969_v27 = vadd.f32 %v13354_v15, %v15904_v35  ;;  %v10960_v41 = vpop.f32.mrb[57].mxu1 }
 0x464   : > { %v10961_v5 = vadd.f32 %v15904_v35, %v10960_v41  ;;  %v13355_v16 = vpop.f32.mrb[58].mxu1 }
 0x465   : > { %11045 = vst [vmem:[%s15909_s30 + $0xb0] sm:$0xff] %v10969_v27  ;;  %v10972_v42 = vadd.f32 %v13355_v16, %v15904_v35  ;;  %v10963_v28 = vpop.f32.mrb[59].mxu1 }
 0x466   : > { %11043 = vst [vmem:[%s15909_s30 + $0xa0] sm:$0xff] %v10961_v5  ;;  %v10964_v43 = vadd.f32 %v15904_v35, %v10963_v28 }
 0x467   : > { %11046 = vst [vmem:[%s15909_s30 + $0xb8] sm:$0xff] %v10972_v42 }
 0x468   : > { %11044 = vst [vmem:[%s15909_s30 + $0xa8] sm:$0xff] %v10964_v43 }
 0x46a   : > { %v13358_v44 = vpop.f32.mrb[60].mxu1 }
 0x46b   : > { %v10985_v45 = vadd.f32 %v13358_v44, %v15904_v35  ;;  %v10976_v29 = vpop.f32.mrb[61].mxu1 }
 0x46c   : > { %v10977_v17 = vadd.f32 %v15904_v35, %v10976_v29  ;;  %v13359_v46 = vpop.f32.mrb[62].mxu1 }
 0x46d   : > { %11049 = vst [vmem:[%s15909_s30 + $0xd0] sm:$0xff] %v10985_v45  ;;  %v10988_v7 = vadd.f32 %v13359_v46, %v15904_v35  ;;  %v10979_v47 = vpop.f32.mrb[63].mxu1 }
 0x46e   : > { %11047 = vst [vmem:[%s15909_s30 + $0xc0] sm:$0xff] %v10977_v17  ;;  %v10980_v18 = vadd.f32 %v15904_v35, %v10979_v47 }
 0x46f   : > { %11050 = vst [vmem:[%s15909_s30 + $0xd8] sm:$0xff] %v10988_v7 }
 0x470   : > { %11048 = vst [vmem:[%s15909_s30 + $0xc8] sm:$0xff] %v10980_v18 }
 0x472   : > { %v13362_v30 = vpop.f32.mrb[64].mxu1 }
 0x473   : > { %v11001_v48 = vadd.f32 %v13362_v30, %v15904_v35  ;;  %v10992_v33 = vpop.f32.mrb[65].mxu1 }
 0x474   : > { %v10993_v8 = vadd.f32 %v15904_v35, %v10992_v33  ;;  %v13363_v61 = vpop.f32.mrb[66].mxu1 }
 0x475   : > { %11053 = vst [vmem:[%s15909_s30 + $0xf0] sm:$0xff] %v11001_v48  ;;  %v11004_v50 = vadd.f32 %v13363_v61, %v15904_v35  ;;  %v10995_v51 = vpop.f32.mrb[67].mxu1 }
 0x476   : > { %11051 = vst [vmem:[%s15909_s30 + $0xe0] sm:$0xff] %v10993_v8  ;;  %v10996_v32 = vadd.f32 %v15904_v35, %v10995_v51 }
 0x477   : > { %11054 = vst [vmem:[%s15909_s30 + $0xf8] sm:$0xff] %v11004_v50 }
 0x478   : > { %11052 = vst [vmem:[%s15909_s30 + $0xe8] sm:$0xff] %v10996_v32 }
 0x47a   : > { %v13366_v38 = vpop.f32.mrb[68].mxu1 }
 0x47b   : > { %v11017_v19 = vadd.f32 %v13366_v38, %v15904_v35  ;;  %v11008_v52 = vpop.f32.mrb[69].mxu1 }
 0x47c   : > { %v11009_v9 = vadd.f32 %v15904_v35, %v11008_v52  ;;  %v13367_v20 = vpop.f32.mrb[70].mxu1 }
 0x47d   : > { %11057 = vst [vmem:[%s15909_s30 + $0x110] sm:$0xff] %v11017_v19  ;;  %v11020_v53 = vadd.f32 %v13367_v20, %v15904_v35  ;;  %v11011_v54 = vpop.f32.mrb[71].mxu1 }
 0x47e   : > { %11055 = vst [vmem:[%s15909_s30 + $0x100] sm:$0xff] %v11009_v9  ;;  %v11012_v55 = vadd.f32 %v15904_v35, %v11011_v54 }
 0x47f   : > { %11058 = vst [vmem:[%s15909_s30 + $0x118] sm:$0xff] %v11020_v53 }
 0x480   : > { %11056 = vst [vmem:[%s15909_s30 + $0x108] sm:$0xff] %v11012_v55 }
 0x481 PF: > { %s17_s24 = sadd.s32 1, %s14512_s24  }
 0x482   : > { %p14_p4 = scmp.ge.s32.totalorder %s17_s24, 4  }
 0x484   :  { %16 = sbr.rel (!%p14_p4) target bundleno = 1 (0x1), region = 97 }

</bundles_post_ra>
